<compile_context>
chip_gen: v6e
topology: v6e:2x2x1
jax: 0.10.0
libtpu: 0.0.40
codegen_flags: <defaults>
</compile_context>

<pallas_src>
import functools

import jax
import jax.numpy as jnp
from jax.experimental import pallas as pl
from jax.experimental.pallas import tpu as pltpu

_VMEM_LIMIT = 32 * 1024 * 1024   # explicit scoped-VMEM budget (safe on v5e/v6e/v7x)


# ----------------------------- Pallas kernels ------------------------------

def _matmul_bias_kernel(x_ref, w_ref, b_ref, o_ref, *, relu):
    """One M-tile of conv1's im2col matmul: (TM,K)@(K,Cout) + bias (+ReLU)."""
    acc = jnp.dot(x_ref[...], w_ref[...], preferred_element_type=jnp.float32)
    acc = acc + b_ref[...]
    if relu:
        acc = jnp.maximum(acc, 0.0)
    o_ref[...] = acc.astype(o_ref.dtype)


def _conv_s1_row_kernel(x_ref, w_ref, b_ref, o_ref, *, KH, KW, OW, relu):
    """Stride-1 conv, one output row per grid step, im2col done in-kernel.

    x_ref: (1, Hp, Wp, Cin)    padded image, stays resident across the row axis
    w_ref: (KH*KW, Cin, Cout)  HWIO weights, one (Cin,Cout) slab per tap
    b_ref: (1, Cout) f32
    o_ref: (1, 1, OW, Cout)
    """
    oh = pl.program_id(1)
    acc = jnp.zeros((OW, b_ref.shape[-1]), jnp.float32) + b_ref[...]
    for kh in range(KH):
        for kw in range(KW):
            xs = x_ref[0, oh + kh, pl.ds(kw, OW), :]          # (OW, Cin) bf16
            acc = acc + jnp.dot(xs, w_ref[kh * KW + kw],
                                preferred_element_type=jnp.float32)
    if relu:
        acc = jnp.maximum(acc, 0.0)
    o_ref[0, 0] = acc.astype(o_ref.dtype)


def _make_maxpool_kernel(OH, OW):
    """3x3 / stride-2 / VALID max-pool over one batch element (1,H,W,C)."""
    def kernel(x_ref, o_ref):
        W = x_ref.shape[2]
        # Exact 0/1 selection matrix: output column p picks window-max column 2p.
        # The stride-2 downsample runs on the MXU -> no strided sublane access,
        # no per-(1,C) slicing or concatenation.
        pio = jax.lax.broadcasted_iota(jnp.int32, (OW, W - 2), 0)
        jio = jax.lax.broadcasted_iota(jnp.int32, (OW, W - 2), 1)
        sel = (jio == 2 * pio).astype(x_ref.dtype)            # (OW, W-2)
        for oh in range(OH):
            r0 = x_ref[0, 2 * oh, :, :]
            r1 = x_ref[0, 2 * oh + 1, :, :]
            r2 = x_ref[0, 2 * oh + 2, :, :]
            rmax = jnp.maximum(jnp.maximum(r0, r1), r2)       # (W, C)
            wmax = jnp.maximum(
                jnp.maximum(rmax[0:W - 2, :], rmax[1:W - 1, :]),
                rmax[2:W, :])                                 # (W-2, C)
            row = jnp.dot(sel, wmax, preferred_element_type=jnp.float32)
            o_ref[0, oh, :, :] = row.astype(o_ref.dtype)      # exact (0/1 gather)
    return kernel


# ------------------------------ layer wrappers ------------------------------

def conv2d_im2col_pallas(x, w, b, *, stride, pad, relu, out_dtype=jnp.bfloat16):
    """Conv via host-side im2col + Pallas MXU matmul (stride-4 conv1 only).

    x: (N,H,W,Cin), w: (KH,KW,Cin,Cout), b: (Cout,). Returns NHWC in out_dtype.
    """
    N, H, W, Cin = x.shape
    KH, KW, _, Cout = w.shape
    OH = (H + 2 * pad - KH) // stride + 1
    OW = (W + 2 * pad - KW) // stride + 1

    # TODO(synk): conv1 keeps host-side im2col -- a stride-4 in-kernel gather
    # with Cin=3 would run the MXU at K=3 per tap; the stride-1 convs below do
    # their im2col inside the kernel instead.
    xp = jnp.pad(x, ((0, 0), (pad, pad), (pad, pad), (0, 0)))
    cols = []
    for i in range(KH):
        for j in range(KW):
            cols.append(xp[:, i:i + stride * (OH - 1) + 1:stride,
                            j:j + stride * (OW - 1) + 1:stride, :])
    patches = jnp.concatenate(cols, axis=-1)                  # (N,OH,OW,KH*KW*Cin)

    M = N * OH * OW
    K = KH * KW * Cin
    Kp = ((K + 127) // 128) * 128                             # lane-aligned K
    if M >= 4096:
        TM = 512
    elif M >= 1024:
        TM = 256
    elif M >= 128:
        TM = 128
    else:
        TM = ((M + 7) // 8) * 8
    M_pad = ((M + TM - 1) // TM) * TM

    pm = patches.reshape(M, K).astype(jnp.bfloat16)
    pm = jnp.pad(pm, ((0, M_pad - M), (0, Kp - K)))
    wm = jnp.pad(w.reshape(K, Cout).astype(jnp.bfloat16), ((0, Kp - K), (0, 0)))
    bm = b.reshape(1, Cout).astype(jnp.float32)

    kernel = functools.partial(_matmul_bias_kernel, relu=relu)
    out = pl.pallas_call(
        kernel,
        out_shape=jax.ShapeDtypeStruct((M_pad, Cout), out_dtype),
        grid=(M_pad // TM,),
        in_specs=[
            pl.BlockSpec((TM, Kp), lambda i: (i, 0)),
            pl.BlockSpec((Kp, Cout), lambda i: (0, 0)),
            pl.BlockSpec((1, Cout), lambda i: (0, 0)),
        ],
        out_specs=pl.BlockSpec((TM, Cout), lambda i: (i, 0)),
        compiler_params=pltpu.CompilerParams(
            dimension_semantics=("parallel",),
            vmem_limit_bytes=_VMEM_LIMIT),
    )(pm, wm, bm)
    return out[:M].reshape(N, OH, OW, Cout)


def conv2d_s1_pallas(x, w, b, *, pad, relu, out_dtype=jnp.bfloat16):
    """Stride-1 conv with in-kernel im2col accumulation.

    x: (N,H,W,Cin), w: (KH,KW,Cin,Cout), b: (Cout,). Returns NHWC in out_dtype.
    """
    N, H, W, Cin = x.shape
    KH, KW, _, Cout = w.shape
    OH = H + 2 * pad - KH + 1
    OW = W + 2 * pad - KW + 1
    Hp, Wp = H + 2 * pad, W + 2 * pad

    xp = jnp.pad(x.astype(jnp.bfloat16),
                 ((0, 0), (pad, pad), (pad, pad), (0, 0)))
    wm = w.astype(jnp.bfloat16).reshape(KH * KW, Cin, Cout)
    bm = b.reshape(1, Cout).astype(jnp.float32)

    kernel = functools.partial(_conv_s1_row_kernel,
                               KH=KH, KW=KW, OW=OW, relu=relu)
    return pl.pallas_call(
        kernel,
        out_shape=jax.ShapeDtypeStruct((N, OH, OW, Cout), out_dtype),
        grid=(N, OH),
        in_specs=[
            pl.BlockSpec((1, Hp, Wp, Cin), lambda n, oh: (n, 0, 0, 0)),
            pl.BlockSpec((KH * KW, Cin, Cout), lambda n, oh: (0, 0, 0)),
            pl.BlockSpec((1, Cout), lambda n, oh: (0, 0)),
        ],
        out_specs=pl.BlockSpec((1, 1, OW, Cout), lambda n, oh: (n, oh, 0, 0)),
        compiler_params=pltpu.CompilerParams(
            dimension_semantics=("parallel", "arbitrary"),
            vmem_limit_bytes=_VMEM_LIMIT),
    )(xp, wm, bm)


def maxpool3x3s2_pallas(x):
    """x: (N,H,W,C) -> (N,OH,OW,C), kernel=3, stride=2, VALID. Keeps x.dtype."""
    N, H, W, C = x.shape
    OH = (H - 3) // 2 + 1
    OW = (W - 3) // 2 + 1
    return pl.pallas_call(
        _make_maxpool_kernel(OH, OW),
        out_shape=jax.ShapeDtypeStruct((N, OH, OW, C), x.dtype),
        grid=(N,),
        in_specs=[pl.BlockSpec((1, H, W, C), lambda n: (n, 0, 0, 0))],
        out_specs=pl.BlockSpec((1, OH, OW, C), lambda n: (n, 0, 0, 0)),
        compiler_params=pltpu.CompilerParams(
            dimension_semantics=("parallel",),
            vmem_limit_bytes=_VMEM_LIMIT),
    )(x)


# --------------------------- model (Alexnet_FE) -----------------------------

CONV_CFG = [
    # (Cin, Cout, K, stride, pad, relu_after)
    (3,    64, 11, 4, 2, True),
    (64,  192,  5, 1, 2, True),
    (192, 384,  3, 1, 1, True),
    (384, 256,  3, 1, 1, True),
    (256, 256,  3, 1, 1, False),   # final ReLU + MaxPool removed by [:-2]
]


def init_params(key):
    params = []
    for (cin, cout, k, _, _, _) in CONV_CFG:
        key, kw, kb = jax.random.split(key, 3)
        fan_in = cin * k * k
        w = jax.random.normal(kw, (k, k, cin, cout), jnp.float32) / jnp.sqrt(fan_in)
        b = jax.random.normal(kb, (cout,), jnp.float32) * 0.01
        params.append((w, b))
    return params


def alexnet_fe_forward(x_nchw, params):
    """x_nchw: (N,3,H,W) f32 (PyTorch layout). Returns (N,256,H',W') f32."""
    x = jnp.transpose(x_nchw, (0, 2, 3, 1)).astype(jnp.float32)   # NCHW -> NHWC
    (w1, b1), (w2, b2), (w3, b3), (w4, b4), (w5, b5) = params

    # Lane-dense conv1: pad Cout 64->128 with zero columns; those zero channels
    # flow through pool1 and meet zero Cin rows in conv2 -> identical math.
    c1p = 128
    w1p = jnp.pad(w1, ((0, 0), (0, 0), (0, 0), (0, c1p - w1.shape[-1])))
    b1p = jnp.pad(b1, (0, c1p - b1.shape[0]))
    w2p = jnp.pad(w2, ((0, 0), (0, 0), (0, c1p - w2.shape[2]), (0, 0)))

    x = conv2d_im2col_pallas(x, w1p, b1p, stride=4, pad=2, relu=True)   # bf16, C=128
    x = maxpool3x3s2_pallas(x)
    x = conv2d_s1_pallas(x, w2p, b2, pad=2, relu=True)                  # bf16, C=192
    x = maxpool3x3s2_pallas(x)
    x = conv2d_s1_pallas(x, w3, b3, pad=1, relu=True)                   # bf16, C=384
    x = conv2d_s1_pallas(x, w4, b4, pad=1, relu=True)                   # bf16, C=256
    x = conv2d_s1_pallas(x, w5, b5, pad=1, relu=False,
                         out_dtype=jnp.float32)                         # f32,  C=256
    return jnp.transpose(x, (0, 3, 1, 2))                               # back to NCHW


# ------------------------------- reference ----------------------------------

def _ref_forward(x_nchw, params):
    x = jnp.transpose(x_nchw, (0, 2, 3, 1))

    def conv(x, w, b, s, p, relu):
        y = jax.lax.conv_general_dilated(
            x, w, (s, s), [(p, p), (p, p)],
            dimension_numbers=("NHWC", "HWIO", "NHWC"),
            precision=jax.lax.Precision.HIGHEST) + b
        return jnp.maximum(y, 0.0) if relu else y

    def pool(x):
        return jax.lax.reduce_window(x, -jnp.inf, jax.lax.max,
                                     (1, 3, 3, 1), (1, 2, 2, 1), "VALID")

    (w1, b1), (w2, b2), (w3, b3), (w4, b4), (w5, b5) = params
    x = pool(conv(x, w1, b1, 4, 2, True))
    x = pool(conv(x, w2, b2, 1, 2, True))
    x = conv(x, w3, b3, 1, 1, True)
    x = conv(x, w4, b4, 1, 1, True)
    x = conv(x, w5, b5, 1, 1, False)
    return jnp.transpose(x, (0, 3, 1, 2))


# --------------------------------- main --------------------------------------

if __name__ == "__main__":
    key = jax.random.PRNGKey(0)
    kx, kp = jax.random.split(key)
    # Small AlexNet-style input: batch=2, RGB, 63x63 spatial -> (2,256,3,3) out.
    x = jax.random.normal(kx, (2, 3, 63, 63), jnp.float32)
    params = init_params(kp)

    out = jax.jit(alexnet_fe_forward)(x, params)
    out = jax.block_until_ready(out)

    assert out.shape == (2, 256, 3, 3), out.shape
    ref = _ref_forward(x, params)
    max_err = float(jnp.max(jnp.abs(out - ref)))
    # bf16 MXU operands + bf16 inter-layer activations (f32 accumulation):
    # compare against the all-f32 reference at a bf16-appropriate tolerance.
    assert jnp.allclose(out, ref, rtol=2e-2, atol=3e-2), max_err
    print("KERNEL_OK")
</pallas_src>

<mosaic_0001>
module attributes {stable_mosaic.version = 11 : i64} {
  func.func @_matmul_bias_kernel(%arg0: i32, %arg1: memref<128x384xbf16, #tpu.memory_space<vmem>>, %arg2: memref<384x128xbf16, #tpu.memory_space<vmem>>, %arg3: memref<1x128xf32, #tpu.memory_space<vmem>>, %arg4: memref<128x128xbf16, #tpu.memory_space<vmem>>) attributes {dimension_semantics = [#tpu.dimension_semantics<parallel>], iteration_bounds = array<i64: 4>, scalar_prefetch = 0 : i64, scratch_operands = 0 : i64, tpu.core_type = #tpu.core_type<tc>, window_params = [{transform_indices = @transform_0, window_bounds = array<i64: 128, 384>}, {pipeline_mode = #tpu.pipeline_mode<synchronous>, transform_indices = @transform_1, window_bounds = array<i64: 384, 128>}, {pipeline_mode = #tpu.pipeline_mode<synchronous>, transform_indices = @transform_2, window_bounds = array<i64: 1, 128>}, {transform_indices = @transform_3, window_bounds = array<i64: 128, 128>}]} {
    %c0 = arith.constant 0 : index
    %c0_0 = arith.constant 0 : index
    %0 = vector.load %arg1[%c0, %c0_0] : memref<128x384xbf16, #tpu.memory_space<vmem>>, vector<128x384xbf16>
    %c0_1 = arith.constant 0 : index
    %c0_2 = arith.constant 0 : index
    %1 = vector.load %arg2[%c0_1, %c0_2] : memref<384x128xbf16, #tpu.memory_space<vmem>>, vector<384x128xbf16>
    %cst = arith.constant dense<0.000000e+00> : vector<128x128xf32>
    %2 = tpu.matmul %0, %1, %cst {dimension_numbers = #tpu.dot_dimension_numbers<[1], [0], [0], [1], [0, 0, 1, 1], [], []>} : vector<128x384xbf16>, vector<384x128xbf16>, vector<128x128xf32> -> vector<128x128xf32>
    %c0_3 = arith.constant 0 : index
    %c0_4 = arith.constant 0 : index
    %3 = vector.load %arg3[%c0_3, %c0_4] : memref<1x128xf32, #tpu.memory_space<vmem>>, vector<1x128xf32>
    %4 = vector.broadcast %3 : vector<1x128xf32> to vector<128x128xf32>
    %5 = arith.addf %2, %4 : vector<128x128xf32>
    %cst_5 = arith.constant 0.000000e+00 : f32
    %6 = vector.broadcast %cst_5 : f32 to vector<128x128xf32>
    %7 = arith.maximumf %5, %6 : vector<128x128xf32>
    %8 = arith.truncf %7 : vector<128x128xf32> to vector<128x128xbf16>
    %c0_6 = arith.constant 0 : index
    %c0_7 = arith.constant 0 : index
    %9 = vector.load %arg4[%c0_6, %c0_7] : memref<128x128xbf16, #tpu.memory_space<vmem>>, vector<128x128xbf16>
    tpu.vector_store %arg4[%c0_6, %c0_7], %8 {strides = array<i32>} : memref<128x128xbf16, #tpu.memory_space<vmem>>, vector<128x128xbf16>,
    return
  }
  func.func @transform_0(%arg0: i32) -> (i32, i32) {
    %c0_i32 = arith.constant 0 : i32
    %c0_i32_0 = arith.constant 0 : i32
    return %arg0, %c0_i32 : i32, i32
  }
  func.func @transform_1(%arg0: i32) -> (i32, i32) {
    %c0_i32 = arith.constant 0 : i32
    %c0_i32_0 = arith.constant 0 : i32
    %c0_i32_1 = arith.constant 0 : i32
    return %c0_i32, %c0_i32_0 : i32, i32
  }
  func.func @transform_2(%arg0: i32) -> (i32, i32) {
    %c0_i32 = arith.constant 0 : i32
    %c0_i32_0 = arith.constant 0 : i32
    %c0_i32_1 = arith.constant 0 : i32
    return %c0_i32, %c0_i32_0 : i32, i32
  }
  func.func @transform_3(%arg0: i32) -> (i32, i32) {
    %c0_i32 = arith.constant 0 : i32
    %c0_i32_0 = arith.constant 0 : i32
    return %arg0, %c0_i32 : i32, i32
  }
}

module attributes {stable_mosaic.version = 11 : i64} {
  func.func @kernel(%arg0: i32, %arg1: memref<1x15x15x128xbf16, #tpu.memory_space<vmem>>, %arg2: memref<1x7x7x128xbf16, #tpu.memory_space<vmem>>) attributes {dimension_semantics = [#tpu.dimension_semantics<parallel>], iteration_bounds = array<i64: 2>, scalar_prefetch = 0 : i64, scratch_operands = 0 : i64, tpu.core_type = #tpu.core_type<tc>, window_params = [{transform_indices = @transform_0, window_bounds = array<i64: 1, 15, 15, 128>}, {transform_indices = @transform_1, window_bounds = array<i64: 1, 7, 7, 128>}]} {
    %0 = tpu.iota {dimensions = array<i32: 0>} : vector<7x13xi32>
    %1 = tpu.iota {dimensions = array<i32: 1>} : vector<7x13xi32>
    %c2_i32 = arith.constant 2 : i32
    %2 = vector.broadcast %c2_i32 : i32 to vector<7x13xi32>
    %3 = arith.muli %2, %0 : vector<7x13xi32>
    %4 = arith.cmpi eq, %1, %3 : vector<7x13xi32>
    %5 = arith.extui %4 : vector<7x13xi1> to vector<7x13xi32>
    %6 = arith.sitofp %5 : vector<7x13xi32> to vector<7x13xf32>
    %7 = arith.truncf %6 : vector<7x13xf32> to vector<7x13xbf16>
    %c0 = arith.constant 0 : index
    %c0_0 = arith.constant 0 : index
    %c0_1 = arith.constant 0 : index
    %c0_2 = arith.constant 0 : index
    %8 = vector.load %arg1[%c0, %c0_0, %c0_1, %c0_2] : memref<1x15x15x128xbf16, #tpu.memory_space<vmem>>, vector<1x1x15x128xbf16>
    %9 = vector.shape_cast %8 : vector<1x1x15x128xbf16> to vector<15x128xbf16>
    %c0_3 = arith.constant 0 : index
    %c1 = arith.constant 1 : index
    %c0_4 = arith.constant 0 : index
    %c0_5 = arith.constant 0 : index
    %10 = vector.load %arg1[%c0_3, %c1, %c0_4, %c0_5] : memref<1x15x15x128xbf16, #tpu.memory_space<vmem>>, vector<1x1x15x128xbf16>
    %11 = vector.shape_cast %10 : vector<1x1x15x128xbf16> to vector<15x128xbf16>
    %c0_6 = arith.constant 0 : index
    %c2 = arith.constant 2 : index
    %c0_7 = arith.constant 0 : index
    %c0_8 = arith.constant 0 : index
    %12 = vector.load %arg1[%c0_6, %c2, %c0_7, %c0_8] : memref<1x15x15x128xbf16, #tpu.memory_space<vmem>>, vector<1x1x15x128xbf16>
    %13 = vector.shape_cast %12 : vector<1x1x15x128xbf16> to vector<15x128xbf16>
    %14 = arith.maximumf %9, %11 : vector<15x128xbf16>
    %15 = arith.maximumf %14, %13 : vector<15x128xbf16>
    %16 = vector.extract_strided_slice %15 {offsets = [0, 0], sizes = [13, 128], strides = [1, 1]} : vector<15x128xbf16> to vector<13x128xbf16>
    %17 = vector.extract_strided_slice %15 {offsets = [1, 0], sizes = [13, 128], strides = [1, 1]} : vector<15x128xbf16> to vector<13x128xbf16>
    %18 = arith.maximumf %16, %17 : vector<13x128xbf16>
    %19 = vector.extract_strided_slice %15 {offsets = [2, 0], sizes = [13, 128], strides = [1, 1]} : vector<15x128xbf16> to vector<13x128xbf16>
    %20 = arith.maximumf %18, %19 : vector<13x128xbf16>
    %cst = arith.constant dense<0.000000e+00> : vector<7x128xf32>
    %21 = tpu.matmul %7, %20, %cst {dimension_numbers = #tpu.dot_dimension_numbers<[1], [0], [0], [1], [0, 0, 1, 1], [], []>} : vector<7x13xbf16>, vector<13x128xbf16>, vector<7x128xf32> -> vector<7x128xf32>
    %22 = arith.truncf %21 : vector<7x128xf32> to vector<7x128xbf16>
    %c0_9 = arith.constant 0 : index
    %c0_10 = arith.constant 0 : index
    %c0_11 = arith.constant 0 : index
    %c0_12 = arith.constant 0 : index
    %23 = vector.load %arg2[%c0_9, %c0_10, %c0_11, %c0_12] : memref<1x7x7x128xbf16, #tpu.memory_space<vmem>>, vector<1x1x7x128xbf16>
    %24 = vector.shape_cast %23 : vector<1x1x7x128xbf16> to vector<7x128xbf16>
    %25 = vector.shape_cast %22 : vector<7x128xbf16> to vector<1x1x7x128xbf16>
    tpu.vector_store %arg2[%c0_9, %c0_10, %c0_11, %c0_12], %25 {strides = array<i32>} : memref<1x7x7x128xbf16, #tpu.memory_space<vmem>>, vector<1x1x7x128xbf16>,
    %c0_13 = arith.constant 0 : index
    %c2_14 = arith.constant 2 : index
    %c0_15 = arith.constant 0 : index
    %c0_16 = arith.constant 0 : index
    %26 = vector.load %arg1[%c0_13, %c2_14, %c0_15, %c0_16] : memref<1x15x15x128xbf16, #tpu.memory_space<vmem>>, vector<1x1x15x128xbf16>
    %27 = vector.shape_cast %26 : vector<1x1x15x128xbf16> to vector<15x128xbf16>
    %c0_17 = arith.constant 0 : index
    %c3 = arith.constant 3 : index
    %c0_18 = arith.constant 0 : index
    %c0_19 = arith.constant 0 : index
    %28 = vector.load %arg1[%c0_17, %c3, %c0_18, %c0_19] : memref<1x15x15x128xbf16, #tpu.memory_space<vmem>>, vector<1x1x15x128xbf16>
    %29 = vector.shape_cast %28 : vector<1x1x15x128xbf16> to vector<15x128xbf16>
    %c0_20 = arith.constant 0 : index
    %c4 = arith.constant 4 : index
    %c0_21 = arith.constant 0 : index
    %c0_22 = arith.constant 0 : index
    %30 = vector.load %arg1[%c0_20, %c4, %c0_21, %c0_22] : memref<1x15x15x128xbf16, #tpu.memory_space<vmem>>, vector<1x1x15x128xbf16>
    %31 = vector.shape_cast %30 : vector<1x1x15x128xbf16> to vector<15x128xbf16>
    %32 = arith.maximumf %27, %29 : vector<15x128xbf16>
    %33 = arith.maximumf %32, %31 : vector<15x128xbf16>
    %34 = vector.extract_strided_slice %33 {offsets = [0, 0], sizes = [13, 128], strides = [1, 1]} : vector<15x128xbf16> to vector<13x128xbf16>
    %35 = vector.extract_strided_slice %33 {offsets = [1, 0], sizes = [13, 128], strides = [1, 1]} : vector<15x128xbf16> to vector<13x128xbf16>
    %36 = arith.maximumf %34, %35 : vector<13x128xbf16>
    %37 = vector.extract_strided_slice %33 {offsets = [2, 0], sizes = [13, 128], strides = [1, 1]} : vector<15x128xbf16> to vector<13x128xbf16>
    %38 = arith.maximumf %36, %37 : vector<13x128xbf16>
    %cst_23 = arith.constant dense<0.000000e+00> : vector<7x128xf32>
    %39 = tpu.matmul %7, %38, %cst_23 {dimension_numbers = #tpu.dot_dimension_numbers<[1], [0], [0], [1], [0, 0, 1, 1], [], []>} : vector<7x13xbf16>, vector<13x128xbf16>, vector<7x128xf32> -> vector<7x128xf32>
    %40 = arith.truncf %39 : vector<7x128xf32> to vector<7x128xbf16>
    %c0_24 = arith.constant 0 : index
    %c1_25 = arith.constant 1 : index
    %c0_26 = arith.constant 0 : index
    %c0_27 = arith.constant 0 : index
    %41 = vector.load %arg2[%c0_24, %c1_25, %c0_26, %c0_27] : memref<1x7x7x128xbf16, #tpu.memory_space<vmem>>, vector<1x1x7x128xbf16>
    %42 = vector.shape_cast %41 : vector<1x1x7x128xbf16> to vector<7x128xbf16>
    %43 = vector.shape_cast %40 : vector<7x128xbf16> to vector<1x1x7x128xbf16>
    tpu.vector_store %arg2[%c0_24, %c1_25, %c0_26, %c0_27], %43 {strides = array<i32>} : memref<1x7x7x128xbf16, #tpu.memory_space<vmem>>, vector<1x1x7x128xbf16>,
    %c0_28 = arith.constant 0 : index
    %c4_29 = arith.constant 4 : index
    %c0_30 = arith.constant 0 : index
    %c0_31 = arith.constant 0 : index
    %44 = vector.load %arg1[%c0_28, %c4_29, %c0_30, %c0_31] : memref<1x15x15x128xbf16, #tpu.memory_space<vmem>>, vector<1x1x15x128xbf16>
    %45 = vector.shape_cast %44 : vector<1x1x15x128xbf16> to vector<15x128xbf16>
    %c0_32 = arith.constant 0 : index
    %c5 = arith.constant 5 : index
    %c0_33 = arith.constant 0 : index
    %c0_34 = arith.constant 0 : index
    %46 = vector.load %arg1[%c0_32, %c5, %c0_33, %c0_34] : memref<1x15x15x128xbf16, #tpu.memory_space<vmem>>, vector<1x1x15x128xbf16>
    %47 = vector.shape_cast %46 : vector<1x1x15x128xbf16> to vector<15x128xbf16>
    %c0_35 = arith.constant 0 : index
    %c6 = arith.constant 6 : index
    %c0_36 = arith.constant 0 : index
    %c0_37 = arith.constant 0 : index
    %48 = vector.load %arg1[%c0_35, %c6, %c0_36, %c0_37] : memref<1x15x15x128xbf16, #tpu.memory_space<vmem>>, vector<1x1x15x128xbf16>
    %49 = vector.shape_cast %48 : vector<1x1x15x128xbf16> to vector<15x128xbf16>
    %50 = arith.maximumf %45, %47 : vector<15x128xbf16>
    %51 = arith.maximumf %50, %49 : vector<15x128xbf16>
    %52 = vector.extract_strided_slice %51 {offsets = [0, 0], sizes = [13, 128], strides = [1, 1]} : vector<15x128xbf16> to vector<13x128xbf16>
    %53 = vector.extract_strided_slice %51 {offsets = [1, 0], sizes = [13, 128], strides = [1, 1]} : vector<15x128xbf16> to vector<13x128xbf16>
    %54 = arith.maximumf %52, %53 : vector<13x128xbf16>
    %55 = vector.extract_strided_slice %51 {offsets = [2, 0], sizes = [13, 128], strides = [1, 1]} : vector<15x128xbf16> to vector<13x128xbf16>
    %56 = arith.maximumf %54, %55 : vector<13x128xbf16>
    %cst_38 = arith.constant dense<0.000000e+00> : vector<7x128xf32>
    %57 = tpu.matmul %7, %56, %cst_38 {dimension_numbers = #tpu.dot_dimension_numbers<[1], [0], [0], [1], [0, 0, 1, 1], [], []>} : vector<7x13xbf16>, vector<13x128xbf16>, vector<7x128xf32> -> vector<7x128xf32>
    %58 = arith.truncf %57 : vector<7x128xf32> to vector<7x128xbf16>
    %c0_39 = arith.constant 0 : index
    %c2_40 = arith.constant 2 : index
    %c0_41 = arith.constant 0 : index
    %c0_42 = arith.constant 0 : index
    %59 = vector.load %arg2[%c0_39, %c2_40, %c0_41, %c0_42] : memref<1x7x7x128xbf16, #tpu.memory_space<vmem>>, vector<1x1x7x128xbf16>
    %60 = vector.shape_cast %59 : vector<1x1x7x128xbf16> to vector<7x128xbf16>
    %61 = vector.shape_cast %58 : vector<7x128xbf16> to vector<1x1x7x128xbf16>
    tpu.vector_store %arg2[%c0_39, %c2_40, %c0_41, %c0_42], %61 {strides = array<i32>} : memref<1x7x7x128xbf16, #tpu.memory_space<vmem>>, vector<1x1x7x128xbf16>,
    %c0_43 = arith.constant 0 : index
    %c6_44 = arith.constant 6 : index
    %c0_45 = arith.constant 0 : index
    %c0_46 = arith.constant 0 : index
    %62 = vector.load %arg1[%c0_43, %c6_44, %c0_45, %c0_46] : memref<1x15x15x128xbf16, #tpu.memory_space<vmem>>, vector<1x1x15x128xbf16>
    %63 = vector.shape_cast %62 : vector<1x1x15x128xbf16> to vector<15x128xbf16>
    %c0_47 = arith.constant 0 : index
    %c7 = arith.constant 7 : index
    %c0_48 = arith.constant 0 : index
    %c0_49 = arith.constant 0 : index
    %64 = vector.load %arg1[%c0_47, %c7, %c0_48, %c0_49] : memref<1x15x15x128xbf16, #tpu.memory_space<vmem>>, vector<1x1x15x128xbf16>
    %65 = vector.shape_cast %64 : vector<1x1x15x128xbf16> to vector<15x128xbf16>
    %c0_50 = arith.constant 0 : index
    %c8 = arith.constant 8 : index
    %c0_51 = arith.constant 0 : index
    %c0_52 = arith.constant 0 : index
    %66 = vector.load %arg1[%c0_50, %c8, %c0_51, %c0_52] : memref<1x15x15x128xbf16, #tpu.memory_space<vmem>>, vector<1x1x15x128xbf16>
    %67 = vector.shape_cast %66 : vector<1x1x15x128xbf16> to vector<15x128xbf16>
    %68 = arith.maximumf %63, %65 : vector<15x128xbf16>
    %69 = arith.maximumf %68, %67 : vector<15x128xbf16>
    %70 = vector.extract_strided_slice %69 {offsets = [0, 0], sizes = [13, 128], strides = [1, 1]} : vector<15x128xbf16> to vector<13x128xbf16>
    %71 = vector.extract_strided_slice %69 {offsets = [1, 0], sizes = [13, 128], strides = [1, 1]} : vector<15x128xbf16> to vector<13x128xbf16>
    %72 = arith.maximumf %70, %71 : vector<13x128xbf16>
    %73 = vector.extract_strided_slice %69 {offsets = [2, 0], sizes = [13, 128], strides = [1, 1]} : vector<15x128xbf16> to vector<13x128xbf16>
    %74 = arith.maximumf %72, %73 : vector<13x128xbf16>
    %cst_53 = arith.constant dense<0.000000e+00> : vector<7x128xf32>
    %75 = tpu.matmul %7, %74, %cst_53 {dimension_numbers = #tpu.dot_dimension_numbers<[1], [0], [0], [1], [0, 0, 1, 1], [], []>} : vector<7x13xbf16>, vector<13x128xbf16>, vector<7x128xf32> -> vector<7x128xf32>
    %76 = arith.truncf %75 : vector<7x128xf32> to vector<7x128xbf16>
    %c0_54 = arith.constant 0 : index
    %c3_55 = arith.constant 3 : index
    %c0_56 = arith.constant 0 : index
    %c0_57 = arith.constant 0 : index
    %77 = vector.load %arg2[%c0_54, %c3_55, %c0_56, %c0_57] : memref<1x7x7x128xbf16, #tpu.memory_space<vmem>>, vector<1x1x7x128xbf16>
    %78 = vector.shape_cast %77 : vector<1x1x7x128xbf16> to vector<7x128xbf16>
    %79 = vector.shape_cast %76 : vector<7x128xbf16> to vector<1x1x7x128xbf16>
    tpu.vector_store %arg2[%c0_54, %c3_55, %c0_56, %c0_57], %79 {strides = array<i32>} : memref<1x7x7x128xbf16, #tpu.memory_space<vmem>>, vector<1x1x7x128xbf16>,
    %c0_58 = arith.constant 0 : index
    %c8_59 = arith.constant 8 : index
    %c0_60 = arith.constant 0 : index
    %c0_61 = arith.constant 0 : index
    %80 = vector.load %arg1[%c0_58, %c8_59, %c0_60, %c0_61] : memref<1x15x15x128xbf16, #tpu.memory_space<vmem>>, vector<1x1x15x128xbf16>
    %81 = vector.shape_cast %80 : vector<1x1x15x128xbf16> to vector<15x128xbf16>
    %c0_62 = arith.constant 0 : index
    %c9 = arith.constant 9 : index
    %c0_63 = arith.constant 0 : index
    %c0_64 = arith.constant 0 : index
    %82 = vector.load %arg1[%c0_62, %c9, %c0_63, %c0_64] : memref<1x15x15x128xbf16, #tpu.memory_space<vmem>>, vector<1x1x15x128xbf16>
    %83 = vector.shape_cast %82 : vector<1x1x15x128xbf16> to vector<15x128xbf16>
    %c0_65 = arith.constant 0 : index
    %c10 = arith.constant 10 : index
    %c0_66 = arith.constant 0 : index
    %c0_67 = arith.constant 0 : index
    %84 = vector.load %arg1[%c0_65, %c10, %c0_66, %c0_67] : memref<1x15x15x128xbf16, #tpu.memory_space<vmem>>, vector<1x1x15x128xbf16>
    %85 = vector.shape_cast %84 : vector<1x1x15x128xbf16> to vector<15x128xbf16>
    %86 = arith.maximumf %81, %83 : vector<15x128xbf16>
    %87 = arith.maximumf %86, %85 : vector<15x128xbf16>
    %88 = vector.extract_strided_slice %87 {offsets = [0, 0], sizes = [13, 128], strides = [1, 1]} : vector<15x128xbf16> to vector<13x128xbf16>
    %89 = vector.extract_strided_slice %87 {offsets = [1, 0], sizes = [13, 128], strides = [1, 1]} : vector<15x128xbf16> to vector<13x128xbf16>
    %90 = arith.maximumf %88, %89 : vector<13x128xbf16>
    %91 = vector.extract_strided_slice %87 {offsets = [2, 0], sizes = [13, 128], strides = [1, 1]} : vector<15x128xbf16> to vector<13x128xbf16>
    %92 = arith.maximumf %90, %91 : vector<13x128xbf16>
    %cst_68 = arith.constant dense<0.000000e+00> : vector<7x128xf32>
    %93 = tpu.matmul %7, %92, %cst_68 {dimension_numbers = #tpu.dot_dimension_numbers<[1], [0], [0], [1], [0, 0, 1, 1], [], []>} : vector<7x13xbf16>, vector<13x128xbf16>, vector<7x128xf32> -> vector<7x128xf32>
    %94 = arith.truncf %93 : vector<7x128xf32> to vector<7x128xbf16>
    %c0_69 = arith.constant 0 : index
    %c4_70 = arith.constant 4 : index
    %c0_71 = arith.constant 0 : index
    %c0_72 = arith.constant 0 : index
    %95 = vector.load %arg2[%c0_69, %c4_70, %c0_71, %c0_72] : memref<1x7x7x128xbf16, #tpu.memory_space<vmem>>, vector<1x1x7x128xbf16>
    %96 = vector.shape_cast %95 : vector<1x1x7x128xbf16> to vector<7x128xbf16>
    %97 = vector.shape_cast %94 : vector<7x128xbf16> to vector<1x1x7x128xbf16>
    tpu.vector_store %arg2[%c0_69, %c4_70, %c0_71, %c0_72], %97 {strides = array<i32>} : memref<1x7x7x128xbf16, #tpu.memory_space<vmem>>, vector<1x1x7x128xbf16>,
    %c0_73 = arith.constant 0 : index
    %c10_74 = arith.constant 10 : index
    %c0_75 = arith.constant 0 : index
    %c0_76 = arith.constant 0 : index
    %98 = vector.load %arg1[%c0_73, %c10_74, %c0_75, %c0_76] : memref<1x15x15x128xbf16, #tpu.memory_space<vmem>>, vector<1x1x15x128xbf16>
    %99 = vector.shape_cast %98 : vector<1x1x15x128xbf16> to vector<15x128xbf16>
    %c0_77 = arith.constant 0 : index
    %c11 = arith.constant 11 : index
    %c0_78 = arith.constant 0 : index
    %c0_79 = arith.constant 0 : index
    %100 = vector.load %arg1[%c0_77, %c11, %c0_78, %c0_79] : memref<1x15x15x128xbf16, #tpu.memory_space<vmem>>, vector<1x1x15x128xbf16>
    %101 = vector.shape_cast %100 : vector<1x1x15x128xbf16> to vector<15x128xbf16>
    %c0_80 = arith.constant 0 : index
    %c12 = arith.constant 12 : index
    %c0_81 = arith.constant 0 : index
    %c0_82 = arith.constant 0 : index
    %102 = vector.load %arg1[%c0_80, %c12, %c0_81, %c0_82] : memref<1x15x15x128xbf16, #tpu.memory_space<vmem>>, vector<1x1x15x128xbf16>
    %103 = vector.shape_cast %102 : vector<1x1x15x128xbf16> to vector<15x128xbf16>
    %104 = arith.maximumf %99, %101 : vector<15x128xbf16>
    %105 = arith.maximumf %104, %103 : vector<15x128xbf16>
    %106 = vector.extract_strided_slice %105 {offsets = [0, 0], sizes = [13, 128], strides = [1, 1]} : vector<15x128xbf16> to vector<13x128xbf16>
    %107 = vector.extract_strided_slice %105 {offsets = [1, 0], sizes = [13, 128], strides = [1, 1]} : vector<15x128xbf16> to vector<13x128xbf16>
    %108 = arith.maximumf %106, %107 : vector<13x128xbf16>
    %109 = vector.extract_strided_slice %105 {offsets = [2, 0], sizes = [13, 128], strides = [1, 1]} : vector<15x128xbf16> to vector<13x128xbf16>
    %110 = arith.maximumf %108, %109 : vector<13x128xbf16>
    %cst_83 = arith.constant dense<0.000000e+00> : vector<7x128xf32>
    %111 = tpu.matmul %7, %110, %cst_83 {dimension_numbers = #tpu.dot_dimension_numbers<[1], [0], [0], [1], [0, 0, 1, 1], [], []>} : vector<7x13xbf16>, vector<13x128xbf16>, vector<7x128xf32> -> vector<7x128xf32>
    %112 = arith.truncf %111 : vector<7x128xf32> to vector<7x128xbf16>
    %c0_84 = arith.constant 0 : index
    %c5_85 = arith.constant 5 : index
    %c0_86 = arith.constant 0 : index
    %c0_87 = arith.constant 0 : index
    %113 = vector.load %arg2[%c0_84, %c5_85, %c0_86, %c0_87] : memref<1x7x7x128xbf16, #tpu.memory_space<vmem>>, vector<1x1x7x128xbf16>
    %114 = vector.shape_cast %113 : vector<1x1x7x128xbf16> to vector<7x128xbf16>
    %115 = vector.shape_cast %112 : vector<7x128xbf16> to vector<1x1x7x128xbf16>
    tpu.vector_store %arg2[%c0_84, %c5_85, %c0_86, %c0_87], %115 {strides = array<i32>} : memref<1x7x7x128xbf16, #tpu.memory_space<vmem>>, vector<1x1x7x128xbf16>,
    %c0_88 = arith.constant 0 : index
    %c12_89 = arith.constant 12 : index
    %c0_90 = arith.constant 0 : index
    %c0_91 = arith.constant 0 : index
    %116 = vector.load %arg1[%c0_88, %c12_89, %c0_90, %c0_91] : memref<1x15x15x128xbf16, #tpu.memory_space<vmem>>, vector<1x1x15x128xbf16>
    %117 = vector.shape_cast %116 : vector<1x1x15x128xbf16> to vector<15x128xbf16>
    %c0_92 = arith.constant 0 : index
    %c13 = arith.constant 13 : index
    %c0_93 = arith.constant 0 : index
    %c0_94 = arith.constant 0 : index
    %118 = vector.load %arg1[%c0_92, %c13, %c0_93, %c0_94] : memref<1x15x15x128xbf16, #tpu.memory_space<vmem>>, vector<1x1x15x128xbf16>
    %119 = vector.shape_cast %118 : vector<1x1x15x128xbf16> to vector<15x128xbf16>
    %c0_95 = arith.constant 0 : index
    %c14 = arith.constant 14 : index
    %c0_96 = arith.constant 0 : index
    %c0_97 = arith.constant 0 : index
    %120 = vector.load %arg1[%c0_95, %c14, %c0_96, %c0_97] : memref<1x15x15x128xbf16, #tpu.memory_space<vmem>>, vector<1x1x15x128xbf16>
    %121 = vector.shape_cast %120 : vector<1x1x15x128xbf16> to vector<15x128xbf16>
    %122 = arith.maximumf %117, %119 : vector<15x128xbf16>
    %123 = arith.maximumf %122, %121 : vector<15x128xbf16>
    %124 = vector.extract_strided_slice %123 {offsets = [0, 0], sizes = [13, 128], strides = [1, 1]} : vector<15x128xbf16> to vector<13x128xbf16>
    %125 = vector.extract_strided_slice %123 {offsets = [1, 0], sizes = [13, 128], strides = [1, 1]} : vector<15x128xbf16> to vector<13x128xbf16>
    %126 = arith.maximumf %124, %125 : vector<13x128xbf16>
    %127 = vector.extract_strided_slice %123 {offsets = [2, 0], sizes = [13, 128], strides = [1, 1]} : vector<15x128xbf16> to vector<13x128xbf16>
    %128 = arith.maximumf %126, %127 : vector<13x128xbf16>
    %cst_98 = arith.constant dense<0.000000e+00> : vector<7x128xf32>
    %129 = tpu.matmul %7, %128, %cst_98 {dimension_numbers = #tpu.dot_dimension_numbers<[1], [0], [0], [1], [0, 0, 1, 1], [], []>} : vector<7x13xbf16>, vector<13x128xbf16>, vector<7x128xf32> -> vector<7x128xf32>
    %130 = arith.truncf %129 : vector<7x128xf32> to vector<7x128xbf16>
    %c0_99 = arith.constant 0 : index
    %c6_100 = arith.constant 6 : index
    %c0_101 = arith.constant 0 : index
    %c0_102 = arith.constant 0 : index
    %131 = vector.load %arg2[%c0_99, %c6_100, %c0_101, %c0_102] : memref<1x7x7x128xbf16, #tpu.memory_space<vmem>>, vector<1x1x7x128xbf16>
    %132 = vector.shape_cast %131 : vector<1x1x7x128xbf16> to vector<7x128xbf16>
    %133 = vector.shape_cast %130 : vector<7x128xbf16> to vector<1x1x7x128xbf16>
    tpu.vector_store %arg2[%c0_99, %c6_100, %c0_101, %c0_102], %133 {strides = array<i32>} : memref<1x7x7x128xbf16, #tpu.memory_space<vmem>>, vector<1x1x7x128xbf16>,
    return
  }
  func.func @transform_0(%arg0: i32) -> (i32, i32, i32, i32) {
    %c0_i32 = arith.constant 0 : i32
    %c0_i32_0 = arith.constant 0 : i32
    %c0_i32_1 = arith.constant 0 : i32
    %c0_i32_2 = arith.constant 0 : i32
    return %arg0, %c0_i32, %c0_i32_0, %c0_i32_1 : i32, i32, i32, i32
  }
  func.func @transform_1(%arg0: i32) -> (i32, i32, i32, i32) {
    %c0_i32 = arith.constant 0 : i32
    %c0_i32_0 = arith.constant 0 : i32
    %c0_i32_1 = arith.constant 0 : i32
    %c0_i32_2 = arith.constant 0 : i32
    return %arg0, %c0_i32, %c0_i32_0, %c0_i32_1 : i32, i32, i32, i32
  }
}

module attributes {stable_mosaic.version = 11 : i64} {
  func.func @_conv_s1_row_kernel(%arg0: i32, %arg1: i32, %arg2: memref<1x11x11x128xbf16, #tpu.memory_space<vmem>>, %arg3: memref<25x128x192xbf16, #tpu.memory_space<vmem>>, %arg4: memref<1x192xf32, #tpu.memory_space<vmem>>, %arg5: memref<1x1x7x192xbf16, #tpu.memory_space<vmem>>) attributes {dimension_semantics = [#tpu.dimension_semantics<parallel>, #tpu.dimension_semantics<arbitrary>], iteration_bounds = array<i64: 2, 7>, scalar_prefetch = 0 : i64, scratch_operands = 0 : i64, tpu.core_type = #tpu.core_type<tc>, window_params = [{transform_indices = @transform_0, window_bounds = array<i64: 1, 11, 11, 128>}, {pipeline_mode = #tpu.pipeline_mode<synchronous>, transform_indices = @transform_1, window_bounds = array<i64: 25, 128, 192>}, {pipeline_mode = #tpu.pipeline_mode<synchronous>, transform_indices = @transform_2, window_bounds = array<i64: 1, 192>}, {transform_indices = @transform_3, window_bounds = array<i64: 1, 1, 7, 192>}]} {
    %cst = arith.constant 0.000000e+00 : f32
    %0 = vector.broadcast %cst : f32 to vector<7x192xf32>
    %c0 = arith.constant 0 : index
    %c0_0 = arith.constant 0 : index
    %1 = vector.load %arg4[%c0, %c0_0] : memref<1x192xf32, #tpu.memory_space<vmem>>, vector<1x192xf32>
    %2 = vector.broadcast %1 : vector<1x192xf32> to vector<7x192xf32>
    %3 = arith.addf %0, %2 : vector<7x192xf32>
    %c0_i32 = arith.constant 0 : i32
    %4 = arith.addi %arg1, %c0_i32 : i32
    %c0_1 = arith.constant 0 : index
    %5 = arith.index_cast %4 : i32 to index
    %c0_2 = arith.constant 0 : index
    %c0_3 = arith.constant 0 : index
    %6 = vector.load %arg2[%c0_1, %5, %c0_2, %c0_3] : memref<1x11x11x128xbf16, #tpu.memory_space<vmem>>, vector<1x1x7x128xbf16>
    %7 = vector.shape_cast %6 : vector<1x1x7x128xbf16> to vector<7x128xbf16>
    %c0_4 = arith.constant 0 : index
    %c0_5 = arith.constant 0 : index
    %c0_6 = arith.constant 0 : index
    %8 = vector.load %arg3[%c0_4, %c0_5, %c0_6] : memref<25x128x192xbf16, #tpu.memory_space<vmem>>, vector<1x128x192xbf16>
    %9 = vector.shape_cast %8 : vector<1x128x192xbf16> to vector<128x192xbf16>
    %cst_7 = arith.constant dense<0.000000e+00> : vector<7x192xf32>
    %10 = tpu.matmul %7, %9, %cst_7 {dimension_numbers = #tpu.dot_dimension_numbers<[1], [0], [0], [1], [0, 0, 1, 1], [], []>} : vector<7x128xbf16>, vector<128x192xbf16>, vector<7x192xf32> -> vector<7x192xf32>
    %11 = arith.addf %3, %10 : vector<7x192xf32>
    %c0_i32_8 = arith.constant 0 : i32
    %12 = arith.addi %arg1, %c0_i32_8 : i32
    %c0_9 = arith.constant 0 : index
    %13 = arith.index_cast %12 : i32 to index
    %c1 = arith.constant 1 : index
    %c0_10 = arith.constant 0 : index
    %14 = vector.load %arg2[%c0_9, %13, %c1, %c0_10] : memref<1x11x11x128xbf16, #tpu.memory_space<vmem>>, vector<1x1x7x128xbf16>
    %15 = vector.shape_cast %14 : vector<1x1x7x128xbf16> to vector<7x128xbf16>
    %c1_11 = arith.constant 1 : index
    %c0_12 = arith.constant 0 : index
    %c0_13 = arith.constant 0 : index
    %16 = vector.load %arg3[%c1_11, %c0_12, %c0_13] : memref<25x128x192xbf16, #tpu.memory_space<vmem>>, vector<1x128x192xbf16>
    %17 = vector.shape_cast %16 : vector<1x128x192xbf16> to vector<128x192xbf16>
    %cst_14 = arith.constant dense<0.000000e+00> : vector<7x192xf32>
    %18 = tpu.matmul %15, %17, %cst_14 {dimension_numbers = #tpu.dot_dimension_numbers<[1], [0], [0], [1], [0, 0, 1, 1], [], []>} : vector<7x128xbf16>, vector<128x192xbf16>, vector<7x192xf32> -> vector<7x192xf32>
    %19 = arith.addf %11, %18 : vector<7x192xf32>
    %c0_i32_15 = arith.constant 0 : i32
    %20 = arith.addi %arg1, %c0_i32_15 : i32
    %c0_16 = arith.constant 0 : index
    %21 = arith.index_cast %20 : i32 to index
    %c2 = arith.constant 2 : index
    %c0_17 = arith.constant 0 : index
    %22 = vector.load %arg2[%c0_16, %21, %c2, %c0_17] : memref<1x11x11x128xbf16, #tpu.memory_space<vmem>>, vector<1x1x7x128xbf16>
    %23 = vector.shape_cast %22 : vector<1x1x7x128xbf16> to vector<7x128xbf16>
    %c2_18 = arith.constant 2 : index
    %c0_19 = arith.constant 0 : index
    %c0_20 = arith.constant 0 : index
    %24 = vector.load %arg3[%c2_18, %c0_19, %c0_20] : memref<25x128x192xbf16, #tpu.memory_space<vmem>>, vector<1x128x192xbf16>
    %25 = vector.shape_cast %24 : vector<1x128x192xbf16> to vector<128x192xbf16>
    %cst_21 = arith.constant dense<0.000000e+00> : vector<7x192xf32>
    %26 = tpu.matmul %23, %25, %cst_21 {dimension_numbers = #tpu.dot_dimension_numbers<[1], [0], [0], [1], [0, 0, 1, 1], [], []>} : vector<7x128xbf16>, vector<128x192xbf16>, vector<7x192xf32> -> vector<7x192xf32>
    %27 = arith.addf %19, %26 : vector<7x192xf32>
    %c0_i32_22 = arith.constant 0 : i32
    %28 = arith.addi %arg1, %c0_i32_22 : i32
    %c0_23 = arith.constant 0 : index
    %29 = arith.index_cast %28 : i32 to index
    %c3 = arith.constant 3 : index
    %c0_24 = arith.constant 0 : index
    %30 = vector.load %arg2[%c0_23, %29, %c3, %c0_24] : memref<1x11x11x128xbf16, #tpu.memory_space<vmem>>, vector<1x1x7x128xbf16>
    %31 = vector.shape_cast %30 : vector<1x1x7x128xbf16> to vector<7x128xbf16>
    %c3_25 = arith.constant 3 : index
    %c0_26 = arith.constant 0 : index
    %c0_27 = arith.constant 0 : index
    %32 = vector.load %arg3[%c3_25, %c0_26, %c0_27] : memref<25x128x192xbf16, #tpu.memory_space<vmem>>, vector<1x128x192xbf16>
    %33 = vector.shape_cast %32 : vector<1x128x192xbf16> to vector<128x192xbf16>
    %cst_28 = arith.constant dense<0.000000e+00> : vector<7x192xf32>
    %34 = tpu.matmul %31, %33, %cst_28 {dimension_numbers = #tpu.dot_dimension_numbers<[1], [0], [0], [1], [0, 0, 1, 1], [], []>} : vector<7x128xbf16>, vector<128x192xbf16>, vector<7x192xf32> -> vector<7x192xf32>
    %35 = arith.addf %27, %34 : vector<7x192xf32>
    %c0_i32_29 = arith.constant 0 : i32
    %36 = arith.addi %arg1, %c0_i32_29 : i32
    %c0_30 = arith.constant 0 : index
    %37 = arith.index_cast %36 : i32 to index
    %c4 = arith.constant 4 : index
    %c0_31 = arith.constant 0 : index
    %38 = vector.load %arg2[%c0_30, %37, %c4, %c0_31] : memref<1x11x11x128xbf16, #tpu.memory_space<vmem>>, vector<1x1x7x128xbf16>
    %39 = vector.shape_cast %38 : vector<1x1x7x128xbf16> to vector<7x128xbf16>
    %c4_32 = arith.constant 4 : index
    %c0_33 = arith.constant 0 : index
    %c0_34 = arith.constant 0 : index
    %40 = vector.load %arg3[%c4_32, %c0_33, %c0_34] : memref<25x128x192xbf16, #tpu.memory_space<vmem>>, vector<1x128x192xbf16>
    %41 = vector.shape_cast %40 : vector<1x128x192xbf16> to vector<128x192xbf16>
    %cst_35 = arith.constant dense<0.000000e+00> : vector<7x192xf32>
    %42 = tpu.matmul %39, %41, %cst_35 {dimension_numbers = #tpu.dot_dimension_numbers<[1], [0], [0], [1], [0, 0, 1, 1], [], []>} : vector<7x128xbf16>, vector<128x192xbf16>, vector<7x192xf32> -> vector<7x192xf32>
    %43 = arith.addf %35, %42 : vector<7x192xf32>
    %c1_i32 = arith.constant 1 : i32
    %44 = arith.addi %arg1, %c1_i32 : i32
    %c0_36 = arith.constant 0 : index
    %45 = arith.index_cast %44 : i32 to index
    %c0_37 = arith.constant 0 : index
    %c0_38 = arith.constant 0 : index
    %46 = vector.load %arg2[%c0_36, %45, %c0_37, %c0_38] : memref<1x11x11x128xbf16, #tpu.memory_space<vmem>>, vector<1x1x7x128xbf16>
    %47 = vector.shape_cast %46 : vector<1x1x7x128xbf16> to vector<7x128xbf16>
    %c5 = arith.constant 5 : index
    %c0_39 = arith.constant 0 : index
    %c0_40 = arith.constant 0 : index
    %48 = vector.load %arg3[%c5, %c0_39, %c0_40] : memref<25x128x192xbf16, #tpu.memory_space<vmem>>, vector<1x128x192xbf16>
    %49 = vector.shape_cast %48 : vector<1x128x192xbf16> to vector<128x192xbf16>
    %cst_41 = arith.constant dense<0.000000e+00> : vector<7x192xf32>
    %50 = tpu.matmul %47, %49, %cst_41 {dimension_numbers = #tpu.dot_dimension_numbers<[1], [0], [0], [1], [0, 0, 1, 1], [], []>} : vector<7x128xbf16>, vector<128x192xbf16>, vector<7x192xf32> -> vector<7x192xf32>
    %51 = arith.addf %43, %50 : vector<7x192xf32>
    %c1_i32_42 = arith.constant 1 : i32
    %52 = arith.addi %arg1, %c1_i32_42 : i32
    %c0_43 = arith.constant 0 : index
    %53 = arith.index_cast %52 : i32 to index
    %c1_44 = arith.constant 1 : index
    %c0_45 = arith.constant 0 : index
    %54 = vector.load %arg2[%c0_43, %53, %c1_44, %c0_45] : memref<1x11x11x128xbf16, #tpu.memory_space<vmem>>, vector<1x1x7x128xbf16>
    %55 = vector.shape_cast %54 : vector<1x1x7x128xbf16> to vector<7x128xbf16>
    %c6 = arith.constant 6 : index
    %c0_46 = arith.constant 0 : index
    %c0_47 = arith.constant 0 : index
    %56 = vector.load %arg3[%c6, %c0_46, %c0_47] : memref<25x128x192xbf16, #tpu.memory_space<vmem>>, vector<1x128x192xbf16>
    %57 = vector.shape_cast %56 : vector<1x128x192xbf16> to vector<128x192xbf16>
    %cst_48 = arith.constant dense<0.000000e+00> : vector<7x192xf32>
    %58 = tpu.matmul %55, %57, %cst_48 {dimension_numbers = #tpu.dot_dimension_numbers<[1], [0], [0], [1], [0, 0, 1, 1], [], []>} : vector<7x128xbf16>, vector<128x192xbf16>, vector<7x192xf32> -> vector<7x192xf32>
    %59 = arith.addf %51, %58 : vector<7x192xf32>
    %c1_i32_49 = arith.constant 1 : i32
    %60 = arith.addi %arg1, %c1_i32_49 : i32
    %c0_50 = arith.constant 0 : index
    %61 = arith.index_cast %60 : i32 to index
    %c2_51 = arith.constant 2 : index
    %c0_52 = arith.constant 0 : index
    %62 = vector.load %arg2[%c0_50, %61, %c2_51, %c0_52] : memref<1x11x11x128xbf16, #tpu.memory_space<vmem>>, vector<1x1x7x128xbf16>
    %63 = vector.shape_cast %62 : vector<1x1x7x128xbf16> to vector<7x128xbf16>
    %c7 = arith.constant 7 : index
    %c0_53 = arith.constant 0 : index
    %c0_54 = arith.constant 0 : index
    %64 = vector.load %arg3[%c7, %c0_53, %c0_54] : memref<25x128x192xbf16, #tpu.memory_space<vmem>>, vector<1x128x192xbf16>
    %65 = vector.shape_cast %64 : vector<1x128x192xbf16> to vector<128x192xbf16>
    %cst_55 = arith.constant dense<0.000000e+00> : vector<7x192xf32>
    %66 = tpu.matmul %63, %65, %cst_55 {dimension_numbers = #tpu.dot_dimension_numbers<[1], [0], [0], [1], [0, 0, 1, 1], [], []>} : vector<7x128xbf16>, vector<128x192xbf16>, vector<7x192xf32> -> vector<7x192xf32>
    %67 = arith.addf %59, %66 : vector<7x192xf32>
    %c1_i32_56 = arith.constant 1 : i32
    %68 = arith.addi %arg1, %c1_i32_56 : i32
    %c0_57 = arith.constant 0 : index
    %69 = arith.index_cast %68 : i32 to index
    %c3_58 = arith.constant 3 : index
    %c0_59 = arith.constant 0 : index
    %70 = vector.load %arg2[%c0_57, %69, %c3_58, %c0_59] : memref<1x11x11x128xbf16, #tpu.memory_space<vmem>>, vector<1x1x7x128xbf16>
    %71 = vector.shape_cast %70 : vector<1x1x7x128xbf16> to vector<7x128xbf16>
    %c8 = arith.constant 8 : index
    %c0_60 = arith.constant 0 : index
    %c0_61 = arith.constant 0 : index
    %72 = vector.load %arg3[%c8, %c0_60, %c0_61] : memref<25x128x192xbf16, #tpu.memory_space<vmem>>, vector<1x128x192xbf16>
    %73 = vector.shape_cast %72 : vector<1x128x192xbf16> to vector<128x192xbf16>
    %cst_62 = arith.constant dense<0.000000e+00> : vector<7x192xf32>
    %74 = tpu.matmul %71, %73, %cst_62 {dimension_numbers = #tpu.dot_dimension_numbers<[1], [0], [0], [1], [0, 0, 1, 1], [], []>} : vector<7x128xbf16>, vector<128x192xbf16>, vector<7x192xf32> -> vector<7x192xf32>
    %75 = arith.addf %67, %74 : vector<7x192xf32>
    %c1_i32_63 = arith.constant 1 : i32
    %76 = arith.addi %arg1, %c1_i32_63 : i32
    %c0_64 = arith.constant 0 : index
    %77 = arith.index_cast %76 : i32 to index
    %c4_65 = arith.constant 4 : index
    %c0_66 = arith.constant 0 : index
    %78 = vector.load %arg2[%c0_64, %77, %c4_65, %c0_66] : memref<1x11x11x128xbf16, #tpu.memory_space<vmem>>, vector<1x1x7x128xbf16>
    %79 = vector.shape_cast %78 : vector<1x1x7x128xbf16> to vector<7x128xbf16>
    %c9 = arith.constant 9 : index
    %c0_67 = arith.constant 0 : index
    %c0_68 = arith.constant 0 : index
    %80 = vector.load %arg3[%c9, %c0_67, %c0_68] : memref<25x128x192xbf16, #tpu.memory_space<vmem>>, vector<1x128x192xbf16>
    %81 = vector.shape_cast %80 : vector<1x128x192xbf16> to vector<128x192xbf16>
    %cst_69 = arith.constant dense<0.000000e+00> : vector<7x192xf32>
    %82 = tpu.matmul %79, %81, %cst_69 {dimension_numbers = #tpu.dot_dimension_numbers<[1], [0], [0], [1], [0, 0, 1, 1], [], []>} : vector<7x128xbf16>, vector<128x192xbf16>, vector<7x192xf32> -> vector<7x192xf32>
    %83 = arith.addf %75, %82 : vector<7x192xf32>
    %c2_i32 = arith.constant 2 : i32
    %84 = arith.addi %arg1, %c2_i32 : i32
    %c0_70 = arith.constant 0 : index
    %85 = arith.index_cast %84 : i32 to index
    %c0_71 = arith.constant 0 : index
    %c0_72 = arith.constant 0 : index
    %86 = vector.load %arg2[%c0_70, %85, %c0_71, %c0_72] : memref<1x11x11x128xbf16, #tpu.memory_space<vmem>>, vector<1x1x7x128xbf16>
    %87 = vector.shape_cast %86 : vector<1x1x7x128xbf16> to vector<7x128xbf16>
    %c10 = arith.constant 10 : index
    %c0_73 = arith.constant 0 : index
    %c0_74 = arith.constant 0 : index
    %88 = vector.load %arg3[%c10, %c0_73, %c0_74] : memref<25x128x192xbf16, #tpu.memory_space<vmem>>, vector<1x128x192xbf16>
    %89 = vector.shape_cast %88 : vector<1x128x192xbf16> to vector<128x192xbf16>
    %cst_75 = arith.constant dense<0.000000e+00> : vector<7x192xf32>
    %90 = tpu.matmul %87, %89, %cst_75 {dimension_numbers = #tpu.dot_dimension_numbers<[1], [0], [0], [1], [0, 0, 1, 1], [], []>} : vector<7x128xbf16>, vector<128x192xbf16>, vector<7x192xf32> -> vector<7x192xf32>
    %91 = arith.addf %83, %90 : vector<7x192xf32>
    %c2_i32_76 = arith.constant 2 : i32
    %92 = arith.addi %arg1, %c2_i32_76 : i32
    %c0_77 = arith.constant 0 : index
    %93 = arith.index_cast %92 : i32 to index
    %c1_78 = arith.constant 1 : index
    %c0_79 = arith.constant 0 : index
    %94 = vector.load %arg2[%c0_77, %93, %c1_78, %c0_79] : memref<1x11x11x128xbf16, #tpu.memory_space<vmem>>, vector<1x1x7x128xbf16>
    %95 = vector.shape_cast %94 : vector<1x1x7x128xbf16> to vector<7x128xbf16>
    %c11 = arith.constant 11 : index
    %c0_80 = arith.constant 0 : index
    %c0_81 = arith.constant 0 : index
    %96 = vector.load %arg3[%c11, %c0_80, %c0_81] : memref<25x128x192xbf16, #tpu.memory_space<vmem>>, vector<1x128x192xbf16>
    %97 = vector.shape_cast %96 : vector<1x128x192xbf16> to vector<128x192xbf16>
    %cst_82 = arith.constant dense<0.000000e+00> : vector<7x192xf32>
    %98 = tpu.matmul %95, %97, %cst_82 {dimension_numbers = #tpu.dot_dimension_numbers<[1], [0], [0], [1], [0, 0, 1, 1], [], []>} : vector<7x128xbf16>, vector<128x192xbf16>, vector<7x192xf32> -> vector<7x192xf32>
    %99 = arith.addf %91, %98 : vector<7x192xf32>
    %c2_i32_83 = arith.constant 2 : i32
    %100 = arith.addi %arg1, %c2_i32_83 : i32
    %c0_84 = arith.constant 0 : index
    %101 = arith.index_cast %100 : i32 to index
    %c2_85 = arith.constant 2 : index
    %c0_86 = arith.constant 0 : index
    %102 = vector.load %arg2[%c0_84, %101, %c2_85, %c0_86] : memref<1x11x11x128xbf16, #tpu.memory_space<vmem>>, vector<1x1x7x128xbf16>
    %103 = vector.shape_cast %102 : vector<1x1x7x128xbf16> to vector<7x128xbf16>
    %c12 = arith.constant 12 : index
    %c0_87 = arith.constant 0 : index
    %c0_88 = arith.constant 0 : index
    %104 = vector.load %arg3[%c12, %c0_87, %c0_88] : memref<25x128x192xbf16, #tpu.memory_space<vmem>>, vector<1x128x192xbf16>
    %105 = vector.shape_cast %104 : vector<1x128x192xbf16> to vector<128x192xbf16>
    %cst_89 = arith.constant dense<0.000000e+00> : vector<7x192xf32>
    %106 = tpu.matmul %103, %105, %cst_89 {dimension_numbers = #tpu.dot_dimension_numbers<[1], [0], [0], [1], [0, 0, 1, 1], [], []>} : vector<7x128xbf16>, vector<128x192xbf16>, vector<7x192xf32> -> vector<7x192xf32>
    %107 = arith.addf %99, %106 : vector<7x192xf32>
    %c2_i32_90 = arith.constant 2 : i32
    %108 = arith.addi %arg1, %c2_i32_90 : i32
    %c0_91 = arith.constant 0 : index
    %109 = arith.index_cast %108 : i32 to index
    %c3_92 = arith.constant 3 : index
    %c0_93 = arith.constant 0 : index
    %110 = vector.load %arg2[%c0_91, %109, %c3_92, %c0_93] : memref<1x11x11x128xbf16, #tpu.memory_space<vmem>>, vector<1x1x7x128xbf16>
    %111 = vector.shape_cast %110 : vector<1x1x7x128xbf16> to vector<7x128xbf16>
    %c13 = arith.constant 13 : index
    %c0_94 = arith.constant 0 : index
    %c0_95 = arith.constant 0 : index
    %112 = vector.load %arg3[%c13, %c0_94, %c0_95] : memref<25x128x192xbf16, #tpu.memory_space<vmem>>, vector<1x128x192xbf16>
    %113 = vector.shape_cast %112 : vector<1x128x192xbf16> to vector<128x192xbf16>
    %cst_96 = arith.constant dense<0.000000e+00> : vector<7x192xf32>
    %114 = tpu.matmul %111, %113, %cst_96 {dimension_numbers = #tpu.dot_dimension_numbers<[1], [0], [0], [1], [0, 0, 1, 1], [], []>} : vector<7x128xbf16>, vector<128x192xbf16>, vector<7x192xf32> -> vector<7x192xf32>
    %115 = arith.addf %107, %114 : vector<7x192xf32>
    %c2_i32_97 = arith.constant 2 : i32
    %116 = arith.addi %arg1, %c2_i32_97 : i32
    %c0_98 = arith.constant 0 : index
    %117 = arith.index_cast %116 : i32 to index
    %c4_99 = arith.constant 4 : index
    %c0_100 = arith.constant 0 : index
    %118 = vector.load %arg2[%c0_98, %117, %c4_99, %c0_100] : memref<1x11x11x128xbf16, #tpu.memory_space<vmem>>, vector<1x1x7x128xbf16>
    %119 = vector.shape_cast %118 : vector<1x1x7x128xbf16> to vector<7x128xbf16>
    %c14 = arith.constant 14 : index
    %c0_101 = arith.constant 0 : index
    %c0_102 = arith.constant 0 : index
    %120 = vector.load %arg3[%c14, %c0_101, %c0_102] : memref<25x128x192xbf16, #tpu.memory_space<vmem>>, vector<1x128x192xbf16>
    %121 = vector.shape_cast %120 : vector<1x128x192xbf16> to vector<128x192xbf16>
    %cst_103 = arith.constant dense<0.000000e+00> : vector<7x192xf32>
    %122 = tpu.matmul %119, %121, %cst_103 {dimension_numbers = #tpu.dot_dimension_numbers<[1], [0], [0], [1], [0, 0, 1, 1], [], []>} : vector<7x128xbf16>, vector<128x192xbf16>, vector<7x192xf32> -> vector<7x192xf32>
    %123 = arith.addf %115, %122 : vector<7x192xf32>
    %c3_i32 = arith.constant 3 : i32
    %124 = arith.addi %arg1, %c3_i32 : i32
    %c0_104 = arith.constant 0 : index
    %125 = arith.index_cast %124 : i32 to index
    %c0_105 = arith.constant 0 : index
    %c0_106 = arith.constant 0 : index
    %126 = vector.load %arg2[%c0_104, %125, %c0_105, %c0_106] : memref<1x11x11x128xbf16, #tpu.memory_space<vmem>>, vector<1x1x7x128xbf16>
    %127 = vector.shape_cast %126 : vector<1x1x7x128xbf16> to vector<7x128xbf16>
    %c15 = arith.constant 15 : index
    %c0_107 = arith.constant 0 : index
    %c0_108 = arith.constant 0 : index
    %128 = vector.load %arg3[%c15, %c0_107, %c0_108] : memref<25x128x192xbf16, #tpu.memory_space<vmem>>, vector<1x128x192xbf16>
    %129 = vector.shape_cast %128 : vector<1x128x192xbf16> to vector<128x192xbf16>
    %cst_109 = arith.constant dense<0.000000e+00> : vector<7x192xf32>
    %130 = tpu.matmul %127, %129, %cst_109 {dimension_numbers = #tpu.dot_dimension_numbers<[1], [0], [0], [1], [0, 0, 1, 1], [], []>} : vector<7x128xbf16>, vector<128x192xbf16>, vector<7x192xf32> -> vector<7x192xf32>
    %131 = arith.addf %123, %130 : vector<7x192xf32>
    %c3_i32_110 = arith.constant 3 : i32
    %132 = arith.addi %arg1, %c3_i32_110 : i32
    %c0_111 = arith.constant 0 : index
    %133 = arith.index_cast %132 : i32 to index
    %c1_112 = arith.constant 1 : index
    %c0_113 = arith.constant 0 : index
    %134 = vector.load %arg2[%c0_111, %133, %c1_112, %c0_113] : memref<1x11x11x128xbf16, #tpu.memory_space<vmem>>, vector<1x1x7x128xbf16>
    %135 = vector.shape_cast %134 : vector<1x1x7x128xbf16> to vector<7x128xbf16>
    %c16 = arith.constant 16 : index
    %c0_114 = arith.constant 0 : index
    %c0_115 = arith.constant 0 : index
    %136 = vector.load %arg3[%c16, %c0_114, %c0_115] : memref<25x128x192xbf16, #tpu.memory_space<vmem>>, vector<1x128x192xbf16>
    %137 = vector.shape_cast %136 : vector<1x128x192xbf16> to vector<128x192xbf16>
    %cst_116 = arith.constant dense<0.000000e+00> : vector<7x192xf32>
    %138 = tpu.matmul %135, %137, %cst_116 {dimension_numbers = #tpu.dot_dimension_numbers<[1], [0], [0], [1], [0, 0, 1, 1], [], []>} : vector<7x128xbf16>, vector<128x192xbf16>, vector<7x192xf32> -> vector<7x192xf32>
    %139 = arith.addf %131, %138 : vector<7x192xf32>
    %c3_i32_117 = arith.constant 3 : i32
    %140 = arith.addi %arg1, %c3_i32_117 : i32
    %c0_118 = arith.constant 0 : index
    %141 = arith.index_cast %140 : i32 to index
    %c2_119 = arith.constant 2 : index
    %c0_120 = arith.constant 0 : index
    %142 = vector.load %arg2[%c0_118, %141, %c2_119, %c0_120] : memref<1x11x11x128xbf16, #tpu.memory_space<vmem>>, vector<1x1x7x128xbf16>
    %143 = vector.shape_cast %142 : vector<1x1x7x128xbf16> to vector<7x128xbf16>
    %c17 = arith.constant 17 : index
    %c0_121 = arith.constant 0 : index
    %c0_122 = arith.constant 0 : index
    %144 = vector.load %arg3[%c17, %c0_121, %c0_122] : memref<25x128x192xbf16, #tpu.memory_space<vmem>>, vector<1x128x192xbf16>
    %145 = vector.shape_cast %144 : vector<1x128x192xbf16> to vector<128x192xbf16>
    %cst_123 = arith.constant dense<0.000000e+00> : vector<7x192xf32>
    %146 = tpu.matmul %143, %145, %cst_123 {dimension_numbers = #tpu.dot_dimension_numbers<[1], [0], [0], [1], [0, 0, 1, 1], [], []>} : vector<7x128xbf16>, vector<128x192xbf16>, vector<7x192xf32> -> vector<7x192xf32>
    %147 = arith.addf %139, %146 : vector<7x192xf32>
    %c3_i32_124 = arith.constant 3 : i32
    %148 = arith.addi %arg1, %c3_i32_124 : i32
    %c0_125 = arith.constant 0 : index
    %149 = arith.index_cast %148 : i32 to index
    %c3_126 = arith.constant 3 : index
    %c0_127 = arith.constant 0 : index
    %150 = vector.load %arg2[%c0_125, %149, %c3_126, %c0_127] : memref<1x11x11x128xbf16, #tpu.memory_space<vmem>>, vector<1x1x7x128xbf16>
    %151 = vector.shape_cast %150 : vector<1x1x7x128xbf16> to vector<7x128xbf16>
    %c18 = arith.constant 18 : index
    %c0_128 = arith.constant 0 : index
    %c0_129 = arith.constant 0 : index
    %152 = vector.load %arg3[%c18, %c0_128, %c0_129] : memref<25x128x192xbf16, #tpu.memory_space<vmem>>, vector<1x128x192xbf16>
    %153 = vector.shape_cast %152 : vector<1x128x192xbf16> to vector<128x192xbf16>
    %cst_130 = arith.constant dense<0.000000e+00> : vector<7x192xf32>
    %154 = tpu.matmul %151, %153, %cst_130 {dimension_numbers = #tpu.dot_dimension_numbers<[1], [0], [0], [1], [0, 0, 1, 1], [], []>} : vector<7x128xbf16>, vector<128x192xbf16>, vector<7x192xf32> -> vector<7x192xf32>
    %155 = arith.addf %147, %154 : vector<7x192xf32>
    %c3_i32_131 = arith.constant 3 : i32
    %156 = arith.addi %arg1, %c3_i32_131 : i32
    %c0_132 = arith.constant 0 : index
    %157 = arith.index_cast %156 : i32 to index
    %c4_133 = arith.constant 4 : index
    %c0_134 = arith.constant 0 : index
    %158 = vector.load %arg2[%c0_132, %157, %c4_133, %c0_134] : memref<1x11x11x128xbf16, #tpu.memory_space<vmem>>, vector<1x1x7x128xbf16>
    %159 = vector.shape_cast %158 : vector<1x1x7x128xbf16> to vector<7x128xbf16>
    %c19 = arith.constant 19 : index
    %c0_135 = arith.constant 0 : index
    %c0_136 = arith.constant 0 : index
    %160 = vector.load %arg3[%c19, %c0_135, %c0_136] : memref<25x128x192xbf16, #tpu.memory_space<vmem>>, vector<1x128x192xbf16>
    %161 = vector.shape_cast %160 : vector<1x128x192xbf16> to vector<128x192xbf16>
    %cst_137 = arith.constant dense<0.000000e+00> : vector<7x192xf32>
    %162 = tpu.matmul %159, %161, %cst_137 {dimension_numbers = #tpu.dot_dimension_numbers<[1], [0], [0], [1], [0, 0, 1, 1], [], []>} : vector<7x128xbf16>, vector<128x192xbf16>, vector<7x192xf32> -> vector<7x192xf32>
    %163 = arith.addf %155, %162 : vector<7x192xf32>
    %c4_i32 = arith.constant 4 : i32
    %164 = arith.addi %arg1, %c4_i32 : i32
    %c0_138 = arith.constant 0 : index
    %165 = arith.index_cast %164 : i32 to index
    %c0_139 = arith.constant 0 : index
    %c0_140 = arith.constant 0 : index
    %166 = vector.load %arg2[%c0_138, %165, %c0_139, %c0_140] : memref<1x11x11x128xbf16, #tpu.memory_space<vmem>>, vector<1x1x7x128xbf16>
    %167 = vector.shape_cast %166 : vector<1x1x7x128xbf16> to vector<7x128xbf16>
    %c20 = arith.constant 20 : index
    %c0_141 = arith.constant 0 : index
    %c0_142 = arith.constant 0 : index
    %168 = vector.load %arg3[%c20, %c0_141, %c0_142] : memref<25x128x192xbf16, #tpu.memory_space<vmem>>, vector<1x128x192xbf16>
    %169 = vector.shape_cast %168 : vector<1x128x192xbf16> to vector<128x192xbf16>
    %cst_143 = arith.constant dense<0.000000e+00> : vector<7x192xf32>
    %170 = tpu.matmul %167, %169, %cst_143 {dimension_numbers = #tpu.dot_dimension_numbers<[1], [0], [0], [1], [0, 0, 1, 1], [], []>} : vector<7x128xbf16>, vector<128x192xbf16>, vector<7x192xf32> -> vector<7x192xf32>
    %171 = arith.addf %163, %170 : vector<7x192xf32>
    %c4_i32_144 = arith.constant 4 : i32
    %172 = arith.addi %arg1, %c4_i32_144 : i32
    %c0_145 = arith.constant 0 : index
    %173 = arith.index_cast %172 : i32 to index
    %c1_146 = arith.constant 1 : index
    %c0_147 = arith.constant 0 : index
    %174 = vector.load %arg2[%c0_145, %173, %c1_146, %c0_147] : memref<1x11x11x128xbf16, #tpu.memory_space<vmem>>, vector<1x1x7x128xbf16>
    %175 = vector.shape_cast %174 : vector<1x1x7x128xbf16> to vector<7x128xbf16>
    %c21 = arith.constant 21 : index
    %c0_148 = arith.constant 0 : index
    %c0_149 = arith.constant 0 : index
    %176 = vector.load %arg3[%c21, %c0_148, %c0_149] : memref<25x128x192xbf16, #tpu.memory_space<vmem>>, vector<1x128x192xbf16>
    %177 = vector.shape_cast %176 : vector<1x128x192xbf16> to vector<128x192xbf16>
    %cst_150 = arith.constant dense<0.000000e+00> : vector<7x192xf32>
    %178 = tpu.matmul %175, %177, %cst_150 {dimension_numbers = #tpu.dot_dimension_numbers<[1], [0], [0], [1], [0, 0, 1, 1], [], []>} : vector<7x128xbf16>, vector<128x192xbf16>, vector<7x192xf32> -> vector<7x192xf32>
    %179 = arith.addf %171, %178 : vector<7x192xf32>
    %c4_i32_151 = arith.constant 4 : i32
    %180 = arith.addi %arg1, %c4_i32_151 : i32
    %c0_152 = arith.constant 0 : index
    %181 = arith.index_cast %180 : i32 to index
    %c2_153 = arith.constant 2 : index
    %c0_154 = arith.constant 0 : index
    %182 = vector.load %arg2[%c0_152, %181, %c2_153, %c0_154] : memref<1x11x11x128xbf16, #tpu.memory_space<vmem>>, vector<1x1x7x128xbf16>
    %183 = vector.shape_cast %182 : vector<1x1x7x128xbf16> to vector<7x128xbf16>
    %c22 = arith.constant 22 : index
    %c0_155 = arith.constant 0 : index
    %c0_156 = arith.constant 0 : index
    %184 = vector.load %arg3[%c22, %c0_155, %c0_156] : memref<25x128x192xbf16, #tpu.memory_space<vmem>>, vector<1x128x192xbf16>
    %185 = vector.shape_cast %184 : vector<1x128x192xbf16> to vector<128x192xbf16>
    %cst_157 = arith.constant dense<0.000000e+00> : vector<7x192xf32>
    %186 = tpu.matmul %183, %185, %cst_157 {dimension_numbers = #tpu.dot_dimension_numbers<[1], [0], [0], [1], [0, 0, 1, 1], [], []>} : vector<7x128xbf16>, vector<128x192xbf16>, vector<7x192xf32> -> vector<7x192xf32>
    %187 = arith.addf %179, %186 : vector<7x192xf32>
    %c4_i32_158 = arith.constant 4 : i32
    %188 = arith.addi %arg1, %c4_i32_158 : i32
    %c0_159 = arith.constant 0 : index
    %189 = arith.index_cast %188 : i32 to index
    %c3_160 = arith.constant 3 : index
    %c0_161 = arith.constant 0 : index
    %190 = vector.load %arg2[%c0_159, %189, %c3_160, %c0_161] : memref<1x11x11x128xbf16, #tpu.memory_space<vmem>>, vector<1x1x7x128xbf16>
    %191 = vector.shape_cast %190 : vector<1x1x7x128xbf16> to vector<7x128xbf16>
    %c23 = arith.constant 23 : index
    %c0_162 = arith.constant 0 : index
    %c0_163 = arith.constant 0 : index
    %192 = vector.load %arg3[%c23, %c0_162, %c0_163] : memref<25x128x192xbf16, #tpu.memory_space<vmem>>, vector<1x128x192xbf16>
    %193 = vector.shape_cast %192 : vector<1x128x192xbf16> to vector<128x192xbf16>
    %cst_164 = arith.constant dense<0.000000e+00> : vector<7x192xf32>
    %194 = tpu.matmul %191, %193, %cst_164 {dimension_numbers = #tpu.dot_dimension_numbers<[1], [0], [0], [1], [0, 0, 1, 1], [], []>} : vector<7x128xbf16>, vector<128x192xbf16>, vector<7x192xf32> -> vector<7x192xf32>
    %195 = arith.addf %187, %194 : vector<7x192xf32>
    %c4_i32_165 = arith.constant 4 : i32
    %196 = arith.addi %arg1, %c4_i32_165 : i32
    %c0_166 = arith.constant 0 : index
    %197 = arith.index_cast %196 : i32 to index
    %c4_167 = arith.constant 4 : index
    %c0_168 = arith.constant 0 : index
    %198 = vector.load %arg2[%c0_166, %197, %c4_167, %c0_168] : memref<1x11x11x128xbf16, #tpu.memory_space<vmem>>, vector<1x1x7x128xbf16>
    %199 = vector.shape_cast %198 : vector<1x1x7x128xbf16> to vector<7x128xbf16>
    %c24 = arith.constant 24 : index
    %c0_169 = arith.constant 0 : index
    %c0_170 = arith.constant 0 : index
    %200 = vector.load %arg3[%c24, %c0_169, %c0_170] : memref<25x128x192xbf16, #tpu.memory_space<vmem>>, vector<1x128x192xbf16>
    %201 = vector.shape_cast %200 : vector<1x128x192xbf16> to vector<128x192xbf16>
    %cst_171 = arith.constant dense<0.000000e+00> : vector<7x192xf32>
    %202 = tpu.matmul %199, %201, %cst_171 {dimension_numbers = #tpu.dot_dimension_numbers<[1], [0], [0], [1], [0, 0, 1, 1], [], []>} : vector<7x128xbf16>, vector<128x192xbf16>, vector<7x192xf32> -> vector<7x192xf32>
    %203 = arith.addf %195, %202 : vector<7x192xf32>
    %cst_172 = arith.constant 0.000000e+00 : f32
    %204 = vector.broadcast %cst_172 : f32 to vector<7x192xf32>
    %205 = arith.maximumf %203, %204 : vector<7x192xf32>
    %206 = arith.truncf %205 : vector<7x192xf32> to vector<7x192xbf16>
    %c0_173 = arith.constant 0 : index
    %c0_174 = arith.constant 0 : index
    %c0_175 = arith.constant 0 : index
    %c0_176 = arith.constant 0 : index
    %207 = vector.load %arg5[%c0_173, %c0_174, %c0_175, %c0_176] : memref<1x1x7x192xbf16, #tpu.memory_space<vmem>>, vector<1x1x7x192xbf16>
    %208 = vector.shape_cast %207 : vector<1x1x7x192xbf16> to vector<7x192xbf16>
    %209 = vector.shape_cast %206 : vector<7x192xbf16> to vector<1x1x7x192xbf16>
    tpu.vector_store %arg5[%c0_173, %c0_174, %c0_175, %c0_176], %209 {strides = array<i32>} : memref<1x1x7x192xbf16, #tpu.memory_space<vmem>>, vector<1x1x7x192xbf16>,
    return
  }
  func.func @transform_0(%arg0: i32, %arg1: i32) -> (i32, i32, i32, i32) {
    %c0_i32 = arith.constant 0 : i32
    %c0_i32_0 = arith.constant 0 : i32
    %c0_i32_1 = arith.constant 0 : i32
    %c0_i32_2 = arith.constant 0 : i32
    return %arg0, %c0_i32, %c0_i32_0, %c0_i32_1 : i32, i32, i32, i32
  }
  func.func @transform_1(%arg0: i32, %arg1: i32) -> (i32, i32, i32) {
    %c0_i32 = arith.constant 0 : i32
    %c0_i32_0 = arith.constant 0 : i32
    %c0_i32_1 = arith.constant 0 : i32
    %c0_i32_2 = arith.constant 0 : i32
    return %c0_i32, %c0_i32_0, %c0_i32_1 : i32, i32, i32
  }
  func.func @transform_2(%arg0: i32, %arg1: i32) -> (i32, i32) {
    %c0_i32 = arith.constant 0 : i32
    %c0_i32_0 = arith.constant 0 : i32
    %c0_i32_1 = arith.constant 0 : i32
    return %c0_i32, %c0_i32_0 : i32, i32
  }
  func.func @transform_3(%arg0: i32, %arg1: i32) -> (i32, i32, i32, i32) {
    %c0_i32 = arith.constant 0 : i32
    %c0_i32_0 = arith.constant 0 : i32
    %c0_i32_1 = arith.constant 0 : i32
    return %arg0, %arg1, %c0_i32, %c0_i32_0 : i32, i32, i32, i32
  }
}

module attributes {stable_mosaic.version = 11 : i64} {
  func.func @kernel(%arg0: i32, %arg1: memref<1x7x7x192xbf16, #tpu.memory_space<vmem>>, %arg2: memref<1x3x3x192xbf16, #tpu.memory_space<vmem>>) attributes {dimension_semantics = [#tpu.dimension_semantics<parallel>], iteration_bounds = array<i64: 2>, scalar_prefetch = 0 : i64, scratch_operands = 0 : i64, tpu.core_type = #tpu.core_type<tc>, window_params = [{transform_indices = @transform_0, window_bounds = array<i64: 1, 7, 7, 192>}, {transform_indices = @transform_1, window_bounds = array<i64: 1, 3, 3, 192>}]} {
    %0 = tpu.iota {dimensions = array<i32: 0>} : vector<3x5xi32>
    %1 = tpu.iota {dimensions = array<i32: 1>} : vector<3x5xi32>
    %c2_i32 = arith.constant 2 : i32
    %2 = vector.broadcast %c2_i32 : i32 to vector<3x5xi32>
    %3 = arith.muli %2, %0 : vector<3x5xi32>
    %4 = arith.cmpi eq, %1, %3 : vector<3x5xi32>
    %5 = arith.extui %4 : vector<3x5xi1> to vector<3x5xi32>
    %6 = arith.sitofp %5 : vector<3x5xi32> to vector<3x5xf32>
    %7 = arith.truncf %6 : vector<3x5xf32> to vector<3x5xbf16>
    %c0 = arith.constant 0 : index
    %c0_0 = arith.constant 0 : index
    %c0_1 = arith.constant 0 : index
    %c0_2 = arith.constant 0 : index
    %8 = vector.load %arg1[%c0, %c0_0, %c0_1, %c0_2] : memref<1x7x7x192xbf16, #tpu.memory_space<vmem>>, vector<1x1x7x192xbf16>
    %9 = vector.shape_cast %8 : vector<1x1x7x192xbf16> to vector<7x192xbf16>
    %c0_3 = arith.constant 0 : index
    %c1 = arith.constant 1 : index
    %c0_4 = arith.constant 0 : index
    %c0_5 = arith.constant 0 : index
    %10 = vector.load %arg1[%c0_3, %c1, %c0_4, %c0_5] : memref<1x7x7x192xbf16, #tpu.memory_space<vmem>>, vector<1x1x7x192xbf16>
    %11 = vector.shape_cast %10 : vector<1x1x7x192xbf16> to vector<7x192xbf16>
    %c0_6 = arith.constant 0 : index
    %c2 = arith.constant 2 : index
    %c0_7 = arith.constant 0 : index
    %c0_8 = arith.constant 0 : index
    %12 = vector.load %arg1[%c0_6, %c2, %c0_7, %c0_8] : memref<1x7x7x192xbf16, #tpu.memory_space<vmem>>, vector<1x1x7x192xbf16>
    %13 = vector.shape_cast %12 : vector<1x1x7x192xbf16> to vector<7x192xbf16>
    %14 = arith.maximumf %9, %11 : vector<7x192xbf16>
    %15 = arith.maximumf %14, %13 : vector<7x192xbf16>
    %16 = vector.extract_strided_slice %15 {offsets = [0, 0], sizes = [5, 192], strides = [1, 1]} : vector<7x192xbf16> to vector<5x192xbf16>
    %17 = vector.extract_strided_slice %15 {offsets = [1, 0], sizes = [5, 192], strides = [1, 1]} : vector<7x192xbf16> to vector<5x192xbf16>
    %18 = arith.maximumf %16, %17 : vector<5x192xbf16>
    %19 = vector.extract_strided_slice %15 {offsets = [2, 0], sizes = [5, 192], strides = [1, 1]} : vector<7x192xbf16> to vector<5x192xbf16>
    %20 = arith.maximumf %18, %19 : vector<5x192xbf16>
    %cst = arith.constant dense<0.000000e+00> : vector<3x192xf32>
    %21 = tpu.matmul %7, %20, %cst {dimension_numbers = #tpu.dot_dimension_numbers<[1], [0], [0], [1], [0, 0, 1, 1], [], []>} : vector<3x5xbf16>, vector<5x192xbf16>, vector<3x192xf32> -> vector<3x192xf32>
    %22 = arith.truncf %21 : vector<3x192xf32> to vector<3x192xbf16>
    %c0_9 = arith.constant 0 : index
    %c0_10 = arith.constant 0 : index
    %c0_11 = arith.constant 0 : index
    %c0_12 = arith.constant 0 : index
    %23 = vector.load %arg2[%c0_9, %c0_10, %c0_11, %c0_12] : memref<1x3x3x192xbf16, #tpu.memory_space<vmem>>, vector<1x1x3x192xbf16>
    %24 = vector.shape_cast %23 : vector<1x1x3x192xbf16> to vector<3x192xbf16>
    %25 = vector.shape_cast %22 : vector<3x192xbf16> to vector<1x1x3x192xbf16>
    tpu.vector_store %arg2[%c0_9, %c0_10, %c0_11, %c0_12], %25 {strides = array<i32>} : memref<1x3x3x192xbf16, #tpu.memory_space<vmem>>, vector<1x1x3x192xbf16>,
    %c0_13 = arith.constant 0 : index
    %c2_14 = arith.constant 2 : index
    %c0_15 = arith.constant 0 : index
    %c0_16 = arith.constant 0 : index
    %26 = vector.load %arg1[%c0_13, %c2_14, %c0_15, %c0_16] : memref<1x7x7x192xbf16, #tpu.memory_space<vmem>>, vector<1x1x7x192xbf16>
    %27 = vector.shape_cast %26 : vector<1x1x7x192xbf16> to vector<7x192xbf16>
    %c0_17 = arith.constant 0 : index
    %c3 = arith.constant 3 : index
    %c0_18 = arith.constant 0 : index
    %c0_19 = arith.constant 0 : index
    %28 = vector.load %arg1[%c0_17, %c3, %c0_18, %c0_19] : memref<1x7x7x192xbf16, #tpu.memory_space<vmem>>, vector<1x1x7x192xbf16>
    %29 = vector.shape_cast %28 : vector<1x1x7x192xbf16> to vector<7x192xbf16>
    %c0_20 = arith.constant 0 : index
    %c4 = arith.constant 4 : index
    %c0_21 = arith.constant 0 : index
    %c0_22 = arith.constant 0 : index
    %30 = vector.load %arg1[%c0_20, %c4, %c0_21, %c0_22] : memref<1x7x7x192xbf16, #tpu.memory_space<vmem>>, vector<1x1x7x192xbf16>
    %31 = vector.shape_cast %30 : vector<1x1x7x192xbf16> to vector<7x192xbf16>
    %32 = arith.maximumf %27, %29 : vector<7x192xbf16>
    %33 = arith.maximumf %32, %31 : vector<7x192xbf16>
    %34 = vector.extract_strided_slice %33 {offsets = [0, 0], sizes = [5, 192], strides = [1, 1]} : vector<7x192xbf16> to vector<5x192xbf16>
    %35 = vector.extract_strided_slice %33 {offsets = [1, 0], sizes = [5, 192], strides = [1, 1]} : vector<7x192xbf16> to vector<5x192xbf16>
    %36 = arith.maximumf %34, %35 : vector<5x192xbf16>
    %37 = vector.extract_strided_slice %33 {offsets = [2, 0], sizes = [5, 192], strides = [1, 1]} : vector<7x192xbf16> to vector<5x192xbf16>
    %38 = arith.maximumf %36, %37 : vector<5x192xbf16>
    %cst_23 = arith.constant dense<0.000000e+00> : vector<3x192xf32>
    %39 = tpu.matmul %7, %38, %cst_23 {dimension_numbers = #tpu.dot_dimension_numbers<[1], [0], [0], [1], [0, 0, 1, 1], [], []>} : vector<3x5xbf16>, vector<5x192xbf16>, vector<3x192xf32> -> vector<3x192xf32>
    %40 = arith.truncf %39 : vector<3x192xf32> to vector<3x192xbf16>
    %c0_24 = arith.constant 0 : index
    %c1_25 = arith.constant 1 : index
    %c0_26 = arith.constant 0 : index
    %c0_27 = arith.constant 0 : index
    %41 = vector.load %arg2[%c0_24, %c1_25, %c0_26, %c0_27] : memref<1x3x3x192xbf16, #tpu.memory_space<vmem>>, vector<1x1x3x192xbf16>
    %42 = vector.shape_cast %41 : vector<1x1x3x192xbf16> to vector<3x192xbf16>
    %43 = vector.shape_cast %40 : vector<3x192xbf16> to vector<1x1x3x192xbf16>
    tpu.vector_store %arg2[%c0_24, %c1_25, %c0_26, %c0_27], %43 {strides = array<i32>} : memref<1x3x3x192xbf16, #tpu.memory_space<vmem>>, vector<1x1x3x192xbf16>,
    %c0_28 = arith.constant 0 : index
    %c4_29 = arith.constant 4 : index
    %c0_30 = arith.constant 0 : index
    %c0_31 = arith.constant 0 : index
    %44 = vector.load %arg1[%c0_28, %c4_29, %c0_30, %c0_31] : memref<1x7x7x192xbf16, #tpu.memory_space<vmem>>, vector<1x1x7x192xbf16>
    %45 = vector.shape_cast %44 : vector<1x1x7x192xbf16> to vector<7x192xbf16>
    %c0_32 = arith.constant 0 : index
    %c5 = arith.constant 5 : index
    %c0_33 = arith.constant 0 : index
    %c0_34 = arith.constant 0 : index
    %46 = vector.load %arg1[%c0_32, %c5, %c0_33, %c0_34] : memref<1x7x7x192xbf16, #tpu.memory_space<vmem>>, vector<1x1x7x192xbf16>
    %47 = vector.shape_cast %46 : vector<1x1x7x192xbf16> to vector<7x192xbf16>
    %c0_35 = arith.constant 0 : index
    %c6 = arith.constant 6 : index
    %c0_36 = arith.constant 0 : index
    %c0_37 = arith.constant 0 : index
    %48 = vector.load %arg1[%c0_35, %c6, %c0_36, %c0_37] : memref<1x7x7x192xbf16, #tpu.memory_space<vmem>>, vector<1x1x7x192xbf16>
    %49 = vector.shape_cast %48 : vector<1x1x7x192xbf16> to vector<7x192xbf16>
    %50 = arith.maximumf %45, %47 : vector<7x192xbf16>
    %51 = arith.maximumf %50, %49 : vector<7x192xbf16>
    %52 = vector.extract_strided_slice %51 {offsets = [0, 0], sizes = [5, 192], strides = [1, 1]} : vector<7x192xbf16> to vector<5x192xbf16>
    %53 = vector.extract_strided_slice %51 {offsets = [1, 0], sizes = [5, 192], strides = [1, 1]} : vector<7x192xbf16> to vector<5x192xbf16>
    %54 = arith.maximumf %52, %53 : vector<5x192xbf16>
    %55 = vector.extract_strided_slice %51 {offsets = [2, 0], sizes = [5, 192], strides = [1, 1]} : vector<7x192xbf16> to vector<5x192xbf16>
    %56 = arith.maximumf %54, %55 : vector<5x192xbf16>
    %cst_38 = arith.constant dense<0.000000e+00> : vector<3x192xf32>
    %57 = tpu.matmul %7, %56, %cst_38 {dimension_numbers = #tpu.dot_dimension_numbers<[1], [0], [0], [1], [0, 0, 1, 1], [], []>} : vector<3x5xbf16>, vector<5x192xbf16>, vector<3x192xf32> -> vector<3x192xf32>
    %58 = arith.truncf %57 : vector<3x192xf32> to vector<3x192xbf16>
    %c0_39 = arith.constant 0 : index
    %c2_40 = arith.constant 2 : index
    %c0_41 = arith.constant 0 : index
    %c0_42 = arith.constant 0 : index
    %59 = vector.load %arg2[%c0_39, %c2_40, %c0_41, %c0_42] : memref<1x3x3x192xbf16, #tpu.memory_space<vmem>>, vector<1x1x3x192xbf16>
    %60 = vector.shape_cast %59 : vector<1x1x3x192xbf16> to vector<3x192xbf16>
    %61 = vector.shape_cast %58 : vector<3x192xbf16> to vector<1x1x3x192xbf16>
    tpu.vector_store %arg2[%c0_39, %c2_40, %c0_41, %c0_42], %61 {strides = array<i32>} : memref<1x3x3x192xbf16, #tpu.memory_space<vmem>>, vector<1x1x3x192xbf16>,
    return
  }
  func.func @transform_0(%arg0: i32) -> (i32, i32, i32, i32) {
    %c0_i32 = arith.constant 0 : i32
    %c0_i32_0 = arith.constant 0 : i32
    %c0_i32_1 = arith.constant 0 : i32
    %c0_i32_2 = arith.constant 0 : i32
    return %arg0, %c0_i32, %c0_i32_0, %c0_i32_1 : i32, i32, i32, i32
  }
  func.func @transform_1(%arg0: i32) -> (i32, i32, i32, i32) {
    %c0_i32 = arith.constant 0 : i32
    %c0_i32_0 = arith.constant 0 : i32
    %c0_i32_1 = arith.constant 0 : i32
    %c0_i32_2 = arith.constant 0 : i32
    return %arg0, %c0_i32, %c0_i32_0, %c0_i32_1 : i32, i32, i32, i32
  }
}

module attributes {stable_mosaic.version = 11 : i64} {
  func.func @_conv_s1_row_kernel(%arg0: i32, %arg1: i32, %arg2: memref<1x5x5x192xbf16, #tpu.memory_space<vmem>>, %arg3: memref<9x192x384xbf16, #tpu.memory_space<vmem>>, %arg4: memref<1x384xf32, #tpu.memory_space<vmem>>, %arg5: memref<1x1x3x384xbf16, #tpu.memory_space<vmem>>) attributes {dimension_semantics = [#tpu.dimension_semantics<parallel>, #tpu.dimension_semantics<arbitrary>], iteration_bounds = array<i64: 2, 3>, scalar_prefetch = 0 : i64, scratch_operands = 0 : i64, tpu.core_type = #tpu.core_type<tc>, window_params = [{transform_indices = @transform_0, window_bounds = array<i64: 1, 5, 5, 192>}, {pipeline_mode = #tpu.pipeline_mode<synchronous>, transform_indices = @transform_1, window_bounds = array<i64: 9, 192, 384>}, {pipeline_mode = #tpu.pipeline_mode<synchronous>, transform_indices = @transform_2, window_bounds = array<i64: 1, 384>}, {transform_indices = @transform_3, window_bounds = array<i64: 1, 1, 3, 384>}]} {
    %cst = arith.constant 0.000000e+00 : f32
    %0 = vector.broadcast %cst : f32 to vector<3x384xf32>
    %c0 = arith.constant 0 : index
    %c0_0 = arith.constant 0 : index
    %1 = vector.load %arg4[%c0, %c0_0] : memref<1x384xf32, #tpu.memory_space<vmem>>, vector<1x384xf32>
    %2 = vector.broadcast %1 : vector<1x384xf32> to vector<3x384xf32>
    %3 = arith.addf %0, %2 : vector<3x384xf32>
    %c0_i32 = arith.constant 0 : i32
    %4 = arith.addi %arg1, %c0_i32 : i32
    %c0_1 = arith.constant 0 : index
    %5 = arith.index_cast %4 : i32 to index
    %c0_2 = arith.constant 0 : index
    %c0_3 = arith.constant 0 : index
    %6 = vector.load %arg2[%c0_1, %5, %c0_2, %c0_3] : memref<1x5x5x192xbf16, #tpu.memory_space<vmem>>, vector<1x1x3x192xbf16>
    %7 = vector.shape_cast %6 : vector<1x1x3x192xbf16> to vector<3x192xbf16>
    %c0_4 = arith.constant 0 : index
    %c0_5 = arith.constant 0 : index
    %c0_6 = arith.constant 0 : index
    %8 = vector.load %arg3[%c0_4, %c0_5, %c0_6] : memref<9x192x384xbf16, #tpu.memory_space<vmem>>, vector<1x192x384xbf16>
    %9 = vector.shape_cast %8 : vector<1x192x384xbf16> to vector<192x384xbf16>
    %cst_7 = arith.constant dense<0.000000e+00> : vector<3x384xf32>
    %10 = tpu.matmul %7, %9, %cst_7 {dimension_numbers = #tpu.dot_dimension_numbers<[1], [0], [0], [1], [0, 0, 1, 1], [], []>} : vector<3x192xbf16>, vector<192x384xbf16>, vector<3x384xf32> -> vector<3x384xf32>
    %11 = arith.addf %3, %10 : vector<3x384xf32>
    %c0_i32_8 = arith.constant 0 : i32
    %12 = arith.addi %arg1, %c0_i32_8 : i32
    %c0_9 = arith.constant 0 : index
    %13 = arith.index_cast %12 : i32 to index
    %c1 = arith.constant 1 : index
    %c0_10 = arith.constant 0 : index
    %14 = vector.load %arg2[%c0_9, %13, %c1, %c0_10] : memref<1x5x5x192xbf16, #tpu.memory_space<vmem>>, vector<1x1x3x192xbf16>
    %15 = vector.shape_cast %14 : vector<1x1x3x192xbf16> to vector<3x192xbf16>
    %c1_11 = arith.constant 1 : index
    %c0_12 = arith.constant 0 : index
    %c0_13 = arith.constant 0 : index
    %16 = vector.load %arg3[%c1_11, %c0_12, %c0_13] : memref<9x192x384xbf16, #tpu.memory_space<vmem>>, vector<1x192x384xbf16>
    %17 = vector.shape_cast %16 : vector<1x192x384xbf16> to vector<192x384xbf16>
    %cst_14 = arith.constant dense<0.000000e+00> : vector<3x384xf32>
    %18 = tpu.matmul %15, %17, %cst_14 {dimension_numbers = #tpu.dot_dimension_numbers<[1], [0], [0], [1], [0, 0, 1, 1], [], []>} : vector<3x192xbf16>, vector<192x384xbf16>, vector<3x384xf32> -> vector<3x384xf32>
    %19 = arith.addf %11, %18 : vector<3x384xf32>
    %c0_i32_15 = arith.constant 0 : i32
    %20 = arith.addi %arg1, %c0_i32_15 : i32
    %c0_16 = arith.constant 0 : index
    %21 = arith.index_cast %20 : i32 to index
    %c2 = arith.constant 2 : index
    %c0_17 = arith.constant 0 : index
    %22 = vector.load %arg2[%c0_16, %21, %c2, %c0_17] : memref<1x5x5x192xbf16, #tpu.memory_space<vmem>>, vector<1x1x3x192xbf16>
    %23 = vector.shape_cast %22 : vector<1x1x3x192xbf16> to vector<3x192xbf16>
    %c2_18 = arith.constant 2 : index
    %c0_19 = arith.constant 0 : index
    %c0_20 = arith.constant 0 : index
    %24 = vector.load %arg3[%c2_18, %c0_19, %c0_20] : memref<9x192x384xbf16, #tpu.memory_space<vmem>>, vector<1x192x384xbf16>
    %25 = vector.shape_cast %24 : vector<1x192x384xbf16> to vector<192x384xbf16>
    %cst_21 = arith.constant dense<0.000000e+00> : vector<3x384xf32>
    %26 = tpu.matmul %23, %25, %cst_21 {dimension_numbers = #tpu.dot_dimension_numbers<[1], [0], [0], [1], [0, 0, 1, 1], [], []>} : vector<3x192xbf16>, vector<192x384xbf16>, vector<3x384xf32> -> vector<3x384xf32>
    %27 = arith.addf %19, %26 : vector<3x384xf32>
    %c1_i32 = arith.constant 1 : i32
    %28 = arith.addi %arg1, %c1_i32 : i32
    %c0_22 = arith.constant 0 : index
    %29 = arith.index_cast %28 : i32 to index
    %c0_23 = arith.constant 0 : index
    %c0_24 = arith.constant 0 : index
    %30 = vector.load %arg2[%c0_22, %29, %c0_23, %c0_24] : memref<1x5x5x192xbf16, #tpu.memory_space<vmem>>, vector<1x1x3x192xbf16>
    %31 = vector.shape_cast %30 : vector<1x1x3x192xbf16> to vector<3x192xbf16>
    %c3 = arith.constant 3 : index
    %c0_25 = arith.constant 0 : index
    %c0_26 = arith.constant 0 : index
    %32 = vector.load %arg3[%c3, %c0_25, %c0_26] : memref<9x192x384xbf16, #tpu.memory_space<vmem>>, vector<1x192x384xbf16>
    %33 = vector.shape_cast %32 : vector<1x192x384xbf16> to vector<192x384xbf16>
    %cst_27 = arith.constant dense<0.000000e+00> : vector<3x384xf32>
    %34 = tpu.matmul %31, %33, %cst_27 {dimension_numbers = #tpu.dot_dimension_numbers<[1], [0], [0], [1], [0, 0, 1, 1], [], []>} : vector<3x192xbf16>, vector<192x384xbf16>, vector<3x384xf32> -> vector<3x384xf32>
    %35 = arith.addf %27, %34 : vector<3x384xf32>
    %c1_i32_28 = arith.constant 1 : i32
    %36 = arith.addi %arg1, %c1_i32_28 : i32
    %c0_29 = arith.constant 0 : index
    %37 = arith.index_cast %36 : i32 to index
    %c1_30 = arith.constant 1 : index
    %c0_31 = arith.constant 0 : index
    %38 = vector.load %arg2[%c0_29, %37, %c1_30, %c0_31] : memref<1x5x5x192xbf16, #tpu.memory_space<vmem>>, vector<1x1x3x192xbf16>
    %39 = vector.shape_cast %38 : vector<1x1x3x192xbf16> to vector<3x192xbf16>
    %c4 = arith.constant 4 : index
    %c0_32 = arith.constant 0 : index
    %c0_33 = arith.constant 0 : index
    %40 = vector.load %arg3[%c4, %c0_32, %c0_33] : memref<9x192x384xbf16, #tpu.memory_space<vmem>>, vector<1x192x384xbf16>
    %41 = vector.shape_cast %40 : vector<1x192x384xbf16> to vector<192x384xbf16>
    %cst_34 = arith.constant dense<0.000000e+00> : vector<3x384xf32>
    %42 = tpu.matmul %39, %41, %cst_34 {dimension_numbers = #tpu.dot_dimension_numbers<[1], [0], [0], [1], [0, 0, 1, 1], [], []>} : vector<3x192xbf16>, vector<192x384xbf16>, vector<3x384xf32> -> vector<3x384xf32>
    %43 = arith.addf %35, %42 : vector<3x384xf32>
    %c1_i32_35 = arith.constant 1 : i32
    %44 = arith.addi %arg1, %c1_i32_35 : i32
    %c0_36 = arith.constant 0 : index
    %45 = arith.index_cast %44 : i32 to index
    %c2_37 = arith.constant 2 : index
    %c0_38 = arith.constant 0 : index
    %46 = vector.load %arg2[%c0_36, %45, %c2_37, %c0_38] : memref<1x5x5x192xbf16, #tpu.memory_space<vmem>>, vector<1x1x3x192xbf16>
    %47 = vector.shape_cast %46 : vector<1x1x3x192xbf16> to vector<3x192xbf16>
    %c5 = arith.constant 5 : index
    %c0_39 = arith.constant 0 : index
    %c0_40 = arith.constant 0 : index
    %48 = vector.load %arg3[%c5, %c0_39, %c0_40] : memref<9x192x384xbf16, #tpu.memory_space<vmem>>, vector<1x192x384xbf16>
    %49 = vector.shape_cast %48 : vector<1x192x384xbf16> to vector<192x384xbf16>
    %cst_41 = arith.constant dense<0.000000e+00> : vector<3x384xf32>
    %50 = tpu.matmul %47, %49, %cst_41 {dimension_numbers = #tpu.dot_dimension_numbers<[1], [0], [0], [1], [0, 0, 1, 1], [], []>} : vector<3x192xbf16>, vector<192x384xbf16>, vector<3x384xf32> -> vector<3x384xf32>
    %51 = arith.addf %43, %50 : vector<3x384xf32>
    %c2_i32 = arith.constant 2 : i32
    %52 = arith.addi %arg1, %c2_i32 : i32
    %c0_42 = arith.constant 0 : index
    %53 = arith.index_cast %52 : i32 to index
    %c0_43 = arith.constant 0 : index
    %c0_44 = arith.constant 0 : index
    %54 = vector.load %arg2[%c0_42, %53, %c0_43, %c0_44] : memref<1x5x5x192xbf16, #tpu.memory_space<vmem>>, vector<1x1x3x192xbf16>
    %55 = vector.shape_cast %54 : vector<1x1x3x192xbf16> to vector<3x192xbf16>
    %c6 = arith.constant 6 : index
    %c0_45 = arith.constant 0 : index
    %c0_46 = arith.constant 0 : index
    %56 = vector.load %arg3[%c6, %c0_45, %c0_46] : memref<9x192x384xbf16, #tpu.memory_space<vmem>>, vector<1x192x384xbf16>
    %57 = vector.shape_cast %56 : vector<1x192x384xbf16> to vector<192x384xbf16>
    %cst_47 = arith.constant dense<0.000000e+00> : vector<3x384xf32>
    %58 = tpu.matmul %55, %57, %cst_47 {dimension_numbers = #tpu.dot_dimension_numbers<[1], [0], [0], [1], [0, 0, 1, 1], [], []>} : vector<3x192xbf16>, vector<192x384xbf16>, vector<3x384xf32> -> vector<3x384xf32>
    %59 = arith.addf %51, %58 : vector<3x384xf32>
    %c2_i32_48 = arith.constant 2 : i32
    %60 = arith.addi %arg1, %c2_i32_48 : i32
    %c0_49 = arith.constant 0 : index
    %61 = arith.index_cast %60 : i32 to index
    %c1_50 = arith.constant 1 : index
    %c0_51 = arith.constant 0 : index
    %62 = vector.load %arg2[%c0_49, %61, %c1_50, %c0_51] : memref<1x5x5x192xbf16, #tpu.memory_space<vmem>>, vector<1x1x3x192xbf16>
    %63 = vector.shape_cast %62 : vector<1x1x3x192xbf16> to vector<3x192xbf16>
    %c7 = arith.constant 7 : index
    %c0_52 = arith.constant 0 : index
    %c0_53 = arith.constant 0 : index
    %64 = vector.load %arg3[%c7, %c0_52, %c0_53] : memref<9x192x384xbf16, #tpu.memory_space<vmem>>, vector<1x192x384xbf16>
    %65 = vector.shape_cast %64 : vector<1x192x384xbf16> to vector<192x384xbf16>
    %cst_54 = arith.constant dense<0.000000e+00> : vector<3x384xf32>
    %66 = tpu.matmul %63, %65, %cst_54 {dimension_numbers = #tpu.dot_dimension_numbers<[1], [0], [0], [1], [0, 0, 1, 1], [], []>} : vector<3x192xbf16>, vector<192x384xbf16>, vector<3x384xf32> -> vector<3x384xf32>
    %67 = arith.addf %59, %66 : vector<3x384xf32>
    %c2_i32_55 = arith.constant 2 : i32
    %68 = arith.addi %arg1, %c2_i32_55 : i32
    %c0_56 = arith.constant 0 : index
    %69 = arith.index_cast %68 : i32 to index
    %c2_57 = arith.constant 2 : index
    %c0_58 = arith.constant 0 : index
    %70 = vector.load %arg2[%c0_56, %69, %c2_57, %c0_58] : memref<1x5x5x192xbf16, #tpu.memory_space<vmem>>, vector<1x1x3x192xbf16>
    %71 = vector.shape_cast %70 : vector<1x1x3x192xbf16> to vector<3x192xbf16>
    %c8 = arith.constant 8 : index
    %c0_59 = arith.constant 0 : index
    %c0_60 = arith.constant 0 : index
    %72 = vector.load %arg3[%c8, %c0_59, %c0_60] : memref<9x192x384xbf16, #tpu.memory_space<vmem>>, vector<1x192x384xbf16>
    %73 = vector.shape_cast %72 : vector<1x192x384xbf16> to vector<192x384xbf16>
    %cst_61 = arith.constant dense<0.000000e+00> : vector<3x384xf32>
    %74 = tpu.matmul %71, %73, %cst_61 {dimension_numbers = #tpu.dot_dimension_numbers<[1], [0], [0], [1], [0, 0, 1, 1], [], []>} : vector<3x192xbf16>, vector<192x384xbf16>, vector<3x384xf32> -> vector<3x384xf32>
    %75 = arith.addf %67, %74 : vector<3x384xf32>
    %cst_62 = arith.constant 0.000000e+00 : f32
    %76 = vector.broadcast %cst_62 : f32 to vector<3x384xf32>
    %77 = arith.maximumf %75, %76 : vector<3x384xf32>
    %78 = arith.truncf %77 : vector<3x384xf32> to vector<3x384xbf16>
    %c0_63 = arith.constant 0 : index
    %c0_64 = arith.constant 0 : index
    %c0_65 = arith.constant 0 : index
    %c0_66 = arith.constant 0 : index
    %79 = vector.load %arg5[%c0_63, %c0_64, %c0_65, %c0_66] : memref<1x1x3x384xbf16, #tpu.memory_space<vmem>>, vector<1x1x3x384xbf16>
    %80 = vector.shape_cast %79 : vector<1x1x3x384xbf16> to vector<3x384xbf16>
    %81 = vector.shape_cast %78 : vector<3x384xbf16> to vector<1x1x3x384xbf16>
    tpu.vector_store %arg5[%c0_63, %c0_64, %c0_65, %c0_66], %81 {strides = array<i32>} : memref<1x1x3x384xbf16, #tpu.memory_space<vmem>>, vector<1x1x3x384xbf16>,
    return
  }
  func.func @transform_0(%arg0: i32, %arg1: i32) -> (i32, i32, i32, i32) {
    %c0_i32 = arith.constant 0 : i32
    %c0_i32_0 = arith.constant 0 : i32
    %c0_i32_1 = arith.constant 0 : i32
    %c0_i32_2 = arith.constant 0 : i32
    return %arg0, %c0_i32, %c0_i32_0, %c0_i32_1 : i32, i32, i32, i32
  }
  func.func @transform_1(%arg0: i32, %arg1: i32) -> (i32, i32, i32) {
    %c0_i32 = arith.constant 0 : i32
    %c0_i32_0 = arith.constant 0 : i32
    %c0_i32_1 = arith.constant 0 : i32
    %c0_i32_2 = arith.constant 0 : i32
    return %c0_i32, %c0_i32_0, %c0_i32_1 : i32, i32, i32
  }
  func.func @transform_2(%arg0: i32, %arg1: i32) -> (i32, i32) {
    %c0_i32 = arith.constant 0 : i32
    %c0_i32_0 = arith.constant 0 : i32
    %c0_i32_1 = arith.constant 0 : i32
    return %c0_i32, %c0_i32_0 : i32, i32
  }
  func.func @transform_3(%arg0: i32, %arg1: i32) -> (i32, i32, i32, i32) {
    %c0_i32 = arith.constant 0 : i32
    %c0_i32_0 = arith.constant 0 : i32
    %c0_i32_1 = arith.constant 0 : i32
    return %arg0, %arg1, %c0_i32, %c0_i32_0 : i32, i32, i32, i32
  }
}

module attributes {stable_mosaic.version = 11 : i64} {
  func.func @_conv_s1_row_kernel(%arg0: i32, %arg1: i32, %arg2: memref<1x5x5x384xbf16, #tpu.memory_space<vmem>>, %arg3: memref<9x384x256xbf16, #tpu.memory_space<vmem>>, %arg4: memref<1x256xf32, #tpu.memory_space<vmem>>, %arg5: memref<1x1x3x256xbf16, #tpu.memory_space<vmem>>) attributes {dimension_semantics = [#tpu.dimension_semantics<parallel>, #tpu.dimension_semantics<arbitrary>], iteration_bounds = array<i64: 2, 3>, scalar_prefetch = 0 : i64, scratch_operands = 0 : i64, tpu.core_type = #tpu.core_type<tc>, window_params = [{transform_indices = @transform_0, window_bounds = array<i64: 1, 5, 5, 384>}, {pipeline_mode = #tpu.pipeline_mode<synchronous>, transform_indices = @transform_1, window_bounds = array<i64: 9, 384, 256>}, {pipeline_mode = #tpu.pipeline_mode<synchronous>, transform_indices = @transform_2, window_bounds = array<i64: 1, 256>}, {transform_indices = @transform_3, window_bounds = array<i64: 1, 1, 3, 256>}]} {
    %cst = arith.constant 0.000000e+00 : f32
    %0 = vector.broadcast %cst : f32 to vector<3x256xf32>
    %c0 = arith.constant 0 : index
    %c0_0 = arith.constant 0 : index
    %1 = vector.load %arg4[%c0, %c0_0] : memref<1x256xf32, #tpu.memory_space<vmem>>, vector<1x256xf32>
    %2 = vector.broadcast %1 : vector<1x256xf32> to vector<3x256xf32>
    %3 = arith.addf %0, %2 : vector<3x256xf32>
    %c0_i32 = arith.constant 0 : i32
    %4 = arith.addi %arg1, %c0_i32 : i32
    %c0_1 = arith.constant 0 : index
    %5 = arith.index_cast %4 : i32 to index
    %c0_2 = arith.constant 0 : index
    %c0_3 = arith.constant 0 : index
    %6 = vector.load %arg2[%c0_1, %5, %c0_2, %c0_3] : memref<1x5x5x384xbf16, #tpu.memory_space<vmem>>, vector<1x1x3x384xbf16>
    %7 = vector.shape_cast %6 : vector<1x1x3x384xbf16> to vector<3x384xbf16>
    %c0_4 = arith.constant 0 : index
    %c0_5 = arith.constant 0 : index
    %c0_6 = arith.constant 0 : index
    %8 = vector.load %arg3[%c0_4, %c0_5, %c0_6] : memref<9x384x256xbf16, #tpu.memory_space<vmem>>, vector<1x384x256xbf16>
    %9 = vector.shape_cast %8 : vector<1x384x256xbf16> to vector<384x256xbf16>
    %cst_7 = arith.constant dense<0.000000e+00> : vector<3x256xf32>
    %10 = tpu.matmul %7, %9, %cst_7 {dimension_numbers = #tpu.dot_dimension_numbers<[1], [0], [0], [1], [0, 0, 1, 1], [], []>} : vector<3x384xbf16>, vector<384x256xbf16>, vector<3x256xf32> -> vector<3x256xf32>
    %11 = arith.addf %3, %10 : vector<3x256xf32>
    %c0_i32_8 = arith.constant 0 : i32
    %12 = arith.addi %arg1, %c0_i32_8 : i32
    %c0_9 = arith.constant 0 : index
    %13 = arith.index_cast %12 : i32 to index
    %c1 = arith.constant 1 : index
    %c0_10 = arith.constant 0 : index
    %14 = vector.load %arg2[%c0_9, %13, %c1, %c0_10] : memref<1x5x5x384xbf16, #tpu.memory_space<vmem>>, vector<1x1x3x384xbf16>
    %15 = vector.shape_cast %14 : vector<1x1x3x384xbf16> to vector<3x384xbf16>
    %c1_11 = arith.constant 1 : index
    %c0_12 = arith.constant 0 : index
    %c0_13 = arith.constant 0 : index
    %16 = vector.load %arg3[%c1_11, %c0_12, %c0_13] : memref<9x384x256xbf16, #tpu.memory_space<vmem>>, vector<1x384x256xbf16>
    %17 = vector.shape_cast %16 : vector<1x384x256xbf16> to vector<384x256xbf16>
    %cst_14 = arith.constant dense<0.000000e+00> : vector<3x256xf32>
    %18 = tpu.matmul %15, %17, %cst_14 {dimension_numbers = #tpu.dot_dimension_numbers<[1], [0], [0], [1], [0, 0, 1, 1], [], []>} : vector<3x384xbf16>, vector<384x256xbf16>, vector<3x256xf32> -> vector<3x256xf32>
    %19 = arith.addf %11, %18 : vector<3x256xf32>
    %c0_i32_15 = arith.constant 0 : i32
    %20 = arith.addi %arg1, %c0_i32_15 : i32
    %c0_16 = arith.constant 0 : index
    %21 = arith.index_cast %20 : i32 to index
    %c2 = arith.constant 2 : index
    %c0_17 = arith.constant 0 : index
    %22 = vector.load %arg2[%c0_16, %21, %c2, %c0_17] : memref<1x5x5x384xbf16, #tpu.memory_space<vmem>>, vector<1x1x3x384xbf16>
    %23 = vector.shape_cast %22 : vector<1x1x3x384xbf16> to vector<3x384xbf16>
    %c2_18 = arith.constant 2 : index
    %c0_19 = arith.constant 0 : index
    %c0_20 = arith.constant 0 : index
    %24 = vector.load %arg3[%c2_18, %c0_19, %c0_20] : memref<9x384x256xbf16, #tpu.memory_space<vmem>>, vector<1x384x256xbf16>
    %25 = vector.shape_cast %24 : vector<1x384x256xbf16> to vector<384x256xbf16>
    %cst_21 = arith.constant dense<0.000000e+00> : vector<3x256xf32>
    %26 = tpu.matmul %23, %25, %cst_21 {dimension_numbers = #tpu.dot_dimension_numbers<[1], [0], [0], [1], [0, 0, 1, 1], [], []>} : vector<3x384xbf16>, vector<384x256xbf16>, vector<3x256xf32> -> vector<3x256xf32>
    %27 = arith.addf %19, %26 : vector<3x256xf32>
    %c1_i32 = arith.constant 1 : i32
    %28 = arith.addi %arg1, %c1_i32 : i32
    %c0_22 = arith.constant 0 : index
    %29 = arith.index_cast %28 : i32 to index
    %c0_23 = arith.constant 0 : index
    %c0_24 = arith.constant 0 : index
    %30 = vector.load %arg2[%c0_22, %29, %c0_23, %c0_24] : memref<1x5x5x384xbf16, #tpu.memory_space<vmem>>, vector<1x1x3x384xbf16>
    %31 = vector.shape_cast %30 : vector<1x1x3x384xbf16> to vector<3x384xbf16>
    %c3 = arith.constant 3 : index
    %c0_25 = arith.constant 0 : index
    %c0_26 = arith.constant 0 : index
    %32 = vector.load %arg3[%c3, %c0_25, %c0_26] : memref<9x384x256xbf16, #tpu.memory_space<vmem>>, vector<1x384x256xbf16>
    %33 = vector.shape_cast %32 : vector<1x384x256xbf16> to vector<384x256xbf16>
    %cst_27 = arith.constant dense<0.000000e+00> : vector<3x256xf32>
    %34 = tpu.matmul %31, %33, %cst_27 {dimension_numbers = #tpu.dot_dimension_numbers<[1], [0], [0], [1], [0, 0, 1, 1], [], []>} : vector<3x384xbf16>, vector<384x256xbf16>, vector<3x256xf32> -> vector<3x256xf32>
    %35 = arith.addf %27, %34 : vector<3x256xf32>
    %c1_i32_28 = arith.constant 1 : i32
    %36 = arith.addi %arg1, %c1_i32_28 : i32
    %c0_29 = arith.constant 0 : index
    %37 = arith.index_cast %36 : i32 to index
    %c1_30 = arith.constant 1 : index
    %c0_31 = arith.constant 0 : index
    %38 = vector.load %arg2[%c0_29, %37, %c1_30, %c0_31] : memref<1x5x5x384xbf16, #tpu.memory_space<vmem>>, vector<1x1x3x384xbf16>
    %39 = vector.shape_cast %38 : vector<1x1x3x384xbf16> to vector<3x384xbf16>
    %c4 = arith.constant 4 : index
    %c0_32 = arith.constant 0 : index
    %c0_33 = arith.constant 0 : index
    %40 = vector.load %arg3[%c4, %c0_32, %c0_33] : memref<9x384x256xbf16, #tpu.memory_space<vmem>>, vector<1x384x256xbf16>
    %41 = vector.shape_cast %40 : vector<1x384x256xbf16> to vector<384x256xbf16>
    %cst_34 = arith.constant dense<0.000000e+00> : vector<3x256xf32>
    %42 = tpu.matmul %39, %41, %cst_34 {dimension_numbers = #tpu.dot_dimension_numbers<[1], [0], [0], [1], [0, 0, 1, 1], [], []>} : vector<3x384xbf16>, vector<384x256xbf16>, vector<3x256xf32> -> vector<3x256xf32>
    %43 = arith.addf %35, %42 : vector<3x256xf32>
    %c1_i32_35 = arith.constant 1 : i32
    %44 = arith.addi %arg1, %c1_i32_35 : i32
    %c0_36 = arith.constant 0 : index
    %45 = arith.index_cast %44 : i32 to index
    %c2_37 = arith.constant 2 : index
    %c0_38 = arith.constant 0 : index
    %46 = vector.load %arg2[%c0_36, %45, %c2_37, %c0_38] : memref<1x5x5x384xbf16, #tpu.memory_space<vmem>>, vector<1x1x3x384xbf16>
    %47 = vector.shape_cast %46 : vector<1x1x3x384xbf16> to vector<3x384xbf16>
    %c5 = arith.constant 5 : index
    %c0_39 = arith.constant 0 : index
    %c0_40 = arith.constant 0 : index
    %48 = vector.load %arg3[%c5, %c0_39, %c0_40] : memref<9x384x256xbf16, #tpu.memory_space<vmem>>, vector<1x384x256xbf16>
    %49 = vector.shape_cast %48 : vector<1x384x256xbf16> to vector<384x256xbf16>
    %cst_41 = arith.constant dense<0.000000e+00> : vector<3x256xf32>
    %50 = tpu.matmul %47, %49, %cst_41 {dimension_numbers = #tpu.dot_dimension_numbers<[1], [0], [0], [1], [0, 0, 1, 1], [], []>} : vector<3x384xbf16>, vector<384x256xbf16>, vector<3x256xf32> -> vector<3x256xf32>
    %51 = arith.addf %43, %50 : vector<3x256xf32>
    %c2_i32 = arith.constant 2 : i32
    %52 = arith.addi %arg1, %c2_i32 : i32
    %c0_42 = arith.constant 0 : index
    %53 = arith.index_cast %52 : i32 to index
    %c0_43 = arith.constant 0 : index
    %c0_44 = arith.constant 0 : index
    %54 = vector.load %arg2[%c0_42, %53, %c0_43, %c0_44] : memref<1x5x5x384xbf16, #tpu.memory_space<vmem>>, vector<1x1x3x384xbf16>
    %55 = vector.shape_cast %54 : vector<1x1x3x384xbf16> to vector<3x384xbf16>
    %c6 = arith.constant 6 : index
    %c0_45 = arith.constant 0 : index
    %c0_46 = arith.constant 0 : index
    %56 = vector.load %arg3[%c6, %c0_45, %c0_46] : memref<9x384x256xbf16, #tpu.memory_space<vmem>>, vector<1x384x256xbf16>
    %57 = vector.shape_cast %56 : vector<1x384x256xbf16> to vector<384x256xbf16>
    %cst_47 = arith.constant dense<0.000000e+00> : vector<3x256xf32>
    %58 = tpu.matmul %55, %57, %cst_47 {dimension_numbers = #tpu.dot_dimension_numbers<[1], [0], [0], [1], [0, 0, 1, 1], [], []>} : vector<3x384xbf16>, vector<384x256xbf16>, vector<3x256xf32> -> vector<3x256xf32>
    %59 = arith.addf %51, %58 : vector<3x256xf32>
    %c2_i32_48 = arith.constant 2 : i32
    %60 = arith.addi %arg1, %c2_i32_48 : i32
    %c0_49 = arith.constant 0 : index
    %61 = arith.index_cast %60 : i32 to index
    %c1_50 = arith.constant 1 : index
    %c0_51 = arith.constant 0 : index
    %62 = vector.load %arg2[%c0_49, %61, %c1_50, %c0_51] : memref<1x5x5x384xbf16, #tpu.memory_space<vmem>>, vector<1x1x3x384xbf16>
    %63 = vector.shape_cast %62 : vector<1x1x3x384xbf16> to vector<3x384xbf16>
    %c7 = arith.constant 7 : index
    %c0_52 = arith.constant 0 : index
    %c0_53 = arith.constant 0 : index
    %64 = vector.load %arg3[%c7, %c0_52, %c0_53] : memref<9x384x256xbf16, #tpu.memory_space<vmem>>, vector<1x384x256xbf16>
    %65 = vector.shape_cast %64 : vector<1x384x256xbf16> to vector<384x256xbf16>
    %cst_54 = arith.constant dense<0.000000e+00> : vector<3x256xf32>
    %66 = tpu.matmul %63, %65, %cst_54 {dimension_numbers = #tpu.dot_dimension_numbers<[1], [0], [0], [1], [0, 0, 1, 1], [], []>} : vector<3x384xbf16>, vector<384x256xbf16>, vector<3x256xf32> -> vector<3x256xf32>
    %67 = arith.addf %59, %66 : vector<3x256xf32>
    %c2_i32_55 = arith.constant 2 : i32
    %68 = arith.addi %arg1, %c2_i32_55 : i32
    %c0_56 = arith.constant 0 : index
    %69 = arith.index_cast %68 : i32 to index
    %c2_57 = arith.constant 2 : index
    %c0_58 = arith.constant 0 : index
    %70 = vector.load %arg2[%c0_56, %69, %c2_57, %c0_58] : memref<1x5x5x384xbf16, #tpu.memory_space<vmem>>, vector<1x1x3x384xbf16>
    %71 = vector.shape_cast %70 : vector<1x1x3x384xbf16> to vector<3x384xbf16>
    %c8 = arith.constant 8 : index
    %c0_59 = arith.constant 0 : index
    %c0_60 = arith.constant 0 : index
    %72 = vector.load %arg3[%c8, %c0_59, %c0_60] : memref<9x384x256xbf16, #tpu.memory_space<vmem>>, vector<1x384x256xbf16>
    %73 = vector.shape_cast %72 : vector<1x384x256xbf16> to vector<384x256xbf16>
    %cst_61 = arith.constant dense<0.000000e+00> : vector<3x256xf32>
    %74 = tpu.matmul %71, %73, %cst_61 {dimension_numbers = #tpu.dot_dimension_numbers<[1], [0], [0], [1], [0, 0, 1, 1], [], []>} : vector<3x384xbf16>, vector<384x256xbf16>, vector<3x256xf32> -> vector<3x256xf32>
    %75 = arith.addf %67, %74 : vector<3x256xf32>
    %cst_62 = arith.constant 0.000000e+00 : f32
    %76 = vector.broadcast %cst_62 : f32 to vector<3x256xf32>
    %77 = arith.maximumf %75, %76 : vector<3x256xf32>
    %78 = arith.truncf %77 : vector<3x256xf32> to vector<3x256xbf16>
    %c0_63 = arith.constant 0 : index
    %c0_64 = arith.constant 0 : index
    %c0_65 = arith.constant 0 : index
    %c0_66 = arith.constant 0 : index
    %79 = vector.load %arg5[%c0_63, %c0_64, %c0_65, %c0_66] : memref<1x1x3x256xbf16, #tpu.memory_space<vmem>>, vector<1x1x3x256xbf16>
    %80 = vector.shape_cast %79 : vector<1x1x3x256xbf16> to vector<3x256xbf16>
    %81 = vector.shape_cast %78 : vector<3x256xbf16> to vector<1x1x3x256xbf16>
    tpu.vector_store %arg5[%c0_63, %c0_64, %c0_65, %c0_66], %81 {strides = array<i32>} : memref<1x1x3x256xbf16, #tpu.memory_space<vmem>>, vector<1x1x3x256xbf16>,
    return
  }
  func.func @transform_0(%arg0: i32, %arg1: i32) -> (i32, i32, i32, i32) {
    %c0_i32 = arith.constant 0 : i32
    %c0_i32_0 = arith.constant 0 : i32
    %c0_i32_1 = arith.constant 0 : i32
    %c0_i32_2 = arith.constant 0 : i32
    return %arg0, %c0_i32, %c0_i32_0, %c0_i32_1 : i32, i32, i32, i32
  }
  func.func @transform_1(%arg0: i32, %arg1: i32) -> (i32, i32, i32) {
    %c0_i32 = arith.constant 0 : i32
    %c0_i32_0 = arith.constant 0 : i32
    %c0_i32_1 = arith.constant 0 : i32
    %c0_i32_2 = arith.constant 0 : i32
    return %c0_i32, %c0_i32_0, %c0_i32_1 : i32, i32, i32
  }
  func.func @transform_2(%arg0: i32, %arg1: i32) -> (i32, i32) {
    %c0_i32 = arith.constant 0 : i32
    %c0_i32_0 = arith.constant 0 : i32
    %c0_i32_1 = arith.constant 0 : i32
    return %c0_i32, %c0_i32_0 : i32, i32
  }
  func.func @transform_3(%arg0: i32, %arg1: i32) -> (i32, i32, i32, i32) {
    %c0_i32 = arith.constant 0 : i32
    %c0_i32_0 = arith.constant 0 : i32
    %c0_i32_1 = arith.constant 0 : i32
    return %arg0, %arg1, %c0_i32, %c0_i32_0 : i32, i32, i32, i32
  }
}

module attributes {stable_mosaic.version = 11 : i64} {
  func.func @_conv_s1_row_kernel(%arg0: i32, %arg1: i32, %arg2: memref<1x5x5x256xbf16, #tpu.memory_space<vmem>>, %arg3: memref<9x256x256xbf16, #tpu.memory_space<vmem>>, %arg4: memref<1x256xf32, #tpu.memory_space<vmem>>, %arg5: memref<1x1x3x256xf32, #tpu.memory_space<vmem>>) attributes {dimension_semantics = [#tpu.dimension_semantics<parallel>, #tpu.dimension_semantics<arbitrary>], iteration_bounds = array<i64: 2, 3>, scalar_prefetch = 0 : i64, scratch_operands = 0 : i64, tpu.core_type = #tpu.core_type<tc>, window_params = [{transform_indices = @transform_0, window_bounds = array<i64: 1, 5, 5, 256>}, {pipeline_mode = #tpu.pipeline_mode<synchronous>, transform_indices = @transform_1, window_bounds = array<i64: 9, 256, 256>}, {pipeline_mode = #tpu.pipeline_mode<synchronous>, transform_indices = @transform_2, window_bounds = array<i64: 1, 256>}, {transform_indices = @transform_3, window_bounds = array<i64: 1, 1, 3, 256>}]} {
    %cst = arith.constant 0.000000e+00 : f32
    %0 = vector.broadcast %cst : f32 to vector<3x256xf32>
    %c0 = arith.constant 0 : index
    %c0_0 = arith.constant 0 : index
    %1 = vector.load %arg4[%c0, %c0_0] : memref<1x256xf32, #tpu.memory_space<vmem>>, vector<1x256xf32>
    %2 = vector.broadcast %1 : vector<1x256xf32> to vector<3x256xf32>
    %3 = arith.addf %0, %2 : vector<3x256xf32>
    %c0_i32 = arith.constant 0 : i32
    %4 = arith.addi %arg1, %c0_i32 : i32
    %c0_1 = arith.constant 0 : index
    %5 = arith.index_cast %4 : i32 to index
    %c0_2 = arith.constant 0 : index
    %c0_3 = arith.constant 0 : index
    %6 = vector.load %arg2[%c0_1, %5, %c0_2, %c0_3] : memref<1x5x5x256xbf16, #tpu.memory_space<vmem>>, vector<1x1x3x256xbf16>
    %7 = vector.shape_cast %6 : vector<1x1x3x256xbf16> to vector<3x256xbf16>
    %c0_4 = arith.constant 0 : index
    %c0_5 = arith.constant 0 : index
    %c0_6 = arith.constant 0 : index
    %8 = vector.load %arg3[%c0_4, %c0_5, %c0_6] : memref<9x256x256xbf16, #tpu.memory_space<vmem>>, vector<1x256x256xbf16>
    %9 = vector.shape_cast %8 : vector<1x256x256xbf16> to vector<256x256xbf16>
    %cst_7 = arith.constant dense<0.000000e+00> : vector<3x256xf32>
    %10 = tpu.matmul %7, %9, %cst_7 {dimension_numbers = #tpu.dot_dimension_numbers<[1], [0], [0], [1], [0, 0, 1, 1], [], []>} : vector<3x256xbf16>, vector<256x256xbf16>, vector<3x256xf32> -> vector<3x256xf32>
    %11 = arith.addf %3, %10 : vector<3x256xf32>
    %c0_i32_8 = arith.constant 0 : i32
    %12 = arith.addi %arg1, %c0_i32_8 : i32
    %c0_9 = arith.constant 0 : index
    %13 = arith.index_cast %12 : i32 to index
    %c1 = arith.constant 1 : index
    %c0_10 = arith.constant 0 : index
    %14 = vector.load %arg2[%c0_9, %13, %c1, %c0_10] : memref<1x5x5x256xbf16, #tpu.memory_space<vmem>>, vector<1x1x3x256xbf16>
    %15 = vector.shape_cast %14 : vector<1x1x3x256xbf16> to vector<3x256xbf16>
    %c1_11 = arith.constant 1 : index
    %c0_12 = arith.constant 0 : index
    %c0_13 = arith.constant 0 : index
    %16 = vector.load %arg3[%c1_11, %c0_12, %c0_13] : memref<9x256x256xbf16, #tpu.memory_space<vmem>>, vector<1x256x256xbf16>
    %17 = vector.shape_cast %16 : vector<1x256x256xbf16> to vector<256x256xbf16>
    %cst_14 = arith.constant dense<0.000000e+00> : vector<3x256xf32>
    %18 = tpu.matmul %15, %17, %cst_14 {dimension_numbers = #tpu.dot_dimension_numbers<[1], [0], [0], [1], [0, 0, 1, 1], [], []>} : vector<3x256xbf16>, vector<256x256xbf16>, vector<3x256xf32> -> vector<3x256xf32>
    %19 = arith.addf %11, %18 : vector<3x256xf32>
    %c0_i32_15 = arith.constant 0 : i32
    %20 = arith.addi %arg1, %c0_i32_15 : i32
    %c0_16 = arith.constant 0 : index
    %21 = arith.index_cast %20 : i32 to index
    %c2 = arith.constant 2 : index
    %c0_17 = arith.constant 0 : index
    %22 = vector.load %arg2[%c0_16, %21, %c2, %c0_17] : memref<1x5x5x256xbf16, #tpu.memory_space<vmem>>, vector<1x1x3x256xbf16>
    %23 = vector.shape_cast %22 : vector<1x1x3x256xbf16> to vector<3x256xbf16>
    %c2_18 = arith.constant 2 : index
    %c0_19 = arith.constant 0 : index
    %c0_20 = arith.constant 0 : index
    %24 = vector.load %arg3[%c2_18, %c0_19, %c0_20] : memref<9x256x256xbf16, #tpu.memory_space<vmem>>, vector<1x256x256xbf16>
    %25 = vector.shape_cast %24 : vector<1x256x256xbf16> to vector<256x256xbf16>
    %cst_21 = arith.constant dense<0.000000e+00> : vector<3x256xf32>
    %26 = tpu.matmul %23, %25, %cst_21 {dimension_numbers = #tpu.dot_dimension_numbers<[1], [0], [0], [1], [0, 0, 1, 1], [], []>} : vector<3x256xbf16>, vector<256x256xbf16>, vector<3x256xf32> -> vector<3x256xf32>
    %27 = arith.addf %19, %26 : vector<3x256xf32>
    %c1_i32 = arith.constant 1 : i32
    %28 = arith.addi %arg1, %c1_i32 : i32
    %c0_22 = arith.constant 0 : index
    %29 = arith.index_cast %28 : i32 to index
    %c0_23 = arith.constant 0 : index
    %c0_24 = arith.constant 0 : index
    %30 = vector.load %arg2[%c0_22, %29, %c0_23, %c0_24] : memref<1x5x5x256xbf16, #tpu.memory_space<vmem>>, vector<1x1x3x256xbf16>
    %31 = vector.shape_cast %30 : vector<1x1x3x256xbf16> to vector<3x256xbf16>
    %c3 = arith.constant 3 : index
    %c0_25 = arith.constant 0 : index
    %c0_26 = arith.constant 0 : index
    %32 = vector.load %arg3[%c3, %c0_25, %c0_26] : memref<9x256x256xbf16, #tpu.memory_space<vmem>>, vector<1x256x256xbf16>
    %33 = vector.shape_cast %32 : vector<1x256x256xbf16> to vector<256x256xbf16>
    %cst_27 = arith.constant dense<0.000000e+00> : vector<3x256xf32>
    %34 = tpu.matmul %31, %33, %cst_27 {dimension_numbers = #tpu.dot_dimension_numbers<[1], [0], [0], [1], [0, 0, 1, 1], [], []>} : vector<3x256xbf16>, vector<256x256xbf16>, vector<3x256xf32> -> vector<3x256xf32>
    %35 = arith.addf %27, %34 : vector<3x256xf32>
    %c1_i32_28 = arith.constant 1 : i32
    %36 = arith.addi %arg1, %c1_i32_28 : i32
    %c0_29 = arith.constant 0 : index
    %37 = arith.index_cast %36 : i32 to index
    %c1_30 = arith.constant 1 : index
    %c0_31 = arith.constant 0 : index
    %38 = vector.load %arg2[%c0_29, %37, %c1_30, %c0_31] : memref<1x5x5x256xbf16, #tpu.memory_space<vmem>>, vector<1x1x3x256xbf16>
    %39 = vector.shape_cast %38 : vector<1x1x3x256xbf16> to vector<3x256xbf16>
    %c4 = arith.constant 4 : index
    %c0_32 = arith.constant 0 : index
    %c0_33 = arith.constant 0 : index
    %40 = vector.load %arg3[%c4, %c0_32, %c0_33] : memref<9x256x256xbf16, #tpu.memory_space<vmem>>, vector<1x256x256xbf16>
    %41 = vector.shape_cast %40 : vector<1x256x256xbf16> to vector<256x256xbf16>
    %cst_34 = arith.constant dense<0.000000e+00> : vector<3x256xf32>
    %42 = tpu.matmul %39, %41, %cst_34 {dimension_numbers = #tpu.dot_dimension_numbers<[1], [0], [0], [1], [0, 0, 1, 1], [], []>} : vector<3x256xbf16>, vector<256x256xbf16>, vector<3x256xf32> -> vector<3x256xf32>
    %43 = arith.addf %35, %42 : vector<3x256xf32>
    %c1_i32_35 = arith.constant 1 : i32
    %44 = arith.addi %arg1, %c1_i32_35 : i32
    %c0_36 = arith.constant 0 : index
    %45 = arith.index_cast %44 : i32 to index
    %c2_37 = arith.constant 2 : index
    %c0_38 = arith.constant 0 : index
    %46 = vector.load %arg2[%c0_36, %45, %c2_37, %c0_38] : memref<1x5x5x256xbf16, #tpu.memory_space<vmem>>, vector<1x1x3x256xbf16>
    %47 = vector.shape_cast %46 : vector<1x1x3x256xbf16> to vector<3x256xbf16>
    %c5 = arith.constant 5 : index
    %c0_39 = arith.constant 0 : index
    %c0_40 = arith.constant 0 : index
    %48 = vector.load %arg3[%c5, %c0_39, %c0_40] : memref<9x256x256xbf16, #tpu.memory_space<vmem>>, vector<1x256x256xbf16>
    %49 = vector.shape_cast %48 : vector<1x256x256xbf16> to vector<256x256xbf16>
    %cst_41 = arith.constant dense<0.000000e+00> : vector<3x256xf32>
    %50 = tpu.matmul %47, %49, %cst_41 {dimension_numbers = #tpu.dot_dimension_numbers<[1], [0], [0], [1], [0, 0, 1, 1], [], []>} : vector<3x256xbf16>, vector<256x256xbf16>, vector<3x256xf32> -> vector<3x256xf32>
    %51 = arith.addf %43, %50 : vector<3x256xf32>
    %c2_i32 = arith.constant 2 : i32
    %52 = arith.addi %arg1, %c2_i32 : i32
    %c0_42 = arith.constant 0 : index
    %53 = arith.index_cast %52 : i32 to index
    %c0_43 = arith.constant 0 : index
    %c0_44 = arith.constant 0 : index
    %54 = vector.load %arg2[%c0_42, %53, %c0_43, %c0_44] : memref<1x5x5x256xbf16, #tpu.memory_space<vmem>>, vector<1x1x3x256xbf16>
    %55 = vector.shape_cast %54 : vector<1x1x3x256xbf16> to vector<3x256xbf16>
    %c6 = arith.constant 6 : index
    %c0_45 = arith.constant 0 : index
    %c0_46 = arith.constant 0 : index
    %56 = vector.load %arg3[%c6, %c0_45, %c0_46] : memref<9x256x256xbf16, #tpu.memory_space<vmem>>, vector<1x256x256xbf16>
    %57 = vector.shape_cast %56 : vector<1x256x256xbf16> to vector<256x256xbf16>
    %cst_47 = arith.constant dense<0.000000e+00> : vector<3x256xf32>
    %58 = tpu.matmul %55, %57, %cst_47 {dimension_numbers = #tpu.dot_dimension_numbers<[1], [0], [0], [1], [0, 0, 1, 1], [], []>} : vector<3x256xbf16>, vector<256x256xbf16>, vector<3x256xf32> -> vector<3x256xf32>
    %59 = arith.addf %51, %58 : vector<3x256xf32>
    %c2_i32_48 = arith.constant 2 : i32
    %60 = arith.addi %arg1, %c2_i32_48 : i32
    %c0_49 = arith.constant 0 : index
    %61 = arith.index_cast %60 : i32 to index
    %c1_50 = arith.constant 1 : index
    %c0_51 = arith.constant 0 : index
    %62 = vector.load %arg2[%c0_49, %61, %c1_50, %c0_51] : memref<1x5x5x256xbf16, #tpu.memory_space<vmem>>, vector<1x1x3x256xbf16>
    %63 = vector.shape_cast %62 : vector<1x1x3x256xbf16> to vector<3x256xbf16>
    %c7 = arith.constant 7 : index
    %c0_52 = arith.constant 0 : index
    %c0_53 = arith.constant 0 : index
    %64 = vector.load %arg3[%c7, %c0_52, %c0_53] : memref<9x256x256xbf16, #tpu.memory_space<vmem>>, vector<1x256x256xbf16>
    %65 = vector.shape_cast %64 : vector<1x256x256xbf16> to vector<256x256xbf16>
    %cst_54 = arith.constant dense<0.000000e+00> : vector<3x256xf32>
    %66 = tpu.matmul %63, %65, %cst_54 {dimension_numbers = #tpu.dot_dimension_numbers<[1], [0], [0], [1], [0, 0, 1, 1], [], []>} : vector<3x256xbf16>, vector<256x256xbf16>, vector<3x256xf32> -> vector<3x256xf32>
    %67 = arith.addf %59, %66 : vector<3x256xf32>
    %c2_i32_55 = arith.constant 2 : i32
    %68 = arith.addi %arg1, %c2_i32_55 : i32
    %c0_56 = arith.constant 0 : index
    %69 = arith.index_cast %68 : i32 to index
    %c2_57 = arith.constant 2 : index
    %c0_58 = arith.constant 0 : index
    %70 = vector.load %arg2[%c0_56, %69, %c2_57, %c0_58] : memref<1x5x5x256xbf16, #tpu.memory_space<vmem>>, vector<1x1x3x256xbf16>
    %71 = vector.shape_cast %70 : vector<1x1x3x256xbf16> to vector<3x256xbf16>
    %c8 = arith.constant 8 : index
    %c0_59 = arith.constant 0 : index
    %c0_60 = arith.constant 0 : index
    %72 = vector.load %arg3[%c8, %c0_59, %c0_60] : memref<9x256x256xbf16, #tpu.memory_space<vmem>>, vector<1x256x256xbf16>
    %73 = vector.shape_cast %72 : vector<1x256x256xbf16> to vector<256x256xbf16>
    %cst_61 = arith.constant dense<0.000000e+00> : vector<3x256xf32>
    %74 = tpu.matmul %71, %73, %cst_61 {dimension_numbers = #tpu.dot_dimension_numbers<[1], [0], [0], [1], [0, 0, 1, 1], [], []>} : vector<3x256xbf16>, vector<256x256xbf16>, vector<3x256xf32> -> vector<3x256xf32>
    %75 = arith.addf %67, %74 : vector<3x256xf32>
    %c0_62 = arith.constant 0 : index
    %c0_63 = arith.constant 0 : index
    %c0_64 = arith.constant 0 : index
    %c0_65 = arith.constant 0 : index
    %76 = vector.load %arg5[%c0_62, %c0_63, %c0_64, %c0_65] : memref<1x1x3x256xf32, #tpu.memory_space<vmem>>, vector<1x1x3x256xf32>
    %77 = vector.shape_cast %76 : vector<1x1x3x256xf32> to vector<3x256xf32>
    %78 = vector.shape_cast %75 : vector<3x256xf32> to vector<1x1x3x256xf32>
    tpu.vector_store %arg5[%c0_62, %c0_63, %c0_64, %c0_65], %78 {strides = array<i32>} : memref<1x1x3x256xf32, #tpu.memory_space<vmem>>, vector<1x1x3x256xf32>,
    return
  }
  func.func @transform_0(%arg0: i32, %arg1: i32) -> (i32, i32, i32, i32) {
    %c0_i32 = arith.constant 0 : i32
    %c0_i32_0 = arith.constant 0 : i32
    %c0_i32_1 = arith.constant 0 : i32
    %c0_i32_2 = arith.constant 0 : i32
    return %arg0, %c0_i32, %c0_i32_0, %c0_i32_1 : i32, i32, i32, i32
  }
  func.func @transform_1(%arg0: i32, %arg1: i32) -> (i32, i32, i32) {
    %c0_i32 = arith.constant 0 : i32
    %c0_i32_0 = arith.constant 0 : i32
    %c0_i32_1 = arith.constant 0 : i32
    %c0_i32_2 = arith.constant 0 : i32
    return %c0_i32, %c0_i32_0, %c0_i32_1 : i32, i32, i32
  }
  func.func @transform_2(%arg0: i32, %arg1: i32) -> (i32, i32) {
    %c0_i32 = arith.constant 0 : i32
    %c0_i32_0 = arith.constant 0 : i32
    %c0_i32_1 = arith.constant 0 : i32
    return %c0_i32, %c0_i32_0 : i32, i32
  }
  func.func @transform_3(%arg0: i32, %arg1: i32) -> (i32, i32, i32, i32) {
    %c0_i32 = arith.constant 0 : i32
    %c0_i32_0 = arith.constant 0 : i32
    %c0_i32_1 = arith.constant 0 : i32
    return %arg0, %arg1, %c0_i32, %c0_i32_0 : i32, i32, i32, i32
  }
}

</mosaic_0001>

<bundles_post_ra>
// kernel: alexnet_fe_forward.7
= control target key start
LH: loop header
LB: loop body
LE: loop exit
PB: predicated region body
PF: predicated region fallthrough
CT: control target
= control target key end

     0   :  { %s1227_s12 = smov 0   ;;  %s1377_s0 = inlined_call_operand.vmem [shape: bf16[512,384], index: 0, kind: input, shape index: {}]   ;;  %s1378_s1 = inlined_call_operand.vmem [shape: bf16[384,128], index: 1, kind: input, shape index: {}]   ;;  %s1379_s2 = inlined_call_operand.vmem [shape: f32[1,128], index: 2, kind: input, shape index: {}]   ;;  %s1380_s3 = inlined_call_operand.vmem [shape: bf16[512,128], index: 3, kind: output, shape index: {}]  }
   0x1 LB: > { %s883_s13 = sadd.s32 4294967295, %s1205_s12   ;;  %p887_p0 = scmp.ge.s32.totalorder %s1205_s12, 1  ;;  %s1205_s12 = sphi %s1227_s12, %s13_s12  }
   0x2   : > { %p139_p1 = scmp.lt.s32.totalorder %s1205_s12, 5 }
   0x4   : > { %p140_p2 = pnand %p887_p0, %p139_p1 }
   0x5   : > { %s888_s28 = sshll.u32 (!%p140_p2), %s883_s13, 4 }
   0x6   : > { %143 = sbr.rel (%p140_p2) target bundleno = 310 (0x136), region = 32  ;;  %p165_p3 = scmp.lt.s32.totalorder (!%p140_p2), %s888_s28, 63 }
   0xb   : > { %v1143_v0 = vld [vmem:[%s1378_s1 + $0x78] sm:$0xff]   ;;  %v1145_v2 = vld [vmem:[%s1378_s1 + $0x70] sm:$0xff]   ;;  %v1148_v5 = vld [vmem:[%s1378_s1 + $0x68] sm:$0xff]   ;;  %s1382_s28 = smov (!%p165_p3, %s888_s28), 63 }
   0xc   : > { %v1144_v1 = vld [vmem:[%s1378_s1 + $0x38] sm:$0xff]   ;;  %1022 = vmatprep.subr.bf16.mxu0 %v1143_v0  ;;  %v1147_v4 = vld [vmem:[%s1378_s1 + $0x30] sm:$0xff]   ;;  %v1150_v7 = vld [vmem:[%s1378_s1 + $0x28] sm:$0xff]   ;;  %s1134_s21 = smul.u32 12, %s1382_s28  ;;  %s891_s18 = sshll.u32 %s1382_s28, 2 }
   0xd   : > { %1023 = vmatpush3.bf16.msra.mxu0 %v1144_v1  ;;  %v1146_v3 = vld [vmem:[%s1378_s1 + $0xb8] sm:$0xff]   ;;  %v1149_v6 = vld [vmem:[%s1378_s1 + $0xb0] sm:$0xff]   ;;  %v1151_v8 = vld [vmem:[%s1378_s1 + $0x60] sm:$0xff]  }
   0xe   : > { %1024 = vmatprep.subr.bf16.mxu0 %v1145_v2  ;;  %1102 = vmatprep.subr.bf16.mxu1 %v1146_v3  ;;  %v1152_v9 = vld [vmem:[%s1378_s1 + $0xa8] sm:$0xff]   ;;  %v1153_v10 = vld [vmem:[%s1378_s1 + $0x20] sm:$0xff]   ;;  %v1154_v11 = vld [vmem:[%s1378_s1 + $0x58] sm:$0xff]   ;;  %s1301_s6 = scalar_lea.vmem %s1377_s0, %s1134_s21  ;;  %s1351_s21 = scalar_lea.vmem %s1380_s3, %s891_s18 }
   0xf   : > { %1103 = vmatpush3.bf16.msra.mxu1 %v1146_v3  ;;  %v1155_v12 = vld [vmem:[%s1378_s1 + $0xa0] sm:$0xff]   ;;  %v1156_v13 = vld [vmem:[%s1378_s1 + $0x18] sm:$0xff]   ;;  %v1157_v15 = vld [vmem:[%s1378_s1 + $0x50] sm:$0xff]  }
  0x10   : > { %1104 = vmatprep.subr.bf16.mxu1 %v1149_v6  ;;  %v1158_v14 = vld [vmem:[%s1378_s1 + $0x98] sm:$0xff]   ;;  %v1159_v16 = vld [vmem:[%s1378_s1 + $0x10] sm:$0xff]   ;;  %v1160_v18 = vld [vmem:[%s1378_s1 + $0x48] sm:$0xff]  }
  0x11   : > { %1025 = vmatpush3.bf16.msra.mxu0 %v1147_v4  ;;  %v1161_v17 = vld [vmem:[%s1378_s1 + $0x90] sm:$0xff]   ;;  %v1162_v19 = vld [vmem:[%s1378_s1 + $0x8] sm:$0xff]   ;;  %v1163_v20 = vld [vmem:[%s1378_s1 + $0x40] sm:$0xff]  }
  0x12   : > { %1026 = vmatprep.subr.bf16.mxu0 %v1148_v5  ;;  %v1164_v21 = vld [vmem:[%s1378_s1 + $0x88] sm:$0xff]   ;;  %v1168_v22 = vld [vmem:[%s1301_s6 + $0x4] ss:$12 sps:$4 sm:$0xff]   ;;  %v1175_v31 = vld [vmem:[%s1301_s6 + $0x34] ss:$12 sps:$4 sm:$0xff]  }
  0x13   : > { %1105 = vmatpush3.bf16.msra.mxu1 %v1149_v6  ;;  %v1165_v23 = vld [vmem:[%s1378_s1] sm:$0xff]   ;;  %569 = vmatprep.mubr.bf16.mxu0 %v1168_v22  ;;  %v1170_v24 = vld [vmem:[%s1301_s6 + $0x8] ss:$12 sps:$4 sm:$0xff]   ;;  %v1179_v32 = vld [vmem:[%s1301_s6 + $0x50] ss:$12 sps:$4 sm:$0xff]  }
  0x14   : > { %1106 = vmatprep.subr.bf16.mxu1 %v1152_v9  ;;  %v1169_v25 = vld [vmem:[%s1378_s1 + $0x80] sm:$0xff]   ;;  %1118 = vmatprep.mubr.bf16.mxu1 %v1170_v24  ;;  %v1172_v27 = vld [vmem:[%s1301_s6 + $0x1c] ss:$12 sps:$4 sm:$0xff]   ;;  %v1180_v35 = vld [vmem:[%s1301_s6 + $0x4c] ss:$12 sps:$4 sm:$0xff]  }
  0x15   : > { %1027 = vmatpush3.bf16.msra.mxu0 %v1150_v7  ;;  %v1166_v26 = vld [vmem:[%s1301_s6] ss:$12 sps:$4 sm:$0xff]   ;;  %v1178_v29 = vld [vmem:[%s1301_s6 + $0x38] ss:$12 sps:$4 sm:$0xff]   ;;  %v1186_v33 = vld [vmem:[%s1301_s6 + $0x68] ss:$12 sps:$4 sm:$0xff]  }
  0x16   : > { %1028 = vmatprep.subr.bf16.mxu0 %v1151_v8  ;;  %v1171_v28 = vld [vmem:[%s1301_s6 + $0x20] ss:$12 sps:$4 sm:$0xff]   ;;  %v1174_v30 = vld [vmem:[%s1301_s6 + $0x18] ss:$12 sps:$4 sm:$0xff]   ;;  %v1177_v34 = vld [vmem:[%s1301_s6 + $0x30] ss:$12 sps:$4 sm:$0xff]  }
  0x17   : > { %1107 = vmatpush3.bf16.msra.mxu1 %v1152_v9  ;;  %v1187_v36 = vld [vmem:[%s1301_s6 + $0x80] ss:$12 sps:$4 sm:$0xff]   ;;  %v1194_v37 = vld [vmem:[%s1301_s6 + $0x98] ss:$12 sps:$4 sm:$0xff]   ;;  %v1182_v38 = vld [vmem:[%s1301_s6 + $0x48] ss:$12 sps:$4 sm:$0xff]  }
  0x18   : > { %1108 = vmatprep.subr.bf16.mxu1 %v1155_v12  ;;  %v1183_v39 = vld [vmem:[%s1301_s6 + $0x64] ss:$12 sps:$4 sm:$0xff]   ;;  %v1185_v41 = vld [vmem:[%s1301_s6 + $0x60] ss:$12 sps:$4 sm:$0xff]   ;;  %v1188_v42 = vld [vmem:[%s1301_s6 + $0x7c] ss:$12 sps:$4 sm:$0xff]  }
  0x19   : > { %1029 = vmatpush3.bf16.msra.mxu0 %v1153_v10  ;;  %v1195_v40 = vld [vmem:[%s1301_s6 + $0xb0] ss:$12 sps:$4 sm:$0xff]   ;;  %v1190_v43 = vld [vmem:[%s1301_s6 + $0x78] ss:$12 sps:$4 sm:$0xff]   ;;  %v1191_v44 = vld [vmem:[%s1301_s6 + $0x94] ss:$12 sps:$4 sm:$0xff]  }
  0x1a   : > { %1030 = vmatprep.subr.bf16.mxu0 %v1154_v11  ;;  %v1193_v45 = vld [vmem:[%s1301_s6 + $0x90] ss:$12 sps:$4 sm:$0xff]   ;;  %v1196_v46 = vld [vmem:[%s1301_s6 + $0xac] ss:$12 sps:$4 sm:$0xff]   ;;  %v1198_v47 = vld [vmem:[%s1301_s6 + $0xa8] ss:$12 sps:$4 sm:$0xff]  }
  0x1b   : > { %1109 = vmatpush3.bf16.msra.mxu1 %v1155_v12  ;;  %v1342_v50 = vld [vmem:[%s1379_s2] ss:$0 sm:$0xff] }
  0x1c   : > { %1110 = vmatprep.subr.bf16.mxu1 %v1158_v14 }
  0x1d   : > { %1031 = vmatpush3.bf16.msra.mxu0 %v1156_v13 }
  0x1e   : > { %1032 = vmatprep.subr.bf16.mxu0 %v1157_v15 }
  0x1f   : > { %1111 = vmatpush3.bf16.msra.mxu1 %v1158_v14 }
  0x20   : > { %1112 = vmatprep.subr.bf16.mxu1 %v1161_v17 }
  0x21   : > { %1033 = vmatpush3.bf16.msra.mxu0 %v1159_v16 }
  0x22   : > { %1034 = vmatprep.subr.bf16.mxu0 %v1160_v18 }
  0x23   : > { %1113 = vmatpush3.bf16.msra.mxu1 %v1161_v17 }
  0x24   : > { %1114 = vmatprep.subr.bf16.mxu1 %v1164_v21 }
  0x25   : > { %1035 = vmatpush3.bf16.msra.mxu0 %v1162_v19 }
  0x26   : > { %1036 = vmatprep.subr.bf16.mxu0 %v1163_v20 }
  0x27   : > { %1115 = vmatpush3.bf16.msra.mxu1 %v1164_v21 }
  0x28   : > { %1116 = vmatprep.subr.bf16.mxu1 %v1169_v25 }
  0x29   : > { %1037 = vmatpush3.bf16.msra.mxu0 %v1165_v23 }
  0x2b   : > { %1117 = vmatpush3.bf16.msra.mxu1 %v1169_v25 }
  0x2c   : > { %570 = vmatmul.mubr.bf16.vlgmr.msra.gmra.mxu0 %v1166_v26 }
  0x2d   : > { %577 = vmatprep.mubr.bf16.mxu0 %v1172_v27 }
  0x2e   : > { %1119 = vmatmul.mubr.bf16.vlgmr.msra.gmra.mxu1 %v1171_v28 }
  0x2f   : > { %1122 = vmatprep.mubr.bf16.mxu1 %v1178_v29 }
  0x34   : > { %578 = vmatmul.mubr.bf16.gmra.mxu0 %v1174_v30 }
  0x35   : > { %585 = vmatprep.mubr.bf16.mxu0 %v1175_v31 }
  0x36   : > { %1123 = vmatmul.mubr.bf16.gmra.mxu1 %v1179_v32 }
  0x37   : > { %1126 = vmatprep.mubr.bf16.mxu1 %v1186_v33 }
  0x3c   : > { %586 = vmatmul.mubr.bf16.gmra.mxu0 %v1177_v34 }
  0x3d   : > { %593 = vmatprep.mubr.bf16.mxu0 %v1180_v35 }
  0x3e   : > { %1127 = vmatmul.mubr.bf16.gmra.mxu1 %v1187_v36 }
  0x3f   : > { %1130 = vmatprep.mubr.bf16.mxu1 %v1194_v37 }
  0x44   : > { %594 = vmatmul.mubr.bf16.gmra.mxu0 %v1182_v38 }
  0x45   : > { %601 = vmatprep.mubr.bf16.mxu0 %v1183_v39 }
  0x46   : > { %1131 = vmatmul.mubr.bf16.gmra.mxu1 %v1195_v40 }
  0x4c   : > { %602 = vmatmul.mubr.bf16.gmra.mxu0 %v1185_v41 }
  0x4d   : > { %609 = vmatprep.mubr.bf16.mxu0 %v1188_v42 }
  0x54   : > { %610 = vmatmul.mubr.bf16.gmra.mxu0 %v1190_v43 }
  0x55   : > { %617 = vmatprep.mubr.bf16.mxu0 %v1191_v44 }
  0x5c   : > { %618 = vmatmul.mubr.bf16.gmra.mxu0 %v1193_v45 }
  0x5d   : > { %625 = vmatprep.mubr.bf16.mxu0 %v1196_v46 }
  0x64   : > { %626 = vmatmul.mubr.bf16.gmra.mxu0 %v1198_v47 }
  0xec   : > { %v1038_v48 = vpop.f32.mrf.mxu0 }
  0xee   : > { %v1039_v49 = vpop.f32.mrf.mxu0  ;;  %v1120_v52 = vpop.f32.mrf.mxu1 }
  0xef   : > { %v1040_v51 = vadd.f32 %v1039_v49, %v1038_v48 }
  0xf0   : > { %v1041_v53 = vpop.f32.mrf.mxu0  ;;  %v668_v55 = vpop.f32.mrf.mxu1 }
  0xf1   : > { %v572_v54 = vadd.f32 %v1040_v51, %v1342_v50 }
  0xf2   : > { %v1042_v56 = vpop.f32.mrf.mxu0  ;;  %v1121_v58 = vpop.f32.mrf.mxu1 }
  0xf3   : > { %v1043_v57 = vadd.f32 %v1042_v56, %v1041_v53  ;;  %v669_v60 = vadd.f32 %v668_v55, %v572_v54 }
  0xf4   : > { %v1044_v59 = vpop.f32.mrf.mxu0  ;;  %v671_v62 = vpop.f32.mrf.mxu1 }
  0xf5   : > { %v575_v61 = vadd.f32 %v1043_v57, %v1342_v50  ;;  %v731_v4 = vmax.f32 %v669_v60, 0.0 }
  0xf6   : > { %v1045_v63 = vpop.f32.mrf.mxu0  ;;  %v1124_v3 = vpop.f32.mrf.mxu1 }
  0xf7   : > { %v1046_v0 = vadd.f32 %v1045_v63, %v1044_v59  ;;  %v672_v1 = vadd.f32 %v671_v62, %v575_v61 }
  0xf8   : > { %v1047_v2 = vpop.f32.mrf.mxu0  ;;  %v684_v11 = vpop.f32.mrf.mxu1 }
  0xf9   : > { %v580_v5 = vadd.f32 %v1046_v0, %v1342_v50  ;;  %v732_v6 = vmax.f32 %v672_v1, 0.0 }
  0xfa   : > { %v1048_v7 = vpop.f32.mrf.mxu0  ;;  %v1125_v18 = vpop.f32.mrf.mxu1 }
  0xfb   : > { %v978_v8 = vpack.c.bf16 %v732_v6, %v731_v4  ;;  %v1049_v9 = vadd.f32 %v1048_v7, %v1047_v2  ;;  %v677_v12 = vadd.f32 %v1120_v52, %v580_v5 }
  0xfc   : > { %v1050_v10 = vpop.f32.mrf.mxu0  ;;  %v687_v26 = vpop.f32.mrf.mxu1 }
  0xfd   : > { %979 = vst [vmem:[%s1351_s21] sm:$0xff] %v978_v8   ;;  %v583_v13 = vadd.f32 %v1049_v9, %v1342_v50  ;;  %v733_v19 = vmax.f32 %v677_v12, 0.0 }
  0xfe   : > { %v1051_v14 = vpop.f32.mrf.mxu0  ;;  %v1128_v33 = vpop.f32.mrf.mxu1 }
  0xff   : > { %v680_v15 = vadd.f32 %v1121_v58, %v583_v13  ;;  %v1052_v16 = vadd.f32 %v1051_v14, %v1050_v10 }
 0x100   : > { %v1053_v17 = vpop.f32.mrf.mxu0  ;;  %v700_v41 = vpop.f32.mrf.mxu1 }
 0x101   : > { %v734_v20 = vmax.f32 %v680_v15, 0.0  ;;  %v588_v21 = vadd.f32 %v1052_v16, %v1342_v50 }
 0x102   : > { %v1054_v22 = vpop.f32.mrf.mxu0  ;;  %v1129_v48 = vpop.f32.mrf.mxu1 }
 0x103   : > { %v983_v23 = vpack.c.bf16 %v734_v20, %v733_v19  ;;  %v1055_v24 = vadd.f32 %v1054_v22, %v1053_v17  ;;  %v685_v27 = vadd.f32 %v684_v11, %v588_v21 }
 0x104   : > { %v1056_v25 = vpop.f32.mrf.mxu0  ;;  %v703_v57 = vpop.f32.mrf.mxu1 }
 0x105   : > { %1015 = vst [vmem:[%s1351_s21 + $0x8] sm:$0xff] %v983_v23   ;;  %v591_v28 = vadd.f32 %v1055_v24, %v1342_v50  ;;  %v735_v34 = vmax.f32 %v685_v27, 0.0 }
 0x106   : > { %v1057_v29 = vpop.f32.mrf.mxu0  ;;  %v1132_v0 = vpop.f32.mrf.mxu1 }
 0x107   : > { %v1058_v30 = vadd.f32 %v1057_v29, %v1056_v25  ;;  %v688_v31 = vadd.f32 %v687_v26, %v591_v28 }
 0x108   : > { %v1059_v32 = vpop.f32.mrf.mxu0  ;;  %v716_v8 = vpop.f32.mrf.mxu1 }
 0x109   : > { %v596_v35 = vadd.f32 %v1058_v30, %v1342_v50  ;;  %v736_v36 = vmax.f32 %v688_v31, 0.0 }
 0x10a   : > { %v1060_v37 = vpop.f32.mrf.mxu0  ;;  %v1133_v15 = vpop.f32.mrf.mxu1 }
 0x10b   : > { %v988_v38 = vpack.c.bf16 %v736_v36, %v735_v34  ;;  %v1061_v39 = vadd.f32 %v1060_v37, %v1059_v32  ;;  %v693_v42 = vadd.f32 %v1124_v3, %v596_v35 }
 0x10c   : > { %v1062_v40 = vpop.f32.mrf.mxu0  ;;  %v719_v23 = vpop.f32.mrf.mxu1 }
 0x10d   : > { %1016 = vst [vmem:[%s1351_s21 + $0x10] sm:$0xff] %v988_v38   ;;  %v599_v43 = vadd.f32 %v1061_v39, %v1342_v50  ;;  %v737_v49 = vmax.f32 %v693_v42, 0.0 }
 0x10e   : > { %v1063_v44 = vpop.f32.mrf.mxu0 }
 0x10f   : > { %v696_v45 = vadd.f32 %v1125_v18, %v599_v43  ;;  %v1064_v46 = vadd.f32 %v1063_v44, %v1062_v40 }
 0x110   : > { %v1065_v47 = vpop.f32.mrf.mxu0 }
 0x111   : > { %v738_v51 = vmax.f32 %v696_v45, 0.0  ;;  %v604_v52 = vadd.f32 %v1064_v46, %v1342_v50 }
 0x112   : > { %v1066_v53 = vpop.f32.mrf.mxu0 }
 0x113   : > { %v993_v54 = vpack.c.bf16 %v738_v51, %v737_v49  ;;  %v1067_v55 = vadd.f32 %v1066_v53, %v1065_v47  ;;  %v701_v58 = vadd.f32 %v700_v41, %v604_v52 }
 0x114   : > { %v1068_v56 = vpop.f32.mrf.mxu0 }
 0x115   : > { %1017 = vst [vmem:[%s1351_s21 + $0x18] sm:$0xff] %v993_v54   ;;  %v607_v59 = vadd.f32 %v1067_v55, %v1342_v50  ;;  %v739_v1 = vmax.f32 %v701_v58, 0.0 }
 0x116   : > { %v1069_v60 = vpop.f32.mrf.mxu0 }
 0x117   : > { %v1070_v61 = vadd.f32 %v1069_v60, %v1068_v56  ;;  %v704_v62 = vadd.f32 %v703_v57, %v607_v59 }
 0x118   : > { %v1071_v63 = vpop.f32.mrf.mxu0 }
 0x119   : > { %v612_v2 = vadd.f32 %v1070_v61, %v1342_v50  ;;  %v740_v3 = vmax.f32 %v704_v62, 0.0 }
 0x11a   : > { %v1072_v4 = vpop.f32.mrf.mxu0 }
 0x11b   : > { %v998_v5 = vpack.c.bf16 %v740_v3, %v739_v1  ;;  %v1073_v6 = vadd.f32 %v1072_v4, %v1071_v63  ;;  %v709_v9 = vadd.f32 %v1128_v33, %v612_v2 }
 0x11c   : > { %v1074_v7 = vpop.f32.mrf.mxu0 }
 0x11d   : > { %1018 = vst [vmem:[%s1351_s21 + $0x20] sm:$0xff] %v998_v5   ;;  %v615_v10 = vadd.f32 %v1073_v6, %v1342_v50  ;;  %v741_v16 = vmax.f32 %v709_v9, 0.0 }
 0x11e   : > { %v1075_v11 = vpop.f32.mrf.mxu0 }
 0x11f   : > { %v712_v12 = vadd.f32 %v1129_v48, %v615_v10  ;;  %v1076_v13 = vadd.f32 %v1075_v11, %v1074_v7 }
 0x120   : > { %v1077_v14 = vpop.f32.mrf.mxu0 }
 0x121   : > { %v742_v17 = vmax.f32 %v712_v12, 0.0  ;;  %v620_v18 = vadd.f32 %v1076_v13, %v1342_v50 }
 0x122   : > { %v1078_v19 = vpop.f32.mrf.mxu0 }
 0x123   : > { %v1003_v20 = vpack.c.bf16 %v742_v17, %v741_v16  ;;  %v1079_v21 = vadd.f32 %v1078_v19, %v1077_v14  ;;  %v717_v24 = vadd.f32 %v716_v8, %v620_v18 }
 0x124   : > { %v1080_v22 = vpop.f32.mrf.mxu0 }
 0x125   : > { %1019 = vst [vmem:[%s1351_s21 + $0x28] sm:$0xff] %v1003_v20   ;;  %v623_v25 = vadd.f32 %v1079_v21, %v1342_v50  ;;  %v743_v30 = vmax.f32 %v717_v24, 0.0 }
 0x126   : > { %v1081_v26 = vpop.f32.mrf.mxu0 }
 0x127   : > { %v1082_v27 = vadd.f32 %v1081_v26, %v1080_v22  ;;  %v720_v28 = vadd.f32 %v719_v23, %v623_v25 }
 0x128   : > { %v1083_v29 = vpop.f32.mrf.mxu0 }
 0x129   : > { %v628_v31 = vadd.f32 %v1082_v27, %v1342_v50  ;;  %v744_v32 = vmax.f32 %v720_v28, 0.0 }
 0x12a   : > { %v1084_v33 = vpop.f32.mrf.mxu0 }
 0x12b   : > { %v1008_v34 = vpack.c.bf16 %v744_v32, %v743_v30  ;;  %v1085_v35 = vadd.f32 %v1084_v33, %v1083_v29  ;;  %v725_v36 = vadd.f32 %v1132_v0, %v628_v31 }
 0x12d   : > { %1020 = vst [vmem:[%s1351_s21 + $0x30] sm:$0xff] %v1008_v34   ;;  %v631_v37 = vadd.f32 %v1085_v35, %v1342_v50  ;;  %v745_v39 = vmax.f32 %v725_v36, 0.0 }
 0x12f   : > { %v728_v38 = vadd.f32 %v1133_v15, %v631_v37 }
 0x131   : > { %v746_v40 = vmax.f32 %v728_v38, 0.0 }
 0x133   : > { %v1013_v41 = vpack.c.bf16 %v746_v40, %v745_v39 }
 0x135   : > { %1021 = vst [vmem:[%s1351_s21 + $0x38] sm:$0xff] %v1013_v41  }
 0x136 PF: > { %s13_s12 = sadd.s32 1, %s1205_s12  }
 0x137   : > { %p10_p4 = scmp.ge.s32.totalorder %s13_s12, 6  }
 0x139   :  { %12 = sbr.rel (!%p10_p4) target bundleno = 1 (0x1), region = 62 }

// kernel: alexnet_fe_forward.8
= control target key start
LH: loop header
LB: loop body
LE: loop exit
PB: predicated region body
PF: predicated region fallthrough
CT: control target
= control target key end

     0   :  { %s1063_s6 = smov 0   ;;  %s1281_s0 = inlined_call_operand.vmem [shape: bf16[2,15,15,128], index: 0, kind: input, shape index: {}]   ;;  %s1282_s1 = inlined_call_operand.vmem [shape: bf16[2,7,7,128], index: 1, kind: output, shape index: {}]  }
   0x1 LB: > { %s890_s7 = sadd.s32 4294967295, %s1048_s6   ;;  %p894_p0 = scmp.ge.s32.totalorder %s1048_s6, 1  ;;  %s1048_s6 = sphi %s1063_s6, %s11_s6  }
   0x2   : > { %p87_p1 = scmp.lt.s32.totalorder %s1048_s6, 3 }
   0x4   : > { %p88_p2 = pnand %p894_p0, %p87_p1 }
   0x5   : > { %p107_p3 = scmp.lt.s32.totalorder (!%p88_p2), %s890_s7, 1 }
   0x6   : > { %91 = sbr.rel (%p88_p2) target bundleno = 277 (0x115), region = 24 }
   0xb   : > { %v118_v0 = vlaneseq  ;;  %v1050_v1 = vmov 0.0   ;;  %s1290_s7 = smov (!%p107_p3, %s890_s7), 1  ;;  %vm188_vm0 = vcmask 1045504   ;;  %vm1051_vm1 = vmmov 0  }
   0xc   : > { %987 = vmatprep.subr.bf16.mxu0 %v1050_v1  ;;  %993 = vmatprep.subr.bf16.mxu1 %v1050_v1  ;;  %s1029_s8 = smul.u32 120, %s1290_s7  ;;  %vm139_vm2 = vsmask.f32 3328  ;;  %vm140_vm3 = vsmask.f32 7440  ;;  %vm167_vm4 = vcmask 1042432  }
   0xd   : > { %v119_v2 = vshrl.u32 %v118_v0, 7  ;;  %v121_v3 = vand.u32 127, %v118_v0  ;;  %989 = vmatprep.mubr.msk.bf16.mxu0 %vm1051_vm1, %v1050_v1  ;;  %995 = vmatprep.mubr.msk.bf16.mxu1 %vm1051_vm1, %v1050_v1  ;;  %vm189_vm5 = vcmask 1046528   ;;  %v1052_v5 = vmov 65535   ;;  %vm1121_vm9 = vmor %vm139_vm2, %vm140_vm3  ;;  %s1030_s12 = smul.u32 28, %s1290_s7 }
   0xe   : > { %s1083_s11 = scalar_lea.vmem %s1281_s0, %s1029_s8  ;;  %v190_v6 = vsel %vm188_vm0, 4294967295, %v1052_v5  ;;  %vm168_vm7 = vcmask 1046532   ;;  %vm184_vm10 = vcmask 105472   ;;  %vm236_vm11 = vcmask 1043456  }
   0xf   : > { %v122_v4 = vmul.u32 2, %v119_v2  ;;  %v127_v7 = vld [vmem:[%s1083_s11] sm:$0xf]  ;;  %v128_v8 = vld [vmem:[%s1083_s11 + $0x4] sm:$0xf]  ;;  %v1098_v23 = vsel %vm189_vm5, %v190_v6, 0  ;;  %vm1104_vm8 = vmor %vm167_vm4, %vm168_vm7  ;;  %s1243_s15 = scalar_lea.vmem %s1282_s1, %s1030_s12 }
  0x10   : > { %v898_v9 = vld [vmem:[%s1083_s11 + $0x8] sm:$0xf]  ;;  %v899_v10 = vld [vmem:[%s1083_s11 + $0xc] sm:$0xf]  ;;  %v900_v11 = vld [vmem:[%s1083_s11 + $0x10] sm:$0xf] }
  0x11   : > { %vm123_vm6 = vcmp.eq.s32.totalorder %v121_v3, %v122_v4  ;;  %v901_v12 = vld [vmem:[%s1083_s11 + $0x14] sm:$0xf]  ;;  %v135_v13 = vmax.bf16 %v898_v9, %v127_v7  ;;  %v136_v14 = vmax.bf16 %v899_v10, %v128_v8  ;;  %v905_v16 = vld [vmem:[%s1083_s11 + $0x10] sm:$0xf]  ;;  %v907_v19 = vld [vmem:[%s1083_s11 + $0x18] sm:$0xf] }
  0x12   : > { %v897_v15 = vsel %vm123_vm6, 1.0, %v1050_v1  ;;  %v906_v17 = vld [vmem:[%s1083_s11 + $0x14] sm:$0xf]  ;;  %v908_v20 = vld [vmem:[%s1083_s11 + $0x1c] sm:$0xf]  ;;  %v249_v25 = vmax.bf16 %v907_v19, %v905_v16  ;;  %vm1246_vm12 = vmand %vm236_vm11, %vm139_vm2 }
  0x13   : > { %v137_v18 = vmax.bf16 %v900_v11, %v135_v13  ;;  %v909_v21 = vld [vmem:[%s1083_s11 + $0x20] sm:$0xf]  ;;  %v138_v22 = vmax.bf16 %v901_v12, %v136_v14  ;;  %v910_v24 = vld [vmem:[%s1083_s11 + $0x24] sm:$0xf]  ;;  %v250_v26 = vmax.bf16 %v908_v20, %v906_v17  ;;  %v1108_v32 = vpack.c.bf16 %v897_v15, %v897_v15  ;;  %v918_v33 = vld [vmem:[%s1083_s11 + $0x28] sm:$0xf] }
  0x14   : > { %v916_v27 = vld [vmem:[%s1083_s11 + $0x20] sm:$0xf]  ;;  %v251_v37 = vmax.bf16 %v909_v21, %v249_v25  ;;  %v917_v46 = vld [vmem:[%s1083_s11 + $0x24] sm:$0xf]  ;;  %v919_v47 = vld [vmem:[%s1083_s11 + $0x2c] sm:$0xf] }
  0x15   : > { %v143_v28 = vshrl.u32 %v137_v18, 16  ;;  %v146_v29 = vshll.u32 %v137_v18, 16  ;;  %v902_v31 = vrot.slane %v137_v18, 9  ;;  %v152_v34 = vshll.u32 %v138_v22, 16  ;;  %v920_v52 = vld [vmem:[%s1083_s11 + $0x30] sm:$0xf] }
  0x16   : > { %v156_v35 = vshrl.u32 %v138_v22, 16  ;;  %v172_v36 = vrot.slane %v138_v22, 5  ;;  %v1111_v40 = vmax.bf16 %v910_v24, %v250_v26  ;;  %v348_v41 = vmax.bf16 %v918_v33, %v916_v27  ;;  %v927_v58 = vld [vmem:[%s1083_s11 + $0x30] sm:$0xf]  ;;  %v929_v63 = vld [vmem:[%s1083_s11 + $0x38] sm:$0xf] }
  0x17   : > { %v145_v38 = vrot.slane %v143_v28, 4  ;;  %v148_v39 = vrot.slane %v146_v29, 5  ;;  %v154_v42 = vrot.slane %v152_v34, 5  ;;  %v254_v49 = vshrl.u32 %v251_v37, 16  ;;  %v921_v5 = vld [vmem:[%s1083_s11 + $0x34] sm:$0xf] }
  0x18   : > { %v158_v43 = vrot.slane %v156_v35, 4  ;;  %v173_v44 = vsel %vm1104_vm8, %v902_v31, %v172_v36  ;;  %v174_v45 = vrot.slane %v172_v36, 4  ;;  %v257_v50 = vshll.u32 %v251_v37, 16  ;;  %v928_v25 = vld [vmem:[%s1083_s11 + $0x34] sm:$0xf] }
  0x19   : > { %v149_v48 = vor.u32 %v148_v39, %v145_v38  ;;  %v263_v51 = vshll.u32 %v1111_v40, 16  ;;  %v267_v55 = vshrl.u32 %v1111_v40, 16  ;;  %v911_v56 = vrot.slane %v251_v37, 9  ;;  %v930_v26 = vld [vmem:[%s1083_s11 + $0x3c] sm:$0xf] }
  0x1a   : > { %v159_v54 = vor.u32 %v158_v43, %v154_v42  ;;  %v280_v57 = vrot.slane %v1111_v40, 5  ;;  %v256_v60 = vrot.slane %v254_v49, 4  ;;  %v259_v61 = vrot.slane %v257_v50, 5  ;;  %v931_v35 = vld [vmem:[%s1083_s11 + $0x40] sm:$0xf] }
  0x1b   : > { %v150_v59 = vrot.slane %v149_v48, 4  ;;  %v265_v62 = vrot.slane %v263_v51, 5  ;;  %v269_v2 = vrot.slane %v267_v55, 4  ;;  %v349_v8 = vmax.bf16 %v919_v47, %v917_v46  ;;  %v932_v36 = vld [vmem:[%s1083_s11 + $0x44] sm:$0xf] }
  0x1c   : > { %v160_v0 = vrot.slane %v159_v54, 4  ;;  %v281_v3 = vsel %vm1104_vm8, %v911_v56, %v280_v57  ;;  %v282_v4 = vrot.slane %v280_v57, 4  ;;  %v260_v7 = vor.u32 %v259_v61, %v256_v60  ;;  %v938_v43 = vld [vmem:[%s1083_s11 + $0x40] sm:$0xf]  ;;  %v939_v55 = vld [vmem:[%s1083_s11 + $0x44] sm:$0xf] }
  0x1d   : > { %v155_v6 = vsel %vm1121_vm9, %v150_v59, %v154_v42  ;;  %v350_v9 = vmax.bf16 %v920_v52, %v348_v41  ;;  %v270_v12 = vor.u32 %v269_v2, %v265_v62  ;;  %v447_v13 = vmax.bf16 %v929_v63, %v927_v58  ;;  %v941_v56 = vld [vmem:[%s1083_s11 + $0x4c] sm:$0xf]  ;;  %v943_v63 = vld [vmem:[%s1083_s11 + $0x54] sm:$0xf] }
  0x1e   : > { %v163_v10 = vmax.bf16 %v155_v6, %v137_v18  ;;  %v164_v11 = vmax.bf16 %v160_v0, %v138_v22  ;;  %v261_v14 = vrot.slane %v260_v7, 4  ;;  %v1134_v15 = vmax.bf16 %v921_v5, %v349_v8  ;;  %v949_v0 = vld [vmem:[%s1083_s11 + $0x50] sm:$0xf]  ;;  %v950_v6 = vld [vmem:[%s1083_s11 + $0x54] sm:$0xf] }
  0x1f   : > { %v353_v16 = vshrl.u32 %v350_v9, 16  ;;  %v356_v17 = vshll.u32 %v350_v9, 16  ;;  %v271_v21 = vrot.slane %v270_v12, 4  ;;  %v922_v24 = vrot.slane %v350_v9, 9  ;;  %v951_v7 = vld [vmem:[%s1083_s11 + $0x58] sm:$0xf] }
  0x20   : > { %v177_v19 = vmax.bf16 %v173_v44, %v163_v10  ;;  %v178_v20 = vmax.bf16 %v174_v45, %v164_v11  ;;  %v266_v18 = vsel %vm1121_vm9, %v261_v14, %v265_v62  ;;  %v362_v28 = vshll.u32 %v1134_v15, 16  ;;  %v940_v44 = vld [vmem:[%s1083_s11 + $0x48] sm:$0xf]  ;;  %v942_v62 = vld [vmem:[%s1083_s11 + $0x50] sm:$0xf] }
  0x21   : > { %v355_v22 = vrot.slane %v353_v16, 4  ;;  %v358_v27 = vrot.slane %v356_v17, 5  ;;  %v274_v31 = vmax.bf16 %v266_v18, %v251_v37  ;;  %v275_v33 = vmax.bf16 %v271_v21, %v1111_v40 }
  0x22   : > { %v903_v29 = vcombine.low %v177_v19, %v178_v20  ;;  %v366_v34 = vshrl.u32 %v1134_v15, 16  ;;  %v364_v39 = vrot.slane %v362_v28, 5  ;;  %v379_v41 = vrot.slane %v1134_v15, 5  ;;  %v1174_v19 = vld [vmem:[%s1083_s11 + $0x60] sm:$0xf] }
  0x23   : > { %v359_v38 = vor.u32 %v358_v27, %v355_v22  ;;  %v448_v42 = vmax.bf16 %v930_v26, %v928_v25  ;;  %v285_v46 = vmax.bf16 %v281_v3, %v274_v31  ;;  %v286_v47 = vmax.bf16 %v282_v4, %v275_v33  ;;  %v1177_v20 = vld [vmem:[%s1083_s11 + $0x68] sm:$0xf] }
  0x24   : > { %v193_v45 = vand.u32 %v903_v29, %v1098_v23  ;;  %v368_v37 = vrot.slane %v366_v34, 4  ;;  %v380_v40 = vsel %vm1104_vm8, %v922_v24, %v379_v41  ;;  %v381_v49 = vrot.slane %v379_v41, 4 }
  0x25   : > { %v360_v48 = vrot.slane %v359_v38, 4  ;;  %v449_v50 = vmax.bf16 %v931_v35, %v447_v13  ;;  %v912_v51 = vcombine.low %v285_v46, %v286_v47  ;;  %v1151_v54 = vmax.bf16 %v932_v36, %v448_v42  ;;  %v952_v13 = vld [vmem:[%s1083_s11 + $0x5c] sm:$0xf] }
  0x26   : > { %988 = vmatpush3.bf16.msra.mxu0 %v193_v45  ;;  %v369_v52 = vor.u32 %v368_v37, %v364_v39  ;;  %v546_v57 = vmax.bf16 %v940_v44, %v938_v43  ;;  %v547_v17 = vmax.bf16 %v941_v56, %v939_v55  ;;  %v645_v27 = vmax.bf16 %v951_v7, %v949_v0  ;;  %v954_v45 = vld [vmem:[%s1083_s11 + $0x64] sm:$0xf] }
  0x27   : > { %999 = vmatprep.subr.bf16.mxu0 %v1050_v1  ;;  %v365_v58 = vsel %vm1121_vm9, %v360_v48, %v364_v39  ;;  %v452_v59 = vshrl.u32 %v449_v50, 16  ;;  %v455_v60 = vshll.u32 %v449_v50, 16  ;;  %v933_v61 = vrot.slane %v449_v50, 9  ;;  %v953_v39 = vld [vmem:[%s1083_s11 + $0x60] sm:$0xf] }
  0x28   : > { %v293_v2 = vand.u32 %v912_v51, %v1098_v23  ;;  %v370_v3 = vrot.slane %v369_v52, 4  ;;  %v373_v4 = vmax.bf16 %v365_v58, %v350_v9  ;;  %v461_v5 = vshll.u32 %v1151_v54, 16 }
  0x29   : > { %990 = vmatmul.mubr.msk.bf16.vlgmr.msra.gmra.mxu0 %vm184_vm10, %v1108_v32  ;;  %v454_v8 = vrot.slane %v452_v59, 4  ;;  %v457_v10 = vrot.slane %v455_v60, 5  ;;  %v465_v11 = vshrl.u32 %v1151_v54, 16  ;;  %v478_v12 = vrot.slane %v1151_v54, 5 }
  0x2a   : > { %994 = vmatpush3.bf16.msra.mxu1 %v293_v2  ;;  %v374_v14 = vmax.bf16 %v370_v3, %v1134_v15  ;;  %v384_v9 = vmax.bf16 %v380_v40, %v373_v4  ;;  %1001 = vmatprep.mubr.msk.bf16.mxu0 %vm1051_vm1, %v1050_v1  ;;  %v463_v16 = vrot.slane %v461_v5, 5  ;;  %v548_v18 = vmax.bf16 %v942_v62, %v546_v57  ;;  %v963_v3 = vld [vmem:[%s1083_s11 + $0x6c] sm:$0xf] }
  0x2b   : > { %1005 = vmatprep.subr.bf16.mxu1 %v1050_v1  ;;  %v458_v21 = vor.u32 %v457_v10, %v454_v8  ;;  %v467_v24 = vrot.slane %v465_v11, 4  ;;  %v479_v25 = vsel %vm1104_vm8, %v933_v61, %v478_v12  ;;  %v480_v26 = vrot.slane %v478_v12, 4  ;;  %v964_v8 = vld [vmem:[%s1083_s11 + $0x70] sm:$0xf] }
  0x2c   : > { %v385_v15 = vmax.bf16 %v381_v49, %v374_v14  ;;  %v1182_v22 = vmax.bf16 %v943_v63, %v547_v17  ;;  %v646_v31 = vmax.bf16 %v952_v13, %v950_v6  ;;  %v744_v33 = vmax.bf16 %v1177_v20, %v1174_v19  ;;  %v965_v19 = vld [vmem:[%s1083_s11 + $0x74] sm:$0xf] }
  0x2d   : > { %996 = vmatmul.mubr.msk.bf16.vlgmr.msra.gmra.mxu1 %vm184_vm10, %v1108_v32  ;;  %v459_v28 = vrot.slane %v458_v21, 4  ;;  %v468_v29 = vor.u32 %v467_v24, %v463_v16  ;;  %v551_v35 = vshrl.u32 %v548_v18, 16  ;;  %v554_v36 = vshll.u32 %v548_v18, 16 }
  0x2e   : > { %v923_v34 = vcombine.low %v384_v9, %v385_v15  ;;  %v560_v38 = vshll.u32 %v1182_v22, 16  ;;  %1007 = vmatprep.mubr.msk.bf16.mxu1 %vm1051_vm1, %v1050_v1  ;;  %v564_v43 = vshrl.u32 %v1182_v22, 16  ;;  %v944_v44 = vrot.slane %v548_v18, 9 }
  0x2f   : > { %v464_v41 = vsel %vm1121_vm9, %v459_v28, %v463_v16  ;;  %v469_v42 = vrot.slane %v468_v29, 4  ;;  %v553_v37 = vrot.slane %v551_v35, 4  ;;  %v556_v48 = vrot.slane %v554_v36, 5 }
  0x30   : > { %v392_v46 = vand.u32 %v923_v34, %v1098_v23  ;;  %v472_v47 = vmax.bf16 %v464_v41, %v449_v50  ;;  %v562_v49 = vrot.slane %v560_v38, 5  ;;  %v566_v51 = vrot.slane %v564_v43, 4 }
  0x31   : > { %v473_v40 = vmax.bf16 %v469_v42, %v1151_v54  ;;  %v577_v52 = vrot.slane %v1182_v22, 5  ;;  %v557_v56 = vor.u32 %v556_v48, %v553_v37  ;;  %v647_v57 = vmax.bf16 %v953_v39, %v645_v27  ;;  %v961_v54 = vld [vmem:[%s1083_s11 + $0x64] sm:$0xf] }
  0x32   : > { %1000 = vmatpush3.bf16.msra.mxu0 %v392_v46  ;;  %v483_v55 = vmax.bf16 %v479_v25, %v472_v47  ;;  %v648_v58 = vmax.bf16 %v954_v45, %v646_v31  ;;  %v567_v50 = vor.u32 %v566_v51, %v562_v49  ;;  %v745_v24 = vmax.bf16 %v963_v3, %v961_v54 }
  0x33   : > { %v484_v59 = vmax.bf16 %v480_v26, %v473_v40  ;;  %1011 = vmatprep.subr.bf16.mxu0 %v1050_v1  ;;  %v578_v60 = vsel %vm1104_vm8, %v944_v44, %v577_v52  ;;  %v579_v61 = vrot.slane %v577_v52, 4  ;;  %v558_v62 = vrot.slane %v557_v56, 4 }
  0x34   : > { %v650_v63 = vshrl.u32 %v647_v57, 16  ;;  %v653_v0 = vshll.u32 %v647_v57, 16  ;;  %v659_v2 = vshll.u32 %v648_v58, 16  ;;  %v568_v5 = vrot.slane %v567_v50, 4 }
  0x35   : > { %1002 = vmatmul.mubr.msk.bf16.vlgmr.msra.gmra.mxu0 %vm184_vm10, %v1108_v32  ;;  %v934_v4 = vcombine.low %v483_v55, %v484_v59  ;;  %v663_v6 = vshrl.u32 %v648_v58, 16  ;;  %v955_v7 = vrot.slane %v647_v57, 9  ;;  %v563_v10 = vsel %vm1121_vm9, %v558_v62, %v562_v49 }
  0x36   : > { %1013 = vmatprep.mubr.msk.bf16.mxu0 %vm1051_vm1, %v1050_v1  ;;  %v652_v11 = vrot.slane %v650_v63, 4  ;;  %v655_v12 = vrot.slane %v653_v0, 5  ;;  %v661_v13 = vrot.slane %v659_v2, 5  ;;  %v571_v9 = vmax.bf16 %v563_v10, %v548_v18 }
  0x37   : > { %v491_v14 = vand.u32 %v934_v4, %v1098_v23  ;;  %v572_v16 = vmax.bf16 %v568_v5, %v1182_v22  ;;  %v665_v17 = vrot.slane %v663_v6, 4  ;;  %v676_v21 = vrot.slane %v648_v58, 5  ;;  %v914_v5 = vld [vmem:[%s1243_s15 + $0x4] sm:$0xf] }
  0x38   : > { %v656_v20 = vor.u32 %v655_v12, %v652_v11  ;;  %v746_v25 = vmax.bf16 %v964_v8, %v744_v33  ;;  %v582_v26 = vmax.bf16 %v578_v60, %v571_v9  ;;  %v747_v31 = vmax.bf16 %v965_v19, %v745_v24  ;;  %v925_v9 = vld [vmem:[%s1243_s15 + $0x8] sm:$0xf] }
  0x39   : > { %1006 = vmatpush3.bf16.msra.mxu1 %v491_v14  ;;  %v583_v15 = vmax.bf16 %v579_v61, %v572_v16  ;;  %v666_v27 = vor.u32 %v665_v17, %v661_v13  ;;  %v678_v29 = vrot.slane %v676_v21, 4  ;;  %v677_v33 = vsel %vm1104_vm8, %v955_v7, %v676_v21 }
  0x3a   : > { %1017 = vmatprep.subr.bf16.mxu1 %v1050_v1  ;;  %v657_v28 = vrot.slane %v656_v20, 4  ;;  %v749_v18 = vshrl.u32 %v746_v25, 16  ;;  %v752_v36 = vshll.u32 %v746_v25, 16  ;;  %v758_v38 = vshll.u32 %v747_v31, 16 }
  0x3b   : > { %v945_v34 = vcombine.low %v582_v26, %v583_v15  ;;  %v667_v35 = vrot.slane %v666_v27, 4  ;;  %v762_v39 = vshrl.u32 %v747_v31, 16  ;;  %v775_v37 = vrot.slane %v747_v31, 5 }
  0x3c   : > { %1008 = vmatmul.mubr.msk.bf16.vlgmr.msra.gmra.mxu1 %vm184_vm10, %v1108_v32  ;;  %v662_v22 = vsel %vm1121_vm9, %v657_v28, %v661_v13  ;;  %v751_v44 = vrot.slane %v749_v18, 4  ;;  %v754_v45 = vrot.slane %v752_v36, 5  ;;  %v760_v46 = vrot.slane %v758_v38, 5  ;;  %v958_v38 = vld [vmem:[%s1243_s15 + $0x14] sm:$0xf] }
  0x3d   : > { %v590_v41 = vand.u32 %v945_v34, %v1098_v23  ;;  %v670_v42 = vmax.bf16 %v662_v22, %v647_v57  ;;  %v671_v43 = vmax.bf16 %v667_v35, %v648_v58  ;;  %1019 = vmatprep.mubr.msk.bf16.mxu1 %vm1051_vm1, %v1050_v1  ;;  %v764_v47 = vrot.slane %v762_v39, 4 }
  0x3e   : > { %v755_v49 = vor.u32 %v754_v45, %v751_v44  ;;  %v966_v52 = vrot.slane %v746_v25, 9  ;;  %v777_v58 = vrot.slane %v775_v37, 4 }
  0x3f   : > { %1012 = vmatpush3.bf16.msra.mxu0 %v590_v41  ;;  %v681_v48 = vmax.bf16 %v677_v33, %v670_v42  ;;  %v682_v40 = vmax.bf16 %v678_v29, %v671_v43  ;;  %v765_v51 = vor.u32 %v764_v47, %v760_v46  ;;  %v969_v47 = vld [vmem:[%s1243_s15 + $0x18] sm:$0xf] }
  0x40   : > { %1023 = vmatprep.subr.bf16.mxu0 %v1050_v1  ;;  %v756_v56 = vrot.slane %v755_v49, 4  ;;  %v776_v61 = vsel %vm1104_vm8, %v966_v52, %v775_v37 }
  0x41   : > { %v956_v55 = vcombine.low %v681_v48, %v682_v40  ;;  %v766_v57 = vrot.slane %v765_v51, 4 }
  0x42   : > { %1014 = vmatmul.mubr.msk.bf16.vlgmr.msra.gmra.mxu0 %vm184_vm10, %v1108_v32  ;;  %v761_v50 = vsel %vm1121_vm9, %v756_v56, %v760_v46 }
  0x43   : > { %v689_v59 = vand.u32 %v956_v55, %v1098_v23  ;;  %1025 = vmatprep.mubr.msk.bf16.mxu0 %vm1051_vm1, %v1050_v1  ;;  %v770_v60 = vmax.bf16 %v766_v57, %v747_v31  ;;  %v769_v54 = vmax.bf16 %v761_v50, %v746_v25  ;;  %v936_v25 = vld [vmem:[%s1243_s15 + $0xc] sm:$0xf]  ;;  %v947_v31 = vld [vmem:[%s1243_s15 + $0x10] sm:$0xf] }
  0x45   : > { %1018 = vmatpush3.bf16.msra.mxu1 %v689_v59  ;;  %v781_v62 = vmax.bf16 %v777_v58, %v770_v60  ;;  %v780_v63 = vmax.bf16 %v776_v61, %v769_v54 }
  0x47   : > { %v967_v0 = vcombine.low %v780_v63, %v781_v62 }
  0x48   : > { %1020 = vmatmul.mubr.msk.bf16.vlgmr.msra.gmra.mxu1 %vm184_vm10, %v1108_v32 }
  0x49   : > { %v788_v2 = vand.u32 %v967_v0, %v1098_v23  ;;  %v238_v23 = vld [vmem:[%s1243_s15] sm:$0xf] }
  0x4b   : > { %1024 = vmatpush3.bf16.msra.mxu0 %v788_v2 }
  0x4e   : > { %1026 = vmatmul.mubr.msk.bf16.vlgmr.msra.gmra.mxu0 %vm184_vm10, %v1108_v32 }
  0xe9   : > { %v229_v1 = vpop.f32.mrf.mxu0 }
  0xea   : > { %v235_v32 = vpack.c.bf16 %v229_v1, %v229_v1 }
  0xeb   : > { %v991_v53 = vpop.f32.mrf.mxu0 }
  0xec   : > { %v239_v3 = vsel %vm1246_vm12, %v235_v32, %v238_v23 }
  0xed   : > { %240 = vst [vmem:[%s1243_s15] sm:$0xf] %v239_v3  ;;  %v329_v4 = vpop.f32.mrf.mxu1  ;;  %v232_v6 = vpop.f32.mrf.mxu0 }
  0xee   : > { %v335_v7 = vpack.c.bf16 %v329_v4, %v329_v4 }
  0xef   : > { %v997_v8 = vpop.f32.mrf.mxu1  ;;  %v992_v10 = vpop.f32.mrf.mxu0 }
  0xf0   : > { %v338_v11 = vsel %vm1246_vm12, %v335_v7, %v914_v5 }
  0xf1   : > { %915 = vst [vmem:[%s1243_s15 + $0x4] sm:$0xf] %v338_v11  ;;  %v332_v12 = vpop.f32.mrf.mxu1 }
  0xf3   : > { %v998_v13 = vpop.f32.mrf.mxu1 }
  0xf5   : > { %v428_v14 = vpop.f32.mrf.mxu0 }
  0xf6   : > { %v434_v16 = vpack.c.bf16 %v428_v14, %v428_v14 }
  0xf7   : > { %v1003_v17 = vpop.f32.mrf.mxu0 }
  0xf8   : > { %v437_v19 = vsel %vm1246_vm12, %v434_v16, %v925_v9 }
  0xf9   : > { %926 = vst [vmem:[%s1243_s15 + $0x8] sm:$0xf] %v437_v19  ;;  %v431_v20 = vpop.f32.mrf.mxu0 }
  0xfb   : > { %v1004_v21 = vpop.f32.mrf.mxu0 }
  0xfc   : > { %v527_v24 = vpop.f32.mrf.mxu1 }
  0xfd   : > { %v533_v26 = vpack.c.bf16 %v527_v24, %v527_v24 }
  0xfe   : > { %v1009_v15 = vpop.f32.mrf.mxu1 }
  0xff   : > { %v536_v27 = vsel %vm1246_vm12, %v533_v26, %v936_v25 }
 0x100   : > { %937 = vst [vmem:[%s1243_s15 + $0xc] sm:$0xf] %v536_v27  ;;  %v530_v28 = vpop.f32.mrf.mxu1 }
 0x102   : > { %v626_v29 = vpop.f32.mrf.mxu0  ;;  %v1010_v34 = vpop.f32.mrf.mxu1 }
 0x103   : > { %v632_v35 = vpack.c.bf16 %v626_v29, %v626_v29 }
 0x104   : > { %v1015_v18 = vpop.f32.mrf.mxu0 }
 0x105   : > { %v635_v36 = vsel %vm1246_vm12, %v632_v35, %v947_v31 }
 0x106   : > { %948 = vst [vmem:[%s1243_s15 + $0x10] sm:$0xf] %v635_v36  ;;  %v629_v22 = vpop.f32.mrf.mxu0 }
 0x108   : > { %v725_v33 = vpop.f32.mrf.mxu1  ;;  %v1016_v39 = vpop.f32.mrf.mxu0 }
 0x109   : > { %v731_v41 = vpack.c.bf16 %v725_v33, %v725_v33 }
 0x10a   : > { %v1021_v42 = vpop.f32.mrf.mxu1 }
 0x10b   : > { %v734_v43 = vsel %vm1246_vm12, %v731_v41, %v958_v38 }
 0x10c   : > { %959 = vst [vmem:[%s1243_s15 + $0x14] sm:$0xf] %v734_v43  ;;  %v728_v44 = vpop.f32.mrf.mxu1 }
 0x10e   : > { %v1022_v45 = vpop.f32.mrf.mxu1  ;;  %v824_v46 = vpop.f32.mrf.mxu0 }
 0x10f   : > { %v830_v37 = vpack.c.bf16 %v824_v46, %v824_v46 }
 0x110   : > { %v1027_v48 = vpop.f32.mrf.mxu0 }
 0x111   : > { %v833_v40 = vsel %vm1246_vm12, %v830_v37, %v969_v47 }
 0x112   : > { %970 = vst [vmem:[%s1243_s15 + $0x18] sm:$0xf] %v833_v40  ;;  %v827_v49 = vpop.f32.mrf.mxu0 }
 0x114   : > { %v1028_v51 = vpop.f32.mrf.mxu0 }
 0x115 PF: > { %s11_s6 = sadd.s32 1, %s1048_s6  }
 0x116   : > { %p8_p4 = scmp.ge.s32.totalorder %s11_s6, 4  }
 0x118   :  { %10 = sbr.rel (!%p8_p4) target bundleno = 1 (0x1), region = 74 }

// kernel: alexnet_fe_forward.10
= control target key start
LH: loop header
LB: loop body
LE: loop exit
PB: predicated region body
PF: predicated region fallthrough
CT: control target
= control target key end

     0   :  { %s545_s6 = smov 0   ;;  %s585_s0 = inlined_call_operand.vmem [shape: bf16[2,7,7,192], index: 0, kind: input, shape index: {}]   ;;  %s586_s1 = inlined_call_operand.vmem [shape: bf16[2,3,3,192], index: 1, kind: output, shape index: {}]  }
   0x1 LB: > { %s472_s7 = sadd.s32 4294967295, %s529_s6   ;;  %p476_p0 = scmp.ge.s32.totalorder %s529_s6, 1  ;;  %s529_s6 = sphi %s545_s6, %s11_s6  }
   0x2   : > { %p87_p1 = scmp.lt.s32.totalorder %s529_s6, 3 }
   0x4   : > { %p88_p2 = pnand %p476_p0, %p87_p1 }
   0x5   : > { %p107_p3 = scmp.lt.s32.totalorder (!%p88_p2), %s472_s7, 1 }
   0x6   : > { %91 = sbr.rel (%p88_p2) target bundleno = 249 (0xf9), region = 24 }
   0xb   : > { %v531_v0 = vmov 0   ;;  %s590_s7 = smov (!%p107_p3, %s472_s7), 1  ;;  %v118_v12 = vlaneseq  ;;  %vm159_vm0 = vcmask 1041408   ;;  %vm160_vm1 = vcmask 1042432  }
   0xc   : > { %201 = vmatprep.mubr.bf16.mxu0 %v531_v0  ;;  %299 = vmatprep.mubr.bf16.mxu1 %v531_v0  ;;  %s509_s8 = smul.u32 56, %s590_s7  ;;  %v532_v38 = vmov 65535   ;;  %v533_v51 = vmov 0.0   ;;  %vm155_vm3 = vcmask 39936   ;;  %v534_v63 = vmov 1983009808  }
   0xd   : > { %v561_v22 = vshrl.u32 %v118_v12, 7  ;;  %v121_v30 = vand.u32 127, %v118_v12  ;;  %v161_v39 = vsel %vm159_vm0, 4294967295, %v532_v38  ;;  %s510_s12 = smul.u32 12, %s590_s7  ;;  %vm224_vm4 = vsmask.f32 1280 }
   0xe   : > { %s111_s11 = scalar_lea.vmem %s585_s0, %s509_s8  ;;  %v162_v45 = vsel %vm160_vm1, %v161_v39, 0  ;;  %vm226_vm5 = vcmask 519170   ;;  %vm227_vm6 = vsmask.f32 3328  ;;  %vm225_vm7 = vmand %vm159_vm0, %vm224_vm4 }
   0xf   : > { %v127_v1 = vld [vmem:[%s111_s11] sm:$0xff]  ;;  %v480_v2 = vld [vmem:[%s111_s11 + $0x8] sm:$0xff]  ;;  %v481_v3 = vld [vmem:[%s111_s11 + $0x10] sm:$0xff]  ;;  %v122_v33 = vmul.u32 2, %v561_v22  ;;  %s116_s15 = scalar_lea.vmem %s586_s1, %s510_s12 }
  0x10   : > { %v132_v4 = vmax.bf16 %v480_v2, %v127_v1  ;;  %v488_v5 = vld [vmem:[%s111_s11 + $0x18] sm:$0xff]  ;;  %v489_v6 = vld [vmem:[%s111_s11 + $0x20] sm:$0xff]  ;;  %v498_v7 = vld [vmem:[%s111_s11 + $0x28] sm:$0xff]  ;;  %v216_v1 = vunpack.c.l.s4 %v534_v63 }
  0x11   : > { %v238_v8 = vmax.bf16 %v488_v5, %v481_v3  ;;  %v499_v9 = vld [vmem:[%s111_s11 + $0x30] sm:$0xff]  ;;  %v330_v10 = vmax.bf16 %v498_v7, %v489_v6  ;;  %vm123_vm2 = vcmp.eq.s32.totalorder %v121_v30, %v122_v33  ;;  %vm228_vm8 = vmand %vm226_vm5, %vm227_vm6 }
  0x12   : > { %v133_v11 = vmax.bf16 %v481_v3, %v132_v4  ;;  %v479_v52 = vsel %vm123_vm2, 1.0, %v533_v51  ;;  %v217_v2 = vunpack.c.0.s8 %v216_v1  ;;  %vm572_vm9 = vmor %vm228_vm8, %vm225_vm7 }
  0x13   : > { %v239_v13 = vmax.bf16 %v489_v6, %v238_v8  ;;  %v331_v14 = vmax.bf16 %v499_v9, %v330_v10  ;;  %v126_v60 = vpack.c.bf16 %v479_v52, %v479_v52  ;;  %v230_v9 = vld [vmem:[%s116_s15] sm:$0xf] }
  0x14   : > { %v135_v15 = vshrl.u32 %v133_v11, 16  ;;  %v138_v16 = vshll.u32 %v133_v11, 16  ;;  %v482_v32 = vrot.slane %v133_v11, 9  ;;  %v220_v4 = vsub.s32 %v217_v2, %v561_v22 }
  0x15   : > { %v241_v17 = vshrl.u32 %v239_v13, 16  ;;  %v244_v18 = vshll.u32 %v239_v13, 16  ;;  %v333_v19 = vshrl.u32 %v331_v14, 16  ;;  %v336_v23 = vshll.u32 %v331_v14, 16 }
  0x16   : > { %v137_v20 = vrot.slane %v135_v15, 4  ;;  %v140_v21 = vrot.slane %v138_v16, 5  ;;  %v490_v36 = vrot.slane %v239_v13, 9  ;;  %v500_v41 = vrot.slane %v331_v14, 9 }
  0x17   : > { %v243_v24 = vrot.slane %v241_v17, 4  ;;  %v246_v25 = vrot.slane %v244_v18, 5  ;;  %v335_v26 = vrot.slane %v333_v19, 4  ;;  %v338_v28 = vrot.slane %v336_v23, 5  ;;  %v505_v23 = vld [vmem:[%s116_s15 + $0x8] sm:$0xf] }
  0x18   : > { %v141_v27 = vor.u32 %v140_v21, %v137_v20 }
  0x19   : > { %v247_v29 = vor.u32 %v246_v25, %v243_v24  ;;  %v339_v34 = vor.u32 %v338_v28, %v335_v26 }
  0x1a   : > { %v142_v31 = vrot.slane %v141_v27, 4 }
  0x1b   : > { %v248_v35 = vrot.slane %v247_v29, 4  ;;  %v340_v40 = vrot.slane %v339_v34, 4 }
  0x1c   : > { %v144_v37 = vmax.bf16 %v142_v31, %v133_v11 }
  0x1d   : > { %v250_v42 = vmax.bf16 %v248_v35, %v239_v13  ;;  %v342_v44 = vmax.bf16 %v340_v40, %v331_v14  ;;  %v495_v13 = vld [vmem:[%s116_s15 + $0x4] sm:$0xf] }
  0x1e   : > { %v149_v43 = vmax.bf16 %v482_v32, %v144_v37 }
  0x1f   : > { %v255_v46 = vmax.bf16 %v490_v36, %v250_v42  ;;  %v347_v49 = vmax.bf16 %v500_v41, %v342_v44 }
  0x20   : > { %v484_v47 = vcombine.high %v149_v43, %v149_v43  ;;  %v483_v48 = vcombine.low %v149_v43, %v149_v43 }
  0x21   : > { %v492_v50 = vcombine.high %v255_v46, %v255_v46  ;;  %v491_v53 = vcombine.low %v255_v46, %v255_v46  ;;  %v502_v56 = vcombine.high %v347_v49, %v347_v49  ;;  %v501_v57 = vcombine.low %v347_v49, %v347_v49 }
  0x22   : > { %v167_v54 = vand.u32 %v484_v47, %v162_v45  ;;  %v164_v55 = vand.u32 %v483_v48, %v162_v45 }
  0x23   : > { %v265_v58 = vand.u32 %v492_v50, %v162_v45  ;;  %v262_v59 = vand.u32 %v491_v53, %v162_v45  ;;  %v357_v61 = vand.u32 %v502_v56, %v162_v45  ;;  %v354_v62 = vand.u32 %v501_v57, %v162_v45 }
  0x24   : > { %183 = vmatprep.subr.bf16.mxu0 %v167_v54 }
  0x25   : > { %184 = vmatpush1.bf16.msra.mxu0 %v164_v55  ;;  %281 = vmatprep.subr.bf16.mxu1 %v265_v58 }
  0x26   : > { %282 = vmatpush1.bf16.msra.mxu1 %v262_v59  ;;  %373 = vmatprep.subr.bf16.mxu0 %v357_v61 }
  0x28   : > { %485 = vmatmul.mubr.msk.bf16.vlgmr.msra.gmra.mxu0 %vm155_vm3, %v126_v60 }
  0x29   : > { %374 = vmatpush1.bf16.msra.mxu0 %v354_v62  ;;  %493 = vmatmul.mubr.msk.bf16.vlgmr.msra.gmra.mxu1 %vm155_vm3, %v126_v60 }
  0x2a   : > { %391 = vmatprep.mubr.bf16.mxu0 %v531_v0 }
  0x30   : > { %503 = vmatmul.mubr.msk.bf16.vlgmr.msra.gmra.mxu0 %vm155_vm3, %v126_v60 }
  0xe8   : > { %v203_v3 = vpop.f32.mrf.mxu0 }
  0xe9   : > { %v301_v5 = vpop.f32.mrf.mxu1 }
  0xea   : > { %v205_v0 = vpop.f32.mrf.mxu0 }
  0xeb   : > { %v486_v6 = vpack.c.bf16 %v205_v0, %v203_v3  ;;  %v303_v7 = vpop.f32.mrf.mxu1 }
  0xec   : > { %v207_v10 = vpop.f32.mrf.mxu0  ;;  %v494_v11 = vpack.c.bf16 %v303_v7, %v301_v5 }
  0xed   : > { %v221_v12 = vrot.slane %v486_v6, %v220_v4  ;;  %v305_v14 = vpop.f32.mrf.mxu1 }
  0xee   : > { %v319_v15 = vrot.slane %v494_v11, %v220_v4  ;;  %v208_v16 = vpop.f32.mrf.mxu0 }
  0xef   : > { %v231_v17 = vsel %vm572_vm9, %v221_v12, %v230_v9  ;;  %v306_v18 = vpop.f32.mrf.mxu1 }
  0xf0   : > { %232 = vst [vmem:[%s116_s15] sm:$0xf] %v231_v17  ;;  %v323_v19 = vsel %vm572_vm9, %v319_v15, %v495_v13  ;;  %v393_v20 = vpop.f32.mrf.mxu0 }
  0xf1   : > { %496 = vst [vmem:[%s116_s15 + $0x4] sm:$0xf] %v323_v19 }
  0xf2   : > { %v395_v21 = vpop.f32.mrf.mxu0 }
  0xf3   : > { %v504_v22 = vpack.c.bf16 %v395_v21, %v393_v20 }
  0xf4   : > { %v397_v24 = vpop.f32.mrf.mxu0 }
  0xf5   : > { %v411_v25 = vrot.slane %v504_v22, %v220_v4 }
  0xf6   : > { %v398_v26 = vpop.f32.mrf.mxu0 }
  0xf7   : > { %v415_v27 = vsel %vm572_vm9, %v411_v25, %v505_v23 }
  0xf8   : > { %506 = vst [vmem:[%s116_s15 + $0x8] sm:$0xf] %v415_v27 }
  0xf9 PF: > { %s11_s6 = sadd.s32 1, %s529_s6  }
  0xfa   : > { %p8_p4 = scmp.ge.s32.totalorder %s11_s6, 4  }
  0xfc   :  { %10 = sbr.rel (!%p8_p4) target bundleno = 1 (0x1), region = 62 }

// kernel: alexnet_fe_forward.11
= control target key start
LH: loop header
LB: loop body
LE: loop exit
PB: predicated region body
PF: predicated region fallthrough
CT: control target
= control target key end

     0   :  { %s4709_s12 = smov 0   ;;  %s4711_s13 = smov 0   ;;  %s5996_s0 = inlined_call_operand.vmem [shape: bf16[2,5,5,192], index: 0, kind: input, shape index: {}]   ;;  %s5997_s1 = inlined_call_operand.vmem [shape: bf16[9,192,384], index: 1, kind: input, shape index: {}]   ;;  %s5998_s2 = inlined_call_operand.vmem [shape: f32[1,384], index: 2, kind: input, shape index: {}]   ;;  %s5999_s3 = inlined_call_operand.vmem [shape: bf16[2,3,3,384], index: 3, kind: output, shape index: {}]  }
   0x1   :  { %s4713_s14 = smov 0   ;;  %s4715_s15 = smov 0  }
   0x2   :  { %s4717_s16 = smov 0  }
   0x3 LB: > { %s22_s17 = sadd.s32 1, %s4677_s14  ;;  %s25_s18 = sadd.s32 1, %s4681_s15  ;;  %s4685_s16 = sphi %s4717_s16, %s13_s16   ;;  %s4681_s15 = sphi %s4715_s15, %s6007_s15   ;;  %s4677_s14 = sphi %s4713_s14, %s6006_s14   ;;  %s4673_s13 = sphi %s4711_s13, %s6005_s13   ;;  %s4669_s12 = sphi %s4709_s12, %s6004_s12  }
   0x4   : > { %p23_p0 = scmp.ge.s32.totalorder %s22_s17, 3  ;;  %p3405_p1 = scmp.ge.s32.totalorder %s4685_s16, 1 }
   0x5   : > { %p151_p2 = scmp.lt.s32.totalorder %s4685_s16, 7 }
   0x6   : > { %s6009_s17 = smov (%p23_p0, %s22_s17), 0  ;;  %s6011_s18 = smov (!%p23_p0, %s25_s18), %s4681_s15 }
   0x7   : > { %p152_p3 = pnand %p3405_p1, %p151_p2  ;;  %p27_p4 = scmp.ge.s32.totalorder %s6011_s18, 2 }
   0x8   : > { %p179_p5 = scmp.lt.s32.totalorder (!%p152_p3), %s4673_s13, 1  ;;  %s4157_s21 = sshll.u32 (!%p152_p3), %s4669_s12, 3 }
   0x9   : > { %s6013_s18 = smov (%p27_p4, %s6011_s18), 0  ;;  %155 = sbr.rel (%p152_p3) target bundleno = 654 (0x28e), region = 32 }
   0xa   : > { %p186_p6 = scmp.lt.s32.totalorder (!%p152_p3), %s4669_s12, 2 }
   0xe   : > { %v4203_v0 = vld [vmem:[%s5997_s1 + $0xac] ss:$12 sps:$4 sm:$0xff]   ;;  %v4687_v1 = vmov 0   ;;  %v4205_v2 = vld [vmem:[%s5997_s1 + $0xb0] ss:$12 sps:$4 sm:$0xff]   ;;  %s6015_s13 = smov (!%p179_p5, %s4673_s13), 1 }
   0xf   : > { %509 = vmatprep.subr.bf16.mxu1 %v4687_v1  ;;  %468 = vmatprep.subr.bf16.mxu0 %v4203_v0  ;;  %v4206_v3 = vld [vmem:[%s5997_s1 + $0xa8] ss:$12 sps:$4 sm:$0xff]   ;;  %v4209_v5 = vld [vmem:[%s5997_s1 + $0x98] ss:$12 sps:$4 sm:$0xff]   ;;  %v4210_v6 = vld [vmem:[%s5997_s1 + $0x90] ss:$12 sps:$4 sm:$0xff]  }
  0x10   : > { %510 = vmatpush1.bf16.msra.mxu1 %v4205_v2  ;;  %v4207_v4 = vld [vmem:[%s5997_s1 + $0x94] ss:$12 sps:$4 sm:$0xff]   ;;  %469 = vmatpush1.bf16.msra.mxu0 %v4206_v3  ;;  %v4211_v7 = vld [vmem:[%s5997_s1 + $0x7c] ss:$12 sps:$4 sm:$0xff]   ;;  %v4214_v9 = vld [vmem:[%s5997_s1 + $0x78] ss:$12 sps:$4 sm:$0xff]  }
  0x11   : > { %511 = vmatprep.subr.bf16.mxu1 %v4687_v1  ;;  %470 = vmatprep.subr.bf16.mxu0 %v4207_v4  ;;  %v4213_v8 = vld [vmem:[%s5997_s1 + $0x80] ss:$12 sps:$4 sm:$0xff]   ;;  %v4215_v10 = vld [vmem:[%s5997_s1 + $0x64] ss:$12 sps:$4 sm:$0xff]   ;;  %v4217_v11 = vld [vmem:[%s5997_s1 + $0x68] ss:$12 sps:$4 sm:$0xff]  }
  0x12   : > { %v4218_v12 = vld [vmem:[%s5997_s1 + $0x60] ss:$12 sps:$4 sm:$0xff]   ;;  %v4221_v14 = vld [vmem:[%s5997_s1 + $0x50] ss:$12 sps:$4 sm:$0xff]   ;;  %v4222_v15 = vld [vmem:[%s5997_s1 + $0x48] ss:$12 sps:$4 sm:$0xff]  }
  0x13   : > { %v4219_v13 = vld [vmem:[%s5997_s1 + $0x4c] ss:$12 sps:$4 sm:$0xff]   ;;  %v4223_v16 = vld [vmem:[%s5997_s1 + $0x34] ss:$12 sps:$4 sm:$0xff]   ;;  %s4158_s4 = smul.u32 40, %s6015_s13  ;;  %vm464_vm0 = vcmask 523264  }
  0x14   : > { %512 = vmatpush1.bf16.msra.mxu1 %v4209_v5  ;;  %471 = vmatpush1.bf16.msra.mxu0 %v4210_v6  ;;  %v4225_v17 = vld [vmem:[%s5997_s1 + $0x38] ss:$12 sps:$4 sm:$0xff]   ;;  %v4226_v18 = vld [vmem:[%s5997_s1 + $0x30] ss:$12 sps:$4 sm:$0xff]   ;;  %v4229_v20 = vld [vmem:[%s5997_s1 + $0x20] ss:$12 sps:$4 sm:$0xff]  }
  0x15   : > { %513 = vmatprep.subr.bf16.mxu1 %v4687_v1  ;;  %472 = vmatprep.subr.bf16.mxu0 %v4211_v7  ;;  %v4227_v19 = vld [vmem:[%s5997_s1 + $0x1c] ss:$12 sps:$4 sm:$0xff]   ;;  %s183_s20 = scalar_lea.vmem %s5996_s0, %s4158_s4  ;;  %v4230_v21 = vld [vmem:[%s5997_s1 + $0x18] ss:$12 sps:$4 sm:$0xff]   ;;  %v4234_v24 = vld [vmem:[%s5997_s1] ss:$12 sps:$4 sm:$0xff]  }
  0x16   : > { %v4231_v22 = vld [vmem:[%s5997_s1 + $0x4] ss:$12 sps:$4 sm:$0xff]   ;;  %s4825_s28 = scalar_lea.vmem %s183_s20, %s4157_s21  ;;  %v4233_v23 = vld [vmem:[%s5997_s1 + $0x8] ss:$12 sps:$4 sm:$0xff]   ;;  %v4235_v26 = vld [vmem:[%s5997_s1 + $0x10c] ss:$12 sps:$4 sm:$0xff]  }
  0x17   : > { %v217_v25 = vld [vmem:[%s4825_s28] sm:$0x33]  ;;  %v4237_v28 = vld [vmem:[%s5997_s1 + $0x110] ss:$12 sps:$4 sm:$0xff]   ;;  %v4238_v29 = vld [vmem:[%s5997_s1 + $0x108] ss:$12 sps:$4 sm:$0xff]  }
  0x18   : > { %514 = vmatpush1.bf16.msra.mxu1 %v4213_v8  ;;  %473 = vmatpush1.bf16.msra.mxu0 %v4214_v9  ;;  %v3411_v27 = vcombine.high %v217_v25, %v217_v25  ;;  %v4239_v30 = vld [vmem:[%s5997_s1 + $0xf4] ss:$12 sps:$4 sm:$0xff]   ;;  %v4241_v31 = vld [vmem:[%s5997_s1 + $0xf8] ss:$12 sps:$4 sm:$0xff]   ;;  %v4242_v32 = vld [vmem:[%s5997_s1 + $0xf0] ss:$12 sps:$4 sm:$0xff]   ;;  %v4880_v43 = vcombine.low %v217_v25, %v217_v25 }
  0x19   : > { %515 = vmatprep.subr.bf16.mxu1 %v4687_v1  ;;  %474 = vmatprep.subr.bf16.mxu0 %v4215_v10  ;;  %v4243_v33 = vld [vmem:[%s5997_s1 + $0xdc] ss:$12 sps:$4 sm:$0xff]   ;;  %v4245_v34 = vld [vmem:[%s5997_s1 + $0xe0] ss:$12 sps:$4 sm:$0xff]   ;;  %v4246_v35 = vld [vmem:[%s5997_s1 + $0xd8] ss:$12 sps:$4 sm:$0xff]  }
  0x1a   : > { %3449 = vmatprep.mubr.msk.bf16.mxu1 %vm464_vm0, %v3411_v27  ;;  %3448 = vmatprep.mubr.msk.bf16.mxu0 %vm464_vm0, %v3411_v27  ;;  %v4247_v36 = vld [vmem:[%s5997_s1 + $0xc4] ss:$12 sps:$4 sm:$0xff]   ;;  %v610_v37 = vshll.u32 %v3411_v27, 16  ;;  %v4249_v38 = vld [vmem:[%s5997_s1 + $0xc8] ss:$12 sps:$4 sm:$0xff]   ;;  %v608_v41 = vshrl.u32 %v3411_v27, 16 }
  0x1b   : > { %v4250_v39 = vld [vmem:[%s5997_s1 + $0xc0] ss:$12 sps:$4 sm:$0xff]   ;;  %v4256_v44 = vld [vmem:[%s5997_s1 + $0x1d0] ss:$12 sps:$4 sm:$0xff]   ;;  %v4253_v45 = vld [vmem:[%s5997_s1 + $0x1c8] ss:$12 sps:$4 sm:$0xff]  }
  0x1c   : > { %516 = vmatpush1.bf16.msra.mxu1 %v4217_v11  ;;  %475 = vmatpush1.bf16.msra.mxu0 %v4218_v12  ;;  %v4255_v40 = vld [vmem:[%s5997_s1 + $0x1cc] ss:$12 sps:$4 sm:$0xff]   ;;  %v612_v42 = vrot.slane %v610_v37, 1  ;;  %v4259_v46 = vld [vmem:[%s5997_s1 + $0x1b4] ss:$12 sps:$4 sm:$0xff]   ;;  %v604_v12 = vshll.u32 %v4880_v43, 16 }
  0x1d   : > { %517 = vmatprep.subr.bf16.mxu1 %v4687_v1  ;;  %476 = vmatprep.subr.bf16.mxu0 %v4219_v13  ;;  %v4260_v48 = vld [vmem:[%s5997_s1 + $0x1b8] ss:$12 sps:$4 sm:$0xff]   ;;  %v4257_v49 = vld [vmem:[%s5997_s1 + $0x1b0] ss:$12 sps:$4 sm:$0xff]   ;;  %v4264_v51 = vld [vmem:[%s5997_s1 + $0x1a0] ss:$12 sps:$4 sm:$0xff]  }
  0x1e   : > { %v613_v47 = vor.u32 %v612_v42, %v608_v41  ;;  %v4263_v50 = vld [vmem:[%s5997_s1 + $0x19c] ss:$12 sps:$4 sm:$0xff]   ;;  %v4261_v52 = vld [vmem:[%s5997_s1 + $0x198] ss:$12 sps:$4 sm:$0xff]   ;;  %v4265_v55 = vld [vmem:[%s5997_s1 + $0x180] ss:$12 sps:$4 sm:$0xff]  }
  0x1f   : > { %v4267_v53 = vld [vmem:[%s5997_s1 + $0x184] ss:$12 sps:$4 sm:$0xff]   ;;  %v4268_v54 = vld [vmem:[%s5997_s1 + $0x188] ss:$12 sps:$4 sm:$0xff]   ;;  %v4271_v56 = vld [vmem:[%s5997_s1 + $0x16c] ss:$12 sps:$4 sm:$0xff]  }
  0x20   : > { %518 = vmatpush1.bf16.msra.mxu1 %v4221_v14  ;;  %477 = vmatpush1.bf16.msra.mxu0 %v4222_v15  ;;  %v4272_v57 = vld [vmem:[%s5997_s1 + $0x170] ss:$12 sps:$4 sm:$0xff]   ;;  %v4269_v58 = vld [vmem:[%s5997_s1 + $0x168] ss:$12 sps:$4 sm:$0xff]   ;;  %v4276_v60 = vld [vmem:[%s5997_s1 + $0x158] ss:$12 sps:$4 sm:$0xff]  }
  0x21   : > { %519 = vmatprep.subr.bf16.mxu1 %v4687_v1  ;;  %478 = vmatprep.subr.bf16.mxu0 %v4223_v16  ;;  %v4275_v59 = vld [vmem:[%s5997_s1 + $0x154] ss:$12 sps:$4 sm:$0xff]   ;;  %v4273_v61 = vld [vmem:[%s5997_s1 + $0x150] ss:$12 sps:$4 sm:$0xff]   ;;  %v4277_v0 = vld [vmem:[%s5997_s1 + $0x138] ss:$12 sps:$4 sm:$0xff]  }
  0x22   : > { %v4279_v62 = vld [vmem:[%s5997_s1 + $0x13c] ss:$12 sps:$4 sm:$0xff]   ;;  %v4280_v63 = vld [vmem:[%s5997_s1 + $0x140] ss:$12 sps:$4 sm:$0xff]   ;;  %v4283_v2 = vld [vmem:[%s5997_s1 + $0x124] ss:$12 sps:$4 sm:$0xff]  }
  0x23   : > { %v4284_v3 = vld [vmem:[%s5997_s1 + $0x128] ss:$12 sps:$4 sm:$0xff]   ;;  %v4281_v4 = vld [vmem:[%s5997_s1 + $0x120] ss:$12 sps:$4 sm:$0xff]   ;;  %v4288_v6 = vld [vmem:[%s5997_s1 + $0x230] ss:$12 sps:$4 sm:$0xff]  }
  0x24   : > { %520 = vmatpush1.bf16.msra.mxu1 %v4225_v17  ;;  %479 = vmatpush1.bf16.msra.mxu0 %v4226_v18  ;;  %v4287_v5 = vld [vmem:[%s5997_s1 + $0x22c] ss:$12 sps:$4 sm:$0xff]   ;;  %v4285_v7 = vld [vmem:[%s5997_s1 + $0x228] ss:$12 sps:$4 sm:$0xff]   ;;  %v4289_v10 = vld [vmem:[%s5997_s1 + $0x210] ss:$12 sps:$4 sm:$0xff]  }
  0x25   : > { %521 = vmatprep.subr.bf16.mxu1 %v4687_v1  ;;  %480 = vmatprep.subr.bf16.mxu0 %v4227_v19  ;;  %v4291_v8 = vld [vmem:[%s5997_s1 + $0x214] ss:$12 sps:$4 sm:$0xff]   ;;  %v4292_v9 = vld [vmem:[%s5997_s1 + $0x218] ss:$12 sps:$4 sm:$0xff]   ;;  %v4295_v11 = vld [vmem:[%s5997_s1 + $0x1fc] ss:$12 sps:$4 sm:$0xff]  }
  0x26   : > { %v4296_v13 = vld [vmem:[%s5997_s1 + $0x200] ss:$12 sps:$4 sm:$0xff]   ;;  %v4293_v14 = vld [vmem:[%s5997_s1 + $0x1f8] ss:$12 sps:$4 sm:$0xff]   ;;  %v602_v16 = vshrl.u32 %v4880_v43, 16  ;;  %v606_v17 = vrot.slane %v604_v12, 1 }
  0x27   : > { %v4299_v15 = vld [vmem:[%s5997_s1 + $0x1e4] ss:$12 sps:$4 sm:$0xff]   ;;  %v4300_v19 = vld [vmem:[%s5997_s1 + $0x1e8] ss:$12 sps:$4 sm:$0xff]   ;;  %v4363_v12 = vld [vmem:[%s5997_s1 + $0x3c0] ss:$12 sps:$4 sm:$0xff]  }
  0x28   : > { %522 = vmatpush1.bf16.msra.mxu1 %v4229_v20  ;;  %481 = vmatpush1.bf16.msra.mxu0 %v4230_v21  ;;  %v4999_v18 = vld [vmem:[%s4825_s28] sm:$0x66]  ;;  %v4303_v21 = vld [vmem:[%s5997_s1 + $0x2ec] ss:$12 sps:$4 sm:$0xff]   ;;  %v4301_v25 = vld [vmem:[%s5997_s1 + $0x2e8] ss:$12 sps:$4 sm:$0xff]  }
  0x29   : > { %523 = vmatprep.subr.bf16.mxu1 %v4687_v1  ;;  %482 = vmatprep.subr.bf16.mxu0 %v4231_v22  ;;  %v4297_v20 = vld [vmem:[%s5997_s1 + $0x1e0] ss:$12 sps:$4 sm:$0xff]   ;;  %v3585_v22 = vcombine.high %v4999_v18, %v4999_v18  ;;  %v4320_v37 = vld [vmem:[%s5997_s1 + $0x290] ss:$12 sps:$4 sm:$0xff]   ;;  %s6017_s12 = smov (!%p186_p6, %s4669_s12), 2  ;;  %s4160_s22 = smul.u32 9, %s6015_s13 }
  0x2a   : > { %v4321_v41 = vld [vmem:[%s5997_s1 + $0x270] ss:$12 sps:$4 sm:$0xff]   ;;  %s4159_s23 = smul.u32 3, %s6017_s12  ;;  %vm3293_vm1 = vcmask 1041408   ;;  %vm3294_vm2 = vsmask.f32 1280 }
  0x2b   : > { %v950_v27 = vrot.slane %v3585_v22, 1  ;;  %v4327_v42 = vld [vmem:[%s5997_s1 + $0x25c] ss:$12 sps:$4 sm:$0xff]   ;;  %v4381_v22 = vld [vmem:[%s5997_s1 + $0x364] ss:$12 sps:$4 sm:$0xff]   ;;  %vm3296_vm3 = vcmask 1043458   ;;  %vm5965_vm5 = vmand %vm3293_vm1, %vm3294_vm2 }
  0x2c   : > { %524 = vmatpush1.bf16.msra.mxu1 %v4233_v23  ;;  %483 = vmatpush1.bf16.msra.mxu0 %v4234_v24  ;;  %v607_v23 = vor.u32 %v606_v17, %v602_v16  ;;  %v4304_v24 = vld [vmem:[%s5997_s1 + $0x2f0] ss:$12 sps:$4 sm:$0xff]   ;;  %v4373_v16 = vld [vmem:[%s5997_s1 + $0x394] ss:$12 sps:$4 sm:$0xff]   ;;  %v4374_v17 = vld [vmem:[%s5997_s1 + $0x398] ss:$12 sps:$4 sm:$0xff]   ;;  %s190_s24 = sadd.s32 %s4160_s22, %s4159_s23 }
  0x2d   : > { %533 = vmatprep.subr.bf16.mxu1 %v4687_v1  ;;  %492 = vmatprep.subr.bf16.mxu0 %v4235_v26  ;;  %v4307_v26 = vld [vmem:[%s5997_s1 + $0x2d4] ss:$12 sps:$4 sm:$0xff]   ;;  %vm3297_vm4 = vsmask.f32 3328  ;;  %s3407_s12 = sshll.u32 %s190_s24, 1  ;;  %vm3300_vm7 = vcmask 1045508  }
  0x2e   : > { %vm5969_vm6 = vmand %vm3296_vm3, %vm3297_vm4  ;;  %vm3301_vm8 = vsmask.f32 5376  ;;  %s192_s26 = scalar_lea.vmem %s5999_s3, %s3407_s12 }
  0x2f   : > { %vm3299_vm9 = vmor %vm5969_vm6, %vm5965_vm5 }
  0x30   : > { %534 = vmatpush2.bf16.msra.mxu1 %v4237_v28  ;;  %493 = vmatpush2.bf16.msra.mxu0 %v4238_v29  ;;  %v4308_v28 = vld [vmem:[%s5997_s1 + $0x2d8] ss:$12 sps:$4 sm:$0xff]   ;;  %v4305_v29 = vld [vmem:[%s5997_s1 + $0x2d0] ss:$12 sps:$4 sm:$0xff]   ;;  %vm3302_vm10 = vmand %vm3300_vm7, %vm3301_vm8 }
  0x31   : > { %535 = vmatprep.subr.bf16.mxu1 %v4687_v1  ;;  %494 = vmatprep.subr.bf16.mxu0 %v4239_v30  ;;  %v4311_v30 = vld [vmem:[%s5997_s1 + $0x2bc] ss:$12 sps:$4 sm:$0xff]   ;;  %vm3303_vm11 = vmor %vm3302_vm10, %vm3299_vm9 }
  0x34   : > { %536 = vmatpush2.bf16.msra.mxu1 %v4241_v31  ;;  %495 = vmatpush2.bf16.msra.mxu0 %v4242_v32  ;;  %v4312_v31 = vld [vmem:[%s5997_s1 + $0x2c0] ss:$12 sps:$4 sm:$0xff]   ;;  %v4309_v32 = vld [vmem:[%s5997_s1 + $0x2b8] ss:$12 sps:$4 sm:$0xff]  }
  0x35   : > { %537 = vmatprep.subr.bf16.mxu1 %v4687_v1  ;;  %496 = vmatprep.subr.bf16.mxu0 %v4243_v33  ;;  %v4315_v33 = vld [vmem:[%s5997_s1 + $0x2a4] ss:$12 sps:$4 sm:$0xff]  }
  0x38   : > { %538 = vmatpush2.bf16.msra.mxu1 %v4245_v34  ;;  %497 = vmatpush2.bf16.msra.mxu0 %v4246_v35  ;;  %v4316_v34 = vld [vmem:[%s5997_s1 + $0x2a8] ss:$12 sps:$4 sm:$0xff]   ;;  %v4313_v35 = vld [vmem:[%s5997_s1 + $0x2a0] ss:$12 sps:$4 sm:$0xff]  }
  0x39   : > { %539 = vmatprep.subr.bf16.mxu1 %v4687_v1  ;;  %498 = vmatprep.subr.bf16.mxu0 %v4247_v36  ;;  %v4319_v36 = vld [vmem:[%s5997_s1 + $0x28c] ss:$12 sps:$4 sm:$0xff]  }
  0x3c   : > { %540 = vmatpush2.bf16.msra.mxu1 %v4249_v38  ;;  %499 = vmatpush2.bf16.msra.mxu0 %v4250_v39  ;;  %v4317_v38 = vld [vmem:[%s5997_s1 + $0x288] ss:$12 sps:$4 sm:$0xff]  }
  0x3d   : > { %851 = vmatprep.subr.bf16.mxu1 %v4687_v1  ;;  %810 = vmatprep.subr.bf16.mxu0 %v4255_v40  ;;  %v4323_v39 = vld [vmem:[%s5997_s1 + $0x274] ss:$12 sps:$4 sm:$0xff]   ;;  %v4324_v40 = vld [vmem:[%s5997_s1 + $0x278] ss:$12 sps:$4 sm:$0xff]  }
  0x3f   : > { %542 = vmatmul.mubr.bf16.vlgmr.msra.gmra.mxu1 %v4880_v43  ;;  %501 = vmatmul.mubr.bf16.vlgmr.msra.gmra.mxu0 %v4880_v43  ;;  %v4328_v43 = vld [vmem:[%s5997_s1 + $0x260] ss:$12 sps:$4 sm:$0xff]  }
  0x40   : > { %852 = vmatpush1.bf16.msra.mxu1 %v4256_v44  ;;  %811 = vmatpush1.bf16.msra.mxu0 %v4253_v45  ;;  %v4325_v44 = vld [vmem:[%s5997_s1 + $0x258] ss:$12 sps:$4 sm:$0xff]  }
  0x41   : > { %853 = vmatprep.subr.bf16.mxu1 %v4687_v1  ;;  %812 = vmatprep.subr.bf16.mxu0 %v4259_v46  ;;  %v4331_v45 = vld [vmem:[%s5997_s1 + $0x244] ss:$12 sps:$4 sm:$0xff]   ;;  %v4332_v46 = vld [vmem:[%s5997_s1 + $0x248] ss:$12 sps:$4 sm:$0xff]  }
  0x42   : > { %3535 = vmatprep.mubr.msk.bf16.mxu1 %vm464_vm0, %v613_v47  ;;  %3534 = vmatprep.mubr.msk.bf16.mxu0 %vm464_vm0, %v613_v47  ;;  %v4329_v47 = vld [vmem:[%s5997_s1 + $0x240] ss:$12 sps:$4 sm:$0xff]  }
  0x44   : > { %854 = vmatpush1.bf16.msra.mxu1 %v4260_v48  ;;  %813 = vmatpush1.bf16.msra.mxu0 %v4257_v49  ;;  %v4335_v48 = vld [vmem:[%s5997_s1 + $0x34c] ss:$12 sps:$4 sm:$0xff]   ;;  %v4336_v49 = vld [vmem:[%s5997_s1 + $0x350] ss:$12 sps:$4 sm:$0xff]  }
  0x45   : > { %855 = vmatprep.subr.bf16.mxu1 %v4687_v1  ;;  %814 = vmatprep.subr.bf16.mxu0 %v4263_v50  ;;  %v4333_v50 = vld [vmem:[%s5997_s1 + $0x348] ss:$12 sps:$4 sm:$0xff]  }
  0x48   : > { %856 = vmatpush1.bf16.msra.mxu1 %v4264_v51  ;;  %815 = vmatpush1.bf16.msra.mxu0 %v4261_v52  ;;  %v4339_v51 = vld [vmem:[%s5997_s1 + $0x334] ss:$12 sps:$4 sm:$0xff]   ;;  %v4340_v52 = vld [vmem:[%s5997_s1 + $0x338] ss:$12 sps:$4 sm:$0xff]  }
  0x49   : > { %857 = vmatprep.subr.bf16.mxu1 %v4687_v1  ;;  %816 = vmatprep.subr.bf16.mxu0 %v4267_v53  ;;  %v4337_v53 = vld [vmem:[%s5997_s1 + $0x330] ss:$12 sps:$4 sm:$0xff]  }
  0x4c   : > { %858 = vmatpush1.bf16.msra.mxu1 %v4268_v54  ;;  %817 = vmatpush1.bf16.msra.mxu0 %v4265_v55  ;;  %v4343_v54 = vld [vmem:[%s5997_s1 + $0x31c] ss:$12 sps:$4 sm:$0xff]   ;;  %v4344_v55 = vld [vmem:[%s5997_s1 + $0x320] ss:$12 sps:$4 sm:$0xff]  }
  0x4d   : > { %859 = vmatprep.subr.bf16.mxu1 %v4687_v1  ;;  %818 = vmatprep.subr.bf16.mxu0 %v4271_v56  ;;  %v4341_v56 = vld [vmem:[%s5997_s1 + $0x318] ss:$12 sps:$4 sm:$0xff]  }
  0x50   : > { %860 = vmatpush1.bf16.msra.mxu1 %v4272_v57  ;;  %819 = vmatpush1.bf16.msra.mxu0 %v4269_v58  ;;  %v4347_v57 = vld [vmem:[%s5997_s1 + $0x304] ss:$12 sps:$4 sm:$0xff]   ;;  %v3584_v58 = vcombine.low %v4999_v18, %v4999_v18 }
  0x51   : > { %861 = vmatprep.subr.bf16.mxu1 %v4687_v1  ;;  %820 = vmatprep.subr.bf16.mxu0 %v4275_v59  ;;  %v4348_v59 = vld [vmem:[%s5997_s1 + $0x308] ss:$12 sps:$4 sm:$0xff]   ;;  %v4371_v18 = vld [vmem:[%s5997_s1 + $0x390] ss:$12 sps:$4 sm:$0xff]  }
  0x54   : > { %862 = vmatpush1.bf16.msra.mxu1 %v4276_v60  ;;  %821 = vmatpush1.bf16.msra.mxu0 %v4273_v61  ;;  %v4345_v60 = vld [vmem:[%s5997_s1 + $0x300] ss:$12 sps:$4 sm:$0xff]  }
  0x55   : > { %863 = vmatprep.subr.bf16.mxu1 %v4687_v1  ;;  %822 = vmatprep.subr.bf16.mxu0 %v4279_v62  ;;  %v4353_v61 = vld [vmem:[%s5997_s1 + $0x40c] ss:$12 sps:$4 sm:$0xff]   ;;  %v949_v62 = vrot.slane %v3584_v58, 1  ;;  %v4421_v58 = vld [vmem:[%s5997_s1 + $0x4b0] ss:$12 sps:$4 sm:$0xff]  }
  0x58   : > { %864 = vmatpush1.bf16.msra.mxu1 %v4280_v63  ;;  %823 = vmatpush1.bf16.msra.mxu0 %v4277_v0  ;;  %v5138_v63 = vld [vmem:[%s4825_s28 + $0x8] sm:$0x33]  ;;  %v4354_v0 = vld [vmem:[%s5997_s1 + $0x410] ss:$12 sps:$4 sm:$0xff]  }
  0x59   : > { %865 = vmatprep.subr.bf16.mxu1 %v4687_v1  ;;  %824 = vmatprep.subr.bf16.mxu0 %v4283_v2  ;;  %v4351_v2 = vld [vmem:[%s5997_s1 + $0x408] ss:$12 sps:$4 sm:$0xff]  }
  0x5c   : > { %866 = vmatpush1.bf16.msra.mxu1 %v4284_v3  ;;  %825 = vmatpush1.bf16.msra.mxu0 %v4281_v4  ;;  %v4357_v3 = vld [vmem:[%s5997_s1 + $0x3f4] ss:$12 sps:$4 sm:$0xff]   ;;  %v5152_v4 = vcombine.high %v5138_v63, %v5138_v63 }
  0x5d   : > { %875 = vmatprep.subr.bf16.mxu1 %v4687_v1  ;;  %834 = vmatprep.subr.bf16.mxu0 %v4287_v5  ;;  %v4358_v5 = vld [vmem:[%s5997_s1 + $0x3f8] ss:$12 sps:$4 sm:$0xff]  }
  0x60   : > { %876 = vmatpush2.bf16.msra.mxu1 %v4288_v6  ;;  %835 = vmatpush2.bf16.msra.mxu0 %v4285_v7  ;;  %v4355_v6 = vld [vmem:[%s5997_s1 + $0x3f0] ss:$12 sps:$4 sm:$0xff]  }
  0x61   : > { %877 = vmatprep.subr.bf16.mxu1 %v4687_v1  ;;  %836 = vmatprep.subr.bf16.mxu0 %v4291_v8  ;;  %v4361_v7 = vld [vmem:[%s5997_s1 + $0x3dc] ss:$12 sps:$4 sm:$0xff]   ;;  %v4362_v8 = vld [vmem:[%s5997_s1 + $0x3e0] ss:$12 sps:$4 sm:$0xff]  }
  0x64   : > { %878 = vmatpush2.bf16.msra.mxu1 %v4292_v9  ;;  %837 = vmatpush2.bf16.msra.mxu0 %v4289_v10  ;;  %v4359_v9 = vld [vmem:[%s5997_s1 + $0x3d8] ss:$12 sps:$4 sm:$0xff]  }
  0x65   : > { %879 = vmatprep.subr.bf16.mxu1 %v4687_v1  ;;  %838 = vmatprep.subr.bf16.mxu0 %v4295_v11  ;;  %v4365_v10 = vld [vmem:[%s5997_s1 + $0x3c4] ss:$12 sps:$4 sm:$0xff]   ;;  %v4366_v11 = vld [vmem:[%s5997_s1 + $0x3c8] ss:$12 sps:$4 sm:$0xff]  }
  0x68   : > { %880 = vmatpush2.bf16.msra.mxu1 %v4296_v13  ;;  %839 = vmatpush2.bf16.msra.mxu0 %v4293_v14  ;;  %v4369_v13 = vld [vmem:[%s5997_s1 + $0x3ac] ss:$12 sps:$4 sm:$0xff]   ;;  %v4370_v14 = vld [vmem:[%s5997_s1 + $0x3b0] ss:$12 sps:$4 sm:$0xff]  }
  0x69   : > { %881 = vmatprep.subr.bf16.mxu1 %v4687_v1  ;;  %840 = vmatprep.subr.bf16.mxu0 %v4299_v15  ;;  %v4367_v15 = vld [vmem:[%s5997_s1 + $0x3a8] ss:$12 sps:$4 sm:$0xff]  }
  0x6c   : > { %882 = vmatpush2.bf16.msra.mxu1 %v4300_v19  ;;  %841 = vmatpush2.bf16.msra.mxu0 %v4297_v20  ;;  %v4377_v19 = vld [vmem:[%s5997_s1 + $0x37c] ss:$12 sps:$4 sm:$0xff]   ;;  %v4378_v20 = vld [vmem:[%s5997_s1 + $0x380] ss:$12 sps:$4 sm:$0xff]  }
  0x6d   : > { %1188 = vmatprep.subr.bf16.mxu1 %v4687_v1  ;;  %1147 = vmatprep.subr.bf16.mxu0 %v4303_v21  ;;  %v4375_v21 = vld [vmem:[%s5997_s1 + $0x378] ss:$12 sps:$4 sm:$0xff]  }
  0x6f   : > { %884 = vmatmul.mubr.bf16.vlgmr.msra.gmra.mxu1 %v607_v23  ;;  %843 = vmatmul.mubr.bf16.vlgmr.msra.gmra.mxu0 %v607_v23  ;;  %v4382_v23 = vld [vmem:[%s5997_s1 + $0x368] ss:$12 sps:$4 sm:$0xff]  }
  0x70   : > { %1189 = vmatpush1.bf16.msra.mxu1 %v4304_v24  ;;  %1148 = vmatpush1.bf16.msra.mxu0 %v4301_v25  ;;  %v4379_v24 = vld [vmem:[%s5997_s1 + $0x360] ss:$12 sps:$4 sm:$0xff]  }
  0x71   : > { %1190 = vmatprep.subr.bf16.mxu1 %v4687_v1  ;;  %1149 = vmatprep.subr.bf16.mxu0 %v4307_v26  ;;  %v4385_v25 = vld [vmem:[%s5997_s1 + $0x46c] ss:$12 sps:$4 sm:$0xff]   ;;  %v4386_v26 = vld [vmem:[%s5997_s1 + $0x470] ss:$12 sps:$4 sm:$0xff]  }
  0x72   : > { %3623 = vmatprep.mubr.msk.bf16.mxu1 %vm464_vm0, %v950_v27  ;;  %3622 = vmatprep.mubr.msk.bf16.mxu0 %vm464_vm0, %v950_v27  ;;  %v4383_v27 = vld [vmem:[%s5997_s1 + $0x468] ss:$12 sps:$4 sm:$0xff]  }
  0x74   : > { %1191 = vmatpush1.bf16.msra.mxu1 %v4308_v28  ;;  %1150 = vmatpush1.bf16.msra.mxu0 %v4305_v29  ;;  %v4389_v28 = vld [vmem:[%s5997_s1 + $0x454] ss:$12 sps:$4 sm:$0xff]   ;;  %v4390_v29 = vld [vmem:[%s5997_s1 + $0x458] ss:$12 sps:$4 sm:$0xff]  }
  0x75   : > { %1192 = vmatprep.subr.bf16.mxu1 %v4687_v1  ;;  %1151 = vmatprep.subr.bf16.mxu0 %v4311_v30  ;;  %v4387_v30 = vld [vmem:[%s5997_s1 + $0x450] ss:$12 sps:$4 sm:$0xff]  }
  0x78   : > { %1193 = vmatpush1.bf16.msra.mxu1 %v4312_v31  ;;  %1152 = vmatpush1.bf16.msra.mxu0 %v4309_v32  ;;  %v4393_v31 = vld [vmem:[%s5997_s1 + $0x43c] ss:$12 sps:$4 sm:$0xff]   ;;  %v4394_v32 = vld [vmem:[%s5997_s1 + $0x440] ss:$12 sps:$4 sm:$0xff]  }
  0x79   : > { %1194 = vmatprep.subr.bf16.mxu1 %v4687_v1  ;;  %1153 = vmatprep.subr.bf16.mxu0 %v4315_v33  ;;  %v4391_v33 = vld [vmem:[%s5997_s1 + $0x438] ss:$12 sps:$4 sm:$0xff]  }
  0x7c   : > { %1195 = vmatpush1.bf16.msra.mxu1 %v4316_v34  ;;  %1154 = vmatpush1.bf16.msra.mxu0 %v4313_v35  ;;  %v4397_v34 = vld [vmem:[%s5997_s1 + $0x424] ss:$12 sps:$4 sm:$0xff]   ;;  %v4398_v35 = vld [vmem:[%s5997_s1 + $0x428] ss:$12 sps:$4 sm:$0xff]  }
  0x7d   : > { %1196 = vmatprep.subr.bf16.mxu1 %v4687_v1  ;;  %1155 = vmatprep.subr.bf16.mxu0 %v4319_v36  ;;  %v1628_v36 = vshll.u32 %v5152_v4, 16 }
  0x80   : > { %1197 = vmatpush1.bf16.msra.mxu1 %v4320_v37  ;;  %1156 = vmatpush1.bf16.msra.mxu0 %v4317_v38  ;;  %v4395_v37 = vld [vmem:[%s5997_s1 + $0x420] ss:$12 sps:$4 sm:$0xff]  }
  0x81   : > { %1198 = vmatprep.subr.bf16.mxu1 %v4687_v1  ;;  %1157 = vmatprep.subr.bf16.mxu0 %v4323_v39  ;;  %v4403_v38 = vld [vmem:[%s5997_s1 + $0x52c] ss:$12 sps:$4 sm:$0xff]   ;;  %v4404_v39 = vld [vmem:[%s5997_s1 + $0x530] ss:$12 sps:$4 sm:$0xff]  }
  0x84   : > { %1199 = vmatpush1.bf16.msra.mxu1 %v4324_v40  ;;  %1158 = vmatpush1.bf16.msra.mxu0 %v4321_v41  ;;  %v1626_v40 = vshrl.u32 %v5152_v4, 16  ;;  %v1630_v41 = vrot.slane %v1628_v36, 1 }
  0x85   : > { %1200 = vmatprep.subr.bf16.mxu1 %v4687_v1  ;;  %1159 = vmatprep.subr.bf16.mxu0 %v4327_v42  ;;  %v5275_v42 = vcombine.low %v5138_v63, %v5138_v63  ;;  %v4431_v63 = vld [vmem:[%s5997_s1 + $0x484] ss:$12 sps:$4 sm:$0xff]  }
  0x88   : > { %1201 = vmatpush1.bf16.msra.mxu1 %v4328_v43  ;;  %1160 = vmatpush1.bf16.msra.mxu0 %v4325_v44  ;;  %v4401_v43 = vld [vmem:[%s5997_s1 + $0x528] ss:$12 sps:$4 sm:$0xff]  }
  0x89   : > { %1202 = vmatprep.subr.bf16.mxu1 %v4687_v1  ;;  %1161 = vmatprep.subr.bf16.mxu0 %v4331_v45  ;;  %v4407_v44 = vld [vmem:[%s5997_s1 + $0x514] ss:$12 sps:$4 sm:$0xff]   ;;  %v4408_v45 = vld [vmem:[%s5997_s1 + $0x518] ss:$12 sps:$4 sm:$0xff]  }
  0x8c   : > { %1203 = vmatpush1.bf16.msra.mxu1 %v4332_v46  ;;  %1162 = vmatpush1.bf16.msra.mxu0 %v4329_v47  ;;  %v1631_v46 = vor.u32 %v1630_v41, %v1626_v40  ;;  %v4405_v47 = vld [vmem:[%s5997_s1 + $0x510] ss:$12 sps:$4 sm:$0xff]   ;;  %v4464_v40 = vld [vmem:[%s5997_s1 + $0x608] ss:$12 sps:$4 sm:$0xff]   ;;  %v4461_v41 = vld [vmem:[%s5997_s1 + $0x600] ss:$12 sps:$4 sm:$0xff]  }
  0x8d   : > { %1212 = vmatprep.subr.bf16.mxu1 %v4687_v1  ;;  %1171 = vmatprep.subr.bf16.mxu0 %v4335_v48  ;;  %v4411_v48 = vld [vmem:[%s5997_s1 + $0x4fc] ss:$12 sps:$4 sm:$0xff]  }
  0x90   : > { %1213 = vmatpush2.bf16.msra.mxu1 %v4336_v49  ;;  %1172 = vmatpush2.bf16.msra.mxu0 %v4333_v50  ;;  %v4412_v49 = vld [vmem:[%s5997_s1 + $0x500] ss:$12 sps:$4 sm:$0xff]   ;;  %v4409_v50 = vld [vmem:[%s5997_s1 + $0x4f8] ss:$12 sps:$4 sm:$0xff]  }
  0x91   : > { %1214 = vmatprep.subr.bf16.mxu1 %v4687_v1  ;;  %1173 = vmatprep.subr.bf16.mxu0 %v4339_v51  ;;  %v4415_v51 = vld [vmem:[%s5997_s1 + $0x4e4] ss:$12 sps:$4 sm:$0xff]  }
  0x94   : > { %1215 = vmatpush2.bf16.msra.mxu1 %v4340_v52  ;;  %1174 = vmatpush2.bf16.msra.mxu0 %v4337_v53  ;;  %v4416_v52 = vld [vmem:[%s5997_s1 + $0x4e8] ss:$12 sps:$4 sm:$0xff]   ;;  %v4413_v53 = vld [vmem:[%s5997_s1 + $0x4e0] ss:$12 sps:$4 sm:$0xff]  }
  0x95   : > { %1216 = vmatprep.subr.bf16.mxu1 %v4687_v1  ;;  %1175 = vmatprep.subr.bf16.mxu0 %v4343_v54  ;;  %v4419_v54 = vld [vmem:[%s5997_s1 + $0x4cc] ss:$12 sps:$4 sm:$0xff]  }
  0x98   : > { %1217 = vmatpush2.bf16.msra.mxu1 %v4344_v55  ;;  %1176 = vmatpush2.bf16.msra.mxu0 %v4341_v56  ;;  %v4417_v55 = vld [vmem:[%s5997_s1 + $0x4c8] ss:$12 sps:$4 sm:$0xff]   ;;  %v4420_v56 = vld [vmem:[%s5997_s1 + $0x4d0] ss:$12 sps:$4 sm:$0xff]  }
  0x99   : > { %1218 = vmatprep.subr.bf16.mxu1 %v4687_v1  ;;  %1177 = vmatprep.subr.bf16.mxu0 %v4347_v57  ;;  %v4423_v57 = vld [vmem:[%s5997_s1 + $0x4b4] ss:$12 sps:$4 sm:$0xff]  }
  0x9c   : > { %1219 = vmatpush2.bf16.msra.mxu1 %v4348_v59  ;;  %1178 = vmatpush2.bf16.msra.mxu0 %v4345_v60  ;;  %v4424_v59 = vld [vmem:[%s5997_s1 + $0x4b8] ss:$12 sps:$4 sm:$0xff]   ;;  %v4427_v60 = vld [vmem:[%s5997_s1 + $0x49c] ss:$12 sps:$4 sm:$0xff]  }
  0x9d   : > { %1527 = vmatprep.subr.bf16.mxu1 %v4687_v1  ;;  %1486 = vmatprep.subr.bf16.mxu0 %v4353_v61  ;;  %v4425_v61 = vld [vmem:[%s5997_s1 + $0x498] ss:$12 sps:$4 sm:$0xff]  }
  0x9f   : > { %1221 = vmatmul.mubr.bf16.vlgmr.msra.gmra.mxu1 %v949_v62  ;;  %1180 = vmatmul.mubr.bf16.vlgmr.msra.gmra.mxu0 %v949_v62  ;;  %v4428_v62 = vld [vmem:[%s5997_s1 + $0x4a0] ss:$12 sps:$4 sm:$0xff]  }
  0xa0   : > { %1528 = vmatpush1.bf16.msra.mxu1 %v4354_v0  ;;  %1487 = vmatpush1.bf16.msra.mxu0 %v4351_v2  ;;  %v4432_v0 = vld [vmem:[%s5997_s1 + $0x488] ss:$12 sps:$4 sm:$0xff]   ;;  %v4429_v2 = vld [vmem:[%s5997_s1 + $0x480] ss:$12 sps:$4 sm:$0xff]  }
  0xa1   : > { %1529 = vmatprep.subr.bf16.mxu1 %v4687_v1  ;;  %1488 = vmatprep.subr.bf16.mxu0 %v4357_v3  ;;  %v4435_v3 = vld [vmem:[%s5997_s1 + $0x58c] ss:$12 sps:$4 sm:$0xff]  }
  0xa2   : > { %3713 = vmatprep.mubr.msk.bf16.mxu1 %vm464_vm0, %v5152_v4  ;;  %3712 = vmatprep.mubr.msk.bf16.mxu0 %vm464_vm0, %v5152_v4  ;;  %v4436_v4 = vld [vmem:[%s5997_s1 + $0x590] ss:$12 sps:$4 sm:$0xff]  }
  0xa4   : > { %1530 = vmatpush1.bf16.msra.mxu1 %v4358_v5  ;;  %1489 = vmatpush1.bf16.msra.mxu0 %v4355_v6  ;;  %v4433_v5 = vld [vmem:[%s5997_s1 + $0x588] ss:$12 sps:$4 sm:$0xff]  }
  0xa5   : > { %1531 = vmatprep.subr.bf16.mxu1 %v4687_v1  ;;  %1490 = vmatprep.subr.bf16.mxu0 %v4361_v7  ;;  %v4439_v6 = vld [vmem:[%s5997_s1 + $0x574] ss:$12 sps:$4 sm:$0xff]   ;;  %v4440_v7 = vld [vmem:[%s5997_s1 + $0x578] ss:$12 sps:$4 sm:$0xff]  }
  0xa8   : > { %1532 = vmatpush1.bf16.msra.mxu1 %v4362_v8  ;;  %1491 = vmatpush1.bf16.msra.mxu0 %v4359_v9  ;;  %v4437_v8 = vld [vmem:[%s5997_s1 + $0x570] ss:$12 sps:$4 sm:$0xff]  }
  0xa9   : > { %1533 = vmatprep.subr.bf16.mxu1 %v4687_v1  ;;  %1492 = vmatprep.subr.bf16.mxu0 %v4365_v10  ;;  %v4443_v9 = vld [vmem:[%s5997_s1 + $0x55c] ss:$12 sps:$4 sm:$0xff]   ;;  %v4444_v10 = vld [vmem:[%s5997_s1 + $0x560] ss:$12 sps:$4 sm:$0xff]  }
  0xac   : > { %1534 = vmatpush1.bf16.msra.mxu1 %v4366_v11  ;;  %1493 = vmatpush1.bf16.msra.mxu0 %v4363_v12  ;;  %v1622_v11 = vshll.u32 %v5275_v42, 16  ;;  %v4441_v12 = vld [vmem:[%s5997_s1 + $0x558] ss:$12 sps:$4 sm:$0xff]  }
  0xad   : > { %1535 = vmatprep.subr.bf16.mxu1 %v4687_v1  ;;  %1494 = vmatprep.subr.bf16.mxu0 %v4369_v13  ;;  %v4447_v13 = vld [vmem:[%s5997_s1 + $0x544] ss:$12 sps:$4 sm:$0xff]  }
  0xb0   : > { %1536 = vmatpush1.bf16.msra.mxu1 %v4370_v14  ;;  %1495 = vmatpush1.bf16.msra.mxu0 %v4367_v15  ;;  %v4448_v14 = vld [vmem:[%s5997_s1 + $0x548] ss:$12 sps:$4 sm:$0xff]  }
  0xb1   : > { %1537 = vmatprep.subr.bf16.mxu1 %v4687_v1  ;;  %1496 = vmatprep.subr.bf16.mxu0 %v4373_v16  ;;  %v5393_v15 = vld [vmem:[%s4825_s28 + $0x8] sm:$0x66]  ;;  %v1620_v16 = vshrl.u32 %v5275_v42, 16 }
  0xb4   : > { %1538 = vmatpush1.bf16.msra.mxu1 %v4374_v17  ;;  %1497 = vmatpush1.bf16.msra.mxu0 %v4371_v18  ;;  %v1624_v17 = vrot.slane %v1622_v11, 1  ;;  %v4445_v18 = vld [vmem:[%s5997_s1 + $0x540] ss:$12 sps:$4 sm:$0xff]  }
  0xb5   : > { %1539 = vmatprep.subr.bf16.mxu1 %v4687_v1  ;;  %1498 = vmatprep.subr.bf16.mxu0 %v4377_v19  ;;  %v4451_v19 = vld [vmem:[%s5997_s1 + $0x64c] ss:$12 sps:$4 sm:$0xff]  }
  0xb6   : > { %v4501_v11 = vld [vmem:[%s5997_s1 + $0x76c] ss:$12 sps:$4 sm:$0xff]  }
  0xb8   : > { %1540 = vmatpush1.bf16.msra.mxu1 %v4378_v20  ;;  %1499 = vmatpush1.bf16.msra.mxu0 %v4375_v21  ;;  %v3850_v20 = vcombine.high %v5393_v15, %v5393_v15  ;;  %v1625_v21 = vor.u32 %v1624_v17, %v1620_v16  ;;  %v4499_v17 = vld [vmem:[%s5997_s1 + $0x768] ss:$12 sps:$4 sm:$0xff]  }
  0xb9   : > { %1541 = vmatprep.subr.bf16.mxu1 %v4687_v1  ;;  %1500 = vmatprep.subr.bf16.mxu0 %v4381_v22  ;;  %v4452_v22 = vld [vmem:[%s5997_s1 + $0x650] ss:$12 sps:$4 sm:$0xff]  }
  0xbc   : > { %1542 = vmatpush1.bf16.msra.mxu1 %v4382_v23  ;;  %1501 = vmatpush1.bf16.msra.mxu0 %v4379_v24  ;;  %v4449_v23 = vld [vmem:[%s5997_s1 + $0x648] ss:$12 sps:$4 sm:$0xff]  }
  0xbd   : > { %1551 = vmatprep.subr.bf16.mxu1 %v4687_v1  ;;  %1510 = vmatprep.subr.bf16.mxu0 %v4385_v25  ;;  %v4455_v24 = vld [vmem:[%s5997_s1 + $0x634] ss:$12 sps:$4 sm:$0xff]   ;;  %v1968_v25 = vrot.slane %v3850_v20, 1 }
  0xc0   : > { %1552 = vmatpush2.bf16.msra.mxu1 %v4386_v26  ;;  %1511 = vmatpush2.bf16.msra.mxu0 %v4383_v27 }
  0xc1   : > { %1553 = vmatprep.subr.bf16.mxu1 %v4687_v1  ;;  %1512 = vmatprep.subr.bf16.mxu0 %v4389_v28  ;;  %v4456_v28 = vld [vmem:[%s5997_s1 + $0x638] ss:$12 sps:$4 sm:$0xff]  }
  0xc4   : > { %1554 = vmatpush2.bf16.msra.mxu1 %v4390_v29  ;;  %1513 = vmatpush2.bf16.msra.mxu0 %v4387_v30  ;;  %v4453_v30 = vld [vmem:[%s5997_s1 + $0x630] ss:$12 sps:$4 sm:$0xff]  }
  0xc5   : > { %1555 = vmatprep.subr.bf16.mxu1 %v4687_v1  ;;  %1514 = vmatprep.subr.bf16.mxu0 %v4393_v31 }
  0xc8   : > { %1556 = vmatpush2.bf16.msra.mxu1 %v4394_v32  ;;  %1515 = vmatpush2.bf16.msra.mxu0 %v4391_v33  ;;  %v4459_v32 = vld [vmem:[%s5997_s1 + $0x61c] ss:$12 sps:$4 sm:$0xff]  }
  0xc9   : > { %1557 = vmatprep.subr.bf16.mxu1 %v4687_v1  ;;  %1516 = vmatprep.subr.bf16.mxu0 %v4397_v34 }
  0xcc   : > { %1558 = vmatpush2.bf16.msra.mxu1 %v4398_v35  ;;  %1517 = vmatpush2.bf16.msra.mxu0 %v4395_v37  ;;  %v4460_v35 = vld [vmem:[%s5997_s1 + $0x620] ss:$12 sps:$4 sm:$0xff]   ;;  %v4457_v37 = vld [vmem:[%s5997_s1 + $0x618] ss:$12 sps:$4 sm:$0xff]  }
  0xcd   : > { %1869 = vmatprep.subr.bf16.mxu1 %v4687_v1  ;;  %1828 = vmatprep.subr.bf16.mxu0 %v4403_v38 }
  0xcf   : > { %1560 = vmatmul.mubr.bf16.vlgmr.msra.gmra.mxu1 %v5275_v42  ;;  %1519 = vmatmul.mubr.bf16.vlgmr.msra.gmra.mxu0 %v5275_v42  ;;  %v4467_v42 = vld [vmem:[%s5997_s1 + $0x5ec] ss:$12 sps:$4 sm:$0xff]  }
  0xd0   : > { %1870 = vmatpush1.bf16.msra.mxu1 %v4404_v39  ;;  %1829 = vmatpush1.bf16.msra.mxu0 %v4401_v43  ;;  %v4463_v39 = vld [vmem:[%s5997_s1 + $0x604] ss:$12 sps:$4 sm:$0xff]  }
  0xd1   : > { %1871 = vmatprep.subr.bf16.mxu1 %v4687_v1  ;;  %1830 = vmatprep.subr.bf16.mxu0 %v4407_v44  ;;  %v4468_v43 = vld [vmem:[%s5997_s1 + $0x5f0] ss:$12 sps:$4 sm:$0xff]   ;;  %v4465_v44 = vld [vmem:[%s5997_s1 + $0x5e8] ss:$12 sps:$4 sm:$0xff]  }
  0xd2   : > { %3799 = vmatprep.mubr.msk.bf16.mxu1 %vm464_vm0, %v1631_v46  ;;  %3798 = vmatprep.mubr.msk.bf16.mxu0 %vm464_vm0, %v1631_v46  ;;  %v4472_v46 = vld [vmem:[%s5997_s1 + $0x5d8] ss:$12 sps:$4 sm:$0xff]  }
  0xd4   : > { %1872 = vmatpush1.bf16.msra.mxu1 %v4408_v45  ;;  %1831 = vmatpush1.bf16.msra.mxu0 %v4405_v47  ;;  %v4471_v45 = vld [vmem:[%s5997_s1 + $0x5d4] ss:$12 sps:$4 sm:$0xff]   ;;  %v4469_v47 = vld [vmem:[%s5997_s1 + $0x5d0] ss:$12 sps:$4 sm:$0xff]  }
  0xd5   : > { %1873 = vmatprep.subr.bf16.mxu1 %v4687_v1  ;;  %1832 = vmatprep.subr.bf16.mxu0 %v4411_v48  ;;  %v4475_v48 = vld [vmem:[%s5997_s1 + $0x5bc] ss:$12 sps:$4 sm:$0xff]  }
  0xd8   : > { %1874 = vmatpush1.bf16.msra.mxu1 %v4412_v49  ;;  %1833 = vmatpush1.bf16.msra.mxu0 %v4409_v50  ;;  %v4476_v49 = vld [vmem:[%s5997_s1 + $0x5c0] ss:$12 sps:$4 sm:$0xff]   ;;  %v4473_v50 = vld [vmem:[%s5997_s1 + $0x5b8] ss:$12 sps:$4 sm:$0xff]  }
  0xd9   : > { %1875 = vmatprep.subr.bf16.mxu1 %v4687_v1  ;;  %1834 = vmatprep.subr.bf16.mxu0 %v4415_v51  ;;  %v4479_v51 = vld [vmem:[%s5997_s1 + $0x5a4] ss:$12 sps:$4 sm:$0xff]  }
  0xdc   : > { %1876 = vmatpush1.bf16.msra.mxu1 %v4416_v52  ;;  %1835 = vmatpush1.bf16.msra.mxu0 %v4413_v53  ;;  %v4480_v52 = vld [vmem:[%s5997_s1 + $0x5a8] ss:$12 sps:$4 sm:$0xff]   ;;  %v4477_v53 = vld [vmem:[%s5997_s1 + $0x5a0] ss:$12 sps:$4 sm:$0xff]  }
  0xdd   : > { %1877 = vmatprep.subr.bf16.mxu1 %v4687_v1  ;;  %1836 = vmatprep.subr.bf16.mxu0 %v4419_v54  ;;  %v4483_v54 = vld [vmem:[%s5997_s1 + $0x6ac] ss:$12 sps:$4 sm:$0xff]  }
  0xe0   : > { %1878 = vmatpush1.bf16.msra.mxu1 %v4420_v56  ;;  %1837 = vmatpush1.bf16.msra.mxu0 %v4417_v55  ;;  %v4484_v55 = vld [vmem:[%s5997_s1 + $0x6b0] ss:$12 sps:$4 sm:$0xff]   ;;  %v4481_v56 = vld [vmem:[%s5997_s1 + $0x6a8] ss:$12 sps:$4 sm:$0xff]  }
  0xe1   : > { %1879 = vmatprep.subr.bf16.mxu1 %v4687_v1  ;;  %1838 = vmatprep.subr.bf16.mxu0 %v4423_v57  ;;  %v4487_v57 = vld [vmem:[%s5997_s1 + $0x694] ss:$12 sps:$4 sm:$0xff]  }
  0xe4   : > { %1880 = vmatpush1.bf16.msra.mxu1 %v4424_v59  ;;  %1839 = vmatpush1.bf16.msra.mxu0 %v4421_v58  ;;  %v196_v58 = vlaneseq  ;;  %v4488_v59 = vld [vmem:[%s5997_s1 + $0x698] ss:$12 sps:$4 sm:$0xff]  }
  0xe5   : > { %1881 = vmatprep.subr.bf16.mxu1 %v4687_v1  ;;  %1840 = vmatprep.subr.bf16.mxu0 %v4427_v60  ;;  %v4485_v60 = vld [vmem:[%s5997_s1 + $0x690] ss:$12 sps:$4 sm:$0xff]  }
  0xe8   : > { %1882 = vmatpush1.bf16.msra.mxu1 %v4428_v62  ;;  %1841 = vmatpush1.bf16.msra.mxu0 %v4425_v61  ;;  %v4491_v61 = vld [vmem:[%s5997_s1 + $0x67c] ss:$12 sps:$4 sm:$0xff]   ;;  %v5513_v62 = vshrl.u32 %v196_v58, 7  ;;  %v4538_v58 = vld [vmem:[%s5997_s1 + $0x7b8] ss:$12 sps:$4 sm:$0xff]  }
  0xe9   : > { %1883 = vmatprep.subr.bf16.mxu1 %v4687_v1  ;;  %1842 = vmatprep.subr.bf16.mxu0 %v4431_v63  ;;  %v4492_v63 = vld [vmem:[%s5997_s1 + $0x680] ss:$12 sps:$4 sm:$0xff]  }
  0xec   : > { %1884 = vmatpush1.bf16.msra.mxu1 %v4432_v0  ;;  %1843 = vmatpush1.bf16.msra.mxu0 %v4429_v2  ;;  %v4489_v0 = vld [vmem:[%s5997_s1 + $0x678] ss:$12 sps:$4 sm:$0xff]   ;;  %v206_v2 = vsub.s32 2, %v5513_v62 }
  0xed   : > { %1893 = vmatprep.subr.bf16.mxu1 %v4687_v1  ;;  %1852 = vmatprep.subr.bf16.mxu0 %v4435_v3  ;;  %v4495_v3 = vld [vmem:[%s5997_s1 + $0x664] ss:$12 sps:$4 sm:$0xff]  }
  0xf0   : > { %1894 = vmatpush2.bf16.msra.mxu1 %v4436_v4  ;;  %1853 = vmatpush2.bf16.msra.mxu0 %v4433_v5  ;;  %v198_v4 = vsub.s32 0, %v5513_v62  ;;  %v3849_v5 = vcombine.low %v5393_v15, %v5393_v15  ;;  %v4502_v15 = vld [vmem:[%s5997_s1 + $0x770] ss:$12 sps:$4 sm:$0xff]  }
  0xf1   : > { %1895 = vmatprep.subr.bf16.mxu1 %v4687_v1  ;;  %1854 = vmatprep.subr.bf16.mxu0 %v4439_v6  ;;  %v194_v6 = vld [vmem:[%s5998_s2] sm:$0x7] }
  0xf4   : > { %1896 = vmatpush2.bf16.msra.mxu1 %v4440_v7  ;;  %1855 = vmatpush2.bf16.msra.mxu0 %v4437_v8  ;;  %v4496_v7 = vld [vmem:[%s5997_s1 + $0x668] ss:$12 sps:$4 sm:$0xff]   ;;  %v202_v8 = vsub.s32 1, %v5513_v62 }
  0xf5   : > { %1897 = vmatprep.subr.bf16.mxu1 %v4687_v1  ;;  %1856 = vmatprep.subr.bf16.mxu0 %v4443_v9  ;;  %v4493_v9 = vld [vmem:[%s5997_s1 + $0x660] ss:$12 sps:$4 sm:$0xff]  }
  0xf6   : > { %v203_v16 = vrot.slane %v194_v6, %v202_v8 }
  0xf8   : > { %1898 = vmatpush2.bf16.msra.mxu1 %v4444_v10  ;;  %1857 = vmatpush2.bf16.msra.mxu0 %v4441_v12  ;;  %v207_v10 = vrot.slane %v194_v6, %v206_v2  ;;  %v199_v12 = vrot.slane %v194_v6, %v198_v4  ;;  %v4543_v4 = vld [vmem:[%s5997_s1 + $0x780] ss:$12 sps:$4 sm:$0xff]  }
  0xf9   : > { %1899 = vmatprep.subr.bf16.mxu1 %v4687_v1  ;;  %1858 = vmatprep.subr.bf16.mxu0 %v4447_v13  ;;  %v1967_v13 = vrot.slane %v3849_v5, 1  ;;  %v4551_v5 = vld [vmem:[%s5997_s1 + $0x88c] ss:$12 sps:$4 sm:$0xff]  }
  0xfc   : > { %1900 = vmatpush2.bf16.msra.mxu1 %v4448_v14  ;;  %1859 = vmatpush2.bf16.msra.mxu0 %v4445_v18  ;;  %v5544_v14 = vld [vmem:[%s4825_s28 + $0x10] sm:$0x33] }
  0xfd   : > { %2206 = vmatprep.subr.bf16.mxu1 %v4687_v1  ;;  %2165 = vmatprep.subr.bf16.mxu0 %v4451_v19  ;;  %v4505_v19 = vld [vmem:[%s5997_s1 + $0x754] ss:$12 sps:$4 sm:$0xff]   ;;  %v5559_v20 = vcombine.high %v5544_v14, %v5544_v14  ;;  %v5687_v8 = vcombine.low %v5544_v14, %v5544_v14 }
  0xff   : > { %v5415_v26 = vpop.f32.mrf.mxu1  ;;  %1902 = vmatmul.mubr.bf16.vlgmr.msra.gmra.mxu1 %v1625_v21  ;;  %v5417_v27 = vpop.f32.mrf.mxu0  ;;  %1861 = vmatmul.mubr.bf16.vlgmr.msra.gmra.mxu0 %v1625_v21  ;;  %v2646_v2 = vshll.u32 %v5559_v20, 16  ;;  %v2644_v6 = vshrl.u32 %v5559_v20, 16 }
 0x100   : > { %2207 = vmatpush1.bf16.msra.mxu1 %v4452_v22  ;;  %2166 = vmatpush1.bf16.msra.mxu0 %v4449_v23  ;;  %v551_v18 = vadd.f32 %v5415_v26, %v207_v10  ;;  %v549_v21 = vadd.f32 %v5417_v27, %v199_v12  ;;  %v4503_v27 = vld [vmem:[%s5997_s1 + $0x750] ss:$12 sps:$4 sm:$0xff]   ;;  %v4549_v10 = vld [vmem:[%s5997_s1 + $0x888] ss:$12 sps:$4 sm:$0xff]  }
 0x101   : > { %v545_v29 = vpop.f32.mrf.mxu1  ;;  %2208 = vmatprep.subr.bf16.mxu1 %v4687_v1  ;;  %v5426_v31 = vpop.f32.mrf.mxu0  ;;  %2167 = vmatprep.subr.bf16.mxu0 %v4455_v24 }
 0x102   : > { %3888 = vmatprep.mubr.msk.bf16.mxu1 %vm464_vm0, %v1968_v25  ;;  %3887 = vmatprep.mubr.msk.bf16.mxu0 %vm464_vm0, %v1968_v25  ;;  %v4506_v25 = vld [vmem:[%s5997_s1 + $0x758] ss:$12 sps:$4 sm:$0xff]   ;;  %v550_v26 = vadd.f32 %v5426_v31, %v203_v16 }
 0x103   : > { %v546_v33 = vpop.f32.mrf.mxu1  ;;  %v506_v34 = vpop.f32.mrf.mxu0  ;;  %v4556_v16 = vld [vmem:[%s5997_s1 + $0x878] ss:$12 sps:$4 sm:$0xff]  }
 0x104   : > { %2209 = vmatpush1.bf16.msra.mxu1 %v4456_v28  ;;  %2168 = vmatpush1.bf16.msra.mxu0 %v4453_v30 }
 0x105   : > { %v547_v36 = vpop.f32.mrf.mxu1  ;;  %2210 = vmatprep.subr.bf16.mxu1 %v4687_v1  ;;  %v507_v38 = vpop.f32.mrf.mxu0  ;;  %2169 = vmatprep.subr.bf16.mxu0 %v4459_v32  ;;  %v4509_v32 = vld [vmem:[%s5997_s1 + $0x73c] ss:$12 sps:$4 sm:$0xff]  }
 0x108   : > { %2211 = vmatpush1.bf16.msra.mxu1 %v4460_v35  ;;  %2170 = vmatpush1.bf16.msra.mxu0 %v4457_v37  ;;  %v4510_v35 = vld [vmem:[%s5997_s1 + $0x740] ss:$12 sps:$4 sm:$0xff]   ;;  %v4507_v37 = vld [vmem:[%s5997_s1 + $0x738] ss:$12 sps:$4 sm:$0xff]  }
 0x109   : > { %2212 = vmatprep.subr.bf16.mxu1 %v4687_v1  ;;  %2171 = vmatprep.subr.bf16.mxu0 %v4463_v39  ;;  %v4513_v39 = vld [vmem:[%s5997_s1 + $0x724] ss:$12 sps:$4 sm:$0xff]  }
 0x10c   : > { %2213 = vmatpush1.bf16.msra.mxu1 %v4464_v40  ;;  %2172 = vmatpush1.bf16.msra.mxu0 %v4461_v41  ;;  %v4514_v40 = vld [vmem:[%s5997_s1 + $0x728] ss:$12 sps:$4 sm:$0xff]   ;;  %v4511_v41 = vld [vmem:[%s5997_s1 + $0x720] ss:$12 sps:$4 sm:$0xff]  }
 0x10d   : > { %2214 = vmatprep.subr.bf16.mxu1 %v4687_v1  ;;  %2173 = vmatprep.subr.bf16.mxu0 %v4467_v42  ;;  %v4517_v42 = vld [vmem:[%s5997_s1 + $0x70c] ss:$12 sps:$4 sm:$0xff]  }
 0x110   : > { %2215 = vmatpush1.bf16.msra.mxu1 %v4468_v43  ;;  %2174 = vmatpush1.bf16.msra.mxu0 %v4465_v44  ;;  %v4518_v43 = vld [vmem:[%s5997_s1 + $0x710] ss:$12 sps:$4 sm:$0xff]   ;;  %v4515_v44 = vld [vmem:[%s5997_s1 + $0x708] ss:$12 sps:$4 sm:$0xff]  }
 0x111   : > { %2216 = vmatprep.subr.bf16.mxu1 %v4687_v1  ;;  %2175 = vmatprep.subr.bf16.mxu0 %v4471_v45  ;;  %v4521_v45 = vld [vmem:[%s5997_s1 + $0x6f4] ss:$12 sps:$4 sm:$0xff]  }
 0x114   : > { %2217 = vmatpush1.bf16.msra.mxu1 %v4472_v46  ;;  %2176 = vmatpush1.bf16.msra.mxu0 %v4469_v47  ;;  %v4522_v46 = vld [vmem:[%s5997_s1 + $0x6f8] ss:$12 sps:$4 sm:$0xff]   ;;  %v4519_v47 = vld [vmem:[%s5997_s1 + $0x6f0] ss:$12 sps:$4 sm:$0xff]  }
 0x115   : > { %2218 = vmatprep.subr.bf16.mxu1 %v4687_v1  ;;  %2177 = vmatprep.subr.bf16.mxu0 %v4475_v48  ;;  %v4525_v48 = vld [vmem:[%s5997_s1 + $0x6dc] ss:$12 sps:$4 sm:$0xff]  }
 0x118   : > { %2219 = vmatpush1.bf16.msra.mxu1 %v4476_v49  ;;  %2178 = vmatpush1.bf16.msra.mxu0 %v4473_v50  ;;  %v4526_v49 = vld [vmem:[%s5997_s1 + $0x6e0] ss:$12 sps:$4 sm:$0xff]   ;;  %v4523_v50 = vld [vmem:[%s5997_s1 + $0x6d8] ss:$12 sps:$4 sm:$0xff]  }
 0x119   : > { %2220 = vmatprep.subr.bf16.mxu1 %v4687_v1  ;;  %2179 = vmatprep.subr.bf16.mxu0 %v4479_v51  ;;  %v4529_v51 = vld [vmem:[%s5997_s1 + $0x6c4] ss:$12 sps:$4 sm:$0xff]  }
 0x11c   : > { %2221 = vmatpush1.bf16.msra.mxu1 %v4480_v52  ;;  %2180 = vmatpush1.bf16.msra.mxu0 %v4477_v53  ;;  %v4530_v52 = vld [vmem:[%s5997_s1 + $0x6c8] ss:$12 sps:$4 sm:$0xff]   ;;  %v4527_v53 = vld [vmem:[%s5997_s1 + $0x6c0] ss:$12 sps:$4 sm:$0xff]  }
 0x11d   : > { %2230 = vmatprep.subr.bf16.mxu1 %v4687_v1  ;;  %2189 = vmatprep.subr.bf16.mxu0 %v4483_v54  ;;  %v4533_v54 = vld [vmem:[%s5997_s1 + $0x7cc] ss:$12 sps:$4 sm:$0xff]  }
 0x120   : > { %2231 = vmatpush2.bf16.msra.mxu1 %v4484_v55  ;;  %2190 = vmatpush2.bf16.msra.mxu0 %v4481_v56  ;;  %v4534_v55 = vld [vmem:[%s5997_s1 + $0x7d0] ss:$12 sps:$4 sm:$0xff]   ;;  %v4531_v56 = vld [vmem:[%s5997_s1 + $0x7c8] ss:$12 sps:$4 sm:$0xff]  }
 0x121   : > { %2232 = vmatprep.subr.bf16.mxu1 %v4687_v1  ;;  %2191 = vmatprep.subr.bf16.mxu0 %v4487_v57  ;;  %v4537_v57 = vld [vmem:[%s5997_s1 + $0x7b4] ss:$12 sps:$4 sm:$0xff]  }
 0x124   : > { %2233 = vmatpush2.bf16.msra.mxu1 %v4488_v59  ;;  %2192 = vmatpush2.bf16.msra.mxu0 %v4485_v60  ;;  %v4535_v59 = vld [vmem:[%s5997_s1 + $0x7b0] ss:$12 sps:$4 sm:$0xff]  }
 0x125   : > { %2234 = vmatprep.subr.bf16.mxu1 %v4687_v1  ;;  %2193 = vmatprep.subr.bf16.mxu0 %v4491_v61  ;;  %v4541_v60 = vld [vmem:[%s5997_s1 + $0x79c] ss:$12 sps:$4 sm:$0xff]   ;;  %v4542_v61 = vld [vmem:[%s5997_s1 + $0x7a0] ss:$12 sps:$4 sm:$0xff]  }
 0x128   : > { %2235 = vmatpush2.bf16.msra.mxu1 %v4492_v63  ;;  %2194 = vmatpush2.bf16.msra.mxu0 %v4489_v0  ;;  %v4539_v63 = vld [vmem:[%s5997_s1 + $0x798] ss:$12 sps:$4 sm:$0xff]  }
 0x129   : > { %2236 = vmatprep.subr.bf16.mxu1 %v4687_v1  ;;  %2195 = vmatprep.subr.bf16.mxu0 %v4495_v3  ;;  %v4545_v0 = vld [vmem:[%s5997_s1 + $0x784] ss:$12 sps:$4 sm:$0xff]   ;;  %v4546_v3 = vld [vmem:[%s5997_s1 + $0x788] ss:$12 sps:$4 sm:$0xff]  }
 0x12c   : > { %2237 = vmatpush2.bf16.msra.mxu1 %v4496_v7  ;;  %2196 = vmatpush2.bf16.msra.mxu0 %v4493_v9  ;;  %v2648_v7 = vrot.slane %v2646_v2, 1  ;;  %v4552_v9 = vld [vmem:[%s5997_s1 + $0x890] ss:$12 sps:$4 sm:$0xff]   ;;  %v4597_v2 = vld [vmem:[%s5997_s1 + $0x9a8] ss:$12 sps:$4 sm:$0xff]  }
 0x12d   : > { %2545 = vmatprep.subr.bf16.mxu1 %v4687_v1  ;;  %2504 = vmatprep.subr.bf16.mxu0 %v4501_v11  ;;  %v4555_v11 = vld [vmem:[%s5997_s1 + $0x874] ss:$12 sps:$4 sm:$0xff]  }
 0x12e   : > { %v2649_v12 = vor.u32 %v2648_v7, %v2644_v6 }
 0x12f   : > { %v885_v22 = vpop.f32.mrf.mxu1  ;;  %2239 = vmatmul.mubr.bf16.vlgmr.msra.gmra.mxu1 %v1967_v13  ;;  %v844_v24 = vpop.f32.mrf.mxu0  ;;  %2198 = vmatmul.mubr.bf16.vlgmr.msra.gmra.mxu0 %v1967_v13 }
 0x130   : > { %v5562_v23 = vadd.f32 %v885_v22, %v551_v18  ;;  %2546 = vmatpush1.bf16.msra.mxu1 %v4502_v15  ;;  %v5568_v28 = vadd.f32 %v844_v24, %v549_v21  ;;  %2505 = vmatpush1.bf16.msra.mxu0 %v4499_v17  ;;  %v4559_v21 = vld [vmem:[%s5997_s1 + $0x85c] ss:$12 sps:$4 sm:$0xff]  }
 0x131   : > { %v887_v29 = vpop.f32.mrf.mxu1  ;;  %2547 = vmatprep.subr.bf16.mxu1 %v4687_v1  ;;  %v846_v30 = vpop.f32.mrf.mxu0  ;;  %2506 = vmatprep.subr.bf16.mxu0 %v4505_v19  ;;  %v4553_v19 = vld [vmem:[%s5997_s1 + $0x870] ss:$12 sps:$4 sm:$0xff]  }
 0x132   : > { %3978 = vmatprep.mubr.msk.bf16.mxu1 %vm464_vm0, %v5559_v20  ;;  %v5579_v31 = vadd.f32 %v846_v30, %v550_v26  ;;  %3977 = vmatprep.mubr.msk.bf16.mxu0 %vm464_vm0, %v5559_v20  ;;  %v4564_v30 = vld [vmem:[%s5997_s1 + $0x848] ss:$12 sps:$4 sm:$0xff]  }
 0x133   : > { %v888_v33 = vpop.f32.mrf.mxu1  ;;  %v848_v34 = vpop.f32.mrf.mxu0 }
 0x134   : > { %2548 = vmatpush1.bf16.msra.mxu1 %v4506_v25  ;;  %2507 = vmatpush1.bf16.msra.mxu0 %v4503_v27  ;;  %v4560_v25 = vld [vmem:[%s5997_s1 + $0x860] ss:$12 sps:$4 sm:$0xff]   ;;  %v4563_v27 = vld [vmem:[%s5997_s1 + $0x844] ss:$12 sps:$4 sm:$0xff]   ;;  %v4565_v34 = vld [vmem:[%s5997_s1 + $0x828] ss:$12 sps:$4 sm:$0xff]  }
 0x135   : > { %v889_v36 = vpop.f32.mrf.mxu1  ;;  %2549 = vmatprep.subr.bf16.mxu1 %v4687_v1  ;;  %v849_v38 = vpop.f32.mrf.mxu0  ;;  %2508 = vmatprep.subr.bf16.mxu0 %v4509_v32  ;;  %v4561_v32 = vld [vmem:[%s5997_s1 + $0x840] ss:$12 sps:$4 sm:$0xff]   ;;  %v4568_v33 = vld [vmem:[%s5997_s1 + $0x830] ss:$12 sps:$4 sm:$0xff]  }
 0x136   : > { %v4572_v36 = vld [vmem:[%s5997_s1 + $0x818] ss:$12 sps:$4 sm:$0xff]   ;;  %v4575_v38 = vld [vmem:[%s5997_s1 + $0x7fc] ss:$12 sps:$4 sm:$0xff]  }
 0x138   : > { %2550 = vmatpush1.bf16.msra.mxu1 %v4510_v35  ;;  %2509 = vmatpush1.bf16.msra.mxu0 %v4507_v37  ;;  %v4571_v35 = vld [vmem:[%s5997_s1 + $0x814] ss:$12 sps:$4 sm:$0xff]   ;;  %v4569_v37 = vld [vmem:[%s5997_s1 + $0x810] ss:$12 sps:$4 sm:$0xff]  }
 0x139   : > { %2551 = vmatprep.subr.bf16.mxu1 %v4687_v1  ;;  %2510 = vmatprep.subr.bf16.mxu0 %v4513_v39  ;;  %v4576_v39 = vld [vmem:[%s5997_s1 + $0x800] ss:$12 sps:$4 sm:$0xff]  }
 0x13c   : > { %2552 = vmatpush1.bf16.msra.mxu1 %v4514_v40  ;;  %2511 = vmatpush1.bf16.msra.mxu0 %v4511_v41  ;;  %v4573_v40 = vld [vmem:[%s5997_s1 + $0x7f8] ss:$12 sps:$4 sm:$0xff]  }
 0x13d   : > { %2553 = vmatprep.subr.bf16.mxu1 %v4687_v1  ;;  %2512 = vmatprep.subr.bf16.mxu0 %v4517_v42  ;;  %v4579_v41 = vld [vmem:[%s5997_s1 + $0x7e4] ss:$12 sps:$4 sm:$0xff]   ;;  %v4580_v42 = vld [vmem:[%s5997_s1 + $0x7e8] ss:$12 sps:$4 sm:$0xff]  }
 0x140   : > { %2554 = vmatpush1.bf16.msra.mxu1 %v4518_v43  ;;  %2513 = vmatpush1.bf16.msra.mxu0 %v4515_v44  ;;  %v4577_v43 = vld [vmem:[%s5997_s1 + $0x7e0] ss:$12 sps:$4 sm:$0xff]  }
 0x141   : > { %2555 = vmatprep.subr.bf16.mxu1 %v4687_v1  ;;  %2514 = vmatprep.subr.bf16.mxu0 %v4521_v45  ;;  %v4583_v44 = vld [vmem:[%s5997_s1 + $0x8ec] ss:$12 sps:$4 sm:$0xff]   ;;  %v4584_v45 = vld [vmem:[%s5997_s1 + $0x8f0] ss:$12 sps:$4 sm:$0xff]  }
 0x144   : > { %2556 = vmatpush1.bf16.msra.mxu1 %v4522_v46  ;;  %2515 = vmatpush1.bf16.msra.mxu0 %v4519_v47  ;;  %v4581_v46 = vld [vmem:[%s5997_s1 + $0x8e8] ss:$12 sps:$4 sm:$0xff]  }
 0x145   : > { %2557 = vmatprep.subr.bf16.mxu1 %v4687_v1  ;;  %2516 = vmatprep.subr.bf16.mxu0 %v4525_v48  ;;  %v4587_v47 = vld [vmem:[%s5997_s1 + $0x8d4] ss:$12 sps:$4 sm:$0xff]   ;;  %v4588_v48 = vld [vmem:[%s5997_s1 + $0x8d8] ss:$12 sps:$4 sm:$0xff]  }
 0x148   : > { %2558 = vmatpush1.bf16.msra.mxu1 %v4526_v49  ;;  %2517 = vmatpush1.bf16.msra.mxu0 %v4523_v50  ;;  %v4585_v49 = vld [vmem:[%s5997_s1 + $0x8d0] ss:$12 sps:$4 sm:$0xff]  }
 0x149   : > { %2559 = vmatprep.subr.bf16.mxu1 %v4687_v1  ;;  %2518 = vmatprep.subr.bf16.mxu0 %v4529_v51  ;;  %v4591_v50 = vld [vmem:[%s5997_s1 + $0x8bc] ss:$12 sps:$4 sm:$0xff]   ;;  %v2640_v51 = vshll.u32 %v5687_v8, 16 }
 0x14c   : > { %2560 = vmatpush1.bf16.msra.mxu1 %v4530_v52  ;;  %2519 = vmatpush1.bf16.msra.mxu0 %v4527_v53  ;;  %v4592_v52 = vld [vmem:[%s5997_s1 + $0x8c0] ss:$12 sps:$4 sm:$0xff]   ;;  %v4589_v53 = vld [vmem:[%s5997_s1 + $0x8b8] ss:$12 sps:$4 sm:$0xff]  }
 0x14d   : > { %2569 = vmatprep.subr.bf16.mxu1 %v4687_v1  ;;  %2528 = vmatprep.subr.bf16.mxu0 %v4533_v54  ;;  %v4595_v54 = vld [vmem:[%s5997_s1 + $0x8a4] ss:$12 sps:$4 sm:$0xff]  }
 0x150   : > { %2570 = vmatpush2.bf16.msra.mxu1 %v4534_v55  ;;  %2529 = vmatpush2.bf16.msra.mxu0 %v4531_v56  ;;  %v2638_v55 = vshrl.u32 %v5687_v8, 16  ;;  %v2642_v56 = vrot.slane %v2640_v51, 1 }
 0x151   : > { %2571 = vmatprep.subr.bf16.mxu1 %v4687_v1  ;;  %2530 = vmatprep.subr.bf16.mxu0 %v4537_v57  ;;  %v5815_v57 = vld [vmem:[%s4825_s28 + $0x10] sm:$0x66] }
 0x154   : > { %2572 = vmatpush2.bf16.msra.mxu1 %v4538_v58  ;;  %2531 = vmatpush2.bf16.msra.mxu0 %v4535_v59  ;;  %v4596_v58 = vld [vmem:[%s5997_s1 + $0x8a8] ss:$12 sps:$4 sm:$0xff]   ;;  %v4593_v59 = vld [vmem:[%s5997_s1 + $0x8a0] ss:$12 sps:$4 sm:$0xff]  }
 0x155   : > { %2573 = vmatprep.subr.bf16.mxu1 %v4687_v1  ;;  %2532 = vmatprep.subr.bf16.mxu0 %v4541_v60  ;;  %v4599_v60 = vld [vmem:[%s5997_s1 + $0x9ac] ss:$12 sps:$4 sm:$0xff]  }
 0x158   : > { %2574 = vmatpush2.bf16.msra.mxu1 %v4542_v61  ;;  %2533 = vmatpush2.bf16.msra.mxu0 %v4539_v63  ;;  %v4115_v61 = vcombine.high %v5815_v57, %v5815_v57  ;;  %v2643_v63 = vor.u32 %v2642_v56, %v2638_v55 }
 0x159   : > { %2575 = vmatprep.subr.bf16.mxu1 %v4687_v1  ;;  %2534 = vmatprep.subr.bf16.mxu0 %v4545_v0  ;;  %v4600_v0 = vld [vmem:[%s5997_s1 + $0x9b0] ss:$12 sps:$4 sm:$0xff]  }
 0x15c   : > { %2576 = vmatpush2.bf16.msra.mxu1 %v4546_v3  ;;  %2535 = vmatpush2.bf16.msra.mxu0 %v4543_v4  ;;  %v4603_v3 = vld [vmem:[%s5997_s1 + $0x994] ss:$12 sps:$4 sm:$0xff]   ;;  %v2986_v4 = vrot.slane %v4115_v61, 1 }
 0x15d   : > { %2887 = vmatprep.subr.bf16.mxu1 %v4687_v1  ;;  %2846 = vmatprep.subr.bf16.mxu0 %v4551_v5 }
 0x15f   : > { %v1222_v13 = vpop.f32.mrf.mxu1  ;;  %2578 = vmatmul.mubr.bf16.vlgmr.msra.gmra.mxu1 %v5687_v8  ;;  %v1181_v15 = vpop.f32.mrf.mxu0  ;;  %2537 = vmatmul.mubr.bf16.vlgmr.msra.gmra.mxu0 %v5687_v8  ;;  %v4604_v8 = vld [vmem:[%s5997_s1 + $0x998] ss:$12 sps:$4 sm:$0xff]  }
 0x160   : > { %v5701_v14 = vadd.f32 %v1222_v13, %v5562_v23  ;;  %2888 = vmatpush1.bf16.msra.mxu1 %v4552_v9  ;;  %v5708_v17 = vadd.f32 %v1181_v15, %v5568_v28  ;;  %2847 = vmatpush1.bf16.msra.mxu0 %v4549_v10  ;;  %v4557_v28 = vld [vmem:[%s5997_s1 + $0x858] ss:$12 sps:$4 sm:$0xff]   ;;  %v4607_v13 = vld [vmem:[%s5997_s1 + $0x97c] ss:$12 sps:$4 sm:$0xff]  }
 0x161   : > { %v1224_v18 = vpop.f32.mrf.mxu1  ;;  %2889 = vmatprep.subr.bf16.mxu1 %v4687_v1  ;;  %v1183_v20 = vpop.f32.mrf.mxu0  ;;  %2848 = vmatprep.subr.bf16.mxu0 %v4555_v11  ;;  %v4601_v11 = vld [vmem:[%s5997_s1 + $0x990] ss:$12 sps:$4 sm:$0xff]  }
 0x162   : > { %4064 = vmatprep.mubr.msk.bf16.mxu1 %vm464_vm0, %v2649_v12  ;;  %v5719_v22 = vadd.f32 %v1183_v20, %v5579_v31  ;;  %4063 = vmatprep.mubr.msk.bf16.mxu0 %vm464_vm0, %v2649_v12  ;;  %v4567_v31 = vld [vmem:[%s5997_s1 + $0x82c] ss:$12 sps:$4 sm:$0xff]  }
 0x163   : > { %v1225_v23 = vpop.f32.mrf.mxu1  ;;  %v1185_v24 = vpop.f32.mrf.mxu0 }
 0x164   : > { %2890 = vmatpush1.bf16.msra.mxu1 %v4556_v16  ;;  %2849 = vmatpush1.bf16.msra.mxu0 %v4553_v19  ;;  %v4605_v19 = vld [vmem:[%s5997_s1 + $0x978] ss:$12 sps:$4 sm:$0xff]   ;;  %v4609_v23 = vld [vmem:[%s5997_s1 + $0x960] ss:$12 sps:$4 sm:$0xff]  }
 0x165   : > { %v1226_v26 = vpop.f32.mrf.mxu1  ;;  %2891 = vmatprep.subr.bf16.mxu1 %v4687_v1  ;;  %v1186_v29 = vpop.f32.mrf.mxu0  ;;  %2850 = vmatprep.subr.bf16.mxu0 %v4559_v21  ;;  %v4611_v21 = vld [vmem:[%s5997_s1 + $0x964] ss:$12 sps:$4 sm:$0xff]   ;;  %v4615_v24 = vld [vmem:[%s5997_s1 + $0x94c] ss:$12 sps:$4 sm:$0xff]  }
 0x166   : > { %v4613_v26 = vld [vmem:[%s5997_s1 + $0x948] ss:$12 sps:$4 sm:$0xff]   ;;  %v4620_v29 = vld [vmem:[%s5997_s1 + $0x938] ss:$12 sps:$4 sm:$0xff]  }
 0x168   : > { %2892 = vmatpush1.bf16.msra.mxu1 %v4560_v25  ;;  %2851 = vmatpush1.bf16.msra.mxu0 %v4557_v28  ;;  %v4616_v25 = vld [vmem:[%s5997_s1 + $0x950] ss:$12 sps:$4 sm:$0xff]   ;;  %v4619_v28 = vld [vmem:[%s5997_s1 + $0x934] ss:$12 sps:$4 sm:$0xff]  }
 0x169   : > { %2893 = vmatprep.subr.bf16.mxu1 %v4687_v1  ;;  %2852 = vmatprep.subr.bf16.mxu0 %v4563_v27  ;;  %v4617_v27 = vld [vmem:[%s5997_s1 + $0x930] ss:$12 sps:$4 sm:$0xff]  }
 0x16c   : > { %2894 = vmatpush1.bf16.msra.mxu1 %v4564_v30  ;;  %2853 = vmatpush1.bf16.msra.mxu0 %v4561_v32  ;;  %v4623_v30 = vld [vmem:[%s5997_s1 + $0x91c] ss:$12 sps:$4 sm:$0xff]   ;;  %v4624_v32 = vld [vmem:[%s5997_s1 + $0x920] ss:$12 sps:$4 sm:$0xff]  }
 0x16d   : > { %2895 = vmatprep.subr.bf16.mxu1 %v4687_v1  ;;  %2854 = vmatprep.subr.bf16.mxu0 %v4567_v31  ;;  %v4621_v31 = vld [vmem:[%s5997_s1 + $0x918] ss:$12 sps:$4 sm:$0xff]  }
 0x170   : > { %2896 = vmatpush1.bf16.msra.mxu1 %v4568_v33  ;;  %2855 = vmatpush1.bf16.msra.mxu0 %v4565_v34  ;;  %v4627_v33 = vld [vmem:[%s5997_s1 + $0x904] ss:$12 sps:$4 sm:$0xff]   ;;  %v4628_v34 = vld [vmem:[%s5997_s1 + $0x908] ss:$12 sps:$4 sm:$0xff]  }
 0x171   : > { %2897 = vmatprep.subr.bf16.mxu1 %v4687_v1  ;;  %2856 = vmatprep.subr.bf16.mxu0 %v4571_v35  ;;  %v4625_v35 = vld [vmem:[%s5997_s1 + $0x900] ss:$12 sps:$4 sm:$0xff]  }
 0x174   : > { %2898 = vmatpush1.bf16.msra.mxu1 %v4572_v36  ;;  %2857 = vmatpush1.bf16.msra.mxu0 %v4569_v37  ;;  %v4631_v36 = vld [vmem:[%s5997_s1 + $0xa0c] ss:$12 sps:$4 sm:$0xff]   ;;  %v4632_v37 = vld [vmem:[%s5997_s1 + $0xa10] ss:$12 sps:$4 sm:$0xff]  }
 0x175   : > { %2899 = vmatprep.subr.bf16.mxu1 %v4687_v1  ;;  %2858 = vmatprep.subr.bf16.mxu0 %v4575_v38  ;;  %v4629_v38 = vld [vmem:[%s5997_s1 + $0xa08] ss:$12 sps:$4 sm:$0xff]  }
 0x178   : > { %2900 = vmatpush1.bf16.msra.mxu1 %v4576_v39  ;;  %2859 = vmatpush1.bf16.msra.mxu0 %v4573_v40  ;;  %v4635_v39 = vld [vmem:[%s5997_s1 + $0x9f4] ss:$12 sps:$4 sm:$0xff]   ;;  %v4636_v40 = vld [vmem:[%s5997_s1 + $0x9f8] ss:$12 sps:$4 sm:$0xff]  }
 0x179   : > { %2901 = vmatprep.subr.bf16.mxu1 %v4687_v1  ;;  %2860 = vmatprep.subr.bf16.mxu0 %v4579_v41  ;;  %v4633_v41 = vld [vmem:[%s5997_s1 + $0x9f0] ss:$12 sps:$4 sm:$0xff]  }
 0x17c   : > { %2902 = vmatpush1.bf16.msra.mxu1 %v4580_v42  ;;  %2861 = vmatpush1.bf16.msra.mxu0 %v4577_v43  ;;  %v4639_v42 = vld [vmem:[%s5997_s1 + $0x9dc] ss:$12 sps:$4 sm:$0xff]   ;;  %v4640_v43 = vld [vmem:[%s5997_s1 + $0x9e0] ss:$12 sps:$4 sm:$0xff]  }
 0x17d   : > { %2911 = vmatprep.subr.bf16.mxu1 %v4687_v1  ;;  %2870 = vmatprep.subr.bf16.mxu0 %v4583_v44  ;;  %v4637_v44 = vld [vmem:[%s5997_s1 + $0x9d8] ss:$12 sps:$4 sm:$0xff]  }
 0x180   : > { %2912 = vmatpush2.bf16.msra.mxu1 %v4584_v45  ;;  %2871 = vmatpush2.bf16.msra.mxu0 %v4581_v46  ;;  %v4643_v45 = vld [vmem:[%s5997_s1 + $0x9c4] ss:$12 sps:$4 sm:$0xff]   ;;  %v4114_v46 = vcombine.low %v5815_v57, %v5815_v57 }
 0x181   : > { %2913 = vmatprep.subr.bf16.mxu1 %v4687_v1  ;;  %2872 = vmatprep.subr.bf16.mxu0 %v4587_v47  ;;  %v4644_v47 = vld [vmem:[%s5997_s1 + $0x9c8] ss:$12 sps:$4 sm:$0xff]  }
 0x184   : > { %2914 = vmatpush2.bf16.msra.mxu1 %v4588_v48  ;;  %2873 = vmatpush2.bf16.msra.mxu0 %v4585_v49  ;;  %v4641_v48 = vld [vmem:[%s5997_s1 + $0x9c0] ss:$12 sps:$4 sm:$0xff]   ;;  %v2985_v49 = vrot.slane %v4114_v46, 1 }
 0x185   : > { %2915 = vmatprep.subr.bf16.mxu1 %v4687_v1  ;;  %2874 = vmatprep.subr.bf16.mxu0 %v4591_v50 }
 0x188   : > { %2916 = vmatpush2.bf16.msra.mxu1 %v4592_v52  ;;  %2875 = vmatpush2.bf16.msra.mxu0 %v4589_v53 }
 0x189   : > { %2917 = vmatprep.subr.bf16.mxu1 %v4687_v1  ;;  %2876 = vmatprep.subr.bf16.mxu0 %v4595_v54 }
 0x18c   : > { %2918 = vmatpush2.bf16.msra.mxu1 %v4596_v58  ;;  %2877 = vmatpush2.bf16.msra.mxu0 %v4593_v59 }
 0x18d   : > { %3224 = vmatprep.subr.bf16.mxu1 %v4687_v1  ;;  %3183 = vmatprep.subr.bf16.mxu0 %v4599_v60 }
 0x18f   : > { %v1561_v5 = vpop.f32.mrf.mxu1  ;;  %2920 = vmatmul.mubr.bf16.vlgmr.msra.gmra.mxu1 %v2643_v63  ;;  %v1520_v7 = vpop.f32.mrf.mxu0  ;;  %2879 = vmatmul.mubr.bf16.vlgmr.msra.gmra.mxu0 %v2643_v63 }
 0x190   : > { %v5840_v6 = vadd.f32 %v1561_v5, %v5701_v14  ;;  %3225 = vmatpush1.bf16.msra.mxu1 %v4600_v0  ;;  %v5846_v9 = vadd.f32 %v1520_v7, %v5708_v17  ;;  %3184 = vmatpush1.bf16.msra.mxu0 %v4597_v2  ;;  %v4608_v17 = vld [vmem:[%s5997_s1 + $0x980] ss:$12 sps:$4 sm:$0xff]  }
 0x191   : > { %v1563_v10 = vpop.f32.mrf.mxu1  ;;  %3226 = vmatprep.subr.bf16.mxu1 %v4687_v1  ;;  %v1522_v12 = vpop.f32.mrf.mxu0  ;;  %3185 = vmatprep.subr.bf16.mxu0 %v4603_v3 }
 0x192   : > { %4153 = vmatprep.mubr.msk.bf16.mxu1 %vm464_vm0, %v2986_v4  ;;  %v5857_v14 = vadd.f32 %v1522_v12, %v5719_v22  ;;  %4152 = vmatprep.mubr.msk.bf16.mxu0 %vm464_vm0, %v2986_v4  ;;  %v4612_v22 = vld [vmem:[%s5997_s1 + $0x968] ss:$12 sps:$4 sm:$0xff]  }
 0x193   : > { %v1564_v15 = vpop.f32.mrf.mxu1  ;;  %v1524_v16 = vpop.f32.mrf.mxu0 }
 0x194   : > { %3227 = vmatpush1.bf16.msra.mxu1 %v4604_v8  ;;  %3186 = vmatpush1.bf16.msra.mxu0 %v4601_v11 }
 0x195   : > { %v1565_v18 = vpop.f32.mrf.mxu1  ;;  %3228 = vmatprep.subr.bf16.mxu1 %v4687_v1  ;;  %v1525_v20 = vpop.f32.mrf.mxu0  ;;  %3187 = vmatprep.subr.bf16.mxu0 %v4607_v13 }
 0x198   : > { %3229 = vmatpush1.bf16.msra.mxu1 %v4608_v17  ;;  %3188 = vmatpush1.bf16.msra.mxu0 %v4605_v19 }
 0x199   : > { %3230 = vmatprep.subr.bf16.mxu1 %v4687_v1  ;;  %3189 = vmatprep.subr.bf16.mxu0 %v4611_v21 }
 0x19c   : > { %3231 = vmatpush1.bf16.msra.mxu1 %v4612_v22  ;;  %3190 = vmatpush1.bf16.msra.mxu0 %v4609_v23 }
 0x19d   : > { %3232 = vmatprep.subr.bf16.mxu1 %v4687_v1  ;;  %3191 = vmatprep.subr.bf16.mxu0 %v4615_v24 }
 0x1a0   : > { %3233 = vmatpush1.bf16.msra.mxu1 %v4616_v25  ;;  %3192 = vmatpush1.bf16.msra.mxu0 %v4613_v26 }
 0x1a1   : > { %3234 = vmatprep.subr.bf16.mxu1 %v4687_v1  ;;  %3193 = vmatprep.subr.bf16.mxu0 %v4619_v28 }
 0x1a4   : > { %3235 = vmatpush1.bf16.msra.mxu1 %v4620_v29  ;;  %3194 = vmatpush1.bf16.msra.mxu0 %v4617_v27  ;;  %v4688_v29 = vmov 1983009808  }
 0x1a5   : > { %3236 = vmatprep.subr.bf16.mxu1 %v4687_v1  ;;  %3195 = vmatprep.subr.bf16.mxu0 %v4623_v30  ;;  %v3278_v27 = vunpack.c.l.s4 %v4688_v29 }
 0x1a8   : > { %3237 = vmatpush1.bf16.msra.mxu1 %v4624_v32  ;;  %3196 = vmatpush1.bf16.msra.mxu0 %v4621_v31 }
 0x1a9   : > { %3238 = vmatprep.subr.bf16.mxu1 %v4687_v1  ;;  %3197 = vmatprep.subr.bf16.mxu0 %v4627_v33 }
 0x1ac   : > { %3239 = vmatpush1.bf16.msra.mxu1 %v4628_v34  ;;  %3198 = vmatpush1.bf16.msra.mxu0 %v4625_v35 }
 0x1ad   : > { %3248 = vmatprep.subr.bf16.mxu1 %v4687_v1  ;;  %3207 = vmatprep.subr.bf16.mxu0 %v4631_v36  ;;  %v3279_v36 = vunpack.c.0.s8 %v3278_v27 }
 0x1b0   : > { %3249 = vmatpush2.bf16.msra.mxu1 %v4632_v37  ;;  %3208 = vmatpush2.bf16.msra.mxu0 %v4629_v38 }
 0x1b1   : > { %3250 = vmatprep.subr.bf16.mxu1 %v4687_v1  ;;  %3209 = vmatprep.subr.bf16.mxu0 %v4635_v39 }
 0x1b4   : > { %3251 = vmatpush2.bf16.msra.mxu1 %v4636_v40  ;;  %3210 = vmatpush2.bf16.msra.mxu0 %v4633_v41 }
 0x1b5   : > { %3252 = vmatprep.subr.bf16.mxu1 %v4687_v1  ;;  %3211 = vmatprep.subr.bf16.mxu0 %v4639_v42 }
 0x1b8   : > { %3253 = vmatpush2.bf16.msra.mxu1 %v4640_v43  ;;  %3212 = vmatpush2.bf16.msra.mxu0 %v4637_v44 }
 0x1b9   : > { %3254 = vmatprep.subr.bf16.mxu1 %v4687_v1  ;;  %3213 = vmatprep.subr.bf16.mxu0 %v4643_v45 }
 0x1bc   : > { %3255 = vmatpush2.bf16.msra.mxu1 %v4644_v47  ;;  %3214 = vmatpush2.bf16.msra.mxu0 %v4641_v48  ;;  %v3282_v47 = vsub.s32 %v3279_v36, %v5513_v62 }
 0x1bf   : > { %v1903_v50 = vpop.f32.mrf.mxu1  ;;  %3257 = vmatmul.mubr.bf16.vlgmr.msra.gmra.mxu1 %v2985_v49  ;;  %v1862_v52 = vpop.f32.mrf.mxu0  ;;  %3216 = vmatmul.mubr.bf16.vlgmr.msra.gmra.mxu0 %v2985_v49 }
 0x1c0   : > { %v1911_v51 = vadd.f32 %v1903_v50, %v5840_v6  ;;  %v1909_v53 = vadd.f32 %v1862_v52, %v5846_v9 }
 0x1c1   : > { %v1905_v54 = vpop.f32.mrf.mxu1  ;;  %v1864_v55 = vpop.f32.mrf.mxu0 }
 0x1c2   : > { %v1910_v1 = vadd.f32 %v1864_v55, %v5857_v14  ;;  %v3304_v55 = vld [vmem:[%s192_s26] sm:$0x3f] }
 0x1c3   : > { %v1906_v56 = vpop.f32.mrf.mxu1  ;;  %v1866_v57 = vpop.f32.mrf.mxu0 }
 0x1c5   : > { %v1907_v58 = vpop.f32.mrf.mxu1  ;;  %v1867_v59 = vpop.f32.mrf.mxu0 }
 0x1ef   : > { %v2240_v60 = vpop.f32.mrf.mxu1  ;;  %v2199_v63 = vpop.f32.mrf.mxu0 }
 0x1f0   : > { %v2248_v61 = vadd.f32 %v2240_v60, %v1911_v51  ;;  %v2246_v0 = vadd.f32 %v2199_v63, %v1909_v53 }
 0x1f1   : > { %v2242_v2 = vpop.f32.mrf.mxu1  ;;  %v2201_v3 = vpop.f32.mrf.mxu0 }
 0x1f2   : > { %v2247_v4 = vadd.f32 %v2201_v3, %v1910_v1 }
 0x1f3   : > { %v2243_v5 = vpop.f32.mrf.mxu1  ;;  %v2203_v6 = vpop.f32.mrf.mxu0 }
 0x1f5   : > { %v2244_v7 = vpop.f32.mrf.mxu1  ;;  %v2204_v8 = vpop.f32.mrf.mxu0 }
 0x21f   : > { %v2579_v9 = vpop.f32.mrf.mxu1  ;;  %v2538_v11 = vpop.f32.mrf.mxu0 }
 0x220   : > { %v2587_v10 = vadd.f32 %v2579_v9, %v2248_v61  ;;  %v2585_v12 = vadd.f32 %v2538_v11, %v2246_v0 }
 0x221   : > { %v2581_v13 = vpop.f32.mrf.mxu1  ;;  %v2540_v14 = vpop.f32.mrf.mxu0 }
 0x222   : > { %v2586_v15 = vadd.f32 %v2540_v14, %v2247_v4 }
 0x223   : > { %v2582_v16 = vpop.f32.mrf.mxu1  ;;  %v2542_v17 = vpop.f32.mrf.mxu0 }
 0x225   : > { %v2583_v18 = vpop.f32.mrf.mxu1  ;;  %v2543_v19 = vpop.f32.mrf.mxu0 }
 0x24f   : > { %v2921_v20 = vpop.f32.mrf.mxu1  ;;  %v2880_v21 = vpop.f32.mrf.mxu0 }
 0x250   : > { %v2929_v30 = vadd.f32 %v2921_v20, %v2587_v10  ;;  %v2927_v32 = vadd.f32 %v2880_v21, %v2585_v12 }
 0x251   : > { %v2923_v22 = vpop.f32.mrf.mxu1  ;;  %v2882_v23 = vpop.f32.mrf.mxu0 }
 0x252   : > { %v2928_v35 = vadd.f32 %v2882_v23, %v2586_v15 }
 0x253   : > { %v2924_v24 = vpop.f32.mrf.mxu1  ;;  %v2884_v25 = vpop.f32.mrf.mxu0 }
 0x255   : > { %v2925_v26 = vpop.f32.mrf.mxu1  ;;  %v2885_v28 = vpop.f32.mrf.mxu0 }
 0x27f   : > { %v3258_v31 = vpop.f32.mrf.mxu1  ;;  %v3217_v34 = vpop.f32.mrf.mxu0 }
 0x280   : > { %v3266_v33 = vadd.f32 %v3258_v31, %v2929_v30  ;;  %v3264_v37 = vadd.f32 %v3217_v34, %v2927_v32 }
 0x281   : > { %v3260_v38 = vpop.f32.mrf.mxu1  ;;  %v3219_v40 = vpop.f32.mrf.mxu0 }
 0x282   : > { %v3269_v39 = vmax.f32 %v3266_v33, 0.0  ;;  %v3265_v42 = vadd.f32 %v3219_v40, %v2928_v35  ;;  %v3267_v48 = vmax.f32 %v3264_v37, 0.0 }
 0x283   : > { %v3261_v44 = vpop.f32.mrf.mxu1  ;;  %v3221_v45 = vpop.f32.mrf.mxu0 }
 0x284   : > { %v3272_v46 = vpack.c.bf16 %v3269_v39, %v3269_v39  ;;  %v3268_v49 = vmax.f32 %v3265_v42, 0.0 }
 0x285   : > { %v3262_v50 = vpop.f32.mrf.mxu1  ;;  %v3222_v51 = vpop.f32.mrf.mxu0 }
 0x286   : > { %v4154_v52 = vpack.c.bf16 %v3268_v49, %v3267_v48  ;;  %v3290_v53 = vrot.slane %v3272_v46, %v3282_v47 }
 0x288   : > { %v3283_v54 = vrot.slane %v4154_v52, %v3282_v47 }
 0x28a   : > { %v3291_v62 = vcombine.low %v3283_v54, %v3290_v53 }
 0x28c   : > { %v3305_v1 = vsel %vm3303_vm11, %v3291_v62, %v3304_v55 }
 0x28d   : > { %3306 = vst [vmem:[%s192_s26] sm:$0x3f] %v3305_v1 }
 0x28e PF: > { %s13_s16 = sadd.s32 1, %s4685_s16   ;;  %s6004_s12 = smov %s4677_s14 }
 0x28f   : > { %p10_p7 = scmp.ge.s32.totalorder %s13_s16, 8   ;;  %s6005_s13 = smov %s4681_s15 }
 0x290   : > { %s6006_s14 = smov %s6009_s17  ;;  %s6007_s15 = smov %s6013_s18 }
 0x291   :  { %12 = sbr.rel (!%p10_p7) target bundleno = 3 (0x3), region = 73 }

// kernel: alexnet_fe_forward.9
= control target key start
LH: loop header
LB: loop body
LE: loop exit
PB: predicated region body
PF: predicated region fallthrough
CT: control target
= control target key end

     0   :  { %s5598_s12 = smov 0   ;;  %s5600_s13 = smov 0   ;;  %s6947_s0 = inlined_call_operand.vmem [shape: bf16[2,11,11,128], index: 0, kind: input, shape index: {}]   ;;  %s6948_s1 = inlined_call_operand.vmem [shape: bf16[25,128,192], index: 1, kind: input, shape index: {}]   ;;  %s6949_s2 = inlined_call_operand.vmem [shape: f32[1,192], index: 2, kind: input, shape index: {}]   ;;  %s6950_s3 = inlined_call_operand.vmem [shape: bf16[2,7,7,192], index: 3, kind: output, shape index: {}]  }
   0x1   :  { %s5602_s14 = smov 0   ;;  %s5604_s15 = smov 0  }
   0x2   :  { %s5606_s16 = smov 0  }
   0x3 LB: > { %s22_s17 = sadd.s32 1, %s5567_s14  ;;  %s25_s18 = sadd.s32 1, %s5571_s15  ;;  %s5575_s16 = sphi %s5606_s16, %s13_s16   ;;  %s5571_s15 = sphi %s5604_s15, %s6954_s15   ;;  %s5567_s14 = sphi %s5602_s14, %s6953_s14   ;;  %s5563_s13 = sphi %s5600_s13, %s6952_s13   ;;  %s5559_s12 = sphi %s5598_s12, %s6951_s12  }
   0x4   : > { %p23_p0 = scmp.ge.s32.totalorder %s22_s17, 7  ;;  %p4045_p1 = scmp.ge.s32.totalorder %s5575_s16, 1 }
   0x5   : > { %p151_p2 = scmp.lt.s32.totalorder %s5575_s16, 15 }
   0x6   : > { %s6956_s17 = smov (%p23_p0, %s22_s17), 0  ;;  %s6958_s18 = smov (!%p23_p0, %s25_s18), %s5571_s15 }
   0x7   : > { %p152_p3 = pnand %p4045_p1, %p151_p2  ;;  %p27_p4 = scmp.ge.s32.totalorder %s6958_s18, 2 }
   0x8   : > { %p179_p5 = scmp.lt.s32.totalorder (!%p152_p3), %s5563_s13, 1  ;;  %s4877_s21 = sshll.u32 (!%p152_p3), %s5559_s12, 3 }
   0x9   : > { %s6960_s18 = smov (%p27_p4, %s6958_s18), 0  ;;  %155 = sbr.rel (%p152_p3) target bundleno = 635 (0x27b), region = 32 }
   0xa   : > { %p186_p6 = scmp.lt.s32.totalorder (!%p152_p3), %s5559_s12, 6 }
   0xe   : > { %v4922_v0 = vld [vmem:[%s6948_s1 + $0x74] ss:$8 sps:$4 sm:$0xff]   ;;  %v4924_v1 = vld [vmem:[%s6948_s1 + $0x70] ss:$8 sps:$4 sm:$0xff]   ;;  %v5577_v2 = vmov 0   ;;  %s6962_s13 = smov (!%p179_p5, %s5563_s13), 1 }
   0xf   : > { %340 = vmatprep.mubr.bf16.mxu0 %v5577_v2  ;;  %491 = vmatprep.mubr.bf16.mxu1 %v5577_v2  ;;  %v4925_v3 = vld [vmem:[%s6948_s1 + $0xf4] ss:$8 sps:$4 sm:$0xff]   ;;  %v4927_v4 = vld [vmem:[%s6948_s1 + $0xf0] ss:$8 sps:$4 sm:$0xff]   ;;  %v4928_v5 = vld [vmem:[%s6948_s1 + $0x64] ss:$8 sps:$4 sm:$0xff]  }
  0x10   : > { %308 = vmatprep.subr.bf16.mxu0 %v4922_v0  ;;  %v4930_v6 = vld [vmem:[%s6948_s1 + $0x60] ss:$8 sps:$4 sm:$0xff]   ;;  %459 = vmatprep.subr.bf16.mxu1 %v4925_v3  ;;  %v4931_v7 = vld [vmem:[%s6948_s1 + $0xe4] ss:$8 sps:$4 sm:$0xff]   ;;  %v4934_v9 = vld [vmem:[%s6948_s1 + $0x54] ss:$8 sps:$4 sm:$0xff]  }
  0x11   : > { %309 = vmatpush1.bf16.msra.mxu0 %v4924_v1  ;;  %460 = vmatpush1.bf16.msra.mxu1 %v4927_v4  ;;  %v4933_v8 = vld [vmem:[%s6948_s1 + $0xe0] ss:$8 sps:$4 sm:$0xff]   ;;  %v4936_v10 = vld [vmem:[%s6948_s1 + $0x50] ss:$8 sps:$4 sm:$0xff]   ;;  %v4937_v11 = vld [vmem:[%s6948_s1 + $0xd4] ss:$8 sps:$4 sm:$0xff]  }
  0x12   : > { %310 = vmatprep.subr.bf16.mxu0 %v4928_v5  ;;  %461 = vmatprep.subr.bf16.mxu1 %v4931_v7  ;;  %v4940_v12 = vld [vmem:[%s6948_s1 + $0x44] ss:$8 sps:$4 sm:$0xff]   ;;  %v4939_v13 = vld [vmem:[%s6948_s1 + $0xd0] ss:$8 sps:$4 sm:$0xff]   ;;  %v4942_v15 = vld [vmem:[%s6948_s1 + $0x40] ss:$8 sps:$4 sm:$0xff]  }
  0x13   : > { %v4943_v14 = vld [vmem:[%s6948_s1 + $0xc4] ss:$8 sps:$4 sm:$0xff]   ;;  %s4879_s29 = smul.u32 88, %s6962_s13  ;;  %v4946_v16 = vld [vmem:[%s6948_s1 + $0x34] ss:$8 sps:$4 sm:$0xff]   ;;  %s6964_s12 = smov (!%p186_p6, %s5559_s12), 6 }
  0x14   : > { %v4945_v17 = vld [vmem:[%s6948_s1 + $0xc0] ss:$8 sps:$4 sm:$0xff]   ;;  %v4949_v18 = vld [vmem:[%s6948_s1 + $0xb4] ss:$8 sps:$4 sm:$0xff]   ;;  %v4948_v19 = vld [vmem:[%s6948_s1 + $0x30] ss:$8 sps:$4 sm:$0xff]  }
  0x15   : > { %311 = vmatpush1.bf16.msra.mxu0 %v4930_v6  ;;  %462 = vmatpush1.bf16.msra.mxu1 %v4933_v8  ;;  %s183_s20 = scalar_lea.vmem %s6947_s0, %s4879_s29  ;;  %v4952_v20 = vld [vmem:[%s6948_s1 + $0x24] ss:$8 sps:$4 sm:$0xff]   ;;  %v4951_v21 = vld [vmem:[%s6948_s1 + $0xb0] ss:$8 sps:$4 sm:$0xff]   ;;  %v4954_v23 = vld [vmem:[%s6948_s1 + $0x20] ss:$8 sps:$4 sm:$0xff]  }
  0x16   : > { %312 = vmatprep.subr.bf16.mxu0 %v4934_v9  ;;  %463 = vmatprep.subr.bf16.mxu1 %v4937_v11  ;;  %v4955_v22 = vld [vmem:[%s6948_s1 + $0xa4] ss:$8 sps:$4 sm:$0xff]   ;;  %s5709_s28 = scalar_lea.vmem %s183_s20, %s4877_s21  ;;  %v4958_v24 = vld [vmem:[%s6948_s1 + $0x14] ss:$8 sps:$4 sm:$0xff]   ;;  %v4957_v25 = vld [vmem:[%s6948_s1 + $0xa0] ss:$8 sps:$4 sm:$0xff]  }
  0x17   : > { %v211_v26 = vld [vmem:[%s5709_s28] sm:$0xf]  ;;  %v4961_v27 = vld [vmem:[%s6948_s1 + $0x94] ss:$8 sps:$4 sm:$0xff]   ;;  %v4960_v29 = vld [vmem:[%s6948_s1 + $0x10] ss:$8 sps:$4 sm:$0xff]  }
  0x18   : > { %v4083_v28 = vcombine.low %v211_v26, %v211_v26  ;;  %v4964_v30 = vld [vmem:[%s6948_s1 + $0x4] ss:$8 sps:$4 sm:$0xff]   ;;  %v4963_v32 = vld [vmem:[%s6948_s1 + $0x90] ss:$8 sps:$4 sm:$0xff]   ;;  %v4966_v34 = vld [vmem:[%s6948_s1] ss:$8 sps:$4 sm:$0xff]  }
  0x19   : > { %313 = vmatpush1.bf16.msra.mxu0 %v4936_v10  ;;  %464 = vmatpush1.bf16.msra.mxu1 %v4939_v13  ;;  %v4967_v33 = vld [vmem:[%s6948_s1 + $0x84] ss:$8 sps:$4 sm:$0xff]   ;;  %v4973_v37 = vld [vmem:[%s6948_s1 + $0x174] ss:$8 sps:$4 sm:$0xff]   ;;  %v4969_v38 = vld [vmem:[%s6948_s1 + $0x80] ss:$8 sps:$4 sm:$0xff]  }
  0x1a   : > { %314 = vmatprep.subr.bf16.mxu0 %v4940_v12  ;;  %465 = vmatprep.subr.bf16.mxu1 %v4943_v14  ;;  %v374_v31 = vshll.u32 %v4083_v28, 16  ;;  %v372_v35 = vshrl.u32 %v4083_v28, 16  ;;  %v4976_v39 = vld [vmem:[%s6948_s1 + $0x1f4] ss:$8 sps:$4 sm:$0xff]   ;;  %v4971_v40 = vld [vmem:[%s6948_s1 + $0x170] ss:$8 sps:$4 sm:$0xff]  }
  0x1b   : > { %v4979_v42 = vld [vmem:[%s6948_s1 + $0x164] ss:$8 sps:$4 sm:$0xff]   ;;  %v4974_v43 = vld [vmem:[%s6948_s1 + $0x1f0] ss:$8 sps:$4 sm:$0xff]   ;;  %v4977_v45 = vld [vmem:[%s6948_s1 + $0x160] ss:$8 sps:$4 sm:$0xff]  }
  0x1c   : > { %v376_v36 = vrot.slane %v374_v31, 1  ;;  %v4982_v44 = vld [vmem:[%s6948_s1 + $0x1e4] ss:$8 sps:$4 sm:$0xff]   ;;  %v4985_v46 = vld [vmem:[%s6948_s1 + $0x154] ss:$8 sps:$4 sm:$0xff]   ;;  %s4047_s26 = sshll.u32 %s6964_s12, 1 }
  0x1d   : > { %315 = vmatpush1.bf16.msra.mxu0 %v4942_v15  ;;  %466 = vmatpush1.bf16.msra.mxu1 %v4945_v17  ;;  %v4980_v47 = vld [vmem:[%s6948_s1 + $0x1e0] ss:$8 sps:$4 sm:$0xff]   ;;  %v4988_v48 = vld [vmem:[%s6948_s1 + $0x1d4] ss:$8 sps:$4 sm:$0xff]   ;;  %v4983_v49 = vld [vmem:[%s6948_s1 + $0x150] ss:$8 sps:$4 sm:$0xff]  }
  0x1e   : > { %316 = vmatprep.subr.bf16.mxu0 %v4946_v16  ;;  %467 = vmatprep.subr.bf16.mxu1 %v4949_v18  ;;  %v377_v41 = vor.u32 %v376_v36, %v372_v35  ;;  %v4991_v50 = vld [vmem:[%s6948_s1 + $0x144] ss:$8 sps:$4 sm:$0xff]   ;;  %v4986_v51 = vld [vmem:[%s6948_s1 + $0x1d0] ss:$8 sps:$4 sm:$0xff]   ;;  %v4989_v53 = vld [vmem:[%s6948_s1 + $0x140] ss:$8 sps:$4 sm:$0xff]  }
  0x1f   : > { %v4994_v52 = vld [vmem:[%s6948_s1 + $0x1c4] ss:$8 sps:$4 sm:$0xff]   ;;  %v4997_v54 = vld [vmem:[%s6948_s1 + $0x134] ss:$8 sps:$4 sm:$0xff]   ;;  %v4992_v55 = vld [vmem:[%s6948_s1 + $0x1c0] ss:$8 sps:$4 sm:$0xff]  }
  0x20   : > { %v5000_v56 = vld [vmem:[%s6948_s1 + $0x1b4] ss:$8 sps:$4 sm:$0xff]   ;;  %v4995_v57 = vld [vmem:[%s6948_s1 + $0x130] ss:$8 sps:$4 sm:$0xff]   ;;  %v5003_v58 = vld [vmem:[%s6948_s1 + $0x124] ss:$8 sps:$4 sm:$0xff]  }
  0x21   : > { %317 = vmatpush1.bf16.msra.mxu0 %v4948_v19  ;;  %468 = vmatpush1.bf16.msra.mxu1 %v4951_v21  ;;  %v4998_v59 = vld [vmem:[%s6948_s1 + $0x1b0] ss:$8 sps:$4 sm:$0xff]   ;;  %v5001_v60 = vld [vmem:[%s6948_s1 + $0x120] ss:$8 sps:$4 sm:$0xff]   ;;  %v5006_v61 = vld [vmem:[%s6948_s1 + $0x1a4] ss:$8 sps:$4 sm:$0xff]  }
  0x22   : > { %318 = vmatprep.subr.bf16.mxu0 %v4952_v20  ;;  %469 = vmatprep.subr.bf16.mxu1 %v4955_v22  ;;  %v5009_v62 = vld [vmem:[%s6948_s1 + $0x114] ss:$8 sps:$4 sm:$0xff]   ;;  %v5019_v63 = vld [vmem:[%s5709_s28] sm:$0x1e]   ;;  %v5007_v3 = vld [vmem:[%s6948_s1 + $0x110] ss:$8 sps:$4 sm:$0xff]  }
  0x23   : > { %v5004_v0 = vld [vmem:[%s6948_s1 + $0x1a0] ss:$8 sps:$4 sm:$0xff]   ;;  %v5012_v1 = vld [vmem:[%s6948_s1 + $0x194] ss:$8 sps:$4 sm:$0xff]   ;;  %v5015_v4 = vld [vmem:[%s6948_s1 + $0x104] ss:$8 sps:$4 sm:$0xff]  }
  0x24   : > { %v669_v5 = vshrl.u32 %v5019_v63, 16  ;;  %v672_v6 = vshll.u32 %v5019_v63, 16  ;;  %v5010_v7 = vld [vmem:[%s6948_s1 + $0x190] ss:$8 sps:$4 sm:$0xff]   ;;  %v5018_v8 = vld [vmem:[%s6948_s1 + $0x184] ss:$8 sps:$4 sm:$0xff]  }
  0x25   : > { %319 = vmatpush1.bf16.msra.mxu0 %v4954_v23  ;;  %470 = vmatpush1.bf16.msra.mxu1 %v4957_v25  ;;  %v5013_v9 = vld [vmem:[%s6948_s1 + $0x100] ss:$8 sps:$4 sm:$0xff]   ;;  %v5022_v10 = vld [vmem:[%s6948_s1 + $0x274] ss:$8 sps:$4 sm:$0xff]   ;;  %v526_v14 = vrot.slane %v5019_v63, 1  ;;  %vm3931_vm0 = vcmask 1043456  }
  0x26   : > { %320 = vmatprep.subr.bf16.mxu0 %v4958_v24  ;;  %471 = vmatprep.subr.bf16.mxu1 %v4961_v27  ;;  %v671_v11 = vrot.slane %v669_v5, 1  ;;  %v674_v12 = vrot.slane %v672_v6, 2  ;;  %v5016_v13 = vld [vmem:[%s6948_s1 + $0x180] ss:$8 sps:$4 sm:$0xff]   ;;  %v5025_v15 = vld [vmem:[%s6948_s1 + $0x2f4] ss:$8 sps:$4 sm:$0xff]  }
  0x27   : > { %v5020_v16 = vld [vmem:[%s6948_s1 + $0x270] ss:$8 sps:$4 sm:$0xff]   ;;  %v5028_v18 = vld [vmem:[%s6948_s1 + $0x264] ss:$8 sps:$4 sm:$0xff]   ;;  %v5026_v21 = vld [vmem:[%s6948_s1 + $0x260] ss:$8 sps:$4 sm:$0xff]  }
  0x28   : > { %v675_v17 = vor.u32 %v674_v12, %v671_v11  ;;  %v5023_v19 = vld [vmem:[%s6948_s1 + $0x2f0] ss:$8 sps:$4 sm:$0xff]   ;;  %v5031_v20 = vld [vmem:[%s6948_s1 + $0x2e4] ss:$8 sps:$4 sm:$0xff]   ;;  %v5034_v22 = vld [vmem:[%s6948_s1 + $0x254] ss:$8 sps:$4 sm:$0xff]  }
  0x29   : > { %321 = vmatpush1.bf16.msra.mxu0 %v4960_v29  ;;  %472 = vmatpush1.bf16.msra.mxu1 %v4963_v32  ;;  %v5029_v23 = vld [vmem:[%s6948_s1 + $0x2e0] ss:$8 sps:$4 sm:$0xff]   ;;  %v5037_v24 = vld [vmem:[%s6948_s1 + $0x2d4] ss:$8 sps:$4 sm:$0xff]   ;;  %v5032_v25 = vld [vmem:[%s6948_s1 + $0x250] ss:$8 sps:$4 sm:$0xff]  }
  0x2a   : > { %322 = vmatprep.subr.bf16.mxu0 %v4964_v30  ;;  %473 = vmatprep.subr.bf16.mxu1 %v4967_v33  ;;  %v5035_v27 = vld [vmem:[%s6948_s1 + $0x2d0] ss:$8 sps:$4 sm:$0xff]   ;;  %v5043_v28 = vld [vmem:[%s6948_s1 + $0x2c4] ss:$8 sps:$4 sm:$0xff]   ;;  %v5038_v29 = vld [vmem:[%s6948_s1 + $0x240] ss:$8 sps:$4 sm:$0xff]  }
  0x2b   : > { %v5046_v30 = vld [vmem:[%s6948_s1 + $0x234] ss:$8 sps:$4 sm:$0xff]   ;;  %v5041_v31 = vld [vmem:[%s6948_s1 + $0x2c0] ss:$8 sps:$4 sm:$0xff]   ;;  %v5044_v33 = vld [vmem:[%s6948_s1 + $0x230] ss:$8 sps:$4 sm:$0xff]  }
  0x2c   : > { %v5049_v32 = vld [vmem:[%s6948_s1 + $0x2b4] ss:$8 sps:$4 sm:$0xff]   ;;  %v5047_v35 = vld [vmem:[%s6948_s1 + $0x2b0] ss:$8 sps:$4 sm:$0xff]   ;;  %v5055_v36 = vld [vmem:[%s6948_s1 + $0x2a4] ss:$8 sps:$4 sm:$0xff]  }
  0x2d   : > { %323 = vmatpush1.bf16.msra.mxu0 %v4966_v34  ;;  %474 = vmatpush1.bf16.msra.mxu1 %v4969_v38  ;;  %v5052_v34 = vld [vmem:[%s6948_s1 + $0x224] ss:$8 sps:$4 sm:$0xff]   ;;  %v5058_v38 = vld [vmem:[%s6948_s1 + $0x214] ss:$8 sps:$4 sm:$0xff]   ;;  %v5094_v5 = vld [vmem:[%s6948_s1 + $0x330] ss:$8 sps:$4 sm:$0xff]  }
  0x2e   : > { %608 = vmatprep.subr.bf16.mxu0 %v4973_v37  ;;  %757 = vmatprep.subr.bf16.mxu1 %v4976_v39  ;;  %v5050_v37 = vld [vmem:[%s6948_s1 + $0x220] ss:$8 sps:$4 sm:$0xff]   ;;  %v5093_v63 = vld [vmem:[%s6948_s1 + $0x3c4] ss:$8 sps:$4 sm:$0xff]   ;;  %v5108_v11 = vld [vmem:[%s6948_s1 + $0x314] ss:$8 sps:$4 sm:$0xff]  }
  0x2f   : > { %v5053_v39 = vld [vmem:[%s6948_s1 + $0x2a0] ss:$8 sps:$4 sm:$0xff]   ;;  %v5102_v6 = vld [vmem:[%s6948_s1 + $0x324] ss:$8 sps:$4 sm:$0xff]   ;;  %vm3932_vm1 = vsmask.f32 3328 }
  0x30   : > { %341 = vmatmul.mubr.bf16.vlgmr.msra.gmra.mxu0 %v211_v26  ;;  %492 = vmatmul.mubr.bf16.vlgmr.msra.gmra.mxu1 %v377_v41  ;;  %v5040_v26 = vld [vmem:[%s6948_s1 + $0x244] ss:$8 sps:$4 sm:$0xff]   ;;  %v5056_v41 = vld [vmem:[%s6948_s1 + $0x210] ss:$8 sps:$4 sm:$0xff]   ;;  %v5103_v12 = vld [vmem:[%s6948_s1 + $0x3a0] ss:$8 sps:$4 sm:$0xff]  }
  0x31   : > { %609 = vmatpush1.bf16.msra.mxu0 %v4971_v40  ;;  %640 = vmatprep.mubr.bf16.mxu0 %v5577_v2  ;;  %v5061_v40 = vld [vmem:[%s6948_s1 + $0x294] ss:$8 sps:$4 sm:$0xff]   ;;  %vm3934_vm2 = vcmask 523268   ;;  %vm3935_vm3 = vsmask.f32 7424  ;;  %vm3933_vm4 = vmand %vm3931_vm0, %vm3932_vm1 }
  0x32   : > { %610 = vmatprep.subr.bf16.mxu0 %v4979_v42  ;;  %758 = vmatpush1.bf16.msra.mxu1 %v4974_v43  ;;  %v5064_v42 = vld [vmem:[%s6948_s1 + $0x204] ss:$8 sps:$4 sm:$0xff]   ;;  %v5059_v43 = vld [vmem:[%s6948_s1 + $0x290] ss:$8 sps:$4 sm:$0xff]   ;;  %vm3936_vm5 = vmand %vm3934_vm2, %vm3935_vm3 }
  0x33   : > { %789 = vmatprep.mubr.bf16.mxu1 %v5577_v2  ;;  %759 = vmatprep.subr.bf16.mxu1 %v4982_v44  ;;  %v5067_v44 = vld [vmem:[%s6948_s1 + $0x284] ss:$8 sps:$4 sm:$0xff]   ;;  %vm3937_vm6 = vmor %vm3936_vm5, %vm3933_vm4 }
  0x35   : > { %611 = vmatpush1.bf16.msra.mxu0 %v4977_v45  ;;  %v5068_v45 = vld [vmem:[%s5709_s28] sm:$0x3c]  }
  0x36   : > { %612 = vmatprep.subr.bf16.mxu0 %v4985_v46  ;;  %760 = vmatpush1.bf16.msra.mxu1 %v4980_v47  ;;  %v5062_v46 = vld [vmem:[%s6948_s1 + $0x200] ss:$8 sps:$4 sm:$0xff]   ;;  %v5071_v47 = vld [vmem:[%s6948_s1 + $0x374] ss:$8 sps:$4 sm:$0xff]  }
  0x37   : > { %761 = vmatprep.subr.bf16.mxu1 %v4988_v48  ;;  %v5065_v48 = vld [vmem:[%s6948_s1 + $0x280] ss:$8 sps:$4 sm:$0xff]  }
  0x39   : > { %613 = vmatpush1.bf16.msra.mxu0 %v4983_v49  ;;  %v824_v49 = vrot.slane %v5068_v45, 2  ;;  %v5151_v45 = vld [vmem:[%s6948_s1 + $0x424] ss:$8 sps:$4 sm:$0xff]  }
  0x3a   : > { %614 = vmatprep.subr.bf16.mxu0 %v4991_v50  ;;  %762 = vmatpush1.bf16.msra.mxu1 %v4986_v51  ;;  %v5075_v50 = vld [vmem:[%s6948_s1 + $0x3f4] ss:$8 sps:$4 sm:$0xff]   ;;  %v5069_v51 = vld [vmem:[%s6948_s1 + $0x370] ss:$8 sps:$4 sm:$0xff]  }
  0x3b   : > { %763 = vmatprep.subr.bf16.mxu1 %v4994_v52  ;;  %v4199_v52 = vld [vmem:[%s5709_s28 + $0x8] sm:$0xf] }
  0x3d   : > { %615 = vmatpush1.bf16.msra.mxu0 %v4989_v53  ;;  %v5078_v53 = vld [vmem:[%s6948_s1 + $0x364] ss:$8 sps:$4 sm:$0xff]  }
  0x3e   : > { %616 = vmatprep.subr.bf16.mxu0 %v4997_v54  ;;  %764 = vmatpush1.bf16.msra.mxu1 %v4992_v55  ;;  %v5073_v54 = vld [vmem:[%s6948_s1 + $0x3f0] ss:$8 sps:$4 sm:$0xff]   ;;  %v5081_v55 = vld [vmem:[%s6948_s1 + $0x3e4] ss:$8 sps:$4 sm:$0xff]  }
  0x3f   : > { %765 = vmatprep.subr.bf16.mxu1 %v5000_v56  ;;  %v5076_v56 = vld [vmem:[%s6948_s1 + $0x360] ss:$8 sps:$4 sm:$0xff]  }
  0x41   : > { %617 = vmatpush1.bf16.msra.mxu0 %v4995_v57  ;;  %v5084_v57 = vld [vmem:[%s6948_s1 + $0x354] ss:$8 sps:$4 sm:$0xff]  }
  0x42   : > { %618 = vmatprep.subr.bf16.mxu0 %v5003_v58  ;;  %766 = vmatpush1.bf16.msra.mxu1 %v4998_v59  ;;  %v5079_v58 = vld [vmem:[%s6948_s1 + $0x3e0] ss:$8 sps:$4 sm:$0xff]   ;;  %v5087_v59 = vld [vmem:[%s6948_s1 + $0x3d4] ss:$8 sps:$4 sm:$0xff]  }
  0x43   : > { %767 = vmatprep.subr.bf16.mxu1 %v5006_v61  ;;  %v5090_v61 = vld [vmem:[%s6948_s1 + $0x344] ss:$8 sps:$4 sm:$0xff]  }
  0x45   : > { %619 = vmatpush1.bf16.msra.mxu0 %v5001_v60  ;;  %v5082_v60 = vld [vmem:[%s6948_s1 + $0x350] ss:$8 sps:$4 sm:$0xff]  }
  0x46   : > { %620 = vmatprep.subr.bf16.mxu0 %v5009_v62  ;;  %768 = vmatpush1.bf16.msra.mxu1 %v5004_v0  ;;  %v5085_v62 = vld [vmem:[%s6948_s1 + $0x3d0] ss:$8 sps:$4 sm:$0xff]   ;;  %v5088_v0 = vld [vmem:[%s6948_s1 + $0x340] ss:$8 sps:$4 sm:$0xff]  }
  0x47   : > { %769 = vmatprep.subr.bf16.mxu1 %v5012_v1  ;;  %v5096_v1 = vld [vmem:[%s6948_s1 + $0x334] ss:$8 sps:$4 sm:$0xff]  }
  0x49   : > { %621 = vmatpush1.bf16.msra.mxu0 %v5007_v3  ;;  %v5091_v3 = vld [vmem:[%s6948_s1 + $0x3c0] ss:$8 sps:$4 sm:$0xff]  }
  0x4a   : > { %622 = vmatprep.subr.bf16.mxu0 %v5015_v4  ;;  %770 = vmatpush1.bf16.msra.mxu1 %v5010_v7  ;;  %v5099_v4 = vld [vmem:[%s6948_s1 + $0x3b4] ss:$8 sps:$4 sm:$0xff]   ;;  %v5097_v7 = vld [vmem:[%s6948_s1 + $0x3b0] ss:$8 sps:$4 sm:$0xff]  }
  0x4b   : > { %771 = vmatprep.subr.bf16.mxu1 %v5018_v8  ;;  %v4248_v8 = vcombine.low %v4199_v52, %v4199_v52 }
  0x4d   : > { %623 = vmatpush1.bf16.msra.mxu0 %v5013_v9  ;;  %v5105_v9 = vld [vmem:[%s6948_s1 + $0x3a4] ss:$8 sps:$4 sm:$0xff]  }
  0x4e   : > { %906 = vmatprep.subr.bf16.mxu0 %v5022_v10  ;;  %772 = vmatpush1.bf16.msra.mxu1 %v5016_v13  ;;  %v5100_v10 = vld [vmem:[%s6948_s1 + $0x320] ss:$8 sps:$4 sm:$0xff]   ;;  %v1117_v13 = vshll.u32 %v4248_v8, 16 }
  0x4f   : > { %1051 = vmatprep.subr.bf16.mxu1 %v5025_v15  ;;  %v5106_v15 = vld [vmem:[%s6948_s1 + $0x310] ss:$8 sps:$4 sm:$0xff]  }
  0x50   : > { %641 = vmatmul.mubr.bf16.vlgmr.msra.gmra.mxu0 %v526_v14  ;;  %v5111_v14 = vld [vmem:[%s6948_s1 + $0x394] ss:$8 sps:$4 sm:$0xff]  }
  0x51   : > { %907 = vmatpush1.bf16.msra.mxu0 %v5020_v16  ;;  %938 = vmatprep.mubr.bf16.mxu0 %v5577_v2  ;;  %v5114_v16 = vld [vmem:[%s6948_s1 + $0x304] ss:$8 sps:$4 sm:$0xff]  }
  0x52   : > { %790 = vmatmul.mubr.bf16.vlgmr.msra.gmra.mxu1 %v675_v17  ;;  %908 = vmatprep.subr.bf16.mxu0 %v5028_v18  ;;  %v5109_v17 = vld [vmem:[%s6948_s1 + $0x390] ss:$8 sps:$4 sm:$0xff]   ;;  %v1115_v18 = vshrl.u32 %v4248_v8, 16  ;;  %v5174_v8 = vld [vmem:[%s6948_s1 + $0x560] ss:$8 sps:$4 sm:$0xff]  }
  0x53   : > { %1052 = vmatpush1.bf16.msra.mxu1 %v5023_v19  ;;  %1083 = vmatprep.mubr.bf16.mxu1 %v5577_v2  ;;  %v1119_v19 = vrot.slane %v1117_v13, 1  ;;  %v5188_v13 = vld [vmem:[%s6948_s1 + $0x544] ss:$8 sps:$4 sm:$0xff]  }
  0x54   : > { %1053 = vmatprep.subr.bf16.mxu1 %v5031_v20  ;;  %v5117_v20 = vld [vmem:[%s6948_s1 + $0x384] ss:$8 sps:$4 sm:$0xff]  }
  0x55   : > { %909 = vmatpush1.bf16.msra.mxu0 %v5026_v21  ;;  %v5112_v21 = vld [vmem:[%s6948_s1 + $0x300] ss:$8 sps:$4 sm:$0xff]  }
  0x56   : > { %910 = vmatprep.subr.bf16.mxu0 %v5034_v22  ;;  %v5120_v22 = vld [vmem:[%s6948_s1 + $0x474] ss:$8 sps:$4 sm:$0xff]  }
  0x57   : > { %1054 = vmatpush1.bf16.msra.mxu1 %v5029_v23  ;;  %v6040_v23 = vld [vmem:[%s5709_s28 + $0x8] sm:$0x1e]  }
  0x58   : > { %1055 = vmatprep.subr.bf16.mxu1 %v5037_v24  ;;  %v5115_v24 = vld [vmem:[%s6948_s1 + $0x380] ss:$8 sps:$4 sm:$0xff]  }
  0x59   : > { %911 = vmatpush1.bf16.msra.mxu0 %v5032_v25  ;;  %v1120_v25 = vor.u32 %v1119_v19, %v1115_v18  ;;  %v5189_v18 = vld [vmem:[%s6948_s1 + $0x5c0] ss:$8 sps:$4 sm:$0xff]   ;;  %v5197_v19 = vld [vmem:[%s6948_s1 + $0x5b4] ss:$8 sps:$4 sm:$0xff]  }
  0x5a   : > { %912 = vmatprep.subr.bf16.mxu0 %v5040_v26  ;;  %v5124_v26 = vld [vmem:[%s6948_s1 + $0x4f4] ss:$8 sps:$4 sm:$0xff]  }
  0x5b   : > { %1056 = vmatpush1.bf16.msra.mxu1 %v5035_v27  ;;  %v5118_v27 = vld [vmem:[%s6948_s1 + $0x470] ss:$8 sps:$4 sm:$0xff]  }
  0x5c   : > { %1057 = vmatprep.subr.bf16.mxu1 %v5043_v28  ;;  %v1269_v28 = vrot.slane %v6040_v23, 1 }
  0x5d   : > { %913 = vmatpush1.bf16.msra.mxu0 %v5038_v29  ;;  %v5127_v29 = vld [vmem:[%s6948_s1 + $0x464] ss:$8 sps:$4 sm:$0xff]  }
  0x5e   : > { %914 = vmatprep.subr.bf16.mxu0 %v5046_v30  ;;  %v5122_v30 = vld [vmem:[%s6948_s1 + $0x4f0] ss:$8 sps:$4 sm:$0xff]  }
  0x5f   : > { %1058 = vmatpush1.bf16.msra.mxu1 %v5041_v31  ;;  %v5130_v31 = vld [vmem:[%s6948_s1 + $0x4e4] ss:$8 sps:$4 sm:$0xff]  }
  0x60   : > { %1059 = vmatprep.subr.bf16.mxu1 %v5049_v32  ;;  %v5125_v32 = vld [vmem:[%s6948_s1 + $0x460] ss:$8 sps:$4 sm:$0xff]  }
  0x61   : > { %915 = vmatpush1.bf16.msra.mxu0 %v5044_v33  ;;  %v5133_v33 = vld [vmem:[%s6948_s1 + $0x454] ss:$8 sps:$4 sm:$0xff]  }
  0x62   : > { %916 = vmatprep.subr.bf16.mxu0 %v5052_v34  ;;  %v5128_v34 = vld [vmem:[%s6948_s1 + $0x4e0] ss:$8 sps:$4 sm:$0xff]  }
  0x63   : > { %1060 = vmatpush1.bf16.msra.mxu1 %v5047_v35  ;;  %v5136_v35 = vld [vmem:[%s6948_s1 + $0x4d4] ss:$8 sps:$4 sm:$0xff]  }
  0x64   : > { %1061 = vmatprep.subr.bf16.mxu1 %v5055_v36  ;;  %v5131_v36 = vld [vmem:[%s6948_s1 + $0x450] ss:$8 sps:$4 sm:$0xff]  }
  0x65   : > { %917 = vmatpush1.bf16.msra.mxu0 %v5050_v37  ;;  %v5139_v37 = vld [vmem:[%s6948_s1 + $0x444] ss:$8 sps:$4 sm:$0xff]  }
  0x66   : > { %918 = vmatprep.subr.bf16.mxu0 %v5058_v38  ;;  %v5134_v38 = vld [vmem:[%s6948_s1 + $0x4d0] ss:$8 sps:$4 sm:$0xff]  }
  0x67   : > { %1062 = vmatpush1.bf16.msra.mxu1 %v5053_v39  ;;  %v5142_v39 = vld [vmem:[%s6948_s1 + $0x4c4] ss:$8 sps:$4 sm:$0xff]  }
  0x68   : > { %1063 = vmatprep.subr.bf16.mxu1 %v5061_v40  ;;  %v5137_v40 = vld [vmem:[%s6948_s1 + $0x440] ss:$8 sps:$4 sm:$0xff]  }
  0x69   : > { %919 = vmatpush1.bf16.msra.mxu0 %v5056_v41  ;;  %v5145_v41 = vld [vmem:[%s6948_s1 + $0x434] ss:$8 sps:$4 sm:$0xff]  }
  0x6a   : > { %920 = vmatprep.subr.bf16.mxu0 %v5064_v42  ;;  %v5140_v42 = vld [vmem:[%s6948_s1 + $0x4c0] ss:$8 sps:$4 sm:$0xff]  }
  0x6b   : > { %1064 = vmatpush1.bf16.msra.mxu1 %v5059_v43  ;;  %v5148_v43 = vld [vmem:[%s6948_s1 + $0x4b4] ss:$8 sps:$4 sm:$0xff]  }
  0x6c   : > { %1065 = vmatprep.subr.bf16.mxu1 %v5067_v44  ;;  %v5143_v44 = vld [vmem:[%s6948_s1 + $0x430] ss:$8 sps:$4 sm:$0xff]  }
  0x6d   : > { %921 = vmatpush1.bf16.msra.mxu0 %v5062_v46  ;;  %v5146_v46 = vld [vmem:[%s6948_s1 + $0x4b0] ss:$8 sps:$4 sm:$0xff]  }
  0x6e   : > { %1202 = vmatprep.subr.bf16.mxu0 %v5071_v47  ;;  %v5154_v47 = vld [vmem:[%s6948_s1 + $0x4a4] ss:$8 sps:$4 sm:$0xff]  }
  0x6f   : > { %1066 = vmatpush1.bf16.msra.mxu1 %v5065_v48  ;;  %v5149_v48 = vld [vmem:[%s6948_s1 + $0x420] ss:$8 sps:$4 sm:$0xff]  }
  0x70   : > { %939 = vmatmul.mubr.bf16.vlgmr.msra.gmra.mxu0 %v824_v49  ;;  %1351 = vmatprep.subr.bf16.mxu1 %v5075_v50  ;;  %v5157_v49 = vld [vmem:[%s6948_s1 + $0x414] ss:$8 sps:$4 sm:$0xff]   ;;  %v5152_v50 = vld [vmem:[%s6948_s1 + $0x4a0] ss:$8 sps:$4 sm:$0xff]  }
  0x71   : > { %1203 = vmatpush1.bf16.msra.mxu0 %v5069_v51  ;;  %1234 = vmatprep.mubr.bf16.mxu0 %v5577_v2  ;;  %v5160_v51 = vld [vmem:[%s6948_s1 + $0x494] ss:$8 sps:$4 sm:$0xff]  }
  0x72   : > { %1084 = vmatmul.mubr.bf16.vlgmr.msra.gmra.mxu1 %v4199_v52  ;;  %1204 = vmatprep.subr.bf16.mxu0 %v5078_v53  ;;  %v1412_v52 = vshrl.u32 %v6040_v23, 16  ;;  %v1415_v53 = vshll.u32 %v6040_v23, 16  ;;  %v4368_v23 = vld [vmem:[%s5709_s28 + $0x10] sm:$0xf] }
  0x73   : > { %1352 = vmatpush1.bf16.msra.mxu1 %v5073_v54  ;;  %1383 = vmatprep.mubr.bf16.mxu1 %v5577_v2  ;;  %v5155_v54 = vld [vmem:[%s6948_s1 + $0x410] ss:$8 sps:$4 sm:$0xff]  }
  0x74   : > { %1353 = vmatprep.subr.bf16.mxu1 %v5081_v55  ;;  %v5163_v55 = vld [vmem:[%s6948_s1 + $0x404] ss:$8 sps:$4 sm:$0xff]  }
  0x75   : > { %1205 = vmatpush1.bf16.msra.mxu0 %v5076_v56  ;;  %v5158_v56 = vld [vmem:[%s6948_s1 + $0x490] ss:$8 sps:$4 sm:$0xff]  }
  0x76   : > { %1206 = vmatprep.subr.bf16.mxu0 %v5084_v57  ;;  %v5161_v57 = vld [vmem:[%s6948_s1 + $0x400] ss:$8 sps:$4 sm:$0xff]  }
  0x77   : > { %1354 = vmatpush1.bf16.msra.mxu1 %v5079_v58  ;;  %v5166_v58 = vld [vmem:[%s6948_s1 + $0x484] ss:$8 sps:$4 sm:$0xff]  }
  0x78   : > { %1355 = vmatprep.subr.bf16.mxu1 %v5087_v59  ;;  %v1414_v59 = vrot.slane %v1412_v52, 1  ;;  %v5232_v52 = vld [vmem:[%s6948_s1 + $0x6d0] ss:$8 sps:$4 sm:$0xff]  }
  0x79   : > { %1207 = vmatpush1.bf16.msra.mxu0 %v5082_v60  ;;  %v1417_v60 = vrot.slane %v1415_v53, 2  ;;  %v5240_v53 = vld [vmem:[%s6948_s1 + $0x6c4] ss:$8 sps:$4 sm:$0xff]  }
  0x7a   : > { %1208 = vmatprep.subr.bf16.mxu0 %v5090_v61  ;;  %v5169_v61 = vld [vmem:[%s6948_s1 + $0x574] ss:$8 sps:$4 sm:$0xff]  }
  0x7b   : > { %1356 = vmatpush1.bf16.msra.mxu1 %v5085_v62  ;;  %v5170_v62 = vld [vmem:[%s5709_s28 + $0x8] sm:$0x3c]  }
  0x7c   : > { %1357 = vmatprep.subr.bf16.mxu1 %v5093_v63  ;;  %v5164_v63 = vld [vmem:[%s6948_s1 + $0x480] ss:$8 sps:$4 sm:$0xff]  }
  0x7d   : > { %1209 = vmatpush1.bf16.msra.mxu0 %v5088_v0  ;;  %v1418_v0 = vor.u32 %v1417_v60, %v1414_v59  ;;  %v5249_v59 = vld [vmem:[%s6948_s1 + $0x624] ss:$8 sps:$4 sm:$0xff]   ;;  %v5244_v60 = vld [vmem:[%s6948_s1 + $0x6b0] ss:$8 sps:$4 sm:$0xff]  }
  0x7e   : > { %1210 = vmatprep.subr.bf16.mxu0 %v5096_v1  ;;  %v5173_v1 = vld [vmem:[%s6948_s1 + $0x5f4] ss:$8 sps:$4 sm:$0xff]  }
  0x7f   : > { %1358 = vmatpush1.bf16.msra.mxu1 %v5091_v3  ;;  %v5167_v3 = vld [vmem:[%s6948_s1 + $0x570] ss:$8 sps:$4 sm:$0xff]  }
  0x80   : > { %1359 = vmatprep.subr.bf16.mxu1 %v5099_v4  ;;  %v1567_v4 = vrot.slane %v5170_v62, 2  ;;  %v5247_v62 = vld [vmem:[%s6948_s1 + $0x620] ss:$8 sps:$4 sm:$0xff]  }
  0x81   : > { %1211 = vmatpush1.bf16.msra.mxu0 %v5094_v5  ;;  %v5176_v5 = vld [vmem:[%s6948_s1 + $0x564] ss:$8 sps:$4 sm:$0xff]  }
  0x82   : > { %1212 = vmatprep.subr.bf16.mxu0 %v5102_v6  ;;  %v5171_v6 = vld [vmem:[%s6948_s1 + $0x5f0] ss:$8 sps:$4 sm:$0xff]  }
  0x83   : > { %1360 = vmatpush1.bf16.msra.mxu1 %v5097_v7  ;;  %v5179_v7 = vld [vmem:[%s6948_s1 + $0x5e4] ss:$8 sps:$4 sm:$0xff]  }
  0x84   : > { %1361 = vmatprep.subr.bf16.mxu1 %v5105_v9  ;;  %v5182_v9 = vld [vmem:[%s6948_s1 + $0x554] ss:$8 sps:$4 sm:$0xff]  }
  0x85   : > { %1213 = vmatpush1.bf16.msra.mxu0 %v5100_v10  ;;  %v5177_v10 = vld [vmem:[%s6948_s1 + $0x5e0] ss:$8 sps:$4 sm:$0xff]  }
  0x86   : > { %1214 = vmatprep.subr.bf16.mxu0 %v5108_v11  ;;  %v5185_v11 = vld [vmem:[%s6948_s1 + $0x5d4] ss:$8 sps:$4 sm:$0xff]  }
  0x87   : > { %1362 = vmatpush1.bf16.msra.mxu1 %v5103_v12  ;;  %v5180_v12 = vld [vmem:[%s6948_s1 + $0x550] ss:$8 sps:$4 sm:$0xff]  }
  0x88   : > { %1363 = vmatprep.subr.bf16.mxu1 %v5111_v14  ;;  %v5183_v14 = vld [vmem:[%s6948_s1 + $0x5d0] ss:$8 sps:$4 sm:$0xff]  }
  0x89   : > { %1215 = vmatpush1.bf16.msra.mxu0 %v5106_v15  ;;  %v5191_v15 = vld [vmem:[%s6948_s1 + $0x5c4] ss:$8 sps:$4 sm:$0xff]  }
  0x8a   : > { %1216 = vmatprep.subr.bf16.mxu0 %v5114_v16  ;;  %v5186_v16 = vld [vmem:[%s6948_s1 + $0x540] ss:$8 sps:$4 sm:$0xff]  }
  0x8b   : > { %1364 = vmatpush1.bf16.msra.mxu1 %v5109_v17  ;;  %v5194_v17 = vld [vmem:[%s6948_s1 + $0x534] ss:$8 sps:$4 sm:$0xff]  }
  0x8c   : > { %1365 = vmatprep.subr.bf16.mxu1 %v5117_v20  ;;  %v5192_v20 = vld [vmem:[%s6948_s1 + $0x530] ss:$8 sps:$4 sm:$0xff]  }
  0x8d   : > { %1217 = vmatpush1.bf16.msra.mxu0 %v5112_v21  ;;  %v5200_v21 = vld [vmem:[%s6948_s1 + $0x524] ss:$8 sps:$4 sm:$0xff]  }
  0x8e   : > { %1500 = vmatprep.subr.bf16.mxu0 %v5120_v22  ;;  %v5195_v22 = vld [vmem:[%s6948_s1 + $0x5b0] ss:$8 sps:$4 sm:$0xff]  }
  0x8f   : > { %1366 = vmatpush1.bf16.msra.mxu1 %v5115_v24  ;;  %v5203_v24 = vld [vmem:[%s6948_s1 + $0x5a4] ss:$8 sps:$4 sm:$0xff]  }
  0x90   : > { %1235 = vmatmul.mubr.bf16.vlgmr.msra.gmra.mxu0 %v1120_v25  ;;  %1649 = vmatprep.subr.bf16.mxu1 %v5124_v26  ;;  %v5198_v25 = vld [vmem:[%s6948_s1 + $0x520] ss:$8 sps:$4 sm:$0xff]   ;;  %v5206_v26 = vld [vmem:[%s6948_s1 + $0x514] ss:$8 sps:$4 sm:$0xff]  }
  0x91   : > { %1501 = vmatpush1.bf16.msra.mxu0 %v5118_v27  ;;  %1532 = vmatprep.mubr.bf16.mxu0 %v5577_v2  ;;  %v4417_v27 = vcombine.low %v4368_v23, %v4368_v23 }
  0x92   : > { %1384 = vmatmul.mubr.bf16.vlgmr.msra.gmra.mxu1 %v1269_v28  ;;  %1502 = vmatprep.subr.bf16.mxu0 %v5127_v29  ;;  %v5201_v28 = vld [vmem:[%s6948_s1 + $0x5a0] ss:$8 sps:$4 sm:$0xff]   ;;  %v5209_v29 = vld [vmem:[%s6948_s1 + $0x594] ss:$8 sps:$4 sm:$0xff]  }
  0x93   : > { %1650 = vmatpush1.bf16.msra.mxu1 %v5122_v30  ;;  %1681 = vmatprep.mubr.bf16.mxu1 %v5577_v2  ;;  %v5204_v30 = vld [vmem:[%s6948_s1 + $0x510] ss:$8 sps:$4 sm:$0xff]  }
  0x94   : > { %1651 = vmatprep.subr.bf16.mxu1 %v5130_v31  ;;  %v5212_v31 = vld [vmem:[%s6948_s1 + $0x504] ss:$8 sps:$4 sm:$0xff]  }
  0x95   : > { %1503 = vmatpush1.bf16.msra.mxu0 %v5125_v32  ;;  %v1860_v32 = vshll.u32 %v4417_v27, 16 }
  0x96   : > { %1504 = vmatprep.subr.bf16.mxu0 %v5133_v33  ;;  %v5207_v33 = vld [vmem:[%s6948_s1 + $0x590] ss:$8 sps:$4 sm:$0xff]  }
  0x97   : > { %1652 = vmatpush1.bf16.msra.mxu1 %v5128_v34  ;;  %v5215_v34 = vld [vmem:[%s6948_s1 + $0x584] ss:$8 sps:$4 sm:$0xff]  }
  0x98   : > { %1653 = vmatprep.subr.bf16.mxu1 %v5136_v35  ;;  %v5210_v35 = vld [vmem:[%s6948_s1 + $0x500] ss:$8 sps:$4 sm:$0xff]  }
  0x99   : > { %1505 = vmatpush1.bf16.msra.mxu0 %v5131_v36  ;;  %v1858_v36 = vshrl.u32 %v4417_v27, 16  ;;  %v5269_v27 = vld [vmem:[%s6948_s1 + $0x7f0] ss:$8 sps:$4 sm:$0xff]  }
  0x9a   : > { %1506 = vmatprep.subr.bf16.mxu0 %v5139_v37  ;;  %v1862_v37 = vrot.slane %v1860_v32, 1 }
  0x9b   : > { %1654 = vmatpush1.bf16.msra.mxu1 %v5134_v38  ;;  %v5219_v38 = vld [vmem:[%s6948_s1 + $0x674] ss:$8 sps:$4 sm:$0xff]  }
  0x9c   : > { %1655 = vmatprep.subr.bf16.mxu1 %v5142_v39  ;;  %v5213_v39 = vld [vmem:[%s6948_s1 + $0x580] ss:$8 sps:$4 sm:$0xff]  }
  0x9d   : > { %1507 = vmatpush1.bf16.msra.mxu0 %v5137_v40  ;;  %v5222_v40 = vld [vmem:[%s6948_s1 + $0x6f4] ss:$8 sps:$4 sm:$0xff]  }
  0x9e   : > { %1508 = vmatprep.subr.bf16.mxu0 %v5145_v41  ;;  %v5217_v41 = vld [vmem:[%s6948_s1 + $0x670] ss:$8 sps:$4 sm:$0xff]  }
  0x9f   : > { %1656 = vmatpush1.bf16.msra.mxu1 %v5140_v42  ;;  %v1863_v42 = vor.u32 %v1862_v37, %v1858_v36  ;;  %v5275_v37 = vld [vmem:[%s6948_s1 + $0x7e0] ss:$8 sps:$4 sm:$0xff]  }
  0xa0   : > { %1657 = vmatprep.subr.bf16.mxu1 %v5148_v43  ;;  %v5225_v43 = vld [vmem:[%s6948_s1 + $0x664] ss:$8 sps:$4 sm:$0xff]  }
  0xa1   : > { %1509 = vmatpush1.bf16.msra.mxu0 %v5143_v44  ;;  %v5220_v44 = vld [vmem:[%s6948_s1 + $0x6f0] ss:$8 sps:$4 sm:$0xff]  }
  0xa2   : > { %1510 = vmatprep.subr.bf16.mxu0 %v5151_v45  ;;  %v5228_v45 = vld [vmem:[%s6948_s1 + $0x6e4] ss:$8 sps:$4 sm:$0xff]  }
  0xa3   : > { %1658 = vmatpush1.bf16.msra.mxu1 %v5146_v46  ;;  %v5223_v46 = vld [vmem:[%s6948_s1 + $0x660] ss:$8 sps:$4 sm:$0xff]  }
  0xa4   : > { %1659 = vmatprep.subr.bf16.mxu1 %v5154_v47  ;;  %v5231_v47 = vld [vmem:[%s6948_s1 + $0x654] ss:$8 sps:$4 sm:$0xff]  }
  0xa5   : > { %1511 = vmatpush1.bf16.msra.mxu0 %v5149_v48  ;;  %v5226_v48 = vld [vmem:[%s6948_s1 + $0x6e0] ss:$8 sps:$4 sm:$0xff]  }
  0xa6   : > { %1512 = vmatprep.subr.bf16.mxu0 %v5157_v49  ;;  %v5234_v49 = vld [vmem:[%s6948_s1 + $0x6d4] ss:$8 sps:$4 sm:$0xff]  }
  0xa7   : > { %1660 = vmatpush1.bf16.msra.mxu1 %v5152_v50  ;;  %v5229_v50 = vld [vmem:[%s6948_s1 + $0x650] ss:$8 sps:$4 sm:$0xff]  }
  0xa8   : > { %1661 = vmatprep.subr.bf16.mxu1 %v5160_v51  ;;  %v5237_v51 = vld [vmem:[%s6948_s1 + $0x644] ss:$8 sps:$4 sm:$0xff]  }
  0xa9   : > { %1513 = vmatpush1.bf16.msra.mxu0 %v5155_v54  ;;  %v5235_v54 = vld [vmem:[%s6948_s1 + $0x640] ss:$8 sps:$4 sm:$0xff]  }
  0xaa   : > { %1514 = vmatprep.subr.bf16.mxu0 %v5163_v55  ;;  %v5243_v55 = vld [vmem:[%s6948_s1 + $0x634] ss:$8 sps:$4 sm:$0xff]  }
  0xab   : > { %1662 = vmatpush1.bf16.msra.mxu1 %v5158_v56  ;;  %v5238_v56 = vld [vmem:[%s6948_s1 + $0x6c0] ss:$8 sps:$4 sm:$0xff]  }
  0xac   : > { %1663 = vmatprep.subr.bf16.mxu1 %v5166_v58  ;;  %v5241_v58 = vld [vmem:[%s6948_s1 + $0x630] ss:$8 sps:$4 sm:$0xff]  }
  0xad   : > { %1515 = vmatpush1.bf16.msra.mxu0 %v5161_v57  ;;  %v5246_v57 = vld [vmem:[%s6948_s1 + $0x6b4] ss:$8 sps:$4 sm:$0xff]  }
  0xae   : > { %1794 = vmatprep.subr.bf16.mxu0 %v5169_v61  ;;  %v5252_v61 = vld [vmem:[%s6948_s1 + $0x6a4] ss:$8 sps:$4 sm:$0xff]  }
  0xaf   : > { %1664 = vmatpush1.bf16.msra.mxu1 %v5164_v63  ;;  %v5255_v63 = vld [vmem:[%s6948_s1 + $0x614] ss:$8 sps:$4 sm:$0xff]  }
  0xb0   : > { %1533 = vmatmul.mubr.bf16.vlgmr.msra.gmra.mxu0 %v1418_v0  ;;  %1945 = vmatprep.subr.bf16.mxu1 %v5173_v1  ;;  %v196_v0 = vlaneseq  ;;  %v5265_v1 = vld [vmem:[%s5709_s28 + $0x10] sm:$0x1e]  }
  0xb1   : > { %1795 = vmatpush1.bf16.msra.mxu0 %v5167_v3  ;;  %1826 = vmatprep.mubr.bf16.mxu0 %v5577_v2  ;;  %v5250_v3 = vld [vmem:[%s6948_s1 + $0x6a0] ss:$8 sps:$4 sm:$0xff]  }
  0xb2   : > { %1682 = vmatmul.mubr.bf16.vlgmr.msra.gmra.mxu1 %v1567_v4  ;;  %1796 = vmatprep.subr.bf16.mxu0 %v5176_v5  ;;  %v5258_v4 = vld [vmem:[%s6948_s1 + $0x694] ss:$8 sps:$4 sm:$0xff]   ;;  %v5253_v5 = vld [vmem:[%s6948_s1 + $0x610] ss:$8 sps:$4 sm:$0xff]  }
  0xb3   : > { %1946 = vmatpush1.bf16.msra.mxu1 %v5171_v6  ;;  %1977 = vmatprep.mubr.bf16.mxu1 %v5577_v2  ;;  %v197_v6 = vshrl.u32 %v196_v0, 7  ;;  %v5313_v0 = vld [vmem:[%s6948_s1 + $0x784] ss:$8 sps:$4 sm:$0xff]  }
  0xb4   : > { %1947 = vmatprep.subr.bf16.mxu1 %v5179_v7  ;;  %v5261_v7 = vld [vmem:[%s6948_s1 + $0x604] ss:$8 sps:$4 sm:$0xff]  }
  0xb5   : > { %1797 = vmatpush1.bf16.msra.mxu0 %v5174_v8  ;;  %v2155_v8 = vshrl.u32 %v5265_v1, 16 }
  0xb6   : > { %1798 = vmatprep.subr.bf16.mxu0 %v5182_v9  ;;  %v2158_v9 = vshll.u32 %v5265_v1, 16 }
  0xb7   : > { %1948 = vmatpush1.bf16.msra.mxu1 %v5177_v10  ;;  %v5256_v10 = vld [vmem:[%s6948_s1 + $0x690] ss:$8 sps:$4 sm:$0xff]  }
  0xb8   : > { %1949 = vmatprep.subr.bf16.mxu1 %v5185_v11  ;;  %v5264_v11 = vld [vmem:[%s6948_s1 + $0x684] ss:$8 sps:$4 sm:$0xff]  }
  0xb9   : > { %1799 = vmatpush1.bf16.msra.mxu0 %v5180_v12  ;;  %v5259_v12 = vld [vmem:[%s6948_s1 + $0x600] ss:$8 sps:$4 sm:$0xff]  }
  0xba   : > { %1800 = vmatprep.subr.bf16.mxu0 %v5188_v13  ;;  %v194_v13 = vld [vmem:[%s6949_s2] sm:$0x3] }
  0xbb   : > { %1950 = vmatpush1.bf16.msra.mxu1 %v5183_v14  ;;  %v198_v14 = vsub.s32 0, %v197_v6 }
  0xbc   : > { %1951 = vmatprep.subr.bf16.mxu1 %v5191_v15  ;;  %v5268_v15 = vld [vmem:[%s6948_s1 + $0x774] ss:$8 sps:$4 sm:$0xff]  }
  0xbd   : > { %1801 = vmatpush1.bf16.msra.mxu0 %v5186_v16  ;;  %v2157_v16 = vrot.slane %v2155_v8, 1  ;;  %v5315_v8 = vld [vmem:[%s6948_s1 + $0x870] ss:$8 sps:$4 sm:$0xff]  }
  0xbe   : > { %1802 = vmatprep.subr.bf16.mxu0 %v5194_v17  ;;  %v2160_v17 = vrot.slane %v2158_v9, 2  ;;  %v4537_v9 = vld [vmem:[%s5709_s28 + $0x18] sm:$0xf] }
  0xbf   : > { %1952 = vmatpush1.bf16.msra.mxu1 %v5189_v18  ;;  %v5262_v18 = vld [vmem:[%s6948_s1 + $0x680] ss:$8 sps:$4 sm:$0xff]  }
  0xc0   : > { %1953 = vmatprep.subr.bf16.mxu1 %v5197_v19  ;;  %v202_v19 = vsub.s32 1, %v197_v6 }
  0xc1   : > { %1803 = vmatpush1.bf16.msra.mxu0 %v5192_v20  ;;  %v2012_v20 = vrot.slane %v5265_v1, 1  ;;  %v5314_v1 = vld [vmem:[%s5709_s28 + $0x10] sm:$0x3c]  }
  0xc2   : > { %1804 = vmatprep.subr.bf16.mxu0 %v5200_v21  ;;  %v5271_v21 = vld [vmem:[%s6948_s1 + $0x7f4] ss:$8 sps:$4 sm:$0xff]   ;;  %v2310_v6 = vrot.slane %v5314_v1, 2 }
  0xc3   : > { %1954 = vmatpush1.bf16.msra.mxu1 %v5195_v22  ;;  %v199_v22 = vrot.slane %v194_v13, %v198_v14 }
  0xc4   : > { %1955 = vmatprep.subr.bf16.mxu1 %v5203_v24  ;;  %v2161_v24 = vor.u32 %v2160_v17, %v2157_v16 }
  0xc5   : > { %1805 = vmatpush1.bf16.msra.mxu0 %v5198_v25  ;;  %v5274_v25 = vld [vmem:[%s6948_s1 + $0x764] ss:$8 sps:$4 sm:$0xff]  }
  0xc6   : > { %1806 = vmatprep.subr.bf16.mxu0 %v5206_v26  ;;  %v203_v26 = vrot.slane %v194_v13, %v202_v19  ;;  %v5327_v13 = vld [vmem:[%s6948_s1 + $0x8e4] ss:$8 sps:$4 sm:$0xff]  }
  0xc7   : > { %1956 = vmatpush1.bf16.msra.mxu1 %v5201_v28 }
  0xc8   : > { %1957 = vmatprep.subr.bf16.mxu1 %v5209_v29  ;;  %v5277_v29 = vld [vmem:[%s6948_s1 + $0x7e4] ss:$8 sps:$4 sm:$0xff]  }
  0xc9   : > { %1807 = vmatpush1.bf16.msra.mxu0 %v5204_v30 }
  0xca   : > { %1808 = vmatprep.subr.bf16.mxu0 %v5212_v31  ;;  %v5272_v31 = vld [vmem:[%s6948_s1 + $0x760] ss:$8 sps:$4 sm:$0xff]  }
  0xcb   : > { %1958 = vmatpush1.bf16.msra.mxu1 %v5207_v33 }
  0xcc   : > { %1959 = vmatprep.subr.bf16.mxu1 %v5215_v34  ;;  %v5280_v34 = vld [vmem:[%s6948_s1 + $0x754] ss:$8 sps:$4 sm:$0xff]  }
  0xcd   : > { %1809 = vmatpush1.bf16.msra.mxu0 %v5210_v35 }
  0xce   : > { %2094 = vmatprep.subr.bf16.mxu0 %v5219_v38 }
  0xcf   : > { %1960 = vmatpush1.bf16.msra.mxu1 %v5213_v39 }
  0xd0   : > { %1827 = vmatmul.mubr.bf16.vlgmr.msra.gmra.mxu0 %v4368_v23  ;;  %2243 = vmatprep.subr.bf16.mxu1 %v5222_v40  ;;  %v5266_v23 = vld [vmem:[%s6948_s1 + $0x770] ss:$8 sps:$4 sm:$0xff]   ;;  %v5283_v40 = vld [vmem:[%s6948_s1 + $0x7d4] ss:$8 sps:$4 sm:$0xff]  }
  0xd1   : > { %2095 = vmatpush1.bf16.msra.mxu0 %v5217_v41  ;;  %2126 = vmatprep.mubr.bf16.mxu0 %v5577_v2 }
  0xd2   : > { %1978 = vmatmul.mubr.bf16.vlgmr.msra.gmra.mxu1 %v1863_v42  ;;  %2096 = vmatprep.subr.bf16.mxu0 %v5225_v43  ;;  %v5278_v42 = vld [vmem:[%s6948_s1 + $0x750] ss:$8 sps:$4 sm:$0xff]  }
  0xd3   : > { %2244 = vmatpush1.bf16.msra.mxu1 %v5220_v44  ;;  %2275 = vmatprep.mubr.bf16.mxu1 %v5577_v2  ;;  %v5286_v44 = vld [vmem:[%s6948_s1 + $0x744] ss:$8 sps:$4 sm:$0xff]  }
  0xd4   : > { %2245 = vmatprep.subr.bf16.mxu1 %v5228_v45 }
  0xd5   : > { %2097 = vmatpush1.bf16.msra.mxu0 %v5223_v46  ;;  %v5281_v46 = vld [vmem:[%s6948_s1 + $0x7d0] ss:$8 sps:$4 sm:$0xff]  }
  0xd6   : > { %2098 = vmatprep.subr.bf16.mxu0 %v5231_v47  ;;  %v5289_v47 = vld [vmem:[%s6948_s1 + $0x7c4] ss:$8 sps:$4 sm:$0xff]  }
  0xd7   : > { %2246 = vmatpush1.bf16.msra.mxu1 %v5226_v48 }
  0xd8   : > { %2247 = vmatprep.subr.bf16.mxu1 %v5234_v49  ;;  %v5284_v49 = vld [vmem:[%s6948_s1 + $0x740] ss:$8 sps:$4 sm:$0xff]  }
  0xd9   : > { %2099 = vmatpush1.bf16.msra.mxu0 %v5229_v50  ;;  %v5292_v50 = vld [vmem:[%s6948_s1 + $0x734] ss:$8 sps:$4 sm:$0xff]  }
  0xda   : > { %2100 = vmatprep.subr.bf16.mxu0 %v5237_v51  ;;  %v5287_v51 = vld [vmem:[%s6948_s1 + $0x7c0] ss:$8 sps:$4 sm:$0xff]  }
  0xdb   : > { %2248 = vmatpush1.bf16.msra.mxu1 %v5232_v52  ;;  %v5295_v52 = vld [vmem:[%s6948_s1 + $0x7b4] ss:$8 sps:$4 sm:$0xff]  }
  0xdc   : > { %2249 = vmatprep.subr.bf16.mxu1 %v5240_v53  ;;  %v5290_v53 = vld [vmem:[%s6948_s1 + $0x730] ss:$8 sps:$4 sm:$0xff]  }
  0xdd   : > { %2101 = vmatpush1.bf16.msra.mxu0 %v5235_v54  ;;  %v5298_v54 = vld [vmem:[%s6948_s1 + $0x724] ss:$8 sps:$4 sm:$0xff]  }
  0xde   : > { %2102 = vmatprep.subr.bf16.mxu0 %v5243_v55  ;;  %v5293_v55 = vld [vmem:[%s6948_s1 + $0x7b0] ss:$8 sps:$4 sm:$0xff]  }
  0xdf   : > { %2250 = vmatpush1.bf16.msra.mxu1 %v5238_v56  ;;  %v5301_v56 = vld [vmem:[%s6948_s1 + $0x7a4] ss:$8 sps:$4 sm:$0xff]  }
  0xe0   : > { %2251 = vmatprep.subr.bf16.mxu1 %v5246_v57  ;;  %v5296_v57 = vld [vmem:[%s6948_s1 + $0x720] ss:$8 sps:$4 sm:$0xff]  }
  0xe1   : > { %2103 = vmatpush1.bf16.msra.mxu0 %v5241_v58  ;;  %v5304_v58 = vld [vmem:[%s6948_s1 + $0x714] ss:$8 sps:$4 sm:$0xff]  }
  0xe2   : > { %2104 = vmatprep.subr.bf16.mxu0 %v5249_v59  ;;  %v5299_v59 = vld [vmem:[%s6948_s1 + $0x7a0] ss:$8 sps:$4 sm:$0xff]  }
  0xe3   : > { %2252 = vmatpush1.bf16.msra.mxu1 %v5244_v60  ;;  %v5307_v60 = vld [vmem:[%s6948_s1 + $0x794] ss:$8 sps:$4 sm:$0xff]  }
  0xe4   : > { %2253 = vmatprep.subr.bf16.mxu1 %v5252_v61  ;;  %v5302_v61 = vld [vmem:[%s6948_s1 + $0x710] ss:$8 sps:$4 sm:$0xff]  }
  0xe5   : > { %2105 = vmatpush1.bf16.msra.mxu0 %v5247_v62  ;;  %v5310_v62 = vld [vmem:[%s6948_s1 + $0x704] ss:$8 sps:$4 sm:$0xff]  }
  0xe6   : > { %2106 = vmatprep.subr.bf16.mxu0 %v5255_v63  ;;  %v5305_v63 = vld [vmem:[%s6948_s1 + $0x790] ss:$8 sps:$4 sm:$0xff]  }
  0xe7   : > { %2254 = vmatpush1.bf16.msra.mxu1 %v5250_v3  ;;  %v5308_v3 = vld [vmem:[%s6948_s1 + $0x700] ss:$8 sps:$4 sm:$0xff]  }
  0xe8   : > { %2255 = vmatprep.subr.bf16.mxu1 %v5258_v4  ;;  %v5317_v4 = vld [vmem:[%s6948_s1 + $0x874] ss:$8 sps:$4 sm:$0xff]  }
  0xe9   : > { %2107 = vmatpush1.bf16.msra.mxu0 %v5253_v5  ;;  %v5311_v5 = vld [vmem:[%s6948_s1 + $0x780] ss:$8 sps:$4 sm:$0xff]  }
  0xea   : > { %2108 = vmatprep.subr.bf16.mxu0 %v5261_v7  ;;  %v5321_v7 = vld [vmem:[%s6948_s1 + $0x8f4] ss:$8 sps:$4 sm:$0xff]  }
  0xeb   : > { %2256 = vmatpush1.bf16.msra.mxu1 %v5256_v10  ;;  %v5324_v10 = vld [vmem:[%s6948_s1 + $0x864] ss:$8 sps:$4 sm:$0xff]  }
  0xec   : > { %2257 = vmatprep.subr.bf16.mxu1 %v5264_v11  ;;  %v5319_v11 = vld [vmem:[%s6948_s1 + $0x8f0] ss:$8 sps:$4 sm:$0xff]  }
  0xed   : > { %2109 = vmatpush1.bf16.msra.mxu0 %v5259_v12 }
  0xee   : > { %2392 = vmatprep.subr.bf16.mxu0 %v5268_v15  ;;  %v5322_v15 = vld [vmem:[%s6948_s1 + $0x860] ss:$8 sps:$4 sm:$0xff]  }
  0xef   : > { %2258 = vmatpush1.bf16.msra.mxu1 %v5262_v18  ;;  %v5330_v18 = vld [vmem:[%s6948_s1 + $0x854] ss:$8 sps:$4 sm:$0xff]  }
  0xf0   : > { %v342_v28 = vpop.f32.mrf.mxu0  ;;  %2127 = vmatmul.mubr.bf16.vlgmr.msra.gmra.mxu0 %v2012_v20  ;;  %2537 = vmatprep.subr.bf16.mxu1 %v5271_v21  ;;  %v493_v33 = vpop.f32.mrf.mxu1  ;;  %v5325_v21 = vld [vmem:[%s6948_s1 + $0x8e0] ss:$8 sps:$4 sm:$0xff]  }
  0xf1   : > { %v349_v30 = vadd.f32 %v342_v28, %v199_v22  ;;  %2393 = vmatpush1.bf16.msra.mxu0 %v5266_v23  ;;  %2424 = vmatprep.mubr.bf16.mxu0 %v5577_v2  ;;  %v5336_v28 = vld [vmem:[%s6948_s1 + $0x844] ss:$8 sps:$4 sm:$0xff]  }
  0xf2   : > { %v344_v32 = vpop.f32.mrf.mxu0  ;;  %2276 = vmatmul.mubr.bf16.vlgmr.msra.gmra.mxu1 %v2161_v24  ;;  %2394 = vmatprep.subr.bf16.mxu0 %v5274_v25  ;;  %v495_v39 = vpop.f32.mrf.mxu1  ;;  %v5333_v24 = vld [vmem:[%s6948_s1 + $0x8d4] ss:$8 sps:$4 sm:$0xff]  }
  0xf3   : > { %v350_v35 = vadd.f32 %v344_v32, %v203_v26  ;;  %v6370_v36 = vadd.f32 %v493_v33, %v349_v30  ;;  %2538 = vmatpush1.bf16.msra.mxu1 %v5269_v27  ;;  %2569 = vmatprep.mubr.bf16.mxu1 %v5577_v2  ;;  %v5328_v26 = vld [vmem:[%s6948_s1 + $0x850] ss:$8 sps:$4 sm:$0xff]   ;;  %v5334_v33 = vld [vmem:[%s6948_s1 + $0x840] ss:$8 sps:$4 sm:$0xff]  }
  0xf4   : > { %v346_v38 = vpop.f32.mrf.mxu0  ;;  %2539 = vmatprep.subr.bf16.mxu1 %v5277_v29  ;;  %v497_v45 = vpop.f32.mrf.mxu1  ;;  %v5331_v30 = vld [vmem:[%s6948_s1 + $0x8d0] ss:$8 sps:$4 sm:$0xff]  }
  0xf5   : > { %v6379_v41 = vadd.f32 %v495_v39, %v350_v35  ;;  %2395 = vmatpush1.bf16.msra.mxu0 %v5272_v31  ;;  %v5339_v31 = vld [vmem:[%s6948_s1 + $0x8c4] ss:$8 sps:$4 sm:$0xff]   ;;  %v5342_v35 = vld [vmem:[%s6948_s1 + $0x834] ss:$8 sps:$4 sm:$0xff]   ;;  %v5343_v39 = vld [vmem:[%s6948_s1 + $0x8b0] ss:$8 sps:$4 sm:$0xff]  }
  0xf6   : > { %v347_v43 = vpop.f32.mrf.mxu0  ;;  %2396 = vmatprep.subr.bf16.mxu0 %v5280_v34  ;;  %v498_v48 = vpop.f32.mrf.mxu1  ;;  %v5337_v34 = vld [vmem:[%s6948_s1 + $0x8c0] ss:$8 sps:$4 sm:$0xff]   ;;  %v5348_v38 = vld [vmem:[%s6948_s1 + $0x824] ss:$8 sps:$4 sm:$0xff]  }
  0xf7   : > { %2540 = vmatpush1.bf16.msra.mxu1 %v5275_v37  ;;  %v5340_v37 = vld [vmem:[%s6948_s1 + $0x830] ss:$8 sps:$4 sm:$0xff]   ;;  %v5349_v43 = vld [vmem:[%s6948_s1 + $0x8a0] ss:$8 sps:$4 sm:$0xff]   ;;  %v5360_v48 = vld [vmem:[%s6948_s1 + $0x804] ss:$8 sps:$4 sm:$0xff]  }
  0xf8   : > { %2541 = vmatprep.subr.bf16.mxu1 %v5283_v40  ;;  %v4586_v40 = vcombine.low %v4537_v9, %v4537_v9 }
  0xf9   : > { %2397 = vmatpush1.bf16.msra.mxu0 %v5278_v42  ;;  %v5351_v42 = vld [vmem:[%s6948_s1 + $0x8a4] ss:$8 sps:$4 sm:$0xff]  }
  0xfa   : > { %2398 = vmatprep.subr.bf16.mxu0 %v5286_v44  ;;  %v5354_v44 = vld [vmem:[%s6948_s1 + $0x814] ss:$8 sps:$4 sm:$0xff]   ;;  %v2603_v45 = vshll.u32 %v4586_v40, 16 }
  0xfb   : > { %2542 = vmatpush1.bf16.msra.mxu1 %v5281_v46  ;;  %v5357_v46 = vld [vmem:[%s6948_s1 + $0x894] ss:$8 sps:$4 sm:$0xff]  }
  0xfc   : > { %2543 = vmatprep.subr.bf16.mxu1 %v5289_v47  ;;  %v5352_v47 = vld [vmem:[%s6948_s1 + $0x810] ss:$8 sps:$4 sm:$0xff]  }
  0xfd   : > { %2399 = vmatpush1.bf16.msra.mxu0 %v5284_v49  ;;  %v5355_v49 = vld [vmem:[%s6948_s1 + $0x890] ss:$8 sps:$4 sm:$0xff]  }
  0xfe   : > { %2400 = vmatprep.subr.bf16.mxu0 %v5292_v50  ;;  %v2601_v50 = vshrl.u32 %v4586_v40, 16 }
  0xff   : > { %2544 = vmatpush1.bf16.msra.mxu1 %v5287_v51  ;;  %v2605_v51 = vrot.slane %v2603_v45, 1 }
 0x100   : > { %2545 = vmatprep.subr.bf16.mxu1 %v5295_v52  ;;  %v5363_v52 = vld [vmem:[%s6948_s1 + $0x884] ss:$8 sps:$4 sm:$0xff]  }
 0x101   : > { %2401 = vmatpush1.bf16.msra.mxu0 %v5290_v53  ;;  %v5358_v53 = vld [vmem:[%s6948_s1 + $0x800] ss:$8 sps:$4 sm:$0xff]  }
 0x102   : > { %2402 = vmatprep.subr.bf16.mxu0 %v5298_v54  ;;  %v5366_v54 = vld [vmem:[%s6948_s1 + $0x974] ss:$8 sps:$4 sm:$0xff]  }
 0x103   : > { %2546 = vmatpush1.bf16.msra.mxu1 %v5293_v55  ;;  %v6554_v55 = vld [vmem:[%s5709_s28 + $0x18] sm:$0x1e]  }
 0x104   : > { %2547 = vmatprep.subr.bf16.mxu1 %v5301_v56  ;;  %v5361_v56 = vld [vmem:[%s6948_s1 + $0x880] ss:$8 sps:$4 sm:$0xff]  }
 0x105   : > { %2403 = vmatpush1.bf16.msra.mxu0 %v5296_v57  ;;  %v2606_v57 = vor.u32 %v2605_v51, %v2601_v50  ;;  %v5417_v50 = vld [vmem:[%s6948_s1 + $0xaf0] ss:$8 sps:$4 sm:$0xff]  }
 0x106   : > { %2404 = vmatprep.subr.bf16.mxu0 %v5304_v58  ;;  %v5370_v58 = vld [vmem:[%s6948_s1 + $0x9f4] ss:$8 sps:$4 sm:$0xff]  }
 0x107   : > { %2548 = vmatpush1.bf16.msra.mxu1 %v5299_v59  ;;  %v5364_v59 = vld [vmem:[%s6948_s1 + $0x970] ss:$8 sps:$4 sm:$0xff]  }
 0x108   : > { %2549 = vmatprep.subr.bf16.mxu1 %v5307_v60  ;;  %v2755_v60 = vrot.slane %v6554_v55, 1 }
 0x109   : > { %2405 = vmatpush1.bf16.msra.mxu0 %v5302_v61  ;;  %v5373_v61 = vld [vmem:[%s6948_s1 + $0x964] ss:$8 sps:$4 sm:$0xff]  }
 0x10a   : > { %2406 = vmatprep.subr.bf16.mxu0 %v5310_v62  ;;  %v5368_v62 = vld [vmem:[%s6948_s1 + $0x9f0] ss:$8 sps:$4 sm:$0xff]  }
 0x10b   : > { %2550 = vmatpush1.bf16.msra.mxu1 %v5305_v63 }
 0x10c   : > { %2551 = vmatprep.subr.bf16.mxu1 %v5313_v0  ;;  %v5376_v0 = vld [vmem:[%s6948_s1 + $0x9e4] ss:$8 sps:$4 sm:$0xff]  }
 0x10d   : > { %2407 = vmatpush1.bf16.msra.mxu0 %v5308_v3  ;;  %v5371_v3 = vld [vmem:[%s6948_s1 + $0x960] ss:$8 sps:$4 sm:$0xff]  }
 0x10e   : > { %2688 = vmatprep.subr.bf16.mxu0 %v5317_v4 }
 0x10f   : > { %2552 = vmatpush1.bf16.msra.mxu1 %v5311_v5 }
 0x110   : > { %v642_v12 = vpop.f32.mrf.mxu0  ;;  %2425 = vmatmul.mubr.bf16.vlgmr.msra.gmra.mxu0 %v2310_v6  ;;  %2837 = vmatprep.subr.bf16.mxu1 %v5321_v7  ;;  %v5379_v6 = vld [vmem:[%s6948_s1 + $0x954] ss:$8 sps:$4 sm:$0xff]  }
 0x111   : > { %v649_v14 = vadd.f32 %v642_v12, %v6370_v36  ;;  %2689 = vmatpush1.bf16.msra.mxu0 %v5315_v8  ;;  %2720 = vmatprep.mubr.bf16.mxu0 %v5577_v2  ;;  %v5345_v36 = vld [vmem:[%s6948_s1 + $0x8b4] ss:$8 sps:$4 sm:$0xff]  }
 0x112   : > { %v644_v16 = vpop.f32.mrf.mxu0  ;;  %v791_v17 = vpop.f32.mrf.mxu1  ;;  %2570 = vmatmul.mubr.bf16.vlgmr.msra.gmra.mxu1 %v4537_v9  ;;  %2690 = vmatprep.subr.bf16.mxu0 %v5324_v10  ;;  %v5374_v9 = vld [vmem:[%s6948_s1 + $0x9e0] ss:$8 sps:$4 sm:$0xff]   ;;  %v5382_v12 = vld [vmem:[%s6948_s1 + $0x9d4] ss:$8 sps:$4 sm:$0xff]  }
 0x113   : > { %v650_v19 = vadd.f32 %v644_v16, %v6379_v41  ;;  %v6476_v20 = vadd.f32 %v791_v17, %v649_v14  ;;  %2838 = vmatpush1.bf16.msra.mxu1 %v5319_v11  ;;  %2869 = vmatprep.mubr.bf16.mxu1 %v5577_v2  ;;  %v5346_v41 = vld [vmem:[%s6948_s1 + $0x820] ss:$8 sps:$4 sm:$0xff]   ;;  %v5377_v14 = vld [vmem:[%s6948_s1 + $0x950] ss:$8 sps:$4 sm:$0xff]   ;;  %v5385_v16 = vld [vmem:[%s6948_s1 + $0x944] ss:$8 sps:$4 sm:$0xff]  }
 0x114   : > { %v646_v22 = vpop.f32.mrf.mxu0  ;;  %v793_v23 = vpop.f32.mrf.mxu1  ;;  %2839 = vmatprep.subr.bf16.mxu1 %v5327_v13 }
 0x115   : > { %v6485_v25 = vadd.f32 %v793_v23, %v650_v19  ;;  %2691 = vmatpush1.bf16.msra.mxu0 %v5322_v15  ;;  %v5388_v19 = vld [vmem:[%s6948_s1 + $0x9c4] ss:$8 sps:$4 sm:$0xff]   ;;  %v5391_v22 = vld [vmem:[%s6948_s1 + $0x934] ss:$8 sps:$4 sm:$0xff]   ;;  %v5386_v23 = vld [vmem:[%s6948_s1 + $0x9c0] ss:$8 sps:$4 sm:$0xff]  }
 0x116   : > { %v647_v27 = vpop.f32.mrf.mxu0  ;;  %2692 = vmatprep.subr.bf16.mxu0 %v5330_v18  ;;  %v795_v29 = vpop.f32.mrf.mxu1  ;;  %v5380_v18 = vld [vmem:[%s6948_s1 + $0x9d0] ss:$8 sps:$4 sm:$0xff]  }
 0x117   : > { %2840 = vmatpush1.bf16.msra.mxu1 %v5325_v21  ;;  %v5383_v21 = vld [vmem:[%s6948_s1 + $0x940] ss:$8 sps:$4 sm:$0xff]   ;;  %v5392_v27 = vld [vmem:[%s6948_s1 + $0x9b0] ss:$8 sps:$4 sm:$0xff]  }
 0x118   : > { %2841 = vmatprep.subr.bf16.mxu1 %v5333_v24  ;;  %v796_v32 = vpop.f32.mrf.mxu1  ;;  %v5394_v24 = vld [vmem:[%s6948_s1 + $0x9b4] ss:$8 sps:$4 sm:$0xff]   ;;  %v5395_v29 = vld [vmem:[%s6948_s1 + $0x920] ss:$8 sps:$4 sm:$0xff]  }
 0x119   : > { %2693 = vmatpush1.bf16.msra.mxu0 %v5328_v26  ;;  %v5397_v26 = vld [vmem:[%s6948_s1 + $0x924] ss:$8 sps:$4 sm:$0xff]   ;;  %v5406_v32 = vld [vmem:[%s6948_s1 + $0x994] ss:$8 sps:$4 sm:$0xff]  }
 0x11a   : > { %2694 = vmatprep.subr.bf16.mxu0 %v5336_v28  ;;  %v5400_v28 = vld [vmem:[%s6948_s1 + $0x9a4] ss:$8 sps:$4 sm:$0xff]  }
 0x11b   : > { %2842 = vmatpush1.bf16.msra.mxu1 %v5331_v30  ;;  %v5403_v30 = vld [vmem:[%s6948_s1 + $0x914] ss:$8 sps:$4 sm:$0xff]  }
 0x11c   : > { %2843 = vmatprep.subr.bf16.mxu1 %v5339_v31  ;;  %v5398_v31 = vld [vmem:[%s6948_s1 + $0x9a0] ss:$8 sps:$4 sm:$0xff]  }
 0x11d   : > { %2695 = vmatpush1.bf16.msra.mxu0 %v5334_v33  ;;  %v2898_v33 = vshrl.u32 %v6554_v55, 16 }
 0x11e   : > { %2696 = vmatprep.subr.bf16.mxu0 %v5342_v35  ;;  %v5401_v35 = vld [vmem:[%s6948_s1 + $0x910] ss:$8 sps:$4 sm:$0xff]  }
 0x11f   : > { %2844 = vmatpush1.bf16.msra.mxu1 %v5337_v34  ;;  %v2901_v34 = vshll.u32 %v6554_v55, 16 }
 0x120   : > { %2845 = vmatprep.subr.bf16.mxu1 %v5345_v36  ;;  %v5409_v36 = vld [vmem:[%s6948_s1 + $0x904] ss:$8 sps:$4 sm:$0xff]  }
 0x121   : > { %2697 = vmatpush1.bf16.msra.mxu0 %v5340_v37  ;;  %v5404_v37 = vld [vmem:[%s6948_s1 + $0x990] ss:$8 sps:$4 sm:$0xff]   ;;  %v2903_v40 = vrot.slane %v2901_v34, 2 }
 0x122   : > { %2698 = vmatprep.subr.bf16.mxu0 %v5348_v38  ;;  %v5412_v38 = vld [vmem:[%s6948_s1 + $0x984] ss:$8 sps:$4 sm:$0xff]   ;;  %v5463_v34 = vld [vmem:[%s6948_s1 + $0xb70] ss:$8 sps:$4 sm:$0xff]  }
 0x123   : > { %2846 = vmatpush1.bf16.msra.mxu1 %v5343_v39  ;;  %v2900_v39 = vrot.slane %v2898_v33, 1  ;;  %v5468_v33 = vld [vmem:[%s6948_s1 + $0xbf4] ss:$8 sps:$4 sm:$0xff]  }
 0x124   : > { %2847 = vmatprep.subr.bf16.mxu1 %v5351_v42  ;;  %v5415_v42 = vld [vmem:[%s6948_s1 + $0xa74] ss:$8 sps:$4 sm:$0xff]  }
 0x125   : > { %2699 = vmatpush1.bf16.msra.mxu0 %v5346_v41  ;;  %v5407_v41 = vld [vmem:[%s6948_s1 + $0x900] ss:$8 sps:$4 sm:$0xff]   ;;  %v2904_v45 = vor.u32 %v2903_v40, %v2900_v39  ;;  %v5474_v39 = vld [vmem:[%s6948_s1 + $0xbe4] ss:$8 sps:$4 sm:$0xff]  }
 0x126   : > { %2700 = vmatprep.subr.bf16.mxu0 %v5354_v44  ;;  %v5410_v44 = vld [vmem:[%s6948_s1 + $0x980] ss:$8 sps:$4 sm:$0xff]  }
 0x127   : > { %2848 = vmatpush1.bf16.msra.mxu1 %v5349_v43  ;;  %v5416_v43 = vld [vmem:[%s5709_s28 + $0x18] sm:$0x3c]  }
 0x128   : > { %2849 = vmatprep.subr.bf16.mxu1 %v5357_v46  ;;  %v5419_v46 = vld [vmem:[%s6948_s1 + $0xaf4] ss:$8 sps:$4 sm:$0xff]  }
 0x129   : > { %2701 = vmatpush1.bf16.msra.mxu0 %v5352_v47  ;;  %v5413_v47 = vld [vmem:[%s6948_s1 + $0xa70] ss:$8 sps:$4 sm:$0xff]  }
 0x12a   : > { %2702 = vmatprep.subr.bf16.mxu0 %v5360_v48  ;;  %v3053_v48 = vrot.slane %v5416_v43, 2 }
 0x12b   : > { %2850 = vmatpush1.bf16.msra.mxu1 %v5355_v49  ;;  %v5422_v49 = vld [vmem:[%s6948_s1 + $0xa64] ss:$8 sps:$4 sm:$0xff]  }
 0x12c   : > { %2851 = vmatprep.subr.bf16.mxu1 %v5363_v52  ;;  %v5425_v52 = vld [vmem:[%s6948_s1 + $0xae4] ss:$8 sps:$4 sm:$0xff]  }
 0x12d   : > { %2703 = vmatpush1.bf16.msra.mxu0 %v5358_v53 }
 0x12e   : > { %2986 = vmatprep.subr.bf16.mxu0 %v5366_v54  ;;  %v5420_v54 = vld [vmem:[%s6948_s1 + $0xa60] ss:$8 sps:$4 sm:$0xff]  }
 0x12f   : > { %2852 = vmatpush1.bf16.msra.mxu1 %v5361_v56 }
 0x130   : > { %v940_v63 = vpop.f32.mrf.mxu0  ;;  %2721 = vmatmul.mubr.bf16.vlgmr.msra.gmra.mxu0 %v2606_v57  ;;  %3135 = vmatprep.subr.bf16.mxu1 %v5370_v58  ;;  %v5428_v57 = vld [vmem:[%s6948_s1 + $0xa54] ss:$8 sps:$4 sm:$0xff]  }
 0x131   : > { %v947_v1 = vadd.f32 %v940_v63, %v6476_v20  ;;  %2987 = vmatpush1.bf16.msra.mxu0 %v5364_v59  ;;  %3018 = vmatprep.mubr.bf16.mxu0 %v5577_v2  ;;  %v5431_v63 = vld [vmem:[%s6948_s1 + $0xad4] ss:$8 sps:$4 sm:$0xff]  }
 0x132   : > { %v942_v4 = vpop.f32.mrf.mxu0  ;;  %v1085_v5 = vpop.f32.mrf.mxu1  ;;  %2870 = vmatmul.mubr.bf16.vlgmr.msra.gmra.mxu1 %v2755_v60  ;;  %2988 = vmatprep.subr.bf16.mxu0 %v5373_v61  ;;  %v5423_v60 = vld [vmem:[%s6948_s1 + $0xae0] ss:$8 sps:$4 sm:$0xff]  }
 0x133   : > { %v948_v7 = vadd.f32 %v942_v4, %v6485_v25  ;;  %v6584_v8 = vadd.f32 %v1085_v5, %v947_v1  ;;  %3136 = vmatpush1.bf16.msra.mxu1 %v5368_v62  ;;  %3167 = vmatprep.mubr.bf16.mxu1 %v5577_v2  ;;  %v5389_v25 = vld [vmem:[%s6948_s1 + $0x930] ss:$8 sps:$4 sm:$0xff]   ;;  %v5434_v4 = vld [vmem:[%s6948_s1 + $0xa44] ss:$8 sps:$4 sm:$0xff]  }
 0x134   : > { %v944_v10 = vpop.f32.mrf.mxu0  ;;  %v1087_v11 = vpop.f32.mrf.mxu1  ;;  %3137 = vmatprep.subr.bf16.mxu1 %v5376_v0  ;;  %v5426_v1 = vld [vmem:[%s6948_s1 + $0xa50] ss:$8 sps:$4 sm:$0xff]  }
 0x135   : > { %v6593_v13 = vadd.f32 %v1087_v11, %v948_v7  ;;  %2989 = vmatpush1.bf16.msra.mxu0 %v5371_v3  ;;  %v5437_v7 = vld [vmem:[%s6948_s1 + $0xac4] ss:$8 sps:$4 sm:$0xff]   ;;  %v5440_v10 = vld [vmem:[%s6948_s1 + $0xa34] ss:$8 sps:$4 sm:$0xff]   ;;  %v5435_v11 = vld [vmem:[%s6948_s1 + $0xac0] ss:$8 sps:$4 sm:$0xff]  }
 0x136   : > { %v945_v15 = vpop.f32.mrf.mxu0  ;;  %2990 = vmatprep.subr.bf16.mxu0 %v5379_v6  ;;  %v1089_v17 = vpop.f32.mrf.mxu1  ;;  %v5429_v6 = vld [vmem:[%s6948_s1 + $0xad0] ss:$8 sps:$4 sm:$0xff]  }
 0x137   : > { %3138 = vmatpush1.bf16.msra.mxu1 %v5374_v9  ;;  %v5432_v9 = vld [vmem:[%s6948_s1 + $0xa40] ss:$8 sps:$4 sm:$0xff]   ;;  %v5441_v15 = vld [vmem:[%s6948_s1 + $0xab0] ss:$8 sps:$4 sm:$0xff]   ;;  %v5449_v17 = vld [vmem:[%s6948_s1 + $0xaa4] ss:$8 sps:$4 sm:$0xff]  }
 0x138   : > { %3139 = vmatprep.subr.bf16.mxu1 %v5382_v12  ;;  %v1090_v20 = vpop.f32.mrf.mxu1  ;;  %v5443_v12 = vld [vmem:[%s6948_s1 + $0xab4] ss:$8 sps:$4 sm:$0xff]  }
 0x139   : > { %2991 = vmatpush1.bf16.msra.mxu0 %v5377_v14  ;;  %v5446_v14 = vld [vmem:[%s6948_s1 + $0xa24] ss:$8 sps:$4 sm:$0xff]  }
 0x13a   : > { %2992 = vmatprep.subr.bf16.mxu0 %v5385_v16  ;;  %v4706_v16 = vld [vmem:[%s5709_s28 + $0x20] sm:$0xf] }
 0x13b   : > { %3140 = vmatpush1.bf16.msra.mxu1 %v5380_v18  ;;  %v5444_v18 = vld [vmem:[%s6948_s1 + $0xa20] ss:$8 sps:$4 sm:$0xff]   ;;  %v4755_v20 = vcombine.low %v4706_v16, %v4706_v16 }
 0x13c   : > { %3141 = vmatprep.subr.bf16.mxu1 %v5388_v19  ;;  %v5452_v19 = vld [vmem:[%s6948_s1 + $0xa14] ss:$8 sps:$4 sm:$0xff]  }
 0x13d   : > { %2993 = vmatpush1.bf16.msra.mxu0 %v5383_v21  ;;  %v5447_v21 = vld [vmem:[%s6948_s1 + $0xaa0] ss:$8 sps:$4 sm:$0xff]  }
 0x13e   : > { %2994 = vmatprep.subr.bf16.mxu0 %v5391_v22  ;;  %v5455_v22 = vld [vmem:[%s6948_s1 + $0xa94] ss:$8 sps:$4 sm:$0xff]  }
 0x13f   : > { %3142 = vmatpush1.bf16.msra.mxu1 %v5386_v23  ;;  %v5450_v23 = vld [vmem:[%s6948_s1 + $0xa10] ss:$8 sps:$4 sm:$0xff]  }
 0x140   : > { %3143 = vmatprep.subr.bf16.mxu1 %v5394_v24  ;;  %v5458_v24 = vld [vmem:[%s6948_s1 + $0xa04] ss:$8 sps:$4 sm:$0xff]  }
 0x141   : > { %2995 = vmatpush1.bf16.msra.mxu0 %v5389_v25  ;;  %v3346_v25 = vshll.u32 %v4755_v20, 16 }
 0x142   : > { %2996 = vmatprep.subr.bf16.mxu0 %v5397_v26  ;;  %v5453_v26 = vld [vmem:[%s6948_s1 + $0xa90] ss:$8 sps:$4 sm:$0xff]  }
 0x143   : > { %3144 = vmatpush1.bf16.msra.mxu1 %v5392_v27  ;;  %v5461_v27 = vld [vmem:[%s6948_s1 + $0xa84] ss:$8 sps:$4 sm:$0xff]  }
 0x144   : > { %3145 = vmatprep.subr.bf16.mxu1 %v5400_v28  ;;  %v5456_v28 = vld [vmem:[%s6948_s1 + $0xa00] ss:$8 sps:$4 sm:$0xff]  }
 0x145   : > { %2997 = vmatpush1.bf16.msra.mxu0 %v5395_v29  ;;  %v3344_v29 = vshrl.u32 %v4755_v20, 16 }
 0x146   : > { %2998 = vmatprep.subr.bf16.mxu0 %v5403_v30  ;;  %v3348_v30 = vrot.slane %v3346_v25, 1 }
 0x147   : > { %3146 = vmatpush1.bf16.msra.mxu1 %v5398_v31  ;;  %v5465_v31 = vld [vmem:[%s6948_s1 + $0xb74] ss:$8 sps:$4 sm:$0xff]  }
 0x148   : > { %3147 = vmatprep.subr.bf16.mxu1 %v5406_v32  ;;  %v5459_v32 = vld [vmem:[%s6948_s1 + $0xa80] ss:$8 sps:$4 sm:$0xff]  }
 0x149   : > { %2999 = vmatpush1.bf16.msra.mxu0 %v5401_v35  ;;  %v3349_v35 = vor.u32 %v3348_v30, %v3344_v29  ;;  %v5520_v29 = vld [vmem:[%s6948_s1 + $0xc54] ss:$8 sps:$4 sm:$0xff]  }
 0x14a   : > { %3000 = vmatprep.subr.bf16.mxu0 %v5409_v36  ;;  %v5471_v36 = vld [vmem:[%s6948_s1 + $0xb64] ss:$8 sps:$4 sm:$0xff]  }
 0x14b   : > { %3148 = vmatpush1.bf16.msra.mxu1 %v5404_v37  ;;  %v5466_v37 = vld [vmem:[%s6948_s1 + $0xbf0] ss:$8 sps:$4 sm:$0xff]  }
 0x14c   : > { %3149 = vmatprep.subr.bf16.mxu1 %v5412_v38 }
 0x14d   : > { %3001 = vmatpush1.bf16.msra.mxu0 %v5407_v41  ;;  %v5469_v41 = vld [vmem:[%s6948_s1 + $0xb60] ss:$8 sps:$4 sm:$0xff]  }
 0x14e   : > { %3280 = vmatprep.subr.bf16.mxu0 %v5415_v42 }
 0x14f   : > { %3150 = vmatpush1.bf16.msra.mxu1 %v5410_v44  ;;  %v5477_v44 = vld [vmem:[%s6948_s1 + $0xb54] ss:$8 sps:$4 sm:$0xff]  }
 0x150   : > { %v1236_v51 = vpop.f32.mrf.mxu0  ;;  %3019 = vmatmul.mubr.bf16.vlgmr.msra.gmra.mxu0 %v2904_v45  ;;  %3431 = vmatprep.subr.bf16.mxu1 %v5419_v46 }
 0x151   : > { %v1243_v53 = vadd.f32 %v1236_v51, %v6584_v8  ;;  %3281 = vmatpush1.bf16.msra.mxu0 %v5413_v47  ;;  %3312 = vmatprep.mubr.bf16.mxu0 %v5577_v2  ;;  %v5472_v47 = vld [vmem:[%s6948_s1 + $0xbe0] ss:$8 sps:$4 sm:$0xff]  }
 0x152   : > { %v1238_v55 = vpop.f32.mrf.mxu0  ;;  %v1385_v56 = vpop.f32.mrf.mxu1  ;;  %3168 = vmatmul.mubr.bf16.vlgmr.msra.gmra.mxu1 %v3053_v48  ;;  %3282 = vmatprep.subr.bf16.mxu0 %v5422_v49 }
 0x153   : > { %v1244_v58 = vadd.f32 %v1238_v55, %v6593_v13  ;;  %v6691_v59 = vadd.f32 %v1385_v56, %v1243_v53  ;;  %3432 = vmatpush1.bf16.msra.mxu1 %v5417_v50  ;;  %3463 = vmatprep.mubr.bf16.mxu1 %v5577_v2  ;;  %v5438_v13 = vld [vmem:[%s6948_s1 + $0xa30] ss:$8 sps:$4 sm:$0xff]   ;;  %v5480_v50 = vld [vmem:[%s6948_s1 + $0xbd4] ss:$8 sps:$4 sm:$0xff]  }
 0x154   : > { %v1240_v61 = vpop.f32.mrf.mxu0  ;;  %v1387_v62 = vpop.f32.mrf.mxu1  ;;  %3433 = vmatprep.subr.bf16.mxu1 %v5425_v52  ;;  %v5475_v52 = vld [vmem:[%s6948_s1 + $0xb50] ss:$8 sps:$4 sm:$0xff]  }
 0x155   : > { %v6700_v0 = vadd.f32 %v1387_v62, %v1244_v58  ;;  %3283 = vmatpush1.bf16.msra.mxu0 %v5420_v54  ;;  %v5483_v54 = vld [vmem:[%s6948_s1 + $0xb44] ss:$8 sps:$4 sm:$0xff]   ;;  %v5478_v56 = vld [vmem:[%s6948_s1 + $0xbd0] ss:$8 sps:$4 sm:$0xff]   ;;  %v5484_v61 = vld [vmem:[%s6948_s1 + $0xbc0] ss:$8 sps:$4 sm:$0xff]  }
 0x156   : > { %v1241_v3 = vpop.f32.mrf.mxu0  ;;  %3284 = vmatprep.subr.bf16.mxu0 %v5428_v57  ;;  %v1389_v5 = vpop.f32.mrf.mxu1  ;;  %v5486_v57 = vld [vmem:[%s6948_s1 + $0xbc4] ss:$8 sps:$4 sm:$0xff]   ;;  %v5492_v62 = vld [vmem:[%s6948_s1 + $0xbb4] ss:$8 sps:$4 sm:$0xff]  }
 0x157   : > { %3434 = vmatpush1.bf16.msra.mxu1 %v5423_v60  ;;  %v5489_v60 = vld [vmem:[%s6948_s1 + $0xb34] ss:$8 sps:$4 sm:$0xff]   ;;  %v5498_v3 = vld [vmem:[%s6948_s1 + $0xba4] ss:$8 sps:$4 sm:$0xff]  }
 0x158   : > { %3435 = vmatprep.subr.bf16.mxu1 %v5431_v63  ;;  %v1390_v8 = vpop.f32.mrf.mxu1  ;;  %v5487_v63 = vld [vmem:[%s6948_s1 + $0xb30] ss:$8 sps:$4 sm:$0xff]   ;;  %v5501_v5 = vld [vmem:[%s6948_s1 + $0xb14] ss:$8 sps:$4 sm:$0xff]  }
 0x159   : > { %3285 = vmatpush1.bf16.msra.mxu0 %v5426_v1  ;;  %v5490_v1 = vld [vmem:[%s6948_s1 + $0xbb0] ss:$8 sps:$4 sm:$0xff]   ;;  %v5504_v8 = vld [vmem:[%s6948_s1 + $0xb94] ss:$8 sps:$4 sm:$0xff]  }
 0x15a   : > { %3286 = vmatprep.subr.bf16.mxu0 %v5434_v4  ;;  %v5493_v4 = vld [vmem:[%s6948_s1 + $0xb20] ss:$8 sps:$4 sm:$0xff]  }
 0x15b   : > { %3436 = vmatpush1.bf16.msra.mxu1 %v5429_v6  ;;  %v5511_v6 = vld [vmem:[%s5709_s28 + $0x20] sm:$0x1e]  }
 0x15c   : > { %3437 = vmatprep.subr.bf16.mxu1 %v5437_v7  ;;  %v5496_v7 = vld [vmem:[%s6948_s1 + $0xba0] ss:$8 sps:$4 sm:$0xff]   ;;  %v3498_v20 = vrot.slane %v5511_v6, 1 }
 0x15d   : > { %3287 = vmatpush1.bf16.msra.mxu0 %v5432_v9  ;;  %v5499_v9 = vld [vmem:[%s6948_s1 + $0xb10] ss:$8 sps:$4 sm:$0xff]  }
 0x15e   : > { %3288 = vmatprep.subr.bf16.mxu0 %v5440_v10  ;;  %v5507_v10 = vld [vmem:[%s6948_s1 + $0xb04] ss:$8 sps:$4 sm:$0xff]  }
 0x15f   : > { %3438 = vmatpush1.bf16.msra.mxu1 %v5435_v11  ;;  %v3641_v11 = vshrl.u32 %v5511_v6, 16 }
 0x160   : > { %3439 = vmatprep.subr.bf16.mxu1 %v5443_v12  ;;  %v3644_v12 = vshll.u32 %v5511_v6, 16 }
 0x161   : > { %3289 = vmatpush1.bf16.msra.mxu0 %v5438_v13  ;;  %v5502_v13 = vld [vmem:[%s6948_s1 + $0xb90] ss:$8 sps:$4 sm:$0xff]  }
 0x162   : > { %3290 = vmatprep.subr.bf16.mxu0 %v5446_v14  ;;  %v5510_v14 = vld [vmem:[%s6948_s1 + $0xb84] ss:$8 sps:$4 sm:$0xff]  }
 0x163   : > { %3440 = vmatpush1.bf16.msra.mxu1 %v5441_v15  ;;  %v5505_v15 = vld [vmem:[%s6948_s1 + $0xb00] ss:$8 sps:$4 sm:$0xff]  }
 0x164   : > { %3441 = vmatprep.subr.bf16.mxu1 %v5449_v17  ;;  %v3643_v17 = vrot.slane %v3641_v11, 1 }
 0x165   : > { %3291 = vmatpush1.bf16.msra.mxu0 %v5444_v18  ;;  %v3646_v18 = vrot.slane %v3644_v12, 2 }
 0x166   : > { %3292 = vmatprep.subr.bf16.mxu0 %v5452_v19  ;;  %v5508_v19 = vld [vmem:[%s6948_s1 + $0xb80] ss:$8 sps:$4 sm:$0xff]  }
 0x167   : > { %3442 = vmatpush1.bf16.msra.mxu1 %v5447_v21  ;;  %v5512_v21 = vld [vmem:[%s6948_s1 + $0xc70] ss:$8 sps:$4 sm:$0xff]  }
 0x168   : > { %3443 = vmatprep.subr.bf16.mxu1 %v5455_v22  ;;  %v3647_v22 = vor.u32 %v3646_v18, %v3643_v17 }
 0x169   : > { %3293 = vmatpush1.bf16.msra.mxu0 %v5450_v23  ;;  %v5517_v23 = vld [vmem:[%s6948_s1 + $0xc64] ss:$8 sps:$4 sm:$0xff]  }
 0x16a   : > { %3294 = vmatprep.subr.bf16.mxu0 %v5458_v24 }
 0x16b   : > { %3444 = vmatpush1.bf16.msra.mxu1 %v5453_v26  ;;  %v5515_v26 = vld [vmem:[%s6948_s1 + $0xc60] ss:$8 sps:$4 sm:$0xff]  }
 0x16c   : > { %3445 = vmatprep.subr.bf16.mxu1 %v5461_v27 }
 0x16d   : > { %3295 = vmatpush1.bf16.msra.mxu0 %v5456_v28 }
 0x16e   : > { %3580 = vmatprep.subr.bf16.mxu0 %v5465_v31 }
 0x16f   : > { %3446 = vmatpush1.bf16.msra.mxu1 %v5459_v32 }
 0x170   : > { %v1534_v38 = vpop.f32.mrf.mxu0  ;;  %3313 = vmatmul.mubr.bf16.vlgmr.msra.gmra.mxu0 %v4706_v16  ;;  %3729 = vmatprep.subr.bf16.mxu1 %v5468_v33  ;;  %v5514_v16 = vld [vmem:[%s6948_s1 + $0xc74] ss:$8 sps:$4 sm:$0xff]  }
 0x171   : > { %v1541_v40 = vadd.f32 %v1534_v38, %v6691_v59  ;;  %3581 = vmatpush1.bf16.msra.mxu0 %v5463_v34  ;;  %3612 = vmatprep.mubr.bf16.mxu0 %v5577_v2  ;;  %v5481_v59 = vld [vmem:[%s6948_s1 + $0xb40] ss:$8 sps:$4 sm:$0xff]  }
 0x172   : > { %v1536_v42 = vpop.f32.mrf.mxu0  ;;  %v1683_v43 = vpop.f32.mrf.mxu1  ;;  %3464 = vmatmul.mubr.bf16.vlgmr.msra.gmra.mxu1 %v3349_v35  ;;  %3582 = vmatprep.subr.bf16.mxu0 %v5471_v36  ;;  %v5518_v35 = vld [vmem:[%s6948_s1 + $0xc50] ss:$8 sps:$4 sm:$0xff]   ;;  %v5523_v36 = vld [vmem:[%s6948_s1 + $0xc44] ss:$8 sps:$4 sm:$0xff]  }
 0x173   : > { %v1542_v45 = vadd.f32 %v1536_v42, %v6700_v0  ;;  %v6796_v46 = vadd.f32 %v1683_v43, %v1541_v40  ;;  %3730 = vmatpush1.bf16.msra.mxu1 %v5466_v37  ;;  %3761 = vmatprep.mubr.bf16.mxu1 %v5577_v2  ;;  %v5495_v0 = vld [vmem:[%s6948_s1 + $0xb24] ss:$8 sps:$4 sm:$0xff]   ;;  %v5526_v40 = vld [vmem:[%s6948_s1 + $0xc34] ss:$8 sps:$4 sm:$0xff]   ;;  %v5527_v43 = vld [vmem:[%s6948_s1 + $0xc20] ss:$8 sps:$4 sm:$0xff]  }
 0x174   : > { %v1538_v48 = vpop.f32.mrf.mxu0  ;;  %v1685_v49 = vpop.f32.mrf.mxu1  ;;  %3731 = vmatprep.subr.bf16.mxu1 %v5474_v39  ;;  %v5521_v39 = vld [vmem:[%s6948_s1 + $0xc40] ss:$8 sps:$4 sm:$0xff]   ;;  %v5529_v42 = vld [vmem:[%s6948_s1 + $0xc24] ss:$8 sps:$4 sm:$0xff]  }
 0x175   : > { %v6805_v51 = vadd.f32 %v1685_v49, %v1542_v45  ;;  %3583 = vmatpush1.bf16.msra.mxu0 %v5469_v41  ;;  %v5524_v41 = vld [vmem:[%s6948_s1 + $0xc30] ss:$8 sps:$4 sm:$0xff]   ;;  %v5533_v48 = vld [vmem:[%s6948_s1 + $0xc00] ss:$8 sps:$4 sm:$0xff]  }
 0x176   : > { %v1539_v53 = vpop.f32.mrf.mxu0  ;;  %3584 = vmatprep.subr.bf16.mxu0 %v5477_v44  ;;  %v1687_v55 = vpop.f32.mrf.mxu1  ;;  %v5532_v44 = vld [vmem:[%s6948_s1 + $0xc14] ss:$8 sps:$4 sm:$0xff]   ;;  %v5530_v45 = vld [vmem:[%s6948_s1 + $0xc10] ss:$8 sps:$4 sm:$0xff]  }
 0x177   : > { %3732 = vmatpush1.bf16.msra.mxu1 %v5472_v47  ;;  %v5536_v47 = vld [vmem:[%s5709_s28 + $0x20] sm:$0x3c]   ;;  %s4880_s28 = smul.u32 14, %s6962_s13 }
 0x178   : > { %3733 = vmatprep.subr.bf16.mxu1 %v5480_v50  ;;  %v1688_v58 = vpop.f32.mrf.mxu1  ;;  %v3796_v49 = vrot.slane %v5536_v47, 2 }
 0x179   : > { %3585 = vmatpush1.bf16.msra.mxu0 %v5475_v52  ;;  %s190_s27 = sadd.s32 %s4880_s28, %s4047_s26 }
 0x17a   : > { %3586 = vmatprep.subr.bf16.mxu0 %v5483_v54  ;;  %s4048_s29 = sshll.u32 %s190_s27, 2 }
 0x17b   : > { %3734 = vmatpush1.bf16.msra.mxu1 %v5478_v56  ;;  %s192_s13 = scalar_lea.vmem %s6950_s3, %s4048_s29 }
 0x17c   : > { %3735 = vmatprep.subr.bf16.mxu1 %v5486_v57 }
 0x17d   : > { %3587 = vmatpush1.bf16.msra.mxu0 %v5481_v59 }
 0x17e   : > { %3588 = vmatprep.subr.bf16.mxu0 %v5489_v60 }
 0x17f   : > { %3736 = vmatpush1.bf16.msra.mxu1 %v5484_v61 }
 0x180   : > { %3737 = vmatprep.subr.bf16.mxu1 %v5492_v62 }
 0x181   : > { %3589 = vmatpush1.bf16.msra.mxu0 %v5487_v63 }
 0x182   : > { %3590 = vmatprep.subr.bf16.mxu0 %v5495_v0 }
 0x183   : > { %3738 = vmatpush1.bf16.msra.mxu1 %v5490_v1 }
 0x184   : > { %3739 = vmatprep.subr.bf16.mxu1 %v5498_v3 }
 0x185   : > { %3591 = vmatpush1.bf16.msra.mxu0 %v5493_v4 }
 0x186   : > { %3592 = vmatprep.subr.bf16.mxu0 %v5501_v5 }
 0x187   : > { %3740 = vmatpush1.bf16.msra.mxu1 %v5496_v7 }
 0x188   : > { %3741 = vmatprep.subr.bf16.mxu1 %v5504_v8 }
 0x189   : > { %3593 = vmatpush1.bf16.msra.mxu0 %v5499_v9 }
 0x18a   : > { %3594 = vmatprep.subr.bf16.mxu0 %v5507_v10 }
 0x18b   : > { %3742 = vmatpush1.bf16.msra.mxu1 %v5502_v13 }
 0x18c   : > { %3743 = vmatprep.subr.bf16.mxu1 %v5510_v14 }
 0x18d   : > { %3595 = vmatpush1.bf16.msra.mxu0 %v5505_v15 }
 0x18e   : > { %3878 = vmatprep.subr.bf16.mxu0 %v5514_v16 }
 0x18f   : > { %3744 = vmatpush1.bf16.msra.mxu1 %v5508_v19 }
 0x190   : > { %v1828_v24 = vpop.f32.mrf.mxu0  ;;  %3613 = vmatmul.mubr.bf16.vlgmr.msra.gmra.mxu0 %v3498_v20 }
 0x191   : > { %v1835_v25 = vadd.f32 %v1828_v24, %v6796_v46  ;;  %3879 = vmatpush1.bf16.msra.mxu0 %v5512_v21  ;;  %3910 = vmatprep.mubr.bf16.mxu0 %v5577_v2  ;;  %v5535_v46 = vld [vmem:[%s6948_s1 + $0xc04] ss:$8 sps:$4 sm:$0xff]  }
 0x192   : > { %v1830_v27 = vpop.f32.mrf.mxu0  ;;  %v1979_v28 = vpop.f32.mrf.mxu1  ;;  %3762 = vmatmul.mubr.bf16.vlgmr.msra.gmra.mxu1 %v3647_v22  ;;  %3880 = vmatprep.subr.bf16.mxu0 %v5517_v23 }
 0x193   : > { %v1836_v30 = vadd.f32 %v1830_v27, %v6805_v51  ;;  %v1986_v31 = vadd.f32 %v1979_v28, %v1835_v25 }
 0x194   : > { %v1832_v32 = vpop.f32.mrf.mxu0  ;;  %v1981_v33 = vpop.f32.mrf.mxu1 }
 0x195   : > { %v1987_v34 = vadd.f32 %v1981_v33, %v1836_v30  ;;  %3881 = vmatpush1.bf16.msra.mxu0 %v5515_v26 }
 0x196   : > { %v1833_v2 = vpop.f32.mrf.mxu0  ;;  %3882 = vmatprep.subr.bf16.mxu0 %v5520_v29  ;;  %v1983_v37 = vpop.f32.mrf.mxu1 }
 0x198   : > { %v1984_v38 = vpop.f32.mrf.mxu1 }
 0x199   : > { %3883 = vmatpush1.bf16.msra.mxu0 %v5518_v35 }
 0x19a   : > { %3884 = vmatprep.subr.bf16.mxu0 %v5523_v36 }
 0x19d   : > { %3885 = vmatpush1.bf16.msra.mxu0 %v5521_v39 }
 0x19e   : > { %3886 = vmatprep.subr.bf16.mxu0 %v5526_v40 }
 0x1a1   : > { %3887 = vmatpush1.bf16.msra.mxu0 %v5524_v41 }
 0x1a2   : > { %3888 = vmatprep.subr.bf16.mxu0 %v5529_v42 }
 0x1a5   : > { %3889 = vmatpush1.bf16.msra.mxu0 %v5527_v43 }
 0x1a6   : > { %3890 = vmatprep.subr.bf16.mxu0 %v5532_v44 }
 0x1a9   : > { %3891 = vmatpush1.bf16.msra.mxu0 %v5530_v45 }
 0x1aa   : > { %3892 = vmatprep.subr.bf16.mxu0 %v5535_v46 }
 0x1ad   : > { %3893 = vmatpush1.bf16.msra.mxu0 %v5533_v48 }
 0x1b0   : > { %v2128_v50 = vpop.f32.mrf.mxu0  ;;  %3911 = vmatmul.mubr.bf16.vlgmr.msra.gmra.mxu0 %v3796_v49 }
 0x1b1   : > { %v2135_v51 = vadd.f32 %v2128_v50, %v1986_v31 }
 0x1b2   : > { %v2130_v52 = vpop.f32.mrf.mxu0  ;;  %v2277_v53 = vpop.f32.mrf.mxu1 }
 0x1b3   : > { %v2136_v54 = vadd.f32 %v2130_v52, %v1987_v34  ;;  %v2284_v55 = vadd.f32 %v2277_v53, %v2135_v51 }
 0x1b4   : > { %v2132_v56 = vpop.f32.mrf.mxu0  ;;  %v2279_v57 = vpop.f32.mrf.mxu1 }
 0x1b5   : > { %v2285_v58 = vadd.f32 %v2279_v57, %v2136_v54 }
 0x1b6   : > { %v2133_v59 = vpop.f32.mrf.mxu0  ;;  %v2281_v60 = vpop.f32.mrf.mxu1 }
 0x1b8   : > { %v2282_v61 = vpop.f32.mrf.mxu1 }
 0x1d0   : > { %v2426_v62 = vpop.f32.mrf.mxu0 }
 0x1d1   : > { %v2433_v63 = vadd.f32 %v2426_v62, %v2284_v55 }
 0x1d2   : > { %v2428_v0 = vpop.f32.mrf.mxu0  ;;  %v2571_v1 = vpop.f32.mrf.mxu1 }
 0x1d3   : > { %v2434_v3 = vadd.f32 %v2428_v0, %v2285_v58  ;;  %v2578_v4 = vadd.f32 %v2571_v1, %v2433_v63  ;;  %v3938_v1 = vld [vmem:[%s192_s13] sm:$0xff] }
 0x1d4   : > { %v2430_v5 = vpop.f32.mrf.mxu0  ;;  %v2573_v6 = vpop.f32.mrf.mxu1 }
 0x1d5   : > { %v2579_v7 = vadd.f32 %v2573_v6, %v2434_v3 }
 0x1d6   : > { %v2431_v8 = vpop.f32.mrf.mxu0  ;;  %v2575_v9 = vpop.f32.mrf.mxu1 }
 0x1d8   : > { %v2576_v10 = vpop.f32.mrf.mxu1 }
 0x1f0   : > { %v2722_v11 = vpop.f32.mrf.mxu0 }
 0x1f1   : > { %v2729_v12 = vadd.f32 %v2722_v11, %v2578_v4 }
 0x1f2   : > { %v2724_v13 = vpop.f32.mrf.mxu0  ;;  %v2871_v14 = vpop.f32.mrf.mxu1 }
 0x1f3   : > { %v2730_v15 = vadd.f32 %v2724_v13, %v2579_v7  ;;  %v2878_v16 = vadd.f32 %v2871_v14, %v2729_v12 }
 0x1f4   : > { %v2726_v17 = vpop.f32.mrf.mxu0  ;;  %v2873_v18 = vpop.f32.mrf.mxu1 }
 0x1f5   : > { %v2879_v19 = vadd.f32 %v2873_v18, %v2730_v15 }
 0x1f6   : > { %v2727_v20 = vpop.f32.mrf.mxu0  ;;  %v2875_v21 = vpop.f32.mrf.mxu1 }
 0x1f8   : > { %v2876_v22 = vpop.f32.mrf.mxu1 }
 0x210   : > { %v3020_v23 = vpop.f32.mrf.mxu0 }
 0x211   : > { %v3027_v24 = vadd.f32 %v3020_v23, %v2878_v16 }
 0x212   : > { %v3022_v25 = vpop.f32.mrf.mxu0  ;;  %v3169_v26 = vpop.f32.mrf.mxu1 }
 0x213   : > { %v3028_v27 = vadd.f32 %v3022_v25, %v2879_v19  ;;  %v3176_v28 = vadd.f32 %v3169_v26, %v3027_v24 }
 0x214   : > { %v3024_v29 = vpop.f32.mrf.mxu0  ;;  %v3171_v30 = vpop.f32.mrf.mxu1 }
 0x215   : > { %v3177_v31 = vadd.f32 %v3171_v30, %v3028_v27 }
 0x216   : > { %v3025_v32 = vpop.f32.mrf.mxu0  ;;  %v3173_v33 = vpop.f32.mrf.mxu1 }
 0x218   : > { %v3174_v34 = vpop.f32.mrf.mxu1 }
 0x230   : > { %v3314_v35 = vpop.f32.mrf.mxu0 }
 0x231   : > { %v3321_v50 = vadd.f32 %v3314_v35, %v3176_v28 }
 0x232   : > { %v3316_v2 = vpop.f32.mrf.mxu0  ;;  %v3465_v36 = vpop.f32.mrf.mxu1 }
 0x233   : > { %v3322_v51 = vadd.f32 %v3316_v2, %v3177_v31  ;;  %v3472_v52 = vadd.f32 %v3465_v36, %v3321_v50 }
 0x234   : > { %v3318_v37 = vpop.f32.mrf.mxu0  ;;  %v3467_v38 = vpop.f32.mrf.mxu1 }
 0x235   : > { %v3473_v53 = vadd.f32 %v3467_v38, %v3322_v51 }
 0x236   : > { %v3319_v39 = vpop.f32.mrf.mxu0  ;;  %v3469_v40 = vpop.f32.mrf.mxu1 }
 0x238   : > { %v3470_v41 = vpop.f32.mrf.mxu1 }
 0x250   : > { %v3614_v42 = vpop.f32.mrf.mxu0 }
 0x251   : > { %v3621_v54 = vadd.f32 %v3614_v42, %v3472_v52 }
 0x252   : > { %v3616_v43 = vpop.f32.mrf.mxu0  ;;  %v3763_v44 = vpop.f32.mrf.mxu1 }
 0x253   : > { %v3622_v55 = vadd.f32 %v3616_v43, %v3473_v53  ;;  %v3770_v56 = vadd.f32 %v3763_v44, %v3621_v54 }
 0x254   : > { %v3618_v45 = vpop.f32.mrf.mxu0  ;;  %v3765_v46 = vpop.f32.mrf.mxu1 }
 0x255   : > { %v3771_v58 = vadd.f32 %v3765_v46, %v3622_v55 }
 0x256   : > { %v3619_v47 = vpop.f32.mrf.mxu0  ;;  %v3767_v48 = vpop.f32.mrf.mxu1 }
 0x258   : > { %v3768_v49 = vpop.f32.mrf.mxu1 }
 0x270   : > { %v3912_v57 = vpop.f32.mrf.mxu0 }
 0x271   : > { %v3919_v59 = vadd.f32 %v3912_v57, %v3770_v56 }
 0x272   : > { %v3914_v60 = vpop.f32.mrf.mxu0 }
 0x273   : > { %v3920_v61 = vadd.f32 %v3914_v60, %v3771_v58  ;;  %v3921_v63 = vmax.f32 %v3919_v59, 0.0 }
 0x274   : > { %v3916_v62 = vpop.f32.mrf.mxu0 }
 0x275   : > { %v3922_v0 = vmax.f32 %v3920_v61, 0.0 }
 0x276   : > { %v3917_v3 = vpop.f32.mrf.mxu0 }
 0x277   : > { %v4878_v4 = vpack.c.bf16 %v3922_v0, %v3921_v63 }
 0x279   : > { %v3939_v5 = vsel %vm3937_vm6, %v4878_v4, %v3938_v1 }
 0x27a   : > { %3940 = vst [vmem:[%s192_s13] sm:$0xff] %v3939_v5 }
 0x27b PF: > { %s13_s16 = sadd.s32 1, %s5575_s16   ;;  %s6951_s12 = smov %s5567_s14 }
 0x27c   : > { %p10_p7 = scmp.ge.s32.totalorder %s13_s16, 16   ;;  %s6952_s13 = smov %s5571_s15 }
 0x27d   : > { %s6953_s14 = smov %s6956_s17  ;;  %s6954_s15 = smov %s6960_s18 }
 0x27e   :  { %12 = sbr.rel (!%p10_p7) target bundleno = 3 (0x3), region = 91 }

// kernel: alexnet_fe_forward.12
= control target key start
LH: loop header
LB: loop body
LE: loop exit
PB: predicated region body
PF: predicated region fallthrough
CT: control target
= control target key end

     0   :  { %s5480_s12 = smov 0   ;;  %s5482_s13 = smov 0   ;;  %s6977_s0 = inlined_call_operand.vmem [shape: bf16[2,5,5,384], index: 0, kind: input, shape index: {}]   ;;  %s6978_s1 = inlined_call_operand.vmem [shape: bf16[9,384,256], index: 1, kind: input, shape index: {}]   ;;  %s6979_s2 = inlined_call_operand.vmem [shape: f32[1,256], index: 2, kind: input, shape index: {}]   ;;  %s6980_s3 = inlined_call_operand.vmem [shape: bf16[2,3,3,256], index: 3, kind: output, shape index: {}]  }
   0x1   :  { %s5484_s14 = smov 0   ;;  %s5486_s15 = smov 0  }
   0x2   :  { %s5488_s16 = smov 0  }
   0x3 LB: > { %s22_s17 = sadd.s32 1, %s5448_s14  ;;  %s25_s18 = sadd.s32 1, %s5452_s15  ;;  %s5456_s16 = sphi %s5488_s16, %s13_s16   ;;  %s5452_s15 = sphi %s5486_s15, %s6984_s15   ;;  %s5448_s14 = sphi %s5484_s14, %s6983_s14   ;;  %s5444_s13 = sphi %s5482_s13, %s6982_s13   ;;  %s5440_s12 = sphi %s5480_s12, %s6981_s12  }
   0x4   : > { %p23_p0 = scmp.ge.s32.totalorder %s22_s17, 3  ;;  %p3857_p1 = scmp.ge.s32.totalorder %s5456_s16, 1 }
   0x5   : > { %p151_p2 = scmp.lt.s32.totalorder %s5456_s16, 7 }
   0x6   : > { %s6986_s17 = smov (%p23_p0, %s22_s17), 0  ;;  %s6988_s18 = smov (!%p23_p0, %s25_s18), %s5452_s15 }
   0x7   : > { %p152_p3 = pnand %p3857_p1, %p151_p2  ;;  %p27_p4 = scmp.ge.s32.totalorder %s6988_s18, 2 }
   0x8   : > { %p179_p5 = scmp.lt.s32.totalorder (!%p152_p3), %s5444_s13, 1  ;;  %s4707_s26 = smul.u32 (!%p152_p3), 12, %s5440_s12 }
   0x9   : > { %s6990_s18 = smov (%p27_p4, %s6988_s18), 0  ;;  %155 = sbr.rel (%p152_p3) target bundleno = 670 (0x29e), region = 32 }
   0xa   : > { %p186_p6 = scmp.lt.s32.totalorder (!%p152_p3), %s5440_s12, 2 }
   0xe   : > { %v4752_v0 = vld [vmem:[%s6978_s1 + $0x74] ss:$8 sps:$4 sm:$0xff]   ;;  %v5458_v2 = vmov 0   ;;  %v4756_v3 = vld [vmem:[%s6978_s1 + $0x70] ss:$8 sps:$4 sm:$0xff]   ;;  %s6992_s13 = smov (!%p179_p5, %s5444_s13), 1 }
   0xf   : > { %v4754_v1 = vld [vmem:[%s6978_s1 + $0x174] ss:$8 sps:$4 sm:$0xff]   ;;  %585 = vmatprep.mubr.bf16.mxu1 %v5458_v2  ;;  %512 = vmatprep.subr.bf16.mxu0 %v4752_v0  ;;  %v4757_v4 = vld [vmem:[%s6978_s1 + $0x170] ss:$8 sps:$4 sm:$0xff]   ;;  %v4758_v5 = vld [vmem:[%s6978_s1 + $0x64] ss:$8 sps:$4 sm:$0xff]  }
  0x10   : > { %553 = vmatprep.subr.bf16.mxu1 %v4754_v1  ;;  %513 = vmatpush1.bf16.msra.mxu0 %v4756_v3  ;;  %v4760_v6 = vld [vmem:[%s6978_s1 + $0x164] ss:$8 sps:$4 sm:$0xff]   ;;  %v4762_v7 = vld [vmem:[%s6978_s1 + $0x60] ss:$8 sps:$4 sm:$0xff]   ;;  %v4764_v9 = vld [vmem:[%s6978_s1 + $0x54] ss:$8 sps:$4 sm:$0xff]  }
  0x11   : > { %554 = vmatpush1.bf16.msra.mxu1 %v4757_v4  ;;  %514 = vmatprep.subr.bf16.mxu0 %v4758_v5  ;;  %v4763_v8 = vld [vmem:[%s6978_s1 + $0x160] ss:$8 sps:$4 sm:$0xff]   ;;  %v4766_v10 = vld [vmem:[%s6978_s1 + $0x154] ss:$8 sps:$4 sm:$0xff]   ;;  %v4768_v11 = vld [vmem:[%s6978_s1 + $0x50] ss:$8 sps:$4 sm:$0xff]  }
  0x12   : > { %555 = vmatprep.subr.bf16.mxu1 %v4760_v6  ;;  %v4769_v12 = vld [vmem:[%s6978_s1 + $0x150] ss:$8 sps:$4 sm:$0xff]   ;;  %v4770_v13 = vld [vmem:[%s6978_s1 + $0x44] ss:$8 sps:$4 sm:$0xff]   ;;  %v4774_v15 = vld [vmem:[%s6978_s1 + $0x40] ss:$8 sps:$4 sm:$0xff]  }
  0x13   : > { %v4772_v14 = vld [vmem:[%s6978_s1 + $0x144] ss:$8 sps:$4 sm:$0xff]   ;;  %v4775_v16 = vld [vmem:[%s6978_s1 + $0x140] ss:$8 sps:$4 sm:$0xff]   ;;  %v4776_v17 = vld [vmem:[%s6978_s1 + $0x34] ss:$8 sps:$4 sm:$0xff]  }
  0x14   : > { %515 = vmatpush1.bf16.msra.mxu0 %v4762_v7  ;;  %v4778_v18 = vld [vmem:[%s6978_s1 + $0x134] ss:$8 sps:$4 sm:$0xff]   ;;  %v4780_v19 = vld [vmem:[%s6978_s1 + $0x30] ss:$8 sps:$4 sm:$0xff]   ;;  %v4782_v21 = vld [vmem:[%s6978_s1 + $0x24] ss:$8 sps:$4 sm:$0xff]  }
  0x15   : > { %556 = vmatpush1.bf16.msra.mxu1 %v4763_v8  ;;  %516 = vmatprep.subr.bf16.mxu0 %v4764_v9  ;;  %v4781_v20 = vld [vmem:[%s6978_s1 + $0x130] ss:$8 sps:$4 sm:$0xff]   ;;  %s4708_s21 = smul.u32 60, %s6992_s13  ;;  %v4784_v22 = vld [vmem:[%s6978_s1 + $0x124] ss:$8 sps:$4 sm:$0xff]   ;;  %s6994_s12 = smov (!%p186_p6, %s5440_s12), 2 }
  0x16   : > { %557 = vmatprep.subr.bf16.mxu1 %v4766_v10  ;;  %v4786_v23 = vld [vmem:[%s6978_s1 + $0x20] ss:$8 sps:$4 sm:$0xff]   ;;  %v4788_v25 = vld [vmem:[%s6978_s1 + $0x14] ss:$8 sps:$4 sm:$0xff]   ;;  %v4792_v27 = vld [vmem:[%s6978_s1 + $0x10] ss:$8 sps:$4 sm:$0xff]  }
  0x17   : > { %v4787_v24 = vld [vmem:[%s6978_s1 + $0x120] ss:$8 sps:$4 sm:$0xff]   ;;  %s183_s6 = scalar_lea.vmem %s6977_s0, %s4708_s21  ;;  %v4790_v26 = vld [vmem:[%s6978_s1 + $0x114] ss:$8 sps:$4 sm:$0xff]   ;;  %v4793_v28 = vld [vmem:[%s6978_s1 + $0x110] ss:$8 sps:$4 sm:$0xff]  }
  0x18   : > { %517 = vmatpush1.bf16.msra.mxu0 %v4768_v11  ;;  %s5608_s20 = scalar_lea.vmem %s183_s6, %s4707_s26  ;;  %v4794_v29 = vld [vmem:[%s6978_s1 + $0x4] ss:$8 sps:$4 sm:$0xff]   ;;  %v4798_v31 = vld [vmem:[%s6978_s1] ss:$8 sps:$4 sm:$0xff]   ;;  %v4800_v33 = vld [vmem:[%s6978_s1 + $0xf4] ss:$8 sps:$4 sm:$0xff]  }
  0x19   : > { %558 = vmatpush1.bf16.msra.mxu1 %v4769_v12  ;;  %518 = vmatprep.subr.bf16.mxu0 %v4770_v13  ;;  %v4796_v30 = vld [vmem:[%s6978_s1 + $0x104] ss:$8 sps:$4 sm:$0xff]   ;;  %v4799_v32 = vld [vmem:[%s6978_s1 + $0x100] ss:$8 sps:$4 sm:$0xff]   ;;  %v4804_v34 = vld [vmem:[%s6978_s1 + $0x1f4] ss:$8 sps:$4 sm:$0xff]  }
  0x1a   : > { %559 = vmatprep.subr.bf16.mxu1 %v4772_v14  ;;  %v4802_v35 = vld [vmem:[%s6978_s1 + $0x1f0] ss:$8 sps:$4 sm:$0xff]   ;;  %v5632_v36 = vld [vmem:[%s5608_s20 + $0x8] ss:$0 sps:$4 sm:$0x33]   ;;  %s4709_s4 = smul.u32 6, %s6992_s13 }
  0x1b   : > { %v4805_v37 = vld [vmem:[%s6978_s1 + $0xf0] ss:$8 sps:$4 sm:$0xff]   ;;  %v4807_v38 = vld [vmem:[%s6978_s1 + $0xe4] ss:$8 sps:$4 sm:$0xff]   ;;  %v4809_v40 = vld [vmem:[%s6978_s1 + $0x1e0] ss:$8 sps:$4 sm:$0xff]  }
  0x1c   : > { %519 = vmatpush1.bf16.msra.mxu0 %v4774_v15  ;;  %v4811_v39 = vld [vmem:[%s6978_s1 + $0x1e4] ss:$8 sps:$4 sm:$0xff]   ;;  %v4812_v41 = vld [vmem:[%s6978_s1 + $0xe0] ss:$8 sps:$4 sm:$0xff]   ;;  %v4813_v42 = vld [vmem:[%s6978_s1 + $0xd4] ss:$8 sps:$4 sm:$0xff]  }
  0x1d   : > { %560 = vmatpush1.bf16.msra.mxu1 %v4775_v16  ;;  %520 = vmatprep.subr.bf16.mxu0 %v4776_v17  ;;  %v4817_v43 = vld [vmem:[%s6978_s1 + $0x1d4] ss:$8 sps:$4 sm:$0xff]   ;;  %v4815_v44 = vld [vmem:[%s6978_s1 + $0x1d0] ss:$8 sps:$4 sm:$0xff]   ;;  %v4819_v46 = vld [vmem:[%s6978_s1 + $0xc4] ss:$8 sps:$4 sm:$0xff]  }
  0x1e   : > { %561 = vmatprep.subr.bf16.mxu1 %v4778_v18  ;;  %v4818_v45 = vld [vmem:[%s6978_s1 + $0xd0] ss:$8 sps:$4 sm:$0xff]   ;;  %v4823_v47 = vld [vmem:[%s6978_s1 + $0x1c4] ss:$8 sps:$4 sm:$0xff]   ;;  %v4821_v48 = vld [vmem:[%s6978_s1 + $0x1c0] ss:$8 sps:$4 sm:$0xff]  }
  0x1f   : > { %v211_v49 = vld [vmem:[%s5608_s20] sm:$0x33]  ;;  %v4825_v51 = vld [vmem:[%s6978_s1 + $0xb4] ss:$8 sps:$4 sm:$0xff]   ;;  %v4827_v54 = vld [vmem:[%s6978_s1 + $0x1b0] ss:$8 sps:$4 sm:$0xff]  }
  0x20   : > { %521 = vmatpush1.bf16.msra.mxu0 %v4780_v19  ;;  %v4824_v50 = vld [vmem:[%s6978_s1 + $0xc0] ss:$8 sps:$4 sm:$0xff]   ;;  %v3863_v52 = vcombine.high %v211_v49, %v211_v49  ;;  %v4829_v53 = vld [vmem:[%s6978_s1 + $0x1b4] ss:$8 sps:$4 sm:$0xff]   ;;  %v4830_v55 = vld [vmem:[%s6978_s1 + $0xb0] ss:$8 sps:$4 sm:$0xff]   ;;  %v5729_v11 = vcombine.low %v211_v49, %v211_v49 }
  0x21   : > { %562 = vmatpush1.bf16.msra.mxu1 %v4781_v20  ;;  %522 = vmatprep.subr.bf16.mxu0 %v4782_v21  ;;  %v4831_v56 = vld [vmem:[%s6978_s1 + $0xa4] ss:$8 sps:$4 sm:$0xff]   ;;  %v4833_v60 = vld [vmem:[%s6978_s1 + $0x1a0] ss:$8 sps:$4 sm:$0xff]   ;;  %v4837_v63 = vld [vmem:[%s6978_s1 + $0x94] ss:$8 sps:$4 sm:$0xff]  }
  0x22   : > { %563 = vmatprep.subr.bf16.mxu1 %v4784_v22  ;;  %544 = vmatprep.mubr.bf16.mxu0 %v3863_v52  ;;  %v4835_v57 = vld [vmem:[%s6978_s1 + $0x1a4] ss:$8 sps:$4 sm:$0xff]   ;;  %v653_v58 = vshrl.u32 %v3863_v52, 16  ;;  %v655_v59 = vshll.u32 %v3863_v52, 16  ;;  %v4836_v62 = vld [vmem:[%s6978_s1 + $0xa0] ss:$8 sps:$4 sm:$0xff]  }
  0x23   : > { %v4841_v0 = vld [vmem:[%s6978_s1 + $0x194] ss:$8 sps:$4 sm:$0xff]   ;;  %v4839_v3 = vld [vmem:[%s6978_s1 + $0x190] ss:$8 sps:$4 sm:$0xff]   ;;  %v4843_v5 = vld [vmem:[%s6978_s1 + $0x84] ss:$8 sps:$4 sm:$0xff]  }
  0x24   : > { %523 = vmatpush1.bf16.msra.mxu0 %v4786_v23  ;;  %v657_v61 = vrot.slane %v655_v59, 1  ;;  %v4842_v4 = vld [vmem:[%s6978_s1 + $0x90] ss:$8 sps:$4 sm:$0xff]   ;;  %v4847_v6 = vld [vmem:[%s6978_s1 + $0x184] ss:$8 sps:$4 sm:$0xff]   ;;  %s3859_s5 = sshll.u32 %s6994_s12, 1 }
  0x25   : > { %564 = vmatpush1.bf16.msra.mxu1 %v4787_v24  ;;  %524 = vmatprep.subr.bf16.mxu0 %v4788_v25  ;;  %v4845_v7 = vld [vmem:[%s6978_s1 + $0x180] ss:$8 sps:$4 sm:$0xff]   ;;  %v4853_v9 = vld [vmem:[%s6978_s1 + $0x274] ss:$8 sps:$4 sm:$0xff]   ;;  %v4851_v12 = vld [vmem:[%s6978_s1 + $0x270] ss:$8 sps:$4 sm:$0xff]   ;;  %s190_s6 = sadd.s32 %s4709_s4, %s3859_s5 }
  0x26   : > { %565 = vmatprep.subr.bf16.mxu1 %v4790_v26  ;;  %v658_v1 = vor.u32 %v657_v61, %v653_v58  ;;  %v4848_v8 = vld [vmem:[%s6978_s1 + $0x80] ss:$8 sps:$4 sm:$0xff]   ;;  %v4856_v10 = vld [vmem:[%s6978_s1 + $0x2f4] ss:$8 sps:$4 sm:$0xff]   ;;  %v4854_v13 = vld [vmem:[%s6978_s1 + $0x2f0] ss:$8 sps:$4 sm:$0xff]  }
  0x27   : > { %v4859_v14 = vld [vmem:[%s6978_s1 + $0x264] ss:$8 sps:$4 sm:$0xff]   ;;  %v4857_v16 = vld [vmem:[%s6978_s1 + $0x260] ss:$8 sps:$4 sm:$0xff]   ;;  %v4865_v18 = vld [vmem:[%s6978_s1 + $0x254] ss:$8 sps:$4 sm:$0xff]  }
  0x28   : > { %525 = vmatpush1.bf16.msra.mxu0 %v4792_v27  ;;  %v4862_v15 = vld [vmem:[%s6978_s1 + $0x2e4] ss:$8 sps:$4 sm:$0xff]   ;;  %v4860_v17 = vld [vmem:[%s6978_s1 + $0x2e0] ss:$8 sps:$4 sm:$0xff]   ;;  %v4868_v19 = vld [vmem:[%s6978_s1 + $0x2d4] ss:$8 sps:$4 sm:$0xff]  }
  0x29   : > { %566 = vmatpush1.bf16.msra.mxu1 %v4793_v28  ;;  %526 = vmatprep.subr.bf16.mxu0 %v4794_v29  ;;  %v4863_v20 = vld [vmem:[%s6978_s1 + $0x250] ss:$8 sps:$4 sm:$0xff]   ;;  %v4871_v22 = vld [vmem:[%s6978_s1 + $0x244] ss:$8 sps:$4 sm:$0xff]   ;;  %v4869_v24 = vld [vmem:[%s6978_s1 + $0x240] ss:$8 sps:$4 sm:$0xff]  }
  0x2a   : > { %567 = vmatprep.subr.bf16.mxu1 %v4796_v30  ;;  %v4866_v21 = vld [vmem:[%s6978_s1 + $0x2d0] ss:$8 sps:$4 sm:$0xff]   ;;  %v4874_v23 = vld [vmem:[%s6978_s1 + $0x2c4] ss:$8 sps:$4 sm:$0xff]   ;;  %v4872_v25 = vld [vmem:[%s6978_s1 + $0x2c0] ss:$8 sps:$4 sm:$0xff]  }
  0x2b   : > { %v4877_v26 = vld [vmem:[%s6978_s1 + $0x234] ss:$8 sps:$4 sm:$0xff]   ;;  %v4875_v28 = vld [vmem:[%s6978_s1 + $0x230] ss:$8 sps:$4 sm:$0xff]   ;;  %v4883_v30 = vld [vmem:[%s6978_s1 + $0x224] ss:$8 sps:$4 sm:$0xff]  }
  0x2c   : > { %527 = vmatpush1.bf16.msra.mxu0 %v4798_v31  ;;  %v4880_v27 = vld [vmem:[%s6978_s1 + $0x2b4] ss:$8 sps:$4 sm:$0xff]   ;;  %v4878_v29 = vld [vmem:[%s6978_s1 + $0x2b0] ss:$8 sps:$4 sm:$0xff]   ;;  %v4886_v31 = vld [vmem:[%s6978_s1 + $0x2a4] ss:$8 sps:$4 sm:$0xff]  }
  0x2d   : > { %568 = vmatpush1.bf16.msra.mxu1 %v4799_v32  ;;  %528 = vmatprep.subr.bf16.mxu0 %v4800_v33  ;;  %v4881_v32 = vld [vmem:[%s6978_s1 + $0x220] ss:$8 sps:$4 sm:$0xff]   ;;  %v4904_v49 = vld [vmem:[%s6978_s1 + $0x474] ss:$8 sps:$4 sm:$0xff]   ;;  %v4899_v52 = vld [vmem:[%s6978_s1 + $0x370] ss:$8 sps:$4 sm:$0xff]  }
  0x2e   : > { %909 = vmatprep.subr.bf16.mxu1 %v4804_v34  ;;  %v4884_v33 = vld [vmem:[%s6978_s1 + $0x2a0] ss:$8 sps:$4 sm:$0xff]   ;;  %v4889_v34 = vld [vmem:[%s6978_s1 + $0x214] ss:$8 sps:$4 sm:$0xff]   ;;  %v4914_v61 = vld [vmem:[%s6978_s1 + $0x450] ss:$8 sps:$4 sm:$0xff]  }
  0x2f   : > { %v4913_v58 = vld [vmem:[%s6978_s1 + $0x354] ss:$8 sps:$4 sm:$0xff]   ;;  %vm3749_vm0 = vcmask 1041408   ;;  %vm3750_vm1 = vsmask.f32 1280  ;;  %s3860_s7 = sshll.u32 %s190_s6, 1 }
  0x30   : > { %586 = vmatmul.mubr.bf16.vlgmr.msra.gmra.mxu1 %v5632_v36  ;;  %529 = vmatpush2.bf16.msra.mxu0 %v4805_v37  ;;  %v662_v37 = vshll.u32 %v5632_v36, 16  ;;  %v4916_v59 = vld [vmem:[%s6978_s1 + $0x454] ss:$8 sps:$4 sm:$0xff]   ;;  %vm3752_vm2 = vcmask 1043458   ;;  %vm3753_vm3 = vsmask.f32 3328  ;;  %vm3751_vm4 = vmand %vm3749_vm0, %vm3750_vm1  ;;  %s192_s8 = scalar_lea.vmem %s6980_s3, %s3860_s7 }
  0x31   : > { %910 = vmatpush1.bf16.msra.mxu1 %v4802_v35  ;;  %530 = vmatprep.subr.bf16.mxu0 %v4807_v38  ;;  %v4892_v35 = vld [vmem:[%s6978_s1 + $0x294] ss:$8 sps:$4 sm:$0xff]   ;;  %v648_v38 = vshll.u32 %v5729_v11, 16  ;;  %vm3754_vm5 = vmand %vm3752_vm2, %vm3753_vm3 }
  0x32   : > { %911 = vmatprep.subr.bf16.mxu1 %v4811_v39  ;;  %941 = vmatprep.mubr.bf16.mxu1 %v658_v1  ;;  %v4887_v39 = vld [vmem:[%s6978_s1 + $0x210] ss:$8 sps:$4 sm:$0xff]   ;;  %v4920_v1 = vld [vmem:[%s6978_s1 + $0x440] ss:$8 sps:$4 sm:$0xff]   ;;  %vm3755_vm6 = vmor %vm3754_vm5, %vm3751_vm4 }
  0x34   : > { %531 = vmatpush2.bf16.msra.mxu0 %v4812_v41  ;;  %v4895_v41 = vld [vmem:[%s6978_s1 + $0x204] ss:$8 sps:$4 sm:$0xff]  }
  0x35   : > { %912 = vmatpush1.bf16.msra.mxu1 %v4809_v40  ;;  %532 = vmatprep.subr.bf16.mxu0 %v4813_v42  ;;  %v4890_v40 = vld [vmem:[%s6978_s1 + $0x290] ss:$8 sps:$4 sm:$0xff]   ;;  %v4898_v42 = vld [vmem:[%s6978_s1 + $0x284] ss:$8 sps:$4 sm:$0xff]  }
  0x36   : > { %913 = vmatprep.subr.bf16.mxu1 %v4817_v43  ;;  %v660_v43 = vshrl.u32 %v5632_v36, 16  ;;  %v4901_v36 = vld [vmem:[%s6978_s1 + $0x374] ss:$8 sps:$4 sm:$0xff]  }
  0x38   : > { %533 = vmatpush2.bf16.msra.mxu0 %v4818_v45  ;;  %v646_v45 = vshrl.u32 %v5729_v11, 16 }
  0x39   : > { %914 = vmatpush1.bf16.msra.mxu1 %v4815_v44  ;;  %534 = vmatprep.subr.bf16.mxu0 %v4819_v46  ;;  %v664_v44 = vrot.slane %v662_v37, 1  ;;  %v650_v46 = vrot.slane %v648_v38, 1  ;;  %v4960_v37 = vld [vmem:[%s6978_s1 + $0x3d0] ss:$8 sps:$4 sm:$0xff]  }
  0x3a   : > { %915 = vmatprep.subr.bf16.mxu1 %v4823_v47  ;;  %v4893_v47 = vld [vmem:[%s6978_s1 + $0x200] ss:$8 sps:$4 sm:$0xff]   ;;  %v4963_v38 = vld [vmem:[%s6978_s1 + $0x4d0] ss:$8 sps:$4 sm:$0xff]  }
  0x3c   : > { %535 = vmatpush2.bf16.msra.mxu0 %v4824_v50  ;;  %v651_v50 = vor.u32 %v650_v46, %v646_v45  ;;  %v4972_v45 = vld [vmem:[%s6978_s1 + $0x3b0] ss:$8 sps:$4 sm:$0xff]  }
  0x3d   : > { %916 = vmatpush1.bf16.msra.mxu1 %v4821_v48  ;;  %536 = vmatprep.subr.bf16.mxu0 %v4825_v51  ;;  %v4896_v48 = vld [vmem:[%s6978_s1 + $0x280] ss:$8 sps:$4 sm:$0xff]   ;;  %v665_v51 = vor.u32 %v664_v44, %v660_v43  ;;  %v4974_v43 = vld [vmem:[%s6978_s1 + $0x3b4] ss:$8 sps:$4 sm:$0xff]   ;;  %v4975_v46 = vld [vmem:[%s6978_s1 + $0x4b0] ss:$8 sps:$4 sm:$0xff]  }
  0x3e   : > { %917 = vmatprep.subr.bf16.mxu1 %v4829_v53  ;;  %v4902_v53 = vld [vmem:[%s6978_s1 + $0x470] ss:$8 sps:$4 sm:$0xff]   ;;  %v4977_v44 = vld [vmem:[%s6978_s1 + $0x4b4] ss:$8 sps:$4 sm:$0xff]  }
  0x40   : > { %537 = vmatpush2.bf16.msra.mxu0 %v4830_v55  ;;  %v4910_v55 = vld [vmem:[%s6978_s1 + $0x464] ss:$8 sps:$4 sm:$0xff]  }
  0x41   : > { %918 = vmatpush1.bf16.msra.mxu1 %v4827_v54  ;;  %538 = vmatprep.subr.bf16.mxu0 %v4831_v56  ;;  %v4907_v54 = vld [vmem:[%s6978_s1 + $0x364] ss:$8 sps:$4 sm:$0xff]   ;;  %v4905_v56 = vld [vmem:[%s6978_s1 + $0x360] ss:$8 sps:$4 sm:$0xff]  }
  0x42   : > { %919 = vmatprep.subr.bf16.mxu1 %v4835_v57  ;;  %v4908_v57 = vld [vmem:[%s6978_s1 + $0x460] ss:$8 sps:$4 sm:$0xff]  }
  0x44   : > { %539 = vmatpush2.bf16.msra.mxu0 %v4836_v62  ;;  %v4919_v62 = vld [vmem:[%s6978_s1 + $0x344] ss:$8 sps:$4 sm:$0xff]  }
  0x45   : > { %920 = vmatpush1.bf16.msra.mxu1 %v4833_v60  ;;  %540 = vmatprep.subr.bf16.mxu0 %v4837_v63  ;;  %v4911_v60 = vld [vmem:[%s6978_s1 + $0x350] ss:$8 sps:$4 sm:$0xff]   ;;  %v4922_v63 = vld [vmem:[%s6978_s1 + $0x444] ss:$8 sps:$4 sm:$0xff]  }
  0x46   : > { %921 = vmatprep.subr.bf16.mxu1 %v4841_v0  ;;  %v4917_v0 = vld [vmem:[%s6978_s1 + $0x340] ss:$8 sps:$4 sm:$0xff]  }
  0x48   : > { %541 = vmatpush2.bf16.msra.mxu0 %v4842_v4  ;;  %v4925_v4 = vld [vmem:[%s6978_s1 + $0x334] ss:$8 sps:$4 sm:$0xff]  }
  0x49   : > { %922 = vmatpush1.bf16.msra.mxu1 %v4839_v3  ;;  %542 = vmatprep.subr.bf16.mxu0 %v4843_v5  ;;  %v5877_v3 = vld [vmem:[%s5608_s20] sm:$0x66]  ;;  %v4928_v5 = vld [vmem:[%s6978_s1 + $0x434] ss:$8 sps:$4 sm:$0xff]  }
  0x4a   : > { %923 = vmatprep.subr.bf16.mxu1 %v4847_v6  ;;  %v4058_v6 = vcombine.high %v5877_v3, %v5877_v3 }
  0x4c   : > { %543 = vmatpush2.bf16.msra.mxu0 %v4848_v8  ;;  %v4923_v8 = vld [vmem:[%s6978_s1 + $0x330] ss:$8 sps:$4 sm:$0xff]  }
  0x4d   : > { %924 = vmatpush1.bf16.msra.mxu1 %v4845_v7  ;;  %950 = vmatprep.subr.bf16.mxu0 %v4856_v10  ;;  %v1053_v7 = vrot.slane %v4058_v6, 1  ;;  %v4931_v10 = vld [vmem:[%s6978_s1 + $0x324] ss:$8 sps:$4 sm:$0xff]   ;;  %v5015_v6 = vld [vmem:[%s6978_s1 + $0x5d4] ss:$8 sps:$4 sm:$0xff]  }
  0x4e   : > { %925 = vmatprep.subr.bf16.mxu1 %v4853_v9  ;;  %v4926_v9 = vld [vmem:[%s6978_s1 + $0x430] ss:$8 sps:$4 sm:$0xff]  }
  0x4f   : > { %545 = vmatmul.mubr.bf16.vlgmr.msra.gmra.mxu0 %v5729_v11  ;;  %v4934_v11 = vld [vmem:[%s6978_s1 + $0x424] ss:$8 sps:$4 sm:$0xff]  }
  0x50   : > { %951 = vmatpush1.bf16.msra.mxu0 %v4854_v13  ;;  %982 = vmatprep.mubr.bf16.mxu0 %v5458_v2  ;;  %v4932_v13 = vld [vmem:[%s6978_s1 + $0x420] ss:$8 sps:$4 sm:$0xff]  }
  0x51   : > { %926 = vmatpush2.bf16.msra.mxu1 %v4851_v12  ;;  %952 = vmatprep.subr.bf16.mxu0 %v4862_v15  ;;  %v4929_v12 = vld [vmem:[%s6978_s1 + $0x320] ss:$8 sps:$4 sm:$0xff]   ;;  %v4940_v15 = vld [vmem:[%s6978_s1 + $0x414] ss:$8 sps:$4 sm:$0xff]  }
  0x52   : > { %927 = vmatprep.subr.bf16.mxu1 %v4859_v14  ;;  %v4937_v14 = vld [vmem:[%s6978_s1 + $0x314] ss:$8 sps:$4 sm:$0xff]  }
  0x54   : > { %953 = vmatpush1.bf16.msra.mxu0 %v4860_v17  ;;  %v4938_v17 = vld [vmem:[%s6978_s1 + $0x410] ss:$8 sps:$4 sm:$0xff]  }
  0x55   : > { %928 = vmatpush2.bf16.msra.mxu1 %v4857_v16  ;;  %954 = vmatprep.subr.bf16.mxu0 %v4868_v19  ;;  %v4935_v16 = vld [vmem:[%s6978_s1 + $0x310] ss:$8 sps:$4 sm:$0xff]   ;;  %v4946_v19 = vld [vmem:[%s6978_s1 + $0x404] ss:$8 sps:$4 sm:$0xff]  }
  0x56   : > { %929 = vmatprep.subr.bf16.mxu1 %v4865_v18  ;;  %v4943_v18 = vld [vmem:[%s6978_s1 + $0x304] ss:$8 sps:$4 sm:$0xff]  }
  0x58   : > { %955 = vmatpush1.bf16.msra.mxu0 %v4866_v21  ;;  %v4941_v21 = vld [vmem:[%s6978_s1 + $0x300] ss:$8 sps:$4 sm:$0xff]  }
  0x59   : > { %930 = vmatpush2.bf16.msra.mxu1 %v4863_v20  ;;  %956 = vmatprep.subr.bf16.mxu0 %v4874_v23  ;;  %v4953_v20 = vld [vmem:[%s5608_s20 + $0x8] ss:$0 sps:$4 sm:$0x66]   ;;  %v4949_v23 = vld [vmem:[%s6978_s1 + $0x3f4] ss:$8 sps:$4 sm:$0xff]  }
  0x5a   : > { %931 = vmatprep.subr.bf16.mxu1 %v4871_v22  ;;  %v4944_v22 = vld [vmem:[%s6978_s1 + $0x400] ss:$8 sps:$4 sm:$0xff]  }
  0x5c   : > { %957 = vmatpush1.bf16.msra.mxu0 %v4872_v25  ;;  %v1054_v25 = vrot.slane %v4953_v20, 1  ;;  %v5031_v20 = vld [vmem:[%s6978_s1 + $0x5a0] ss:$8 sps:$4 sm:$0xff]  }
  0x5d   : > { %932 = vmatpush2.bf16.msra.mxu1 %v4869_v24  ;;  %958 = vmatprep.subr.bf16.mxu0 %v4880_v27  ;;  %v4952_v24 = vld [vmem:[%s6978_s1 + $0x4f4] ss:$8 sps:$4 sm:$0xff]   ;;  %v4950_v27 = vld [vmem:[%s6978_s1 + $0x4f0] ss:$8 sps:$4 sm:$0xff]  }
  0x5e   : > { %933 = vmatprep.subr.bf16.mxu1 %v4877_v26  ;;  %v4947_v26 = vld [vmem:[%s6978_s1 + $0x3f0] ss:$8 sps:$4 sm:$0xff]  }
  0x60   : > { %959 = vmatpush1.bf16.msra.mxu0 %v4878_v29  ;;  %v4959_v29 = vld [vmem:[%s6978_s1 + $0x4e4] ss:$8 sps:$4 sm:$0xff]  }
  0x61   : > { %934 = vmatpush2.bf16.msra.mxu1 %v4875_v28  ;;  %960 = vmatprep.subr.bf16.mxu0 %v4886_v31  ;;  %v4956_v28 = vld [vmem:[%s6978_s1 + $0x3e4] ss:$8 sps:$4 sm:$0xff]   ;;  %v4954_v31 = vld [vmem:[%s6978_s1 + $0x3e0] ss:$8 sps:$4 sm:$0xff]  }
  0x62   : > { %935 = vmatprep.subr.bf16.mxu1 %v4883_v30  ;;  %v5949_v30 = vld [vmem:[%s5608_s20 + $0xc] sm:$0x33] }
  0x64   : > { %961 = vmatpush1.bf16.msra.mxu0 %v4884_v33  ;;  %v4957_v33 = vld [vmem:[%s6978_s1 + $0x4e0] ss:$8 sps:$4 sm:$0xff]  }
  0x65   : > { %936 = vmatpush2.bf16.msra.mxu1 %v4881_v32  ;;  %962 = vmatprep.subr.bf16.mxu0 %v4892_v35  ;;  %v5956_v32 = vcombine.high %v5949_v30, %v5949_v30  ;;  %v4965_v35 = vld [vmem:[%s6978_s1 + $0x4d4] ss:$8 sps:$4 sm:$0xff]  }
  0x66   : > { %937 = vmatprep.subr.bf16.mxu1 %v4889_v34  ;;  %v4962_v34 = vld [vmem:[%s6978_s1 + $0x3d4] ss:$8 sps:$4 sm:$0xff]  }
  0x68   : > { %963 = vmatpush1.bf16.msra.mxu0 %v4890_v40  ;;  %v4971_v40 = vld [vmem:[%s6978_s1 + $0x4c4] ss:$8 sps:$4 sm:$0xff]  }
  0x69   : > { %938 = vmatpush2.bf16.msra.mxu1 %v4887_v39  ;;  %964 = vmatprep.subr.bf16.mxu0 %v4898_v42  ;;  %v4968_v39 = vld [vmem:[%s6978_s1 + $0x3c4] ss:$8 sps:$4 sm:$0xff]   ;;  %v4969_v42 = vld [vmem:[%s6978_s1 + $0x4c0] ss:$8 sps:$4 sm:$0xff]  }
  0x6a   : > { %939 = vmatprep.subr.bf16.mxu1 %v4895_v41  ;;  %v4966_v41 = vld [vmem:[%s6978_s1 + $0x3c0] ss:$8 sps:$4 sm:$0xff]  }
  0x6c   : > { %965 = vmatpush1.bf16.msra.mxu0 %v4896_v48  ;;  %v4983_v48 = vld [vmem:[%s6978_s1 + $0x4a4] ss:$8 sps:$4 sm:$0xff]  }
  0x6d   : > { %940 = vmatpush2.bf16.msra.mxu1 %v4893_v47  ;;  %1298 = vmatprep.subr.bf16.mxu0 %v4901_v36  ;;  %v4980_v47 = vld [vmem:[%s6978_s1 + $0x3a4] ss:$8 sps:$4 sm:$0xff]   ;;  %v4978_v36 = vld [vmem:[%s6978_s1 + $0x3a0] ss:$8 sps:$4 sm:$0xff]  }
  0x6e   : > { %1339 = vmatprep.subr.bf16.mxu1 %v4904_v49  ;;  %v4981_v49 = vld [vmem:[%s6978_s1 + $0x4a0] ss:$8 sps:$4 sm:$0xff]  }
  0x6f   : > { %983 = vmatmul.mubr.bf16.vlgmr.msra.gmra.mxu0 %v665_v51  ;;  %v4989_v51 = vld [vmem:[%s6978_s1 + $0x494] ss:$8 sps:$4 sm:$0xff]  }
  0x70   : > { %942 = vmatmul.mubr.bf16.vlgmr.msra.gmra.mxu1 %v651_v50  ;;  %1299 = vmatpush1.bf16.msra.mxu0 %v4899_v52  ;;  %v4986_v50 = vld [vmem:[%s6978_s1 + $0x394] ss:$8 sps:$4 sm:$0xff]   ;;  %v4984_v52 = vld [vmem:[%s6978_s1 + $0x390] ss:$8 sps:$4 sm:$0xff]  }
  0x71   : > { %1340 = vmatpush1.bf16.msra.mxu1 %v4902_v53  ;;  %1300 = vmatprep.subr.bf16.mxu0 %v4907_v54  ;;  %v4987_v53 = vld [vmem:[%s6978_s1 + $0x490] ss:$8 sps:$4 sm:$0xff]   ;;  %v4992_v54 = vld [vmem:[%s6978_s1 + $0x384] ss:$8 sps:$4 sm:$0xff]  }
  0x72   : > { %1341 = vmatprep.subr.bf16.mxu1 %v4910_v55  ;;  %1371 = vmatprep.mubr.bf16.mxu1 %v5458_v2  ;;  %v4995_v55 = vld [vmem:[%s6978_s1 + $0x484] ss:$8 sps:$4 sm:$0xff]  }
  0x73   : > { %1330 = vmatprep.mubr.bf16.mxu0 %v1053_v7  ;;  %v5010_v7 = vld [vmem:[%s6978_s1 + $0x550] ss:$8 sps:$4 sm:$0xff]  }
  0x74   : > { %1301 = vmatpush1.bf16.msra.mxu0 %v4905_v56  ;;  %v4990_v56 = vld [vmem:[%s6978_s1 + $0x380] ss:$8 sps:$4 sm:$0xff]  }
  0x75   : > { %1342 = vmatpush1.bf16.msra.mxu1 %v4908_v57  ;;  %1302 = vmatprep.subr.bf16.mxu0 %v4913_v58  ;;  %v4057_v57 = vcombine.low %v5877_v3, %v5877_v3  ;;  %v4993_v58 = vld [vmem:[%s6978_s1 + $0x480] ss:$8 sps:$4 sm:$0xff]  }
  0x76   : > { %1343 = vmatprep.subr.bf16.mxu1 %v4916_v59  ;;  %v5000_v59 = vld [vmem:[%s6978_s1 + $0x574] ss:$8 sps:$4 sm:$0xff]   ;;  %v5004_v3 = vld [vmem:[%s6978_s1 + $0x560] ss:$8 sps:$4 sm:$0xff]  }
  0x78   : > { %1303 = vmatpush1.bf16.msra.mxu0 %v4911_v60  ;;  %v5003_v60 = vld [vmem:[%s6978_s1 + $0x5f4] ss:$8 sps:$4 sm:$0xff]  }
  0x79   : > { %1344 = vmatpush1.bf16.msra.mxu1 %v4914_v61  ;;  %1304 = vmatprep.subr.bf16.mxu0 %v4919_v62  ;;  %v1052_v61 = vrot.slane %v4057_v57, 1  ;;  %v4998_v62 = vld [vmem:[%s6978_s1 + $0x570] ss:$8 sps:$4 sm:$0xff]   ;;  %v5079_v57 = vld [vmem:[%s6978_s1 + $0x620] ss:$8 sps:$4 sm:$0xff]  }
  0x7a   : > { %1345 = vmatprep.subr.bf16.mxu1 %v4922_v63  ;;  %v5001_v63 = vld [vmem:[%s6978_s1 + $0x5f0] ss:$8 sps:$4 sm:$0xff]  }
  0x7c   : > { %1305 = vmatpush1.bf16.msra.mxu0 %v4917_v0  ;;  %v5006_v0 = vld [vmem:[%s6978_s1 + $0x564] ss:$8 sps:$4 sm:$0xff]  }
  0x7d   : > { %1346 = vmatpush1.bf16.msra.mxu1 %v4920_v1  ;;  %1306 = vmatprep.subr.bf16.mxu0 %v4925_v4  ;;  %v5009_v1 = vld [vmem:[%s6978_s1 + $0x5e4] ss:$8 sps:$4 sm:$0xff]   ;;  %v5007_v4 = vld [vmem:[%s6978_s1 + $0x5e0] ss:$8 sps:$4 sm:$0xff]  }
  0x7e   : > { %1347 = vmatprep.subr.bf16.mxu1 %v4928_v5  ;;  %v5012_v5 = vld [vmem:[%s6978_s1 + $0x554] ss:$8 sps:$4 sm:$0xff]  }
  0x80   : > { %1307 = vmatpush1.bf16.msra.mxu0 %v4923_v8  ;;  %v5013_v8 = vld [vmem:[%s6978_s1 + $0x5d0] ss:$8 sps:$4 sm:$0xff]  }
  0x81   : > { %1348 = vmatpush1.bf16.msra.mxu1 %v4926_v9  ;;  %1308 = vmatprep.subr.bf16.mxu0 %v4931_v10  ;;  %v5018_v9 = vld [vmem:[%s6978_s1 + $0x544] ss:$8 sps:$4 sm:$0xff]  }
  0x82   : > { %1349 = vmatprep.subr.bf16.mxu1 %v4934_v11  ;;  %v5021_v10 = vld [vmem:[%s6978_s1 + $0x5c4] ss:$8 sps:$4 sm:$0xff]   ;;  %v5016_v11 = vld [vmem:[%s6978_s1 + $0x540] ss:$8 sps:$4 sm:$0xff]  }
  0x84   : > { %1309 = vmatpush1.bf16.msra.mxu0 %v4929_v12  ;;  %v5019_v12 = vld [vmem:[%s6978_s1 + $0x5c0] ss:$8 sps:$4 sm:$0xff]  }
  0x85   : > { %1350 = vmatpush1.bf16.msra.mxu1 %v4932_v13  ;;  %1310 = vmatprep.subr.bf16.mxu0 %v4937_v14  ;;  %v5024_v13 = vld [vmem:[%s6978_s1 + $0x534] ss:$8 sps:$4 sm:$0xff]  }
  0x86   : > { %1351 = vmatprep.subr.bf16.mxu1 %v4940_v15  ;;  %v5027_v14 = vld [vmem:[%s6978_s1 + $0x5b4] ss:$8 sps:$4 sm:$0xff]   ;;  %v5022_v15 = vld [vmem:[%s6978_s1 + $0x530] ss:$8 sps:$4 sm:$0xff]  }
  0x88   : > { %1311 = vmatpush1.bf16.msra.mxu0 %v4935_v16  ;;  %v5025_v16 = vld [vmem:[%s6978_s1 + $0x5b0] ss:$8 sps:$4 sm:$0xff]  }
  0x89   : > { %1352 = vmatpush1.bf16.msra.mxu1 %v4938_v17  ;;  %1312 = vmatprep.subr.bf16.mxu0 %v4943_v18  ;;  %v5030_v17 = vld [vmem:[%s6978_s1 + $0x524] ss:$8 sps:$4 sm:$0xff]  }
  0x8a   : > { %1353 = vmatprep.subr.bf16.mxu1 %v4946_v19  ;;  %v5033_v18 = vld [vmem:[%s6978_s1 + $0x5a4] ss:$8 sps:$4 sm:$0xff]   ;;  %v5028_v19 = vld [vmem:[%s6978_s1 + $0x520] ss:$8 sps:$4 sm:$0xff]  }
  0x8c   : > { %1313 = vmatpush1.bf16.msra.mxu0 %v4941_v21  ;;  %v5036_v21 = vld [vmem:[%s6978_s1 + $0x514] ss:$8 sps:$4 sm:$0xff]  }
  0x8d   : > { %1354 = vmatpush1.bf16.msra.mxu1 %v4944_v22  ;;  %1314 = vmatprep.subr.bf16.mxu0 %v4949_v23  ;;  %v5039_v22 = vld [vmem:[%s6978_s1 + $0x594] ss:$8 sps:$4 sm:$0xff]   ;;  %v5034_v23 = vld [vmem:[%s6978_s1 + $0x510] ss:$8 sps:$4 sm:$0xff]  }
  0x8e   : > { %1688 = vmatprep.subr.bf16.mxu1 %v4952_v24  ;;  %v5037_v24 = vld [vmem:[%s6978_s1 + $0x590] ss:$8 sps:$4 sm:$0xff]  }
  0x90   : > { %1372 = vmatmul.mubr.bf16.vlgmr.msra.gmra.mxu1 %v1054_v25  ;;  %1315 = vmatpush2.bf16.msra.mxu0 %v4947_v26  ;;  %v5042_v25 = vld [vmem:[%s6978_s1 + $0x504] ss:$8 sps:$4 sm:$0xff]  }
  0x91   : > { %1689 = vmatpush1.bf16.msra.mxu1 %v4950_v27  ;;  %1316 = vmatprep.subr.bf16.mxu0 %v4956_v28  ;;  %v5045_v26 = vld [vmem:[%s6978_s1 + $0x584] ss:$8 sps:$4 sm:$0xff]   ;;  %v1831_v27 = vshll.u32 %v5956_v32, 16  ;;  %v5040_v28 = vld [vmem:[%s6978_s1 + $0x500] ss:$8 sps:$4 sm:$0xff]  }
  0x92   : > { %1690 = vmatprep.subr.bf16.mxu1 %v4959_v29  ;;  %1720 = vmatprep.mubr.bf16.mxu1 %v5956_v32  ;;  %v5043_v29 = vld [vmem:[%s6978_s1 + $0x580] ss:$8 sps:$4 sm:$0xff]  }
  0x94   : > { %1317 = vmatpush2.bf16.msra.mxu0 %v4954_v31  ;;  %v5051_v31 = vld [vmem:[%s6978_s1 + $0x674] ss:$8 sps:$4 sm:$0xff]  }
  0x95   : > { %1691 = vmatpush1.bf16.msra.mxu1 %v4957_v33  ;;  %1318 = vmatprep.subr.bf16.mxu0 %v4962_v34  ;;  %v5054_v33 = vld [vmem:[%s6978_s1 + $0x774] ss:$8 sps:$4 sm:$0xff]   ;;  %v1829_v34 = vshrl.u32 %v5956_v32, 16  ;;  %v5057_v32 = vld [vmem:[%s6978_s1 + $0x664] ss:$8 sps:$4 sm:$0xff]  }
  0x96   : > { %1692 = vmatprep.subr.bf16.mxu1 %v4965_v35  ;;  %v1833_v35 = vrot.slane %v1831_v27, 1  ;;  %v5120_v27 = vld [vmem:[%s6978_s1 + $0x7c4] ss:$8 sps:$4 sm:$0xff]  }
  0x98   : > { %1319 = vmatpush2.bf16.msra.mxu0 %v4960_v37  ;;  %v6143_v37 = vcombine.low %v5949_v30, %v5949_v30  ;;  %v5060_v30 = vld [vmem:[%s6978_s1 + $0x764] ss:$8 sps:$4 sm:$0xff]  }
  0x99   : > { %1693 = vmatpush1.bf16.msra.mxu1 %v4963_v38  ;;  %1320 = vmatprep.subr.bf16.mxu0 %v4968_v39  ;;  %v6146_v38 = vld [vmem:[%s5608_s20 + $0x14] ss:$0 sps:$4 sm:$0x33]   ;;  %v5049_v39 = vld [vmem:[%s6978_s1 + $0x670] ss:$8 sps:$4 sm:$0xff]  }
  0x9a   : > { %1694 = vmatprep.subr.bf16.mxu1 %v4971_v40  ;;  %v5052_v40 = vld [vmem:[%s6978_s1 + $0x770] ss:$8 sps:$4 sm:$0xff]  }
  0x9c   : > { %1321 = vmatpush2.bf16.msra.mxu0 %v4966_v41  ;;  %v1834_v41 = vor.u32 %v1833_v35, %v1829_v34  ;;  %v5126_v34 = vld [vmem:[%s6978_s1 + $0x7b4] ss:$8 sps:$4 sm:$0xff]   ;;  %v5121_v35 = vld [vmem:[%s6978_s1 + $0x6b0] ss:$8 sps:$4 sm:$0xff]  }
  0x9d   : > { %1695 = vmatpush1.bf16.msra.mxu1 %v4969_v42  ;;  %1322 = vmatprep.subr.bf16.mxu0 %v4974_v43  ;;  %v5055_v42 = vld [vmem:[%s6978_s1 + $0x660] ss:$8 sps:$4 sm:$0xff]  }
  0x9e   : > { %1696 = vmatprep.subr.bf16.mxu1 %v4977_v44  ;;  %v5058_v43 = vld [vmem:[%s6978_s1 + $0x760] ss:$8 sps:$4 sm:$0xff]   ;;  %v5063_v44 = vld [vmem:[%s6978_s1 + $0x654] ss:$8 sps:$4 sm:$0xff]  }
  0xa0   : > { %1323 = vmatpush2.bf16.msra.mxu0 %v4972_v45  ;;  %v5066_v45 = vld [vmem:[%s6978_s1 + $0x754] ss:$8 sps:$4 sm:$0xff]  }
  0xa1   : > { %1697 = vmatpush1.bf16.msra.mxu1 %v4975_v46  ;;  %1324 = vmatprep.subr.bf16.mxu0 %v4980_v47  ;;  %v5061_v46 = vld [vmem:[%s6978_s1 + $0x650] ss:$8 sps:$4 sm:$0xff]  }
  0xa2   : > { %1698 = vmatprep.subr.bf16.mxu1 %v4983_v48  ;;  %v5064_v47 = vld [vmem:[%s6978_s1 + $0x750] ss:$8 sps:$4 sm:$0xff]   ;;  %v5069_v48 = vld [vmem:[%s6978_s1 + $0x644] ss:$8 sps:$4 sm:$0xff]  }
  0xa4   : > { %1325 = vmatpush2.bf16.msra.mxu0 %v4978_v36  ;;  %v5072_v36 = vld [vmem:[%s6978_s1 + $0x744] ss:$8 sps:$4 sm:$0xff]  }
  0xa5   : > { %1699 = vmatpush1.bf16.msra.mxu1 %v4981_v49  ;;  %1326 = vmatprep.subr.bf16.mxu0 %v4986_v50  ;;  %v5067_v49 = vld [vmem:[%s6978_s1 + $0x640] ss:$8 sps:$4 sm:$0xff]  }
  0xa6   : > { %1700 = vmatprep.subr.bf16.mxu1 %v4989_v51  ;;  %v5070_v50 = vld [vmem:[%s6978_s1 + $0x740] ss:$8 sps:$4 sm:$0xff]   ;;  %v5075_v51 = vld [vmem:[%s6978_s1 + $0x634] ss:$8 sps:$4 sm:$0xff]  }
  0xa8   : > { %1327 = vmatpush2.bf16.msra.mxu0 %v4984_v52  ;;  %v5078_v52 = vld [vmem:[%s6978_s1 + $0x734] ss:$8 sps:$4 sm:$0xff]  }
  0xa9   : > { %1701 = vmatpush1.bf16.msra.mxu1 %v4987_v53  ;;  %1328 = vmatprep.subr.bf16.mxu0 %v4992_v54  ;;  %v5073_v53 = vld [vmem:[%s6978_s1 + $0x630] ss:$8 sps:$4 sm:$0xff]  }
  0xaa   : > { %1702 = vmatprep.subr.bf16.mxu1 %v4995_v55  ;;  %v5076_v54 = vld [vmem:[%s6978_s1 + $0x730] ss:$8 sps:$4 sm:$0xff]   ;;  %v5081_v55 = vld [vmem:[%s6978_s1 + $0x624] ss:$8 sps:$4 sm:$0xff]  }
  0xac   : > { %1329 = vmatpush2.bf16.msra.mxu0 %v4990_v56  ;;  %v5084_v56 = vld [vmem:[%s6978_s1 + $0x724] ss:$8 sps:$4 sm:$0xff]  }
  0xad   : > { %1703 = vmatpush1.bf16.msra.mxu1 %v4993_v58  ;;  %1729 = vmatprep.subr.bf16.mxu0 %v5003_v60  ;;  %v5082_v58 = vld [vmem:[%s6978_s1 + $0x720] ss:$8 sps:$4 sm:$0xff]   ;;  %v5090_v60 = vld [vmem:[%s6978_s1 + $0x714] ss:$8 sps:$4 sm:$0xff]  }
  0xae   : > { %1704 = vmatprep.subr.bf16.mxu1 %v5000_v59  ;;  %v5087_v59 = vld [vmem:[%s6978_s1 + $0x614] ss:$8 sps:$4 sm:$0xff]  }
  0xaf   : > { %1331 = vmatmul.mubr.bf16.vlgmr.msra.gmra.mxu0 %v1052_v61  ;;  %v1838_v61 = vshll.u32 %v6146_v38, 16 }
  0xb0   : > { %1730 = vmatpush1.bf16.msra.mxu0 %v5001_v63  ;;  %1761 = vmatprep.mubr.bf16.mxu0 %v5458_v2  ;;  %v5088_v63 = vld [vmem:[%s6978_s1 + $0x710] ss:$8 sps:$4 sm:$0xff]  }
  0xb1   : > { %1705 = vmatpush2.bf16.msra.mxu1 %v4998_v62  ;;  %1731 = vmatprep.subr.bf16.mxu0 %v5009_v1  ;;  %v5085_v62 = vld [vmem:[%s6978_s1 + $0x610] ss:$8 sps:$4 sm:$0xff]   ;;  %v5096_v1 = vld [vmem:[%s6978_s1 + $0x704] ss:$8 sps:$4 sm:$0xff]  }
  0xb2   : > { %1706 = vmatprep.subr.bf16.mxu1 %v5006_v0  ;;  %v5093_v0 = vld [vmem:[%s6978_s1 + $0x604] ss:$8 sps:$4 sm:$0xff]  }
  0xb4   : > { %1732 = vmatpush1.bf16.msra.mxu0 %v5007_v4  ;;  %v1836_v4 = vshrl.u32 %v6146_v38, 16 }
  0xb5   : > { %1707 = vmatpush2.bf16.msra.mxu1 %v5004_v3  ;;  %1733 = vmatprep.subr.bf16.mxu0 %v5015_v6  ;;  %v5091_v3 = vld [vmem:[%s6978_s1 + $0x600] ss:$8 sps:$4 sm:$0xff]   ;;  %v6241_v6 = vld [vmem:[%s5608_s20 + $0xc] sm:$0x66] }
  0xb6   : > { %1708 = vmatprep.subr.bf16.mxu1 %v5012_v5  ;;  %v1840_v5 = vrot.slane %v1838_v61, 1 }
  0xb8   : > { %1734 = vmatpush1.bf16.msra.mxu0 %v5013_v8  ;;  %v5099_v8 = vld [vmem:[%s6978_s1 + $0x6f4] ss:$8 sps:$4 sm:$0xff]  }
  0xb9   : > { %1709 = vmatpush2.bf16.msra.mxu1 %v5010_v7  ;;  %1735 = vmatprep.subr.bf16.mxu0 %v5021_v10  ;;  %v5094_v7 = vld [vmem:[%s6978_s1 + $0x700] ss:$8 sps:$4 sm:$0xff]   ;;  %v4356_v10 = vcombine.high %v6241_v6, %v6241_v6 }
  0xba   : > { %1710 = vmatprep.subr.bf16.mxu1 %v5018_v9  ;;  %v5102_v9 = vld [vmem:[%s6978_s1 + $0x7f4] ss:$8 sps:$4 sm:$0xff]  }
  0xbc   : > { %1736 = vmatpush1.bf16.msra.mxu0 %v5019_v12  ;;  %v5100_v12 = vld [vmem:[%s6978_s1 + $0x7f0] ss:$8 sps:$4 sm:$0xff]  }
  0xbd   : > { %1711 = vmatpush2.bf16.msra.mxu1 %v5016_v11  ;;  %1737 = vmatprep.subr.bf16.mxu0 %v5027_v14  ;;  %v5097_v11 = vld [vmem:[%s6978_s1 + $0x6f0] ss:$8 sps:$4 sm:$0xff]   ;;  %v5105_v14 = vld [vmem:[%s6978_s1 + $0x6e4] ss:$8 sps:$4 sm:$0xff]  }
  0xbe   : > { %1712 = vmatprep.subr.bf16.mxu1 %v5024_v13  ;;  %v1841_v13 = vor.u32 %v1840_v5, %v1836_v4  ;;  %v5160_v4 = vld [vmem:[%s6978_s1 + $0x8d0] ss:$8 sps:$4 sm:$0xff]  }
  0xc0   : > { %1738 = vmatpush1.bf16.msra.mxu0 %v5025_v16  ;;  %v2229_v16 = vrot.slane %v4356_v10, 1  ;;  %v5166_v10 = vld [vmem:[%s6978_s1 + $0x8c0] ss:$8 sps:$4 sm:$0xff]  }
  0xc1   : > { %1713 = vmatpush2.bf16.msra.mxu1 %v5022_v15  ;;  %1739 = vmatprep.subr.bf16.mxu0 %v5033_v18  ;;  %v5108_v15 = vld [vmem:[%s6978_s1 + $0x7e4] ss:$8 sps:$4 sm:$0xff]   ;;  %v5106_v18 = vld [vmem:[%s6978_s1 + $0x7e0] ss:$8 sps:$4 sm:$0xff]  }
  0xc2   : > { %1714 = vmatprep.subr.bf16.mxu1 %v5030_v17  ;;  %v5103_v17 = vld [vmem:[%s6978_s1 + $0x6e0] ss:$8 sps:$4 sm:$0xff]  }
  0xc4   : > { %1740 = vmatpush1.bf16.msra.mxu0 %v5031_v20  ;;  %v5111_v20 = vld [vmem:[%s6978_s1 + $0x6d4] ss:$8 sps:$4 sm:$0xff]  }
  0xc5   : > { %1715 = vmatpush2.bf16.msra.mxu1 %v5028_v19  ;;  %1741 = vmatprep.subr.bf16.mxu0 %v5039_v22 }
  0xc6   : > { %1716 = vmatprep.subr.bf16.mxu1 %v5036_v21  ;;  %v5114_v21 = vld [vmem:[%s6978_s1 + $0x7d4] ss:$8 sps:$4 sm:$0xff]  }
  0xc8   : > { %1742 = vmatpush1.bf16.msra.mxu0 %v5037_v24  ;;  %v5112_v24 = vld [vmem:[%s6978_s1 + $0x7d0] ss:$8 sps:$4 sm:$0xff]  }
  0xc9   : > { %1717 = vmatpush2.bf16.msra.mxu1 %v5034_v23  ;;  %1743 = vmatprep.subr.bf16.mxu0 %v5045_v26  ;;  %v5109_v23 = vld [vmem:[%s6978_s1 + $0x6d0] ss:$8 sps:$4 sm:$0xff]   ;;  %v5117_v26 = vld [vmem:[%s6978_s1 + $0x6c4] ss:$8 sps:$4 sm:$0xff]  }
  0xca   : > { %1718 = vmatprep.subr.bf16.mxu1 %v5042_v25 }
  0xcc   : > { %1744 = vmatpush1.bf16.msra.mxu0 %v5043_v29  ;;  %v5115_v29 = vld [vmem:[%s6978_s1 + $0x6c0] ss:$8 sps:$4 sm:$0xff]  }
  0xcd   : > { %1719 = vmatpush2.bf16.msra.mxu1 %v5040_v28  ;;  %2085 = vmatprep.subr.bf16.mxu0 %v5051_v31  ;;  %v5118_v31 = vld [vmem:[%s6978_s1 + $0x7c0] ss:$8 sps:$4 sm:$0xff]  }
  0xce   : > { %2126 = vmatprep.subr.bf16.mxu1 %v5054_v33  ;;  %v5123_v33 = vld [vmem:[%s6978_s1 + $0x6b4] ss:$8 sps:$4 sm:$0xff]  }
  0xcf   : > { %1762 = vmatmul.mubr.bf16.vlgmr.msra.gmra.mxu0 %v6146_v38  ;;  %v5124_v38 = vld [vmem:[%s6978_s1 + $0x7b0] ss:$8 sps:$4 sm:$0xff]  }
  0xd0   : > { %1721 = vmatmul.mubr.bf16.vlgmr.msra.gmra.mxu1 %v6143_v37  ;;  %2086 = vmatpush1.bf16.msra.mxu0 %v5049_v39  ;;  %v5129_v39 = vld [vmem:[%s6978_s1 + $0x6a4] ss:$8 sps:$4 sm:$0xff]  }
  0xd1   : > { %2127 = vmatpush1.bf16.msra.mxu1 %v5052_v40  ;;  %2087 = vmatprep.subr.bf16.mxu0 %v5057_v32  ;;  %v5132_v40 = vld [vmem:[%s6978_s1 + $0x7a4] ss:$8 sps:$4 sm:$0xff]   ;;  %v5127_v32 = vld [vmem:[%s6978_s1 + $0x6a0] ss:$8 sps:$4 sm:$0xff]  }
  0xd2   : > { %2128 = vmatprep.subr.bf16.mxu1 %v5060_v30  ;;  %2158 = vmatprep.mubr.bf16.mxu1 %v5458_v2  ;;  %v5130_v30 = vld [vmem:[%s6978_s1 + $0x7a0] ss:$8 sps:$4 sm:$0xff]  }
  0xd3   : > { %2117 = vmatprep.mubr.bf16.mxu0 %v1834_v41  ;;  %v5135_v41 = vld [vmem:[%s6978_s1 + $0x694] ss:$8 sps:$4 sm:$0xff]  }
  0xd4   : > { %2088 = vmatpush1.bf16.msra.mxu0 %v5055_v42  ;;  %v5138_v42 = vld [vmem:[%s6978_s1 + $0x794] ss:$8 sps:$4 sm:$0xff]  }
  0xd5   : > { %2129 = vmatpush1.bf16.msra.mxu1 %v5058_v43  ;;  %2089 = vmatprep.subr.bf16.mxu0 %v5063_v44  ;;  %v5133_v43 = vld [vmem:[%s6978_s1 + $0x690] ss:$8 sps:$4 sm:$0xff]   ;;  %v1824_v44 = vshll.u32 %v6143_v37, 16 }
  0xd6   : > { %2130 = vmatprep.subr.bf16.mxu1 %v5066_v45  ;;  %v5136_v45 = vld [vmem:[%s6978_s1 + $0x790] ss:$8 sps:$4 sm:$0xff]  }
  0xd8   : > { %2090 = vmatpush1.bf16.msra.mxu0 %v5061_v46  ;;  %v5141_v46 = vld [vmem:[%s6978_s1 + $0x684] ss:$8 sps:$4 sm:$0xff]  }
  0xd9   : > { %2131 = vmatpush1.bf16.msra.mxu1 %v5064_v47  ;;  %2091 = vmatprep.subr.bf16.mxu0 %v5069_v48  ;;  %v5144_v47 = vld [vmem:[%s6978_s1 + $0x784] ss:$8 sps:$4 sm:$0xff]   ;;  %v5139_v48 = vld [vmem:[%s6978_s1 + $0x680] ss:$8 sps:$4 sm:$0xff]  }
  0xda   : > { %2132 = vmatprep.subr.bf16.mxu1 %v5072_v36  ;;  %v1822_v36 = vshrl.u32 %v6143_v37, 16  ;;  %v5145_v37 = vld [vmem:[%s6978_s1 + $0x870] ss:$8 sps:$4 sm:$0xff]  }
  0xdc   : > { %2092 = vmatpush1.bf16.msra.mxu0 %v5067_v49  ;;  %v1826_v49 = vrot.slane %v1824_v44, 1  ;;  %v5207_v44 = vld [vmem:[%s6978_s1 + $0xa64] ss:$8 sps:$4 sm:$0xff]  }
  0xdd   : > { %2133 = vmatpush1.bf16.msra.mxu1 %v5070_v50  ;;  %2093 = vmatprep.subr.bf16.mxu0 %v5075_v51  ;;  %v5142_v50 = vld [vmem:[%s6978_s1 + $0x780] ss:$8 sps:$4 sm:$0xff]   ;;  %v5147_v51 = vld [vmem:[%s6978_s1 + $0x874] ss:$8 sps:$4 sm:$0xff]  }
  0xde   : > { %2134 = vmatprep.subr.bf16.mxu1 %v5078_v52  ;;  %v5150_v52 = vld [vmem:[%s6978_s1 + $0x8f4] ss:$8 sps:$4 sm:$0xff]  }
  0xe0   : > { %2094 = vmatpush1.bf16.msra.mxu0 %v5073_v53  ;;  %v1827_v53 = vor.u32 %v1826_v49, %v1822_v36 }
  0xe1   : > { %2135 = vmatpush1.bf16.msra.mxu1 %v5076_v54  ;;  %2095 = vmatprep.subr.bf16.mxu0 %v5081_v55  ;;  %v5148_v54 = vld [vmem:[%s6978_s1 + $0x8f0] ss:$8 sps:$4 sm:$0xff]   ;;  %v5153_v55 = vld [vmem:[%s6978_s1 + $0x864] ss:$8 sps:$4 sm:$0xff]  }
  0xe2   : > { %2136 = vmatprep.subr.bf16.mxu1 %v5084_v56  ;;  %v5156_v56 = vld [vmem:[%s6978_s1 + $0x8e4] ss:$8 sps:$4 sm:$0xff]  }
  0xe4   : > { %2096 = vmatpush1.bf16.msra.mxu0 %v5079_v57 }
  0xe5   : > { %2137 = vmatpush1.bf16.msra.mxu1 %v5082_v58  ;;  %2097 = vmatprep.subr.bf16.mxu0 %v5087_v59  ;;  %v5151_v58 = vld [vmem:[%s6978_s1 + $0x860] ss:$8 sps:$4 sm:$0xff]  }
  0xe6   : > { %2138 = vmatprep.subr.bf16.mxu1 %v5090_v60  ;;  %v5154_v60 = vld [vmem:[%s6978_s1 + $0x8e0] ss:$8 sps:$4 sm:$0xff]  }
  0xe8   : > { %2098 = vmatpush1.bf16.msra.mxu0 %v5085_v62  ;;  %v5159_v62 = vld [vmem:[%s6978_s1 + $0x854] ss:$8 sps:$4 sm:$0xff]  }
  0xe9   : > { %2139 = vmatpush1.bf16.msra.mxu1 %v5088_v63  ;;  %2099 = vmatprep.subr.bf16.mxu0 %v5093_v0  ;;  %v5162_v63 = vld [vmem:[%s6978_s1 + $0x8d4] ss:$8 sps:$4 sm:$0xff]  }
  0xea   : > { %2140 = vmatprep.subr.bf16.mxu1 %v5096_v1 }
  0xec   : > { %2100 = vmatpush1.bf16.msra.mxu0 %v5091_v3  ;;  %v5157_v3 = vld [vmem:[%s6978_s1 + $0x850] ss:$8 sps:$4 sm:$0xff]  }
  0xed   : > { %2141 = vmatpush1.bf16.msra.mxu1 %v5094_v7  ;;  %2101 = vmatprep.subr.bf16.mxu0 %v5099_v8  ;;  %v5165_v7 = vld [vmem:[%s6978_s1 + $0x844] ss:$8 sps:$4 sm:$0xff]  }
  0xee   : > { %2474 = vmatprep.subr.bf16.mxu1 %v5102_v9  ;;  %v5168_v8 = vld [vmem:[%s6978_s1 + $0x8c4] ss:$8 sps:$4 sm:$0xff]   ;;  %v5163_v9 = vld [vmem:[%s6978_s1 + $0x840] ss:$8 sps:$4 sm:$0xff]  }
  0xf0   : > { %2159 = vmatmul.mubr.bf16.vlgmr.msra.gmra.mxu1 %v1841_v13  ;;  %v6272_v19 = vpop.f32.mrf.mxu1  ;;  %2102 = vmatpush2.bf16.msra.mxu0 %v5097_v11  ;;  %v5171_v11 = vld [vmem:[%s6978_s1 + $0x834] ss:$8 sps:$4 sm:$0xff]   ;;  %v5169_v13 = vld [vmem:[%s6978_s1 + $0x830] ss:$8 sps:$4 sm:$0xff]  }
  0xf1   : > { %2475 = vmatpush1.bf16.msra.mxu1 %v5100_v12  ;;  %2103 = vmatprep.subr.bf16.mxu0 %v5105_v14  ;;  %v5174_v12 = vld [vmem:[%s6978_s1 + $0x8b4] ss:$8 sps:$4 sm:$0xff]   ;;  %v5172_v14 = vld [vmem:[%s6978_s1 + $0x8b0] ss:$8 sps:$4 sm:$0xff]  }
  0xf2   : > { %2476 = vmatprep.subr.bf16.mxu1 %v5108_v15  ;;  %v6280_v22 = vpop.f32.mrf.mxu1  ;;  %2506 = vmatprep.mubr.bf16.mxu1 %v2229_v16  ;;  %v5177_v15 = vld [vmem:[%s6978_s1 + $0x824] ss:$8 sps:$4 sm:$0xff]  }
  0xf3   : > { %v5180_v16 = vld [vmem:[%s6978_s1 + $0x8a4] ss:$8 sps:$4 sm:$0xff]  }
  0xf4   : > { %v591_v25 = vpop.f32.mrf.mxu1  ;;  %2104 = vmatpush2.bf16.msra.mxu0 %v5103_v17  ;;  %v5175_v17 = vld [vmem:[%s6978_s1 + $0x820] ss:$8 sps:$4 sm:$0xff]  }
  0xf5   : > { %2477 = vmatpush1.bf16.msra.mxu1 %v5106_v18  ;;  %2105 = vmatprep.subr.bf16.mxu0 %v5111_v20  ;;  %v5178_v18 = vld [vmem:[%s6978_s1 + $0x8a0] ss:$8 sps:$4 sm:$0xff]   ;;  %v5183_v20 = vld [vmem:[%s6978_s1 + $0x814] ss:$8 sps:$4 sm:$0xff]   ;;  %v5189_v25 = vld [vmem:[%s6978_s1 + $0x804] ss:$8 sps:$4 sm:$0xff]  }
  0xf6   : > { %2478 = vmatprep.subr.bf16.mxu1 %v5114_v21  ;;  %v592_v28 = vpop.f32.mrf.mxu1  ;;  %v5186_v21 = vld [vmem:[%s6978_s1 + $0x894] ss:$8 sps:$4 sm:$0xff]  }
  0xf7   : > { %v5195_v28 = vld [vmem:[%s5608_s20 + $0x14] ss:$0 sps:$4 sm:$0x66]  }
  0xf8   : > { %2106 = vmatpush2.bf16.msra.mxu0 %v5109_v23  ;;  %v5184_v23 = vld [vmem:[%s6978_s1 + $0x890] ss:$8 sps:$4 sm:$0xff]  }
  0xf9   : > { %2479 = vmatpush1.bf16.msra.mxu1 %v5112_v24  ;;  %2107 = vmatprep.subr.bf16.mxu0 %v5117_v26  ;;  %v5192_v26 = vld [vmem:[%s6978_s1 + $0x884] ss:$8 sps:$4 sm:$0xff]  }
  0xfa   : > { %2480 = vmatprep.subr.bf16.mxu1 %v5120_v27  ;;  %v4355_v27 = vcombine.low %v6241_v6, %v6241_v6  ;;  %v5198_v6 = vld [vmem:[%s6978_s1 + $0x974] ss:$8 sps:$4 sm:$0xff]  }
  0xfc   : > { %2108 = vmatpush2.bf16.msra.mxu0 %v5115_v29 }
  0xfd   : > { %2481 = vmatpush1.bf16.msra.mxu1 %v5118_v31  ;;  %2109 = vmatprep.subr.bf16.mxu0 %v5123_v33  ;;  %v5187_v31 = vld [vmem:[%s6978_s1 + $0x800] ss:$8 sps:$4 sm:$0xff]  }
  0xfe   : > { %2482 = vmatprep.subr.bf16.mxu1 %v5126_v34  ;;  %v5190_v33 = vld [vmem:[%s6978_s1 + $0x880] ss:$8 sps:$4 sm:$0xff]  }
  0xff   : > { %v194_v34 = vld [vmem:[%s6979_s2] sm:$0x3] }
 0x100   : > { %2110 = vmatpush2.bf16.msra.mxu0 %v5121_v35  ;;  %v5201_v35 = vld [vmem:[%s6978_s1 + $0xa74] ss:$8 sps:$4 sm:$0xff]  }
 0x101   : > { %2483 = vmatpush1.bf16.msra.mxu1 %v5124_v38  ;;  %2111 = vmatprep.subr.bf16.mxu0 %v5129_v39  ;;  %v2228_v39 = vrot.slane %v4355_v27, 1 }
 0x102   : > { %2484 = vmatprep.subr.bf16.mxu1 %v5132_v40  ;;  %v2230_v40 = vrot.slane %v5195_v28, 1 }
 0x104   : > { %2112 = vmatpush2.bf16.msra.mxu0 %v5127_v32  ;;  %v6470_v32 = vld [vmem:[%s5608_s20 + $0x18] sm:$0x33] }
 0x105   : > { %2485 = vmatpush1.bf16.msra.mxu1 %v5130_v30  ;;  %2113 = vmatprep.subr.bf16.mxu0 %v5135_v41  ;;  %v5196_v41 = vld [vmem:[%s6978_s1 + $0x970] ss:$8 sps:$4 sm:$0xff]  }
 0x106   : > { %2486 = vmatprep.subr.bf16.mxu1 %v5138_v42  ;;  %v5199_v42 = vld [vmem:[%s6978_s1 + $0xa70] ss:$8 sps:$4 sm:$0xff]  }
 0x108   : > { %2114 = vmatpush2.bf16.msra.mxu0 %v5133_v43  ;;  %v5204_v43 = vld [vmem:[%s6978_s1 + $0x964] ss:$8 sps:$4 sm:$0xff]  }
 0x109   : > { %2487 = vmatpush1.bf16.msra.mxu1 %v5136_v45  ;;  %2115 = vmatprep.subr.bf16.mxu0 %v5141_v46  ;;  %v6486_v46 = vcombine.high %v6470_v32, %v6470_v32 }
 0x10a   : > { %2488 = vmatprep.subr.bf16.mxu1 %v5144_v47 }
 0x10b   : > { %v3005_v27 = vshrl.u32 %v6486_v46, 16 }
 0x10c   : > { %2116 = vmatpush2.bf16.msra.mxu0 %v5139_v48 }
 0x10d   : > { %2489 = vmatpush1.bf16.msra.mxu1 %v5142_v50  ;;  %2515 = vmatprep.subr.bf16.mxu0 %v5150_v52  ;;  %v5202_v50 = vld [vmem:[%s6978_s1 + $0x960] ss:$8 sps:$4 sm:$0xff]  }
 0x10e   : > { %2490 = vmatprep.subr.bf16.mxu1 %v5147_v51  ;;  %v5205_v51 = vld [vmem:[%s6978_s1 + $0xa60] ss:$8 sps:$4 sm:$0xff]  }
 0x10f   : > { %v546_v57 = vpop.f32.mrf.mxu0  ;;  %2118 = vmatmul.mubr.bf16.vlgmr.msra.gmra.mxu0 %v1827_v53 }
 0x110   : > { %v6372_v59 = vadd.f32 %v6272_v19, %v546_v57  ;;  %2516 = vmatpush1.bf16.msra.mxu0 %v5148_v54  ;;  %2547 = vmatprep.mubr.bf16.mxu0 %v5458_v2  ;;  %v196_v19 = vlaneseq  ;;  %v5213_v54 = vld [vmem:[%s6978_s1 + $0xa54] ss:$8 sps:$4 sm:$0xff]  }
 0x111   : > { %2491 = vmatpush2.bf16.msra.mxu1 %v5145_v37  ;;  %v548_v61 = vpop.f32.mrf.mxu0  ;;  %2517 = vmatprep.subr.bf16.mxu0 %v5156_v56  ;;  %v5210_v37 = vld [vmem:[%s6978_s1 + $0x954] ss:$8 sps:$4 sm:$0xff]  }
 0x112   : > { %2492 = vmatprep.subr.bf16.mxu1 %v5153_v55  ;;  %v6384_v0 = vadd.f32 %v6280_v22, %v548_v61  ;;  %v5181_v22 = vld [vmem:[%s6978_s1 + $0x810] ss:$8 sps:$4 sm:$0xff]   ;;  %v6441_v24 = vshrl.u32 %v196_v19, 7  ;;  %v5240_v19 = vld [vmem:[%s6978_s1 + $0x904] ss:$8 sps:$4 sm:$0xff]  }
 0x113   : > { %v550_v1 = vpop.f32.mrf.mxu0  ;;  %v5208_v61 = vld [vmem:[%s6978_s1 + $0x950] ss:$8 sps:$4 sm:$0xff]  }
 0x114   : > { %2518 = vmatpush1.bf16.msra.mxu0 %v5154_v60  ;;  %v198_v29 = vsub.s32 0, %v6441_v24  ;;  %v202_v38 = vsub.s32 1, %v6441_v24  ;;  %v5219_v1 = vld [vmem:[%s6978_s1 + $0xa44] ss:$8 sps:$4 sm:$0xff]  }
 0x115   : > { %2493 = vmatpush2.bf16.msra.mxu1 %v5151_v58  ;;  %v551_v5 = vpop.f32.mrf.mxu0  ;;  %2519 = vmatprep.subr.bf16.mxu0 %v5162_v63 }
 0x116   : > { %2494 = vmatprep.subr.bf16.mxu1 %v5159_v62  ;;  %v199_v30 = vrot.slane %v194_v34, %v198_v29  ;;  %v203_v45 = vrot.slane %v194_v34, %v202_v38  ;;  %v5211_v62 = vld [vmem:[%s6978_s1 + $0xa50] ss:$8 sps:$4 sm:$0xff]   ;;  %v5217_v5 = vld [vmem:[%s6978_s1 + $0xa40] ss:$8 sps:$4 sm:$0xff]   ;;  %v5253_v34 = vld [vmem:[%s6978_s1 + $0x9e4] ss:$8 sps:$4 sm:$0xff]  }
 0x117   : > { %v6583_v29 = vld [vmem:[%s5608_s20 + $0x20] ss:$0 sps:$4 sm:$0x33]  }
 0x118   : > { %2520 = vmatpush1.bf16.msra.mxu0 %v5160_v4  ;;  %v594_v36 = vadd.f32 %v6372_v59, %v199_v30  ;;  %v595_v55 = vadd.f32 %v6384_v0, %v203_v45  ;;  %v5216_v0 = vld [vmem:[%s6978_s1 + $0x944] ss:$8 sps:$4 sm:$0xff]   ;;  %v5214_v4 = vld [vmem:[%s6978_s1 + $0x940] ss:$8 sps:$4 sm:$0xff]   ;;  %v5259_v30 = vld [vmem:[%s6978_s1 + $0x9d4] ss:$8 sps:$4 sm:$0xff]  }
 0x119   : > { %2495 = vmatpush2.bf16.msra.mxu1 %v5157_v3  ;;  %2521 = vmatprep.subr.bf16.mxu0 %v5168_v8  ;;  %v5225_v8 = vld [vmem:[%s6978_s1 + $0xa34] ss:$8 sps:$4 sm:$0xff]   ;;  %v5260_v45 = vld [vmem:[%s6978_s1 + $0xad0] ss:$8 sps:$4 sm:$0xff]  }
 0x11a   : > { %2496 = vmatprep.subr.bf16.mxu1 %v5165_v7  ;;  %v5222_v7 = vld [vmem:[%s6978_s1 + $0x934] ss:$8 sps:$4 sm:$0xff]  }
 0x11c   : > { %2522 = vmatpush1.bf16.msra.mxu0 %v5166_v10  ;;  %v5223_v10 = vld [vmem:[%s6978_s1 + $0xa30] ss:$8 sps:$4 sm:$0xff]  }
 0x11d   : > { %2497 = vmatpush2.bf16.msra.mxu1 %v5163_v9  ;;  %2523 = vmatprep.subr.bf16.mxu0 %v5174_v12  ;;  %v5220_v9 = vld [vmem:[%s6978_s1 + $0x930] ss:$8 sps:$4 sm:$0xff]   ;;  %v5231_v12 = vld [vmem:[%s6978_s1 + $0xa24] ss:$8 sps:$4 sm:$0xff]  }
 0x11e   : > { %2498 = vmatprep.subr.bf16.mxu1 %v5171_v11  ;;  %v5228_v11 = vld [vmem:[%s6978_s1 + $0x924] ss:$8 sps:$4 sm:$0xff]  }
 0x120   : > { %2524 = vmatpush1.bf16.msra.mxu0 %v5172_v14  ;;  %v5229_v14 = vld [vmem:[%s6978_s1 + $0xa20] ss:$8 sps:$4 sm:$0xff]  }
 0x121   : > { %2499 = vmatpush2.bf16.msra.mxu1 %v5169_v13  ;;  %2525 = vmatprep.subr.bf16.mxu0 %v5180_v16  ;;  %v5226_v13 = vld [vmem:[%s6978_s1 + $0x920] ss:$8 sps:$4 sm:$0xff]   ;;  %v5237_v16 = vld [vmem:[%s6978_s1 + $0xa14] ss:$8 sps:$4 sm:$0xff]  }
 0x122   : > { %2500 = vmatprep.subr.bf16.mxu1 %v5177_v15  ;;  %v5234_v15 = vld [vmem:[%s6978_s1 + $0x914] ss:$8 sps:$4 sm:$0xff]  }
 0x124   : > { %2526 = vmatpush1.bf16.msra.mxu0 %v5178_v18  ;;  %v5235_v18 = vld [vmem:[%s6978_s1 + $0xa10] ss:$8 sps:$4 sm:$0xff]  }
 0x125   : > { %2501 = vmatpush2.bf16.msra.mxu1 %v5175_v17  ;;  %2527 = vmatprep.subr.bf16.mxu0 %v5186_v21  ;;  %v5232_v17 = vld [vmem:[%s6978_s1 + $0x910] ss:$8 sps:$4 sm:$0xff]   ;;  %v3007_v21 = vshll.u32 %v6486_v46, 16 }
 0x126   : > { %2502 = vmatprep.subr.bf16.mxu1 %v5183_v20  ;;  %v5243_v20 = vld [vmem:[%s6978_s1 + $0xa04] ss:$8 sps:$4 sm:$0xff]  }
 0x127   : > { %v3009_v28 = vrot.slane %v3007_v21, 1 }
 0x128   : > { %2528 = vmatpush1.bf16.msra.mxu0 %v5184_v23  ;;  %v5241_v23 = vld [vmem:[%s6978_s1 + $0xa00] ss:$8 sps:$4 sm:$0xff]  }
 0x129   : > { %2503 = vmatpush2.bf16.msra.mxu1 %v5181_v22  ;;  %2529 = vmatprep.subr.bf16.mxu0 %v5192_v26  ;;  %v5238_v22 = vld [vmem:[%s6978_s1 + $0x900] ss:$8 sps:$4 sm:$0xff]   ;;  %v5249_v26 = vld [vmem:[%s6978_s1 + $0xaf4] ss:$8 sps:$4 sm:$0xff]  }
 0x12a   : > { %2504 = vmatprep.subr.bf16.mxu1 %v5189_v25  ;;  %v5246_v25 = vld [vmem:[%s6978_s1 + $0x9f4] ss:$8 sps:$4 sm:$0xff]  }
 0x12c   : > { %2530 = vmatpush1.bf16.msra.mxu0 %v5190_v33  ;;  %v5247_v33 = vld [vmem:[%s6978_s1 + $0xaf0] ss:$8 sps:$4 sm:$0xff]  }
 0x12d   : > { %2505 = vmatpush2.bf16.msra.mxu1 %v5187_v31  ;;  %2864 = vmatprep.subr.bf16.mxu0 %v5198_v6  ;;  %v5244_v31 = vld [vmem:[%s6978_s1 + $0x9f0] ss:$8 sps:$4 sm:$0xff]   ;;  %v5256_v6 = vld [vmem:[%s6978_s1 + $0xae4] ss:$8 sps:$4 sm:$0xff]  }
 0x12e   : > { %2905 = vmatprep.subr.bf16.mxu1 %v5201_v35  ;;  %v3010_v35 = vor.u32 %v3009_v28, %v3005_v27  ;;  %v5316_v27 = vld [vmem:[%s6978_s1 + $0xbc0] ss:$8 sps:$4 sm:$0xff]   ;;  %v5321_v28 = vld [vmem:[%s6978_s1 + $0xb34] ss:$8 sps:$4 sm:$0xff]  }
 0x12f   : > { %v984_v48 = vpop.f32.mrf.mxu0  ;;  %2548 = vmatmul.mubr.bf16.vlgmr.msra.gmra.mxu0 %v2230_v40  ;;  %v5254_v40 = vld [vmem:[%s6978_s1 + $0xae0] ss:$8 sps:$4 sm:$0xff]  }
 0x130   : > { %v943_v47 = vpop.f32.mrf.mxu1  ;;  %2507 = vmatmul.mubr.bf16.vlgmr.msra.gmra.mxu1 %v2228_v39  ;;  %2865 = vmatpush1.bf16.msra.mxu0 %v5196_v41  ;;  %v5251_v39 = vld [vmem:[%s6978_s1 + $0x9e0] ss:$8 sps:$4 sm:$0xff]   ;;  %v5262_v41 = vld [vmem:[%s6978_s1 + $0xad4] ss:$8 sps:$4 sm:$0xff]  }
 0x131   : > { %v985_v49 = vadd.f32 %v984_v48, %v943_v47  ;;  %2906 = vmatpush1.bf16.msra.mxu1 %v5199_v42  ;;  %v986_v53 = vpop.f32.mrf.mxu0  ;;  %2866 = vmatprep.subr.bf16.mxu0 %v5204_v43  ;;  %v5268_v47 = vld [vmem:[%s6978_s1 + $0xac4] ss:$8 sps:$4 sm:$0xff]  }
 0x132   : > { %v945_v52 = vpop.f32.mrf.mxu1  ;;  %2907 = vmatprep.subr.bf16.mxu1 %v5207_v44  ;;  %2937 = vmatprep.mubr.bf16.mxu1 %v5458_v2  ;;  %v5257_v44 = vld [vmem:[%s6978_s1 + $0x9d0] ss:$8 sps:$4 sm:$0xff]  }
 0x133   : > { %v6502_v56 = vadd.f32 %v985_v49, %v594_v36  ;;  %v987_v57 = vadd.f32 %v986_v53, %v945_v52  ;;  %2896 = vmatprep.mubr.bf16.mxu0 %v6486_v46  ;;  %v988_v58 = vpop.f32.mrf.mxu0  ;;  %v5265_v46 = vld [vmem:[%s6978_s1 + $0x9c4] ss:$8 sps:$4 sm:$0xff]   ;;  %v5263_v36 = vld [vmem:[%s6978_s1 + $0x9c0] ss:$8 sps:$4 sm:$0xff]   ;;  %v5269_v52 = vld [vmem:[%s6978_s1 + $0x9b0] ss:$8 sps:$4 sm:$0xff]  }
 0x134   : > { %v947_v59 = vpop.f32.mrf.mxu1  ;;  %2867 = vmatpush1.bf16.msra.mxu0 %v5202_v50  ;;  %v5266_v49 = vld [vmem:[%s6978_s1 + $0xac0] ss:$8 sps:$4 sm:$0xff]   ;;  %v5271_v50 = vld [vmem:[%s6978_s1 + $0x9b4] ss:$8 sps:$4 sm:$0xff]   ;;  %v5272_v53 = vld [vmem:[%s6978_s1 + $0xab0] ss:$8 sps:$4 sm:$0xff]  }
 0x135   : > { %v6506_v60 = vadd.f32 %v987_v57, %v595_v55  ;;  %2908 = vmatpush1.bf16.msra.mxu1 %v5205_v51  ;;  %v989_v63 = vpop.f32.mrf.mxu0  ;;  %2868 = vmatprep.subr.bf16.mxu0 %v5210_v37  ;;  %v5274_v51 = vld [vmem:[%s6978_s1 + $0xab4] ss:$8 sps:$4 sm:$0xff]   ;;  %v5277_v37 = vld [vmem:[%s6978_s1 + $0x9a4] ss:$8 sps:$4 sm:$0xff]   ;;  %v5275_v55 = vld [vmem:[%s6978_s1 + $0x9a0] ss:$8 sps:$4 sm:$0xff]  }
 0x136   : > { %2909 = vmatprep.subr.bf16.mxu1 %v5213_v54  ;;  %v948_v3 = vpop.f32.mrf.mxu1  ;;  %v5280_v54 = vld [vmem:[%s6978_s1 + $0xaa4] ss:$8 sps:$4 sm:$0xff]   ;;  %v5278_v57 = vld [vmem:[%s6978_s1 + $0xaa0] ss:$8 sps:$4 sm:$0xff]   ;;  %v5283_v58 = vld [vmem:[%s6978_s1 + $0x994] ss:$8 sps:$4 sm:$0xff]  }
 0x137   : > { %v5286_v59 = vld [vmem:[%s6978_s1 + $0xa94] ss:$8 sps:$4 sm:$0xff]   ;;  %v5289_v63 = vld [vmem:[%s6978_s1 + $0x984] ss:$8 sps:$4 sm:$0xff]   ;;  %v5290_v3 = vld [vmem:[%s6978_s1 + $0xa80] ss:$8 sps:$4 sm:$0xff]  }
 0x138   : > { %2869 = vmatpush1.bf16.msra.mxu0 %v5208_v61  ;;  %v5281_v61 = vld [vmem:[%s6978_s1 + $0x990] ss:$8 sps:$4 sm:$0xff]  }
 0x139   : > { %2910 = vmatpush1.bf16.msra.mxu1 %v5211_v62  ;;  %2870 = vmatprep.subr.bf16.mxu0 %v5216_v0  ;;  %v5284_v62 = vld [vmem:[%s6978_s1 + $0xa90] ss:$8 sps:$4 sm:$0xff]   ;;  %v5292_v0 = vld [vmem:[%s6978_s1 + $0xa84] ss:$8 sps:$4 sm:$0xff]  }
 0x13a   : > { %2911 = vmatprep.subr.bf16.mxu1 %v5219_v1  ;;  %v5287_v1 = vld [vmem:[%s6978_s1 + $0x980] ss:$8 sps:$4 sm:$0xff]  }
 0x13c   : > { %2871 = vmatpush1.bf16.msra.mxu0 %v5214_v4  ;;  %v5297_v4 = vld [vmem:[%s6978_s1 + $0xb74] ss:$8 sps:$4 sm:$0xff]  }
 0x13d   : > { %2912 = vmatpush1.bf16.msra.mxu1 %v5217_v5  ;;  %2872 = vmatprep.subr.bf16.mxu0 %v5222_v7  ;;  %v5300_v5 = vld [vmem:[%s6978_s1 + $0xbf4] ss:$8 sps:$4 sm:$0xff]   ;;  %v6688_v7 = vcombine.low %v6470_v32, %v6470_v32  ;;  %v5306_v32 = vld [vmem:[%s6978_s1 + $0xbe4] ss:$8 sps:$4 sm:$0xff]  }
 0x13e   : > { %2913 = vmatprep.subr.bf16.mxu1 %v5225_v8  ;;  %v5295_v8 = vld [vmem:[%s6978_s1 + $0xb70] ss:$8 sps:$4 sm:$0xff]  }
 0x140   : > { %2873 = vmatpush1.bf16.msra.mxu0 %v5220_v9  ;;  %v5298_v9 = vld [vmem:[%s6978_s1 + $0xbf0] ss:$8 sps:$4 sm:$0xff]  }
 0x141   : > { %2914 = vmatpush1.bf16.msra.mxu1 %v5223_v10  ;;  %2874 = vmatprep.subr.bf16.mxu0 %v5228_v11  ;;  %v5303_v10 = vld [vmem:[%s6978_s1 + $0xb64] ss:$8 sps:$4 sm:$0xff]  }
 0x142   : > { %2915 = vmatprep.subr.bf16.mxu1 %v5231_v12 }
 0x144   : > { %2875 = vmatpush1.bf16.msra.mxu0 %v5226_v13  ;;  %v5301_v13 = vld [vmem:[%s6978_s1 + $0xb60] ss:$8 sps:$4 sm:$0xff]  }
 0x145   : > { %2916 = vmatpush1.bf16.msra.mxu1 %v5229_v14  ;;  %2876 = vmatprep.subr.bf16.mxu0 %v5234_v15  ;;  %v5304_v14 = vld [vmem:[%s6978_s1 + $0xbe0] ss:$8 sps:$4 sm:$0xff]  }
 0x146   : > { %2917 = vmatprep.subr.bf16.mxu1 %v5237_v16  ;;  %v5309_v16 = vld [vmem:[%s6978_s1 + $0xb54] ss:$8 sps:$4 sm:$0xff]  }
 0x148   : > { %2877 = vmatpush1.bf16.msra.mxu0 %v5232_v17  ;;  %v5312_v17 = vld [vmem:[%s6978_s1 + $0xbd4] ss:$8 sps:$4 sm:$0xff]  }
 0x149   : > { %2918 = vmatpush1.bf16.msra.mxu1 %v5235_v18  ;;  %2878 = vmatprep.subr.bf16.mxu0 %v5240_v19 }
 0x14a   : > { %2919 = vmatprep.subr.bf16.mxu1 %v5243_v20 }
 0x14c   : > { %2879 = vmatpush1.bf16.msra.mxu0 %v5238_v22  ;;  %v5307_v22 = vld [vmem:[%s6978_s1 + $0xb50] ss:$8 sps:$4 sm:$0xff]  }
 0x14d   : > { %2920 = vmatpush1.bf16.msra.mxu1 %v5241_v23  ;;  %2880 = vmatprep.subr.bf16.mxu0 %v5246_v25  ;;  %v5310_v23 = vld [vmem:[%s6978_s1 + $0xbd0] ss:$8 sps:$4 sm:$0xff]   ;;  %v5315_v25 = vld [vmem:[%s6978_s1 + $0xb44] ss:$8 sps:$4 sm:$0xff]  }
 0x14e   : > { %3261 = vmatprep.subr.bf16.mxu1 %v5249_v26  ;;  %v5313_v26 = vld [vmem:[%s6978_s1 + $0xb40] ss:$8 sps:$4 sm:$0xff]  }
 0x150   : > { %2938 = vmatmul.mubr.bf16.vlgmr.msra.gmra.mxu1 %v6583_v29  ;;  %v6598_v38 = vpop.f32.mrf.mxu1  ;;  %2881 = vmatpush2.bf16.msra.mxu0 %v5244_v31  ;;  %v5324_v31 = vld [vmem:[%s6978_s1 + $0xbb4] ss:$8 sps:$4 sm:$0xff]  }
 0x151   : > { %3262 = vmatpush1.bf16.msra.mxu1 %v5247_v33  ;;  %2882 = vmatprep.subr.bf16.mxu0 %v5253_v34  ;;  %v5319_v33 = vld [vmem:[%s6978_s1 + $0xb30] ss:$8 sps:$4 sm:$0xff]  }
 0x152   : > { %3263 = vmatprep.subr.bf16.mxu1 %v5256_v6  ;;  %v6612_v42 = vpop.f32.mrf.mxu1  ;;  %3293 = vmatprep.mubr.bf16.mxu1 %v3010_v35  ;;  %v5322_v34 = vld [vmem:[%s6978_s1 + $0xbb0] ss:$8 sps:$4 sm:$0xff]   ;;  %v5327_v6 = vld [vmem:[%s6978_s1 + $0xb24] ss:$8 sps:$4 sm:$0xff]  }
 0x153   : > { %v5330_v35 = vld [vmem:[%s6978_s1 + $0xba4] ss:$8 sps:$4 sm:$0xff]  }
 0x154   : > { %v1377_v43 = vpop.f32.mrf.mxu1  ;;  %2883 = vmatpush2.bf16.msra.mxu0 %v5251_v39  ;;  %v5328_v39 = vld [vmem:[%s6978_s1 + $0xba0] ss:$8 sps:$4 sm:$0xff]  }
 0x155   : > { %3264 = vmatpush1.bf16.msra.mxu1 %v5254_v40  ;;  %2884 = vmatprep.subr.bf16.mxu0 %v5259_v30  ;;  %v5333_v40 = vld [vmem:[%s6978_s1 + $0xb14] ss:$8 sps:$4 sm:$0xff]   ;;  %v5331_v43 = vld [vmem:[%s6978_s1 + $0xb10] ss:$8 sps:$4 sm:$0xff]  }
 0x156   : > { %3265 = vmatprep.subr.bf16.mxu1 %v5262_v41  ;;  %v1378_v48 = vpop.f32.mrf.mxu1  ;;  %v5336_v30 = vld [vmem:[%s6978_s1 + $0xb94] ss:$8 sps:$4 sm:$0xff]   ;;  %v3000_v41 = vshll.u32 %v6688_v7, 16 }
 0x158   : > { %2885 = vmatpush2.bf16.msra.mxu0 %v5257_v44  ;;  %v5334_v44 = vld [vmem:[%s6978_s1 + $0xb90] ss:$8 sps:$4 sm:$0xff]   ;;  %v3002_v48 = vrot.slane %v3000_v41, 1 }
 0x159   : > { %3266 = vmatpush1.bf16.msra.mxu1 %v5260_v45  ;;  %2886 = vmatprep.subr.bf16.mxu0 %v5265_v46  ;;  %v5339_v45 = vld [vmem:[%s6978_s1 + $0xb04] ss:$8 sps:$4 sm:$0xff]  }
 0x15a   : > { %3267 = vmatprep.subr.bf16.mxu1 %v5268_v47  ;;  %v5342_v46 = vld [vmem:[%s6978_s1 + $0xb84] ss:$8 sps:$4 sm:$0xff]   ;;  %v2998_v47 = vshrl.u32 %v6688_v7, 16 }
 0x15c   : > { %2887 = vmatpush2.bf16.msra.mxu0 %v5263_v36  ;;  %v3012_v36 = vshrl.u32 %v6583_v29, 16 }
 0x15d   : > { %3268 = vmatpush1.bf16.msra.mxu1 %v5266_v49  ;;  %2888 = vmatprep.subr.bf16.mxu0 %v5271_v50  ;;  %v6789_v50 = vld [vmem:[%s5608_s20 + $0x18] sm:$0x66] }
 0x15e   : > { %3269 = vmatprep.subr.bf16.mxu1 %v5274_v51  ;;  %v5337_v51 = vld [vmem:[%s6978_s1 + $0xb00] ss:$8 sps:$4 sm:$0xff]  }
 0x160   : > { %2889 = vmatpush2.bf16.msra.mxu0 %v5269_v52  ;;  %v5340_v52 = vld [vmem:[%s6978_s1 + $0xb80] ss:$8 sps:$4 sm:$0xff]  }
 0x161   : > { %3270 = vmatpush1.bf16.msra.mxu1 %v5272_v53  ;;  %2890 = vmatprep.subr.bf16.mxu0 %v5277_v37  ;;  %v5345_v53 = vld [vmem:[%s6978_s1 + $0xc74] ss:$8 sps:$4 sm:$0xff]   ;;  %v4654_v37 = vcombine.high %v6789_v50, %v6789_v50 }
 0x162   : > { %3271 = vmatprep.subr.bf16.mxu1 %v5280_v54  ;;  %v3003_v54 = vor.u32 %v3002_v48, %v2998_v47 }
 0x164   : > { %2891 = vmatpush2.bf16.msra.mxu0 %v5275_v55 }
 0x165   : > { %3272 = vmatpush1.bf16.msra.mxu1 %v5278_v57  ;;  %2892 = vmatprep.subr.bf16.mxu0 %v5283_v58  ;;  %v5343_v57 = vld [vmem:[%s6978_s1 + $0xc70] ss:$8 sps:$4 sm:$0xff]  }
 0x166   : > { %3273 = vmatprep.subr.bf16.mxu1 %v5286_v59  ;;  %v5364_v58 = vld [vmem:[%s6978_s1 + $0xd70] ss:$8 sps:$4 sm:$0xff]   ;;  %v5348_v59 = vld [vmem:[%s6978_s1 + $0xc64] ss:$8 sps:$4 sm:$0xff]  }
 0x168   : > { %2893 = vmatpush2.bf16.msra.mxu0 %v5281_v61  ;;  %v5372_v61 = vld [vmem:[%s6978_s1 + $0xd64] ss:$8 sps:$4 sm:$0xff]  }
 0x169   : > { %3274 = vmatpush1.bf16.msra.mxu1 %v5284_v62  ;;  %2894 = vmatprep.subr.bf16.mxu0 %v5289_v63  ;;  %v3405_v62 = vrot.slane %v4654_v37, 1  ;;  %v5405_v37 = vld [vmem:[%s6978_s1 + $0xca4] ss:$8 sps:$4 sm:$0xff]  }
 0x16a   : > { %3275 = vmatprep.subr.bf16.mxu1 %v5292_v0 }
 0x16c   : > { %2895 = vmatpush2.bf16.msra.mxu0 %v5287_v1 }
 0x16d   : > { %3276 = vmatpush1.bf16.msra.mxu1 %v5290_v3  ;;  %3302 = vmatprep.subr.bf16.mxu0 %v5300_v5  ;;  %v5346_v3 = vld [vmem:[%s6978_s1 + $0xc60] ss:$8 sps:$4 sm:$0xff]  }
 0x16e   : > { %3277 = vmatprep.subr.bf16.mxu1 %v5297_v4  ;;  %v5370_v4 = vld [vmem:[%s6978_s1 + $0xd60] ss:$8 sps:$4 sm:$0xff]  }
 0x16f   : > { %v1332_v11 = vpop.f32.mrf.mxu0  ;;  %2897 = vmatmul.mubr.bf16.vlgmr.msra.gmra.mxu0 %v6688_v7 }
 0x170   : > { %v1374_v12 = vadd.f32 %v6598_v38, %v1332_v11  ;;  %3303 = vmatpush1.bf16.msra.mxu0 %v5298_v9  ;;  %3334 = vmatprep.mubr.bf16.mxu0 %v5458_v2  ;;  %v5325_v38 = vld [vmem:[%s6978_s1 + $0xb20] ss:$8 sps:$4 sm:$0xff]   ;;  %v5378_v9 = vld [vmem:[%s6978_s1 + $0xd54] ss:$8 sps:$4 sm:$0xff]  }
 0x171   : > { %3278 = vmatpush2.bf16.msra.mxu1 %v5295_v8  ;;  %v1334_v15 = vpop.f32.mrf.mxu0  ;;  %3304 = vmatprep.subr.bf16.mxu0 %v5306_v32  ;;  %v5351_v8 = vld [vmem:[%s6978_s1 + $0xc54] ss:$8 sps:$4 sm:$0xff]  }
 0x172   : > { %3279 = vmatprep.subr.bf16.mxu1 %v5303_v10  ;;  %v6717_v18 = vadd.f32 %v1374_v12, %v6502_v56  ;;  %v1376_v19 = vadd.f32 %v6612_v42, %v1334_v15  ;;  %v3014_v42 = vshll.u32 %v6583_v29, 16  ;;  %v5366_v29 = vld [vmem:[%s6978_s1 + $0xd74] ss:$8 sps:$4 sm:$0xff]   ;;  %v5376_v15 = vld [vmem:[%s6978_s1 + $0xd50] ss:$8 sps:$4 sm:$0xff]  }
 0x173   : > { %v1336_v20 = vpop.f32.mrf.mxu0 }
 0x174   : > { %v6722_v21 = vadd.f32 %v1376_v19, %v6506_v60  ;;  %3305 = vmatpush1.bf16.msra.mxu0 %v5304_v14  ;;  %v5318_v60 = vld [vmem:[%s6978_s1 + $0xbc4] ss:$8 sps:$4 sm:$0xff]   ;;  %v3016_v49 = vrot.slane %v3014_v42, 1  ;;  %v5349_v14 = vld [vmem:[%s6978_s1 + $0xc50] ss:$8 sps:$4 sm:$0xff]  }
 0x175   : > { %3280 = vmatpush2.bf16.msra.mxu1 %v5301_v13  ;;  %v1337_v56 = vpop.f32.mrf.mxu0  ;;  %3306 = vmatprep.subr.bf16.mxu0 %v5312_v17  ;;  %v5352_v19 = vld [vmem:[%s6978_s1 + $0xc40] ss:$8 sps:$4 sm:$0xff]   ;;  %v5373_v42 = vld [vmem:[%s6978_s1 + $0xcf0] ss:$8 sps:$4 sm:$0xff]  }
 0x176   : > { %3281 = vmatprep.subr.bf16.mxu1 %v5309_v16  ;;  %v3017_v55 = vor.u32 %v3016_v49, %v3012_v36  ;;  %v5382_v20 = vld [vmem:[%s6978_s1 + $0xd40] ss:$8 sps:$4 sm:$0xff]   ;;  %v5388_v56 = vld [vmem:[%s6978_s1 + $0xd30] ss:$8 sps:$4 sm:$0xff]   ;;  %v5393_v49 = vld [vmem:[%s6978_s1 + $0xcc4] ss:$8 sps:$4 sm:$0xff]  }
 0x177   : > { %v5385_v36 = vld [vmem:[%s6978_s1 + $0xcd0] ss:$8 sps:$4 sm:$0xff]  }
 0x178   : > { %3307 = vmatpush1.bf16.msra.mxu0 %v5310_v23  ;;  %v5355_v23 = vld [vmem:[%s6978_s1 + $0xc30] ss:$8 sps:$4 sm:$0xff]  }
 0x179   : > { %3282 = vmatpush2.bf16.msra.mxu1 %v5307_v22  ;;  %3308 = vmatprep.subr.bf16.mxu0 %v5318_v60  ;;  %v5390_v22 = vld [vmem:[%s6978_s1 + $0xd34] ss:$8 sps:$4 sm:$0xff]   ;;  %v5396_v60 = vld [vmem:[%s6978_s1 + $0xd24] ss:$8 sps:$4 sm:$0xff]  }
 0x17a   : > { %3283 = vmatprep.subr.bf16.mxu1 %v5315_v25  ;;  %v5360_v25 = vld [vmem:[%s6978_s1 + $0xc24] ss:$8 sps:$4 sm:$0xff]  }
 0x17c   : > { %3309 = vmatpush1.bf16.msra.mxu0 %v5316_v27  ;;  %v5394_v27 = vld [vmem:[%s6978_s1 + $0xd20] ss:$8 sps:$4 sm:$0xff]  }
 0x17d   : > { %3284 = vmatpush2.bf16.msra.mxu1 %v5313_v26  ;;  %3310 = vmatprep.subr.bf16.mxu0 %v5324_v31  ;;  %v5358_v26 = vld [vmem:[%s6978_s1 + $0xc20] ss:$8 sps:$4 sm:$0xff]   ;;  %v5402_v31 = vld [vmem:[%s6978_s1 + $0xd14] ss:$8 sps:$4 sm:$0xff]  }
 0x17e   : > { %3285 = vmatprep.subr.bf16.mxu1 %v5321_v28  ;;  %v5363_v28 = vld [vmem:[%s6978_s1 + $0xc14] ss:$8 sps:$4 sm:$0xff]  }
 0x180   : > { %3311 = vmatpush1.bf16.msra.mxu0 %v5322_v34  ;;  %v5400_v34 = vld [vmem:[%s6978_s1 + $0xd10] ss:$8 sps:$4 sm:$0xff]  }
 0x181   : > { %3286 = vmatpush2.bf16.msra.mxu1 %v5319_v33  ;;  %3312 = vmatprep.subr.bf16.mxu0 %v5330_v35  ;;  %v5361_v33 = vld [vmem:[%s6978_s1 + $0xc10] ss:$8 sps:$4 sm:$0xff]   ;;  %v5408_v35 = vld [vmem:[%s6978_s1 + $0xd04] ss:$8 sps:$4 sm:$0xff]  }
 0x182   : > { %3287 = vmatprep.subr.bf16.mxu1 %v5327_v6  ;;  %v5369_v6 = vld [vmem:[%s6978_s1 + $0xc04] ss:$8 sps:$4 sm:$0xff]  }
 0x184   : > { %3313 = vmatpush1.bf16.msra.mxu0 %v5328_v39  ;;  %v5367_v39 = vld [vmem:[%s6978_s1 + $0xc00] ss:$8 sps:$4 sm:$0xff]  }
 0x185   : > { %3288 = vmatpush2.bf16.msra.mxu1 %v5325_v38  ;;  %3314 = vmatprep.subr.bf16.mxu0 %v5336_v30  ;;  %v5412_v38 = vld [vmem:[%s5608_s20 + $0x20] ss:$0 sps:$4 sm:$0x66]   ;;  %v5375_v30 = vld [vmem:[%s6978_s1 + $0xcf4] ss:$8 sps:$4 sm:$0xff]  }
 0x186   : > { %3289 = vmatprep.subr.bf16.mxu1 %v5333_v40  ;;  %v5406_v40 = vld [vmem:[%s6978_s1 + $0xd00] ss:$8 sps:$4 sm:$0xff]   ;;  %v3406_v41 = vrot.slane %v5412_v38, 1 }
 0x188   : > { %3315 = vmatpush1.bf16.msra.mxu0 %v5334_v44 }
 0x189   : > { %3290 = vmatpush2.bf16.msra.mxu1 %v5331_v43  ;;  %3316 = vmatprep.subr.bf16.mxu0 %v5342_v46  ;;  %v5381_v43 = vld [vmem:[%s6978_s1 + $0xce4] ss:$8 sps:$4 sm:$0xff]   ;;  %v5387_v46 = vld [vmem:[%s6978_s1 + $0xcd4] ss:$8 sps:$4 sm:$0xff]  }
 0x18a   : > { %3291 = vmatprep.subr.bf16.mxu1 %v5339_v45  ;;  %v5379_v45 = vld [vmem:[%s6978_s1 + $0xce0] ss:$8 sps:$4 sm:$0xff]  }
 0x18c   : > { %3317 = vmatpush1.bf16.msra.mxu0 %v5340_v52  ;;  %v5391_v52 = vld [vmem:[%s6978_s1 + $0xcc0] ss:$8 sps:$4 sm:$0xff]  }
 0x18d   : > { %3292 = vmatpush2.bf16.msra.mxu1 %v5337_v51  ;;  %3650 = vmatprep.subr.bf16.mxu0 %v5345_v53  ;;  %v5399_v53 = vld [vmem:[%s6978_s1 + $0xcb4] ss:$8 sps:$4 sm:$0xff]  }
 0x18e   : > { %3691 = vmatprep.subr.bf16.mxu1 %v5366_v29  ;;  %v5397_v29 = vld [vmem:[%s6978_s1 + $0xcb0] ss:$8 sps:$4 sm:$0xff]  }
 0x18f   : > { %v1763_v0 = vpop.f32.mrf.mxu0  ;;  %3335 = vmatmul.mubr.bf16.vlgmr.msra.gmra.mxu0 %v3017_v55  ;;  %v5411_v55 = vld [vmem:[%s6978_s1 + $0xc94] ss:$8 sps:$4 sm:$0xff]  }
 0x190   : > { %v1722_v63 = vpop.f32.mrf.mxu1  ;;  %3294 = vmatmul.mubr.bf16.vlgmr.msra.gmra.mxu1 %v3003_v54  ;;  %3651 = vmatpush1.bf16.msra.mxu0 %v5343_v57  ;;  %v5403_v54 = vld [vmem:[%s6978_s1 + $0xca0] ss:$8 sps:$4 sm:$0xff]   ;;  %v5409_v57 = vld [vmem:[%s6978_s1 + $0xc90] ss:$8 sps:$4 sm:$0xff]  }
 0x191   : > { %v1764_v1 = vadd.f32 %v1763_v0, %v1722_v63  ;;  %3692 = vmatpush1.bf16.msra.mxu1 %v5364_v58  ;;  %v1765_v7 = vpop.f32.mrf.mxu0  ;;  %3652 = vmatprep.subr.bf16.mxu0 %v5348_v59  ;;  %v5415_v58 = vld [vmem:[%s6978_s1 + $0xc84] ss:$8 sps:$4 sm:$0xff]   ;;  %v4653_v59 = vcombine.low %v6789_v50, %v6789_v50 }
 0x192   : > { %v1724_v5 = vpop.f32.mrf.mxu1  ;;  %3693 = vmatprep.subr.bf16.mxu1 %v5372_v61  ;;  %3723 = vmatprep.mubr.bf16.mxu1 %v5458_v2  ;;  %v5354_v2 = vld [vmem:[%s6978_s1 + $0xc44] ss:$8 sps:$4 sm:$0xff]   ;;  %v5413_v61 = vld [vmem:[%s6978_s1 + $0xc80] ss:$8 sps:$4 sm:$0xff]  }
 0x193   : > { %v6830_v10 = vadd.f32 %v1764_v1, %v6717_v18  ;;  %v1766_v32 = vadd.f32 %v1765_v7, %v1724_v5  ;;  %3682 = vmatprep.mubr.bf16.mxu0 %v3405_v62  ;;  %v1767_v11 = vpop.f32.mrf.mxu0  ;;  %v5384_v18 = vld [vmem:[%s6978_s1 + $0xd44] ss:$8 sps:$4 sm:$0xff]   ;;  %v3404_v62 = vrot.slane %v4653_v59, 1 }
 0x194   : > { %v1726_v12 = vpop.f32.mrf.mxu1  ;;  %3653 = vmatpush1.bf16.msra.mxu0 %v5346_v3 }
 0x195   : > { %v6834_v13 = vadd.f32 %v1766_v32, %v6722_v21  ;;  %3694 = vmatpush1.bf16.msra.mxu1 %v5370_v4  ;;  %v1768_v16 = vpop.f32.mrf.mxu0  ;;  %3654 = vmatprep.subr.bf16.mxu0 %v5351_v8  ;;  %v5357_v21 = vld [vmem:[%s6978_s1 + $0xc34] ss:$8 sps:$4 sm:$0xff]  }
 0x196   : > { %v1727_v17 = vpop.f32.mrf.mxu1  ;;  %3695 = vmatprep.subr.bf16.mxu1 %v5378_v9 }
 0x198   : > { %3655 = vmatpush1.bf16.msra.mxu0 %v5349_v14 }
 0x199   : > { %3696 = vmatpush1.bf16.msra.mxu1 %v5376_v15  ;;  %3656 = vmatprep.subr.bf16.mxu0 %v5354_v2 }
 0x19a   : > { %3697 = vmatprep.subr.bf16.mxu1 %v5384_v18 }
 0x19c   : > { %3657 = vmatpush1.bf16.msra.mxu0 %v5352_v19 }
 0x19d   : > { %3698 = vmatpush1.bf16.msra.mxu1 %v5382_v20  ;;  %3658 = vmatprep.subr.bf16.mxu0 %v5357_v21 }
 0x19e   : > { %3699 = vmatprep.subr.bf16.mxu1 %v5390_v22 }
 0x1a0   : > { %3659 = vmatpush1.bf16.msra.mxu0 %v5355_v23 }
 0x1a1   : > { %3700 = vmatpush1.bf16.msra.mxu1 %v5388_v56  ;;  %3660 = vmatprep.subr.bf16.mxu0 %v5360_v25 }
 0x1a2   : > { %3701 = vmatprep.subr.bf16.mxu1 %v5396_v60 }
 0x1a4   : > { %3661 = vmatpush1.bf16.msra.mxu0 %v5358_v26 }
 0x1a5   : > { %3702 = vmatpush1.bf16.msra.mxu1 %v5394_v27  ;;  %3662 = vmatprep.subr.bf16.mxu0 %v5363_v28 }
 0x1a6   : > { %3703 = vmatprep.subr.bf16.mxu1 %v5402_v31 }
 0x1a8   : > { %3663 = vmatpush1.bf16.msra.mxu0 %v5361_v33 }
 0x1a9   : > { %3704 = vmatpush1.bf16.msra.mxu1 %v5400_v34  ;;  %3664 = vmatprep.subr.bf16.mxu0 %v5369_v6 }
 0x1aa   : > { %3705 = vmatprep.subr.bf16.mxu1 %v5408_v35 }
 0x1ac   : > { %3665 = vmatpush1.bf16.msra.mxu0 %v5367_v39 }
 0x1ad   : > { %3706 = vmatpush1.bf16.msra.mxu1 %v5406_v40  ;;  %3666 = vmatprep.subr.bf16.mxu0 %v5375_v30 }
 0x1b0   : > { %3724 = vmatmul.mubr.bf16.vlgmr.msra.gmra.mxu1 %v3406_v41  ;;  %v2160_v44 = vpop.f32.mrf.mxu1  ;;  %3667 = vmatpush2.bf16.msra.mxu0 %v5373_v42 }
 0x1b1   : > { %3668 = vmatprep.subr.bf16.mxu0 %v5381_v43 }
 0x1b2   : > { %v2162_v47 = vpop.f32.mrf.mxu1 }
 0x1b4   : > { %v2164_v48 = vpop.f32.mrf.mxu1  ;;  %3669 = vmatpush2.bf16.msra.mxu0 %v5379_v45 }
 0x1b5   : > { %3670 = vmatprep.subr.bf16.mxu0 %v5387_v46  ;;  %v5459_v46 = vmov 1983009808  }
 0x1b6   : > { %v2165_v51 = vpop.f32.mrf.mxu1 }
 0x1b8   : > { %3671 = vmatpush2.bf16.msra.mxu0 %v5385_v36 }
 0x1b9   : > { %3672 = vmatprep.subr.bf16.mxu0 %v5393_v49 }
 0x1bc   : > { %3673 = vmatpush2.bf16.msra.mxu0 %v5391_v52 }
 0x1bd   : > { %3674 = vmatprep.subr.bf16.mxu0 %v5399_v53 }
 0x1c0   : > { %3675 = vmatpush2.bf16.msra.mxu0 %v5397_v29 }
 0x1c1   : > { %3676 = vmatprep.subr.bf16.mxu0 %v5405_v37 }
 0x1c4   : > { %3677 = vmatpush2.bf16.msra.mxu0 %v5403_v54 }
 0x1c5   : > { %3678 = vmatprep.subr.bf16.mxu0 %v5411_v55 }
 0x1c8   : > { %3679 = vmatpush2.bf16.msra.mxu0 %v5409_v57 }
 0x1c9   : > { %3680 = vmatprep.subr.bf16.mxu0 %v5415_v58 }
 0x1cc   : > { %3681 = vmatpush2.bf16.msra.mxu0 %v5413_v61 }
 0x1cf   : > { %v2119_v63 = vpop.f32.mrf.mxu0  ;;  %3683 = vmatmul.mubr.bf16.vlgmr.msra.gmra.mxu0 %v3404_v62 }
 0x1d0   : > { %v2161_v0 = vadd.f32 %v2160_v44, %v2119_v63  ;;  %v3756_v63 = vld [vmem:[%s192_s8] sm:$0xf] }
 0x1d1   : > { %v2121_v1 = vpop.f32.mrf.mxu0 }
 0x1d2   : > { %v2167_v3 = vadd.f32 %v2161_v0, %v6830_v10  ;;  %v2163_v4 = vadd.f32 %v2162_v47, %v2121_v1  ;;  %v3742_v47 = vunpack.c.l.s4 %v5459_v46 }
 0x1d3   : > { %v2123_v5 = vpop.f32.mrf.mxu0 }
 0x1d4   : > { %v2168_v7 = vadd.f32 %v2163_v4, %v6834_v13  ;;  %v3743_v52 = vunpack.c.0.s8 %v3742_v47 }
 0x1d5   : > { %v2124_v8 = vpop.f32.mrf.mxu0 }
 0x1d6   : > { %v3746_v61 = vsub.s32 %v3743_v52, %v6441_v24 }
 0x1ef   : > { %v2549_v9 = vpop.f32.mrf.mxu0 }
 0x1f0   : > { %v2508_v50 = vpop.f32.mrf.mxu1 }
 0x1f1   : > { %v2550_v32 = vadd.f32 %v2549_v9, %v2508_v50  ;;  %v2551_v12 = vpop.f32.mrf.mxu0 }
 0x1f2   : > { %v2510_v11 = vpop.f32.mrf.mxu1 }
 0x1f3   : > { %v2556_v14 = vadd.f32 %v2550_v32, %v2167_v3  ;;  %v2552_v15 = vadd.f32 %v2551_v12, %v2510_v11  ;;  %v2553_v16 = vpop.f32.mrf.mxu0 }
 0x1f4   : > { %v2512_v2 = vpop.f32.mrf.mxu1 }
 0x1f5   : > { %v2557_v17 = vadd.f32 %v2552_v15, %v2168_v7  ;;  %v2554_v18 = vpop.f32.mrf.mxu0 }
 0x1f6   : > { %v2513_v19 = vpop.f32.mrf.mxu1 }
 0x210   : > { %v2939_v20 = vpop.f32.mrf.mxu1 }
 0x212   : > { %v2941_v21 = vpop.f32.mrf.mxu1 }
 0x214   : > { %v2943_v10 = vpop.f32.mrf.mxu1 }
 0x216   : > { %v2944_v22 = vpop.f32.mrf.mxu1 }
 0x22f   : > { %v2898_v23 = vpop.f32.mrf.mxu0 }
 0x230   : > { %v2940_v56 = vadd.f32 %v2939_v20, %v2898_v23 }
 0x231   : > { %v2900_v13 = vpop.f32.mrf.mxu0 }
 0x232   : > { %v2946_v25 = vadd.f32 %v2940_v56, %v2556_v14  ;;  %v2942_v60 = vadd.f32 %v2941_v21, %v2900_v13 }
 0x233   : > { %v2902_v26 = vpop.f32.mrf.mxu0 }
 0x234   : > { %v2947_v27 = vadd.f32 %v2942_v60, %v2557_v17 }
 0x235   : > { %v2903_v28 = vpop.f32.mrf.mxu0 }
 0x24f   : > { %v3336_v33 = vpop.f32.mrf.mxu0 }
 0x250   : > { %v3295_v31 = vpop.f32.mrf.mxu1 }
 0x251   : > { %v3337_v34 = vadd.f32 %v3336_v33, %v3295_v31  ;;  %v3338_v35 = vpop.f32.mrf.mxu0 }
 0x252   : > { %v3297_v6 = vpop.f32.mrf.mxu1 }
 0x253   : > { %v3343_v38 = vadd.f32 %v3337_v34, %v2946_v25  ;;  %v3340_v39 = vpop.f32.mrf.mxu0  ;;  %v3339_v48 = vadd.f32 %v3338_v35, %v3297_v6 }
 0x254   : > { %v3299_v40 = vpop.f32.mrf.mxu1 }
 0x255   : > { %v3341_v30 = vpop.f32.mrf.mxu0  ;;  %v3344_v53 = vadd.f32 %v3339_v48, %v2947_v27 }
 0x256   : > { %v3300_v41 = vpop.f32.mrf.mxu1 }
 0x270   : > { %v3725_v42 = vpop.f32.mrf.mxu1 }
 0x272   : > { %v3727_v43 = vpop.f32.mrf.mxu1 }
 0x274   : > { %v3729_v44 = vpop.f32.mrf.mxu1 }
 0x276   : > { %v3730_v45 = vpop.f32.mrf.mxu1 }
 0x28f   : > { %v3684_v36 = vpop.f32.mrf.mxu0 }
 0x290   : > { %v3726_v49 = vadd.f32 %v3725_v42, %v3684_v36 }
 0x291   : > { %v3686_v51 = vpop.f32.mrf.mxu0 }
 0x292   : > { %v3732_v29 = vadd.f32 %v3726_v49, %v3343_v38  ;;  %v3728_v37 = vadd.f32 %v3727_v43, %v3686_v51 }
 0x293   : > { %v3688_v54 = vpop.f32.mrf.mxu0 }
 0x294   : > { %v3733_v55 = vadd.f32 %v3728_v37, %v3344_v53  ;;  %v3734_v58 = vmax.f32 %v3732_v29, 0.0 }
 0x295   : > { %v3689_v57 = vpop.f32.mrf.mxu0 }
 0x296   : > { %v3735_v59 = vmax.f32 %v3733_v55, 0.0 }
 0x298   : > { %v4704_v62 = vpack.c.bf16 %v3735_v59, %v3734_v58 }
 0x29a   : > { %v3747_v0 = vrot.slane %v4704_v62, %v3746_v61 }
 0x29c   : > { %v3757_v1 = vsel %vm3755_vm6, %v3747_v0, %v3756_v63 }
 0x29d   : > { %3758 = vst [vmem:[%s192_s8] sm:$0xf] %v3757_v1 }
 0x29e PF: > { %s13_s16 = sadd.s32 1, %s5456_s16   ;;  %s6981_s12 = smov %s5448_s14 }
 0x29f   : > { %p10_p7 = scmp.ge.s32.totalorder %s13_s16, 8   ;;  %s6982_s13 = smov %s5452_s15 }
 0x2a0   : > { %s6983_s14 = smov %s6986_s17  ;;  %s6984_s15 = smov %s6990_s18 }
 0x2a1   :  { %12 = sbr.rel (!%p10_p7) target bundleno = 3 (0x3), region = 73 }

// kernel: alexnet_fe_forward.13
= control target key start
LH: loop header
LB: loop body
LE: loop exit
PB: predicated region body
PF: predicated region fallthrough
CT: control target
= control target key end

     0   :  { %s3663_s12 = smov 0   ;;  %s3665_s13 = smov 0   ;;  %s4648_s0 = inlined_call_operand.vmem [shape: bf16[2,5,5,256], index: 0, kind: input, shape index: {}]   ;;  %s4649_s1 = inlined_call_operand.vmem [shape: bf16[9,256,256], index: 1, kind: input, shape index: {}]   ;;  %s4650_s2 = inlined_call_operand.vmem [shape: f32[1,256], index: 2, kind: input, shape index: {}]   ;;  %s4651_s3 = inlined_call_operand.vmem [shape: f32[2,3,3,256], index: 3, kind: output, shape index: {}]  }
   0x1   :  { %s3667_s14 = smov 0   ;;  %s3669_s15 = smov 0  }
   0x2   :  { %s3671_s16 = smov 0  }
   0x3 LB: > { %s22_s17 = sadd.s32 1, %s3633_s14  ;;  %s25_s18 = sadd.s32 1, %s3637_s15  ;;  %s3641_s16 = sphi %s3671_s16, %s13_s16   ;;  %s3637_s15 = sphi %s3669_s15, %s4655_s15   ;;  %s3633_s14 = sphi %s3667_s14, %s4654_s14   ;;  %s3629_s13 = sphi %s3665_s13, %s4653_s13   ;;  %s3625_s12 = sphi %s3663_s12, %s4652_s12  }
   0x4   : > { %p23_p0 = scmp.ge.s32.totalorder %s22_s17, 3  ;;  %p2546_p1 = scmp.ge.s32.totalorder %s3641_s16, 1 }
   0x5   : > { %p151_p2 = scmp.lt.s32.totalorder %s3641_s16, 7 }
   0x6   : > { %s4657_s17 = smov (%p23_p0, %s22_s17), 0  ;;  %s4659_s18 = smov (!%p23_p0, %s25_s18), %s3637_s15 }
   0x7   : > { %p152_p3 = pnand %p2546_p1, %p151_p2  ;;  %p27_p4 = scmp.ge.s32.totalorder %s4659_s18, 2 }
   0x8   : > { %p179_p5 = scmp.lt.s32.totalorder (!%p152_p3), %s3629_s13, 1  ;;  %s3116_s23 = sshll.u32 (!%p152_p3), %s3625_s12, 3 }
   0x9   : > { %s4661_s18 = smov (%p27_p4, %s4659_s18), 0  ;;  %155 = sbr.rel (%p152_p3) target bundleno = 535 (0x217), region = 32 }
   0xa   : > { %p186_p6 = scmp.lt.s32.totalorder (!%p152_p3), %s3625_s12, 2 }
   0xe   : > { %v3159_v0 = vld [vmem:[%s4649_s1 + $0x74] ss:$8 sps:$4 sm:$0xff]   ;;  %v3161_v1 = vld [vmem:[%s4649_s1 + $0x70] ss:$8 sps:$4 sm:$0xff]   ;;  %v3165_v4 = vld [vmem:[%s4649_s1 + $0x64] ss:$8 sps:$4 sm:$0xff]  }
   0xf   : > { %410 = vmatprep.subr.bf16.mxu0 %v3159_v0  ;;  %v3162_v2 = vld [vmem:[%s4649_s1 + $0x174] ss:$8 sps:$4 sm:$0xff]   ;;  %v3164_v3 = vld [vmem:[%s4649_s1 + $0x170] ss:$8 sps:$4 sm:$0xff]   ;;  %v3167_v5 = vld [vmem:[%s4649_s1 + $0x60] ss:$8 sps:$4 sm:$0xff]  }
  0x10   : > { %411 = vmatpush1.bf16.msra.mxu0 %v3161_v1  ;;  %662 = vmatprep.subr.bf16.mxu1 %v3162_v2  ;;  %v3168_v6 = vld [vmem:[%s4649_s1 + $0x164] ss:$8 sps:$4 sm:$0xff]   ;;  %v3170_v7 = vld [vmem:[%s4649_s1 + $0x160] ss:$8 sps:$4 sm:$0xff]   ;;  %v3171_v8 = vld [vmem:[%s4649_s1 + $0x54] ss:$8 sps:$4 sm:$0xff]  }
  0x11   : > { %663 = vmatpush1.bf16.msra.mxu1 %v3164_v3  ;;  %412 = vmatprep.subr.bf16.mxu0 %v3165_v4  ;;  %v3173_v9 = vld [vmem:[%s4649_s1 + $0x50] ss:$8 sps:$4 sm:$0xff]   ;;  %v3174_v10 = vld [vmem:[%s4649_s1 + $0x154] ss:$8 sps:$4 sm:$0xff]   ;;  %v3177_v11 = vld [vmem:[%s4649_s1 + $0x44] ss:$8 sps:$4 sm:$0xff]  }
  0x12   : > { %664 = vmatprep.subr.bf16.mxu1 %v3168_v6  ;;  %v3176_v12 = vld [vmem:[%s4649_s1 + $0x150] ss:$8 sps:$4 sm:$0xff]   ;;  %v3180_v13 = vld [vmem:[%s4649_s1 + $0x144] ss:$8 sps:$4 sm:$0xff]   ;;  %v3179_v14 = vld [vmem:[%s4649_s1 + $0x40] ss:$8 sps:$4 sm:$0xff]  }
  0x13   : > { %v3183_v15 = vld [vmem:[%s4649_s1 + $0x34] ss:$8 sps:$4 sm:$0xff]   ;;  %v3182_v16 = vld [vmem:[%s4649_s1 + $0x140] ss:$8 sps:$4 sm:$0xff]   ;;  %v3185_v18 = vld [vmem:[%s4649_s1 + $0x30] ss:$8 sps:$4 sm:$0xff]  }
  0x14   : > { %413 = vmatpush1.bf16.msra.mxu0 %v3167_v5  ;;  %v3186_v17 = vld [vmem:[%s4649_s1 + $0x134] ss:$8 sps:$4 sm:$0xff]   ;;  %v3189_v19 = vld [vmem:[%s4649_s1 + $0x24] ss:$8 sps:$4 sm:$0xff]   ;;  %v3188_v20 = vld [vmem:[%s4649_s1 + $0x130] ss:$8 sps:$4 sm:$0xff]  }
  0x15   : > { %414 = vmatprep.subr.bf16.mxu0 %v3171_v8  ;;  %665 = vmatpush1.bf16.msra.mxu1 %v3170_v7  ;;  %v3192_v21 = vld [vmem:[%s4649_s1 + $0x124] ss:$8 sps:$4 sm:$0xff]   ;;  %v3191_v22 = vld [vmem:[%s4649_s1 + $0x20] ss:$8 sps:$4 sm:$0xff]   ;;  %v3195_v23 = vld [vmem:[%s4649_s1 + $0x14] ss:$8 sps:$4 sm:$0xff]  }
  0x16   : > { %666 = vmatprep.subr.bf16.mxu1 %v3174_v10  ;;  %v3194_v24 = vld [vmem:[%s4649_s1 + $0x120] ss:$8 sps:$4 sm:$0xff]   ;;  %v3198_v25 = vld [vmem:[%s4649_s1 + $0x114] ss:$8 sps:$4 sm:$0xff]   ;;  %v3197_v26 = vld [vmem:[%s4649_s1 + $0x10] ss:$8 sps:$4 sm:$0xff]  }
  0x17   : > { %v3201_v27 = vld [vmem:[%s4649_s1 + $0x4] ss:$8 sps:$4 sm:$0xff]   ;;  %v3200_v28 = vld [vmem:[%s4649_s1 + $0x110] ss:$8 sps:$4 sm:$0xff]   ;;  %v3203_v30 = vld [vmem:[%s4649_s1] ss:$8 sps:$4 sm:$0xff]  }
  0x18   : > { %415 = vmatpush1.bf16.msra.mxu0 %v3173_v9  ;;  %v3204_v29 = vld [vmem:[%s4649_s1 + $0x104] ss:$8 sps:$4 sm:$0xff]   ;;  %v3207_v31 = vld [vmem:[%s4649_s1 + $0xf4] ss:$8 sps:$4 sm:$0xff]   ;;  %s4663_s13 = smov (!%p179_p5, %s3629_s13), 1  ;;  %s4665_s12 = smov (!%p186_p6, %s3625_s12), 2 }
  0x19   : > { %416 = vmatprep.subr.bf16.mxu0 %v3177_v11  ;;  %667 = vmatpush1.bf16.msra.mxu1 %v3176_v12  ;;  %v3206_v32 = vld [vmem:[%s4649_s1 + $0x100] ss:$8 sps:$4 sm:$0xff]   ;;  %v3210_v33 = vld [vmem:[%s4649_s1 + $0x1f4] ss:$8 sps:$4 sm:$0xff]   ;;  %v3209_v34 = vld [vmem:[%s4649_s1 + $0xf0] ss:$8 sps:$4 sm:$0xff]  }
  0x1a   : > { %668 = vmatprep.subr.bf16.mxu1 %v3180_v13  ;;  %v3213_v35 = vld [vmem:[%s4649_s1 + $0xe4] ss:$8 sps:$4 sm:$0xff]   ;;  %s3117_s4 = smul.u32 40, %s4663_s13  ;;  %v3212_v36 = vld [vmem:[%s4649_s1 + $0x1f0] ss:$8 sps:$4 sm:$0xff]   ;;  %s2548_s25 = sshll.u32 %s4665_s12, 1 }
  0x1b   : > { %v3216_v37 = vld [vmem:[%s4649_s1 + $0x1e4] ss:$8 sps:$4 sm:$0xff]   ;;  %v3215_v38 = vld [vmem:[%s4649_s1 + $0xe0] ss:$8 sps:$4 sm:$0xff]   ;;  %v3219_v39 = vld [vmem:[%s4649_s1 + $0xd4] ss:$8 sps:$4 sm:$0xff]  }
  0x1c   : > { %417 = vmatpush1.bf16.msra.mxu0 %v3179_v14  ;;  %s183_s22 = scalar_lea.vmem %s4648_s0, %s3117_s4  ;;  %v3218_v40 = vld [vmem:[%s4649_s1 + $0x1e0] ss:$8 sps:$4 sm:$0xff]   ;;  %v3222_v41 = vld [vmem:[%s4649_s1 + $0x1d4] ss:$8 sps:$4 sm:$0xff]   ;;  %v3221_v42 = vld [vmem:[%s4649_s1 + $0xd0] ss:$8 sps:$4 sm:$0xff]  }
  0x1d   : > { %418 = vmatprep.subr.bf16.mxu0 %v3183_v15  ;;  %669 = vmatpush1.bf16.msra.mxu1 %v3182_v16  ;;  %s3835_s30 = scalar_lea.vmem %s183_s22, %s3116_s23  ;;  %v3225_v43 = vld [vmem:[%s4649_s1 + $0xc4] ss:$8 sps:$4 sm:$0xff]   ;;  %v3224_v44 = vld [vmem:[%s4649_s1 + $0x1d0] ss:$8 sps:$4 sm:$0xff]   ;;  %v3227_v47 = vld [vmem:[%s4649_s1 + $0xc0] ss:$8 sps:$4 sm:$0xff]  }
  0x1e   : > { %670 = vmatprep.subr.bf16.mxu1 %v3186_v17  ;;  %v3228_v45 = vld [vmem:[%s4649_s1 + $0x1c4] ss:$8 sps:$4 sm:$0xff]   ;;  %v3231_v49 = vld [vmem:[%s4649_s1 + $0xb4] ss:$8 sps:$4 sm:$0xff]   ;;  %v3230_v50 = vld [vmem:[%s4649_s1 + $0x1c0] ss:$8 sps:$4 sm:$0xff]  }
  0x1f   : > { %v210_v46 = vld [vmem:[%s3835_s30] sm:$0x33]  ;;  %v3234_v53 = vld [vmem:[%s4649_s1 + $0x1b4] ss:$8 sps:$4 sm:$0xff]   ;;  %v3233_v54 = vld [vmem:[%s4649_s1 + $0xb0] ss:$8 sps:$4 sm:$0xff]  }
  0x20   : > { %419 = vmatpush1.bf16.msra.mxu0 %v3185_v18  ;;  %v2553_v48 = vcombine.high %v210_v46, %v210_v46  ;;  %v3237_v56 = vld [vmem:[%s4649_s1 + $0xa4] ss:$8 sps:$4 sm:$0xff]   ;;  %v3236_v57 = vld [vmem:[%s4649_s1 + $0x1b0] ss:$8 sps:$4 sm:$0xff]   ;;  %v3239_v60 = vld [vmem:[%s4649_s1 + $0xa0] ss:$8 sps:$4 sm:$0xff]   ;;  %v2552_v62 = vcombine.low %v210_v46, %v210_v46 }
  0x21   : > { %420 = vmatprep.subr.bf16.mxu0 %v3189_v19  ;;  %671 = vmatpush1.bf16.msra.mxu1 %v3188_v20  ;;  %v3240_v59 = vld [vmem:[%s4649_s1 + $0x1a4] ss:$8 sps:$4 sm:$0xff]   ;;  %v3243_v61 = vld [vmem:[%s4649_s1 + $0x94] ss:$8 sps:$4 sm:$0xff]   ;;  %v3242_v63 = vld [vmem:[%s4649_s1 + $0x1a0] ss:$8 sps:$4 sm:$0xff]  }
  0x22   : > { %672 = vmatprep.subr.bf16.mxu1 %v3192_v21  ;;  %442 = vmatprep.mubr.bf16.mxu0 %v2553_v48  ;;  %v494_v51 = vshrl.u32 %v2553_v48, 16  ;;  %v496_v52 = vshll.u32 %v2553_v48, 16  ;;  %v3246_v0 = vld [vmem:[%s4649_s1 + $0x194] ss:$8 sps:$4 sm:$0xff]   ;;  %v3245_v1 = vld [vmem:[%s4649_s1 + $0x90] ss:$8 sps:$4 sm:$0xff]  }
  0x23   : > { %v3249_v2 = vld [vmem:[%s4649_s1 + $0x84] ss:$8 sps:$4 sm:$0xff]   ;;  %v489_v3 = vshll.u32 %v2552_v62, 16  ;;  %v3248_v4 = vld [vmem:[%s4649_s1 + $0x190] ss:$8 sps:$4 sm:$0xff]   ;;  %v487_v8 = vshrl.u32 %v2552_v62, 16 }
  0x24   : > { %421 = vmatpush1.bf16.msra.mxu0 %v3191_v22  ;;  %v498_v55 = vrot.slane %v496_v52, 1  ;;  %v3252_v5 = vld [vmem:[%s4649_s1 + $0x184] ss:$8 sps:$4 sm:$0xff]   ;;  %v3251_v6 = vld [vmem:[%s4649_s1 + $0x80] ss:$8 sps:$4 sm:$0xff]   ;;  %s3118_s24 = smul.u32 6, %s4663_s13 }
  0x25   : > { %422 = vmatprep.subr.bf16.mxu0 %v3195_v23  ;;  %673 = vmatpush1.bf16.msra.mxu1 %v3194_v24  ;;  %v3259_v7 = vld [vmem:[%s4649_s1 + $0x274] ss:$8 sps:$4 sm:$0xff]   ;;  %v491_v9 = vrot.slane %v489_v3, 1  ;;  %v3255_v10 = vld [vmem:[%s4649_s1 + $0x180] ss:$8 sps:$4 sm:$0xff]  }
  0x26   : > { %674 = vmatprep.subr.bf16.mxu1 %v3198_v25  ;;  %v499_v58 = vor.u32 %v498_v55, %v494_v51  ;;  %v3262_v11 = vld [vmem:[%s4649_s1 + $0x374] ss:$8 sps:$4 sm:$0xff]   ;;  %v3257_v12 = vld [vmem:[%s4649_s1 + $0x270] ss:$8 sps:$4 sm:$0xff]   ;;  %v3265_v14 = vld [vmem:[%s4649_s1 + $0x264] ss:$8 sps:$4 sm:$0xff]   ;;  %s190_s26 = sadd.s32 %s3118_s24, %s2548_s25 }
  0x27   : > { %v492_v13 = vor.u32 %v491_v9, %v487_v8  ;;  %v3260_v15 = vld [vmem:[%s4649_s1 + $0x370] ss:$8 sps:$4 sm:$0xff]   ;;  %v3268_v16 = vld [vmem:[%s4649_s1 + $0x364] ss:$8 sps:$4 sm:$0xff]   ;;  %v3263_v17 = vld [vmem:[%s4649_s1 + $0x260] ss:$8 sps:$4 sm:$0xff]  }
  0x28   : > { %423 = vmatpush1.bf16.msra.mxu0 %v3197_v26  ;;  %694 = vmatprep.mubr.bf16.mxu1 %v499_v58  ;;  %v3271_v18 = vld [vmem:[%s4649_s1 + $0x254] ss:$8 sps:$4 sm:$0xff]   ;;  %v3266_v19 = vld [vmem:[%s4649_s1 + $0x360] ss:$8 sps:$4 sm:$0xff]   ;;  %v3269_v21 = vld [vmem:[%s4649_s1 + $0x250] ss:$8 sps:$4 sm:$0xff]  }
  0x29   : > { %424 = vmatprep.subr.bf16.mxu0 %v3201_v27  ;;  %675 = vmatpush1.bf16.msra.mxu1 %v3200_v28  ;;  %v3274_v20 = vld [vmem:[%s4649_s1 + $0x354] ss:$8 sps:$4 sm:$0xff]   ;;  %v3277_v22 = vld [vmem:[%s4649_s1 + $0x244] ss:$8 sps:$4 sm:$0xff]   ;;  %v3272_v23 = vld [vmem:[%s4649_s1 + $0x350] ss:$8 sps:$4 sm:$0xff]  }
  0x2a   : > { %676 = vmatprep.subr.bf16.mxu1 %v3204_v29  ;;  %v3280_v24 = vld [vmem:[%s4649_s1 + $0x344] ss:$8 sps:$4 sm:$0xff]   ;;  %v3275_v25 = vld [vmem:[%s4649_s1 + $0x240] ss:$8 sps:$4 sm:$0xff]   ;;  %v3283_v26 = vld [vmem:[%s4649_s1 + $0x234] ss:$8 sps:$4 sm:$0xff]  }
  0x2b   : > { %v3278_v27 = vld [vmem:[%s4649_s1 + $0x340] ss:$8 sps:$4 sm:$0xff]   ;;  %v3286_v28 = vld [vmem:[%s4649_s1 + $0x334] ss:$8 sps:$4 sm:$0xff]   ;;  %v3281_v29 = vld [vmem:[%s4649_s1 + $0x230] ss:$8 sps:$4 sm:$0xff]  }
  0x2c   : > { %425 = vmatpush1.bf16.msra.mxu0 %v3203_v30  ;;  %v3289_v30 = vld [vmem:[%s4649_s1 + $0x224] ss:$8 sps:$4 sm:$0xff]   ;;  %v3299_v46 = vld [vmem:[%s4649_s1 + $0x200] ss:$8 sps:$4 sm:$0xff]   ;;  %v3308_v52 = vld [vmem:[%s4649_s1 + $0x3f0] ss:$8 sps:$4 sm:$0xff]  }
  0x2d   : > { %426 = vmatprep.subr.bf16.mxu0 %v3207_v31  ;;  %677 = vmatpush1.bf16.msra.mxu1 %v3206_v32  ;;  %v3284_v31 = vld [vmem:[%s4649_s1 + $0x330] ss:$8 sps:$4 sm:$0xff]   ;;  %v3292_v32 = vld [vmem:[%s4649_s1 + $0x324] ss:$8 sps:$4 sm:$0xff]   ;;  %v3302_v48 = vld [vmem:[%s4649_s1 + $0x300] ss:$8 sps:$4 sm:$0xff]  }
  0x2e   : > { %678 = vmatprep.subr.bf16.mxu1 %v3210_v33  ;;  %v3287_v33 = vld [vmem:[%s4649_s1 + $0x220] ss:$8 sps:$4 sm:$0xff]   ;;  %v3313_v51 = vld [vmem:[%s4649_s1 + $0x2e4] ss:$8 sps:$4 sm:$0xff]   ;;  %v3319_v55 = vld [vmem:[%s4649_s1 + $0x2d4] ss:$8 sps:$4 sm:$0xff]  }
  0x2f   : > { %v3317_v58 = vld [vmem:[%s4649_s1 + $0x2d0] ss:$8 sps:$4 sm:$0xff]   ;;  %v3337_v3 = vld [vmem:[%s4649_s1 + $0x2a4] ss:$8 sps:$4 sm:$0xff]   ;;  %v3338_v8 = vld [vmem:[%s4649_s1 + $0x3a0] ss:$8 sps:$4 sm:$0xff]  }
  0x30   : > { %427 = vmatpush2.bf16.msra.mxu0 %v3209_v34  ;;  %v3295_v34 = vld [vmem:[%s4649_s1 + $0x214] ss:$8 sps:$4 sm:$0xff]   ;;  %s2549_s27 = sshll.u32 %s190_s26, 2 }
  0x31   : > { %428 = vmatprep.subr.bf16.mxu0 %v3213_v35  ;;  %679 = vmatpush2.bf16.msra.mxu1 %v3212_v36  ;;  %v3290_v35 = vld [vmem:[%s4649_s1 + $0x320] ss:$8 sps:$4 sm:$0xff]   ;;  %v3298_v36 = vld [vmem:[%s4649_s1 + $0x314] ss:$8 sps:$4 sm:$0xff]   ;;  %s192_s4 = scalar_lea.vmem %s4651_s3, %s2549_s27 }
  0x32   : > { %680 = vmatprep.subr.bf16.mxu1 %v3216_v37  ;;  %v3980_v37 = vld [vmem:[%s3835_s30] sm:$0x66]  ;;  %v3346_v9 = vld [vmem:[%s4649_s1 + $0x394] ss:$8 sps:$4 sm:$0xff]  }
  0x34   : > { %429 = vmatpush2.bf16.msra.mxu0 %v3215_v38  ;;  %v3293_v38 = vld [vmem:[%s4649_s1 + $0x210] ss:$8 sps:$4 sm:$0xff]  }
  0x35   : > { %430 = vmatprep.subr.bf16.mxu0 %v3219_v39  ;;  %681 = vmatpush2.bf16.msra.mxu1 %v3218_v40  ;;  %v2683_v39 = vcombine.high %v3980_v37, %v3980_v37  ;;  %v3301_v40 = vld [vmem:[%s4649_s1 + $0x204] ss:$8 sps:$4 sm:$0xff]  }
  0x36   : > { %682 = vmatprep.subr.bf16.mxu1 %v3222_v41  ;;  %v3991_v41 = vld [vmem:[%s3835_s30 + $0x8] sm:$0x33] }
  0x38   : > { %431 = vmatpush2.bf16.msra.mxu0 %v3221_v42  ;;  %v3296_v42 = vld [vmem:[%s4649_s1 + $0x310] ss:$8 sps:$4 sm:$0xff]  }
  0x39   : > { %432 = vmatprep.subr.bf16.mxu0 %v3225_v43  ;;  %683 = vmatpush2.bf16.msra.mxu1 %v3224_v44  ;;  %v745_v43 = vrot.slane %v2683_v39, 1  ;;  %v3998_v44 = vcombine.high %v3991_v41, %v3991_v41  ;;  %v3380_v39 = vld [vmem:[%s4649_s1 + $0x544] ss:$8 sps:$4 sm:$0xff]  }
  0x3a   : > { %684 = vmatprep.subr.bf16.mxu1 %v3228_v45  ;;  %v3304_v45 = vld [vmem:[%s4649_s1 + $0x304] ss:$8 sps:$4 sm:$0xff]  }
  0x3c   : > { %433 = vmatpush2.bf16.msra.mxu0 %v3227_v47  ;;  %v3307_v47 = vld [vmem:[%s4649_s1 + $0x2f4] ss:$8 sps:$4 sm:$0xff]  }
  0x3d   : > { %434 = vmatprep.subr.bf16.mxu0 %v3231_v49  ;;  %685 = vmatpush2.bf16.msra.mxu1 %v3230_v50  ;;  %v3310_v49 = vld [vmem:[%s4649_s1 + $0x3f4] ss:$8 sps:$4 sm:$0xff]   ;;  %v3305_v50 = vld [vmem:[%s4649_s1 + $0x2f0] ss:$8 sps:$4 sm:$0xff]  }
  0x3e   : > { %686 = vmatprep.subr.bf16.mxu1 %v3234_v53  ;;  %v3316_v53 = vld [vmem:[%s4649_s1 + $0x3e4] ss:$8 sps:$4 sm:$0xff]  }
  0x40   : > { %435 = vmatpush2.bf16.msra.mxu0 %v3233_v54  ;;  %v3311_v54 = vld [vmem:[%s4649_s1 + $0x2e0] ss:$8 sps:$4 sm:$0xff]  }
  0x41   : > { %436 = vmatprep.subr.bf16.mxu0 %v3237_v56  ;;  %687 = vmatpush2.bf16.msra.mxu1 %v3236_v57  ;;  %v3314_v56 = vld [vmem:[%s4649_s1 + $0x3e0] ss:$8 sps:$4 sm:$0xff]   ;;  %v3322_v57 = vld [vmem:[%s4649_s1 + $0x3d4] ss:$8 sps:$4 sm:$0xff]  }
  0x42   : > { %688 = vmatprep.subr.bf16.mxu1 %v3240_v59  ;;  %v3325_v59 = vld [vmem:[%s4649_s1 + $0x2c4] ss:$8 sps:$4 sm:$0xff]  }
  0x44   : > { %437 = vmatpush2.bf16.msra.mxu0 %v3239_v60  ;;  %v3320_v60 = vld [vmem:[%s4649_s1 + $0x3d0] ss:$8 sps:$4 sm:$0xff]  }
  0x45   : > { %438 = vmatprep.subr.bf16.mxu0 %v3243_v61  ;;  %689 = vmatpush2.bf16.msra.mxu1 %v3242_v63  ;;  %v3328_v61 = vld [vmem:[%s4649_s1 + $0x3c4] ss:$8 sps:$4 sm:$0xff]   ;;  %v3331_v63 = vld [vmem:[%s4649_s1 + $0x2b4] ss:$8 sps:$4 sm:$0xff]  }
  0x46   : > { %690 = vmatprep.subr.bf16.mxu1 %v3246_v0  ;;  %v3326_v0 = vld [vmem:[%s4649_s1 + $0x3c0] ss:$8 sps:$4 sm:$0xff]  }
  0x48   : > { %439 = vmatpush2.bf16.msra.mxu0 %v3245_v1  ;;  %v3334_v1 = vld [vmem:[%s4649_s1 + $0x3b4] ss:$8 sps:$4 sm:$0xff]  }
  0x49   : > { %440 = vmatprep.subr.bf16.mxu0 %v3249_v2  ;;  %691 = vmatpush2.bf16.msra.mxu1 %v3248_v4  ;;  %v3329_v2 = vld [vmem:[%s4649_s1 + $0x2b0] ss:$8 sps:$4 sm:$0xff]  }
  0x4a   : > { %692 = vmatprep.subr.bf16.mxu1 %v3252_v5  ;;  %v3332_v4 = vld [vmem:[%s4649_s1 + $0x3b0] ss:$8 sps:$4 sm:$0xff]   ;;  %v3340_v5 = vld [vmem:[%s4649_s1 + $0x3a4] ss:$8 sps:$4 sm:$0xff]  }
  0x4c   : > { %441 = vmatpush2.bf16.msra.mxu0 %v3251_v6  ;;  %v3335_v6 = vld [vmem:[%s4649_s1 + $0x2a0] ss:$8 sps:$4 sm:$0xff]  }
  0x4d   : > { %908 = vmatprep.subr.bf16.mxu0 %v3259_v7  ;;  %693 = vmatpush2.bf16.msra.mxu1 %v3255_v10  ;;  %v3343_v7 = vld [vmem:[%s4649_s1 + $0x294] ss:$8 sps:$4 sm:$0xff]   ;;  %v3341_v10 = vld [vmem:[%s4649_s1 + $0x290] ss:$8 sps:$4 sm:$0xff]  }
  0x4e   : > { %1156 = vmatprep.subr.bf16.mxu1 %v3262_v11  ;;  %v1242_v11 = vshll.u32 %v3998_v44, 16 }
  0x4f   : > { %443 = vmatmul.mubr.bf16.vlgmr.msra.gmra.mxu0 %v2552_v62  ;;  %v3323_v62 = vld [vmem:[%s4649_s1 + $0x2c0] ss:$8 sps:$4 sm:$0xff]  }
  0x50   : > { %909 = vmatpush1.bf16.msra.mxu0 %v3257_v12  ;;  %695 = vmatmul.mubr.bf16.vlgmr.msra.gmra.mxu1 %v492_v13  ;;  %v3349_v12 = vld [vmem:[%s4649_s1 + $0x284] ss:$8 sps:$4 sm:$0xff]   ;;  %v3344_v13 = vld [vmem:[%s4649_s1 + $0x390] ss:$8 sps:$4 sm:$0xff]  }
  0x51   : > { %910 = vmatprep.subr.bf16.mxu0 %v3265_v14  ;;  %1157 = vmatpush1.bf16.msra.mxu1 %v3260_v15  ;;  %v3352_v14 = vld [vmem:[%s4649_s1 + $0x384] ss:$8 sps:$4 sm:$0xff]   ;;  %v2682_v15 = vcombine.low %v3980_v37, %v3980_v37 }
  0x52   : > { %1158 = vmatprep.subr.bf16.mxu1 %v3268_v16  ;;  %940 = vmatprep.mubr.bf16.mxu0 %v745_v43  ;;  %v3347_v16 = vld [vmem:[%s4649_s1 + $0x280] ss:$8 sps:$4 sm:$0xff]   ;;  %v3377_v37 = vld [vmem:[%s4649_s1 + $0x444] ss:$8 sps:$4 sm:$0xff]   ;;  %v3386_v43 = vld [vmem:[%s4649_s1 + $0x534] ss:$8 sps:$4 sm:$0xff]  }
  0x53   : > { %1188 = vmatprep.mubr.bf16.mxu1 %v3998_v44 }
  0x54   : > { %911 = vmatpush1.bf16.msra.mxu0 %v3263_v17  ;;  %v1240_v17 = vshrl.u32 %v3998_v44, 16  ;;  %v3381_v44 = vld [vmem:[%s4649_s1 + $0x430] ss:$8 sps:$4 sm:$0xff]  }
  0x55   : > { %912 = vmatprep.subr.bf16.mxu0 %v3271_v18  ;;  %1159 = vmatpush1.bf16.msra.mxu1 %v3266_v19  ;;  %v1244_v18 = vrot.slane %v1242_v11, 1  ;;  %v3357_v19 = vld [vmem:[%s4649_s1 + $0x474] ss:$8 sps:$4 sm:$0xff]  }
  0x56   : > { %1160 = vmatprep.subr.bf16.mxu1 %v3274_v20  ;;  %v3350_v20 = vld [vmem:[%s4649_s1 + $0x380] ss:$8 sps:$4 sm:$0xff]   ;;  %v3434_v11 = vld [vmem:[%s4649_s1 + $0x5b4] ss:$8 sps:$4 sm:$0xff]  }
  0x58   : > { %913 = vmatpush1.bf16.msra.mxu0 %v3269_v21  ;;  %v744_v21 = vrot.slane %v2682_v15, 1  ;;  %v3440_v15 = vld [vmem:[%s4649_s1 + $0x5a4] ss:$8 sps:$4 sm:$0xff]  }
  0x59   : > { %914 = vmatprep.subr.bf16.mxu0 %v3277_v22  ;;  %1161 = vmatpush1.bf16.msra.mxu1 %v3272_v23  ;;  %v3362_v22 = vld [vmem:[%s4649_s1 + $0x574] ss:$8 sps:$4 sm:$0xff]   ;;  %v3355_v23 = vld [vmem:[%s4649_s1 + $0x470] ss:$8 sps:$4 sm:$0xff]  }
  0x5a   : > { %1162 = vmatprep.subr.bf16.mxu1 %v3280_v24  ;;  %v1245_v24 = vor.u32 %v1244_v18, %v1240_v17  ;;  %v3435_v17 = vld [vmem:[%s4649_s1 + $0x4a0] ss:$8 sps:$4 sm:$0xff]   ;;  %v3443_v18 = vld [vmem:[%s4649_s1 + $0x494] ss:$8 sps:$4 sm:$0xff]  }
  0x5c   : > { %915 = vmatpush1.bf16.msra.mxu0 %v3275_v25  ;;  %v4121_v25 = vcombine.low %v3991_v41, %v3991_v41  ;;  %v3383_v41 = vld [vmem:[%s4649_s1 + $0x434] ss:$8 sps:$4 sm:$0xff]  }
  0x5d   : > { %916 = vmatprep.subr.bf16.mxu0 %v3283_v26  ;;  %1163 = vmatpush1.bf16.msra.mxu1 %v3278_v27  ;;  %v3365_v26 = vld [vmem:[%s4649_s1 + $0x464] ss:$8 sps:$4 sm:$0xff]   ;;  %v3360_v27 = vld [vmem:[%s4649_s1 + $0x570] ss:$8 sps:$4 sm:$0xff]  }
  0x5e   : > { %1164 = vmatprep.subr.bf16.mxu1 %v3286_v28  ;;  %v3368_v28 = vld [vmem:[%s4649_s1 + $0x564] ss:$8 sps:$4 sm:$0xff]  }
  0x60   : > { %917 = vmatpush1.bf16.msra.mxu0 %v3281_v29  ;;  %v3363_v29 = vld [vmem:[%s4649_s1 + $0x460] ss:$8 sps:$4 sm:$0xff]  }
  0x61   : > { %918 = vmatprep.subr.bf16.mxu0 %v3289_v30  ;;  %1165 = vmatpush1.bf16.msra.mxu1 %v3284_v31  ;;  %v4136_v30 = vld [vmem:[%s3835_s30 + $0x8] sm:$0x66]  ;;  %v3371_v31 = vld [vmem:[%s4649_s1 + $0x454] ss:$8 sps:$4 sm:$0xff]  }
  0x62   : > { %1166 = vmatprep.subr.bf16.mxu1 %v3292_v32  ;;  %v2882_v32 = vcombine.high %v4136_v30, %v4136_v30 }
  0x64   : > { %919 = vmatpush1.bf16.msra.mxu0 %v3287_v33  ;;  %v3366_v33 = vld [vmem:[%s4649_s1 + $0x560] ss:$8 sps:$4 sm:$0xff]  }
  0x65   : > { %920 = vmatprep.subr.bf16.mxu0 %v3295_v34  ;;  %1167 = vmatpush1.bf16.msra.mxu1 %v3290_v35  ;;  %v3374_v34 = vld [vmem:[%s4649_s1 + $0x554] ss:$8 sps:$4 sm:$0xff]   ;;  %v1491_v35 = vrot.slane %v2882_v32, 1  ;;  %v3447_v32 = vld [vmem:[%s4649_s1 + $0x480] ss:$8 sps:$4 sm:$0xff]  }
  0x66   : > { %1168 = vmatprep.subr.bf16.mxu1 %v3298_v36  ;;  %v3369_v36 = vld [vmem:[%s4649_s1 + $0x450] ss:$8 sps:$4 sm:$0xff]  }
  0x68   : > { %921 = vmatpush1.bf16.msra.mxu0 %v3293_v38  ;;  %v3372_v38 = vld [vmem:[%s4649_s1 + $0x550] ss:$8 sps:$4 sm:$0xff]  }
  0x69   : > { %922 = vmatprep.subr.bf16.mxu0 %v3301_v40  ;;  %1169 = vmatpush1.bf16.msra.mxu1 %v3296_v42  ;;  %v3375_v40 = vld [vmem:[%s4649_s1 + $0x440] ss:$8 sps:$4 sm:$0xff]  }
  0x6a   : > { %1170 = vmatprep.subr.bf16.mxu1 %v3304_v45  ;;  %v3378_v42 = vld [vmem:[%s4649_s1 + $0x540] ss:$8 sps:$4 sm:$0xff]   ;;  %v3389_v45 = vld [vmem:[%s4649_s1 + $0x424] ss:$8 sps:$4 sm:$0xff]  }
  0x6c   : > { %923 = vmatpush1.bf16.msra.mxu0 %v3299_v46  ;;  %v3384_v46 = vld [vmem:[%s4649_s1 + $0x530] ss:$8 sps:$4 sm:$0xff]  }
  0x6d   : > { %924 = vmatprep.subr.bf16.mxu0 %v3307_v47  ;;  %1171 = vmatpush1.bf16.msra.mxu1 %v3302_v48  ;;  %v3392_v47 = vld [vmem:[%s4649_s1 + $0x524] ss:$8 sps:$4 sm:$0xff]   ;;  %v3387_v48 = vld [vmem:[%s4649_s1 + $0x420] ss:$8 sps:$4 sm:$0xff]  }
  0x6e   : > { %1172 = vmatprep.subr.bf16.mxu1 %v3310_v49  ;;  %v3395_v49 = vld [vmem:[%s4649_s1 + $0x414] ss:$8 sps:$4 sm:$0xff]  }
  0x70   : > { %925 = vmatpush2.bf16.msra.mxu0 %v3305_v50  ;;  %v3390_v50 = vld [vmem:[%s4649_s1 + $0x520] ss:$8 sps:$4 sm:$0xff]  }
  0x71   : > { %926 = vmatprep.subr.bf16.mxu0 %v3313_v51  ;;  %1173 = vmatpush2.bf16.msra.mxu1 %v3308_v52  ;;  %v3398_v51 = vld [vmem:[%s4649_s1 + $0x514] ss:$8 sps:$4 sm:$0xff]   ;;  %v3393_v52 = vld [vmem:[%s4649_s1 + $0x410] ss:$8 sps:$4 sm:$0xff]  }
  0x72   : > { %1174 = vmatprep.subr.bf16.mxu1 %v3316_v53  ;;  %v3401_v53 = vld [vmem:[%s4649_s1 + $0x404] ss:$8 sps:$4 sm:$0xff]  }
  0x74   : > { %927 = vmatpush2.bf16.msra.mxu0 %v3311_v54  ;;  %v3396_v54 = vld [vmem:[%s4649_s1 + $0x510] ss:$8 sps:$4 sm:$0xff]  }
  0x75   : > { %928 = vmatprep.subr.bf16.mxu0 %v3319_v55  ;;  %1175 = vmatpush2.bf16.msra.mxu1 %v3314_v56  ;;  %v3404_v55 = vld [vmem:[%s4649_s1 + $0x504] ss:$8 sps:$4 sm:$0xff]   ;;  %v3399_v56 = vld [vmem:[%s4649_s1 + $0x400] ss:$8 sps:$4 sm:$0xff]  }
  0x76   : > { %1176 = vmatprep.subr.bf16.mxu1 %v3322_v57  ;;  %v3407_v57 = vld [vmem:[%s4649_s1 + $0x4f4] ss:$8 sps:$4 sm:$0xff]  }
  0x78   : > { %929 = vmatpush2.bf16.msra.mxu0 %v3317_v58  ;;  %v3402_v58 = vld [vmem:[%s4649_s1 + $0x500] ss:$8 sps:$4 sm:$0xff]  }
  0x79   : > { %930 = vmatprep.subr.bf16.mxu0 %v3325_v59  ;;  %1177 = vmatpush2.bf16.msra.mxu1 %v3320_v60  ;;  %v3410_v59 = vld [vmem:[%s4649_s1 + $0x5f4] ss:$8 sps:$4 sm:$0xff]   ;;  %v3405_v60 = vld [vmem:[%s4649_s1 + $0x4f0] ss:$8 sps:$4 sm:$0xff]  }
  0x7a   : > { %1178 = vmatprep.subr.bf16.mxu1 %v3328_v61  ;;  %v3413_v61 = vld [vmem:[%s4649_s1 + $0x4e4] ss:$8 sps:$4 sm:$0xff]  }
  0x7c   : > { %931 = vmatpush2.bf16.msra.mxu0 %v3323_v62  ;;  %v3408_v62 = vld [vmem:[%s4649_s1 + $0x5f0] ss:$8 sps:$4 sm:$0xff]  }
  0x7d   : > { %932 = vmatprep.subr.bf16.mxu0 %v3331_v63  ;;  %1179 = vmatpush2.bf16.msra.mxu1 %v3326_v0  ;;  %v3416_v63 = vld [vmem:[%s4649_s1 + $0x5e4] ss:$8 sps:$4 sm:$0xff]   ;;  %v3411_v0 = vld [vmem:[%s4649_s1 + $0x4e0] ss:$8 sps:$4 sm:$0xff]  }
  0x7e   : > { %1180 = vmatprep.subr.bf16.mxu1 %v3334_v1  ;;  %v3419_v1 = vld [vmem:[%s4649_s1 + $0x4d4] ss:$8 sps:$4 sm:$0xff]  }
  0x80   : > { %933 = vmatpush2.bf16.msra.mxu0 %v3329_v2  ;;  %v3414_v2 = vld [vmem:[%s4649_s1 + $0x5e0] ss:$8 sps:$4 sm:$0xff]  }
  0x81   : > { %934 = vmatprep.subr.bf16.mxu0 %v3337_v3  ;;  %1181 = vmatpush2.bf16.msra.mxu1 %v3332_v4  ;;  %v3422_v3 = vld [vmem:[%s4649_s1 + $0x5d4] ss:$8 sps:$4 sm:$0xff]   ;;  %v3417_v4 = vld [vmem:[%s4649_s1 + $0x4d0] ss:$8 sps:$4 sm:$0xff]  }
  0x82   : > { %1182 = vmatprep.subr.bf16.mxu1 %v3340_v5  ;;  %v3425_v5 = vld [vmem:[%s4649_s1 + $0x4c4] ss:$8 sps:$4 sm:$0xff]  }
  0x84   : > { %935 = vmatpush2.bf16.msra.mxu0 %v3335_v6  ;;  %v3420_v6 = vld [vmem:[%s4649_s1 + $0x5d0] ss:$8 sps:$4 sm:$0xff]  }
  0x85   : > { %936 = vmatprep.subr.bf16.mxu0 %v3343_v7  ;;  %1183 = vmatpush2.bf16.msra.mxu1 %v3338_v8  ;;  %v3428_v7 = vld [vmem:[%s4649_s1 + $0x5c4] ss:$8 sps:$4 sm:$0xff]   ;;  %v3423_v8 = vld [vmem:[%s4649_s1 + $0x4c0] ss:$8 sps:$4 sm:$0xff]  }
  0x86   : > { %1184 = vmatprep.subr.bf16.mxu1 %v3346_v9  ;;  %v3431_v9 = vld [vmem:[%s4649_s1 + $0x4b4] ss:$8 sps:$4 sm:$0xff]  }
  0x88   : > { %937 = vmatpush2.bf16.msra.mxu0 %v3341_v10  ;;  %v3426_v10 = vld [vmem:[%s4649_s1 + $0x5c0] ss:$8 sps:$4 sm:$0xff]  }
  0x89   : > { %938 = vmatprep.subr.bf16.mxu0 %v3349_v12  ;;  %1185 = vmatpush2.bf16.msra.mxu1 %v3344_v13  ;;  %v3429_v12 = vld [vmem:[%s4649_s1 + $0x4b0] ss:$8 sps:$4 sm:$0xff]  }
  0x8a   : > { %1186 = vmatprep.subr.bf16.mxu1 %v3352_v14  ;;  %v3432_v13 = vld [vmem:[%s4649_s1 + $0x5b0] ss:$8 sps:$4 sm:$0xff]   ;;  %v3437_v14 = vld [vmem:[%s4649_s1 + $0x4a4] ss:$8 sps:$4 sm:$0xff]  }
  0x8c   : > { %939 = vmatpush2.bf16.msra.mxu0 %v3347_v16  ;;  %v4283_v16 = vld [vmem:[%s3835_s30 + $0x10] sm:$0x33] }
  0x8d   : > { %1408 = vmatprep.subr.bf16.mxu0 %v3357_v19  ;;  %1187 = vmatpush2.bf16.msra.mxu1 %v3350_v20  ;;  %v3438_v19 = vld [vmem:[%s4649_s1 + $0x5a0] ss:$8 sps:$4 sm:$0xff]   ;;  %v2950_v20 = vcombine.high %v4283_v16, %v4283_v16 }
  0x8e   : > { %1654 = vmatprep.subr.bf16.mxu1 %v3362_v22  ;;  %v1235_v22 = vshll.u32 %v4121_v25, 16 }
  0x8f   : > { %941 = vmatmul.mubr.bf16.vlgmr.msra.gmra.mxu0 %v744_v21  ;;  %v3446_v21 = vld [vmem:[%s4649_s1 + $0x594] ss:$8 sps:$4 sm:$0xff]  }
  0x90   : > { %1409 = vmatpush1.bf16.msra.mxu0 %v3355_v23  ;;  %1440 = vmatprep.mubr.bf16.mxu0 %v1245_v24  ;;  %v3441_v23 = vld [vmem:[%s4649_s1 + $0x490] ss:$8 sps:$4 sm:$0xff]   ;;  %v3449_v24 = vld [vmem:[%s4649_s1 + $0x484] ss:$8 sps:$4 sm:$0xff]  }
  0x91   : > { %1189 = vmatmul.mubr.bf16.vlgmr.msra.gmra.mxu1 %v4121_v25  ;;  %1410 = vmatprep.subr.bf16.mxu0 %v3365_v26  ;;  %v3444_v26 = vld [vmem:[%s4649_s1 + $0x590] ss:$8 sps:$4 sm:$0xff]  }
  0x92   : > { %1655 = vmatpush1.bf16.msra.mxu1 %v3360_v27  ;;  %1686 = vmatprep.mubr.bf16.mxu1 %v1491_v35  ;;  %v1988_v27 = vshll.u32 %v2950_v20, 16  ;;  %v3450_v35 = vld [vmem:[%s4649_s1 + $0x580] ss:$8 sps:$4 sm:$0xff]  }
  0x93   : > { %1656 = vmatprep.subr.bf16.mxu1 %v3368_v28  ;;  %v3452_v28 = vld [vmem:[%s4649_s1 + $0x584] ss:$8 sps:$4 sm:$0xff]  }
  0x94   : > { %1411 = vmatpush1.bf16.msra.mxu0 %v3363_v29  ;;  %v1233_v29 = vshrl.u32 %v4121_v25, 16  ;;  %v1986_v25 = vshrl.u32 %v2950_v20, 16 }
  0x95   : > { %1412 = vmatprep.subr.bf16.mxu0 %v3371_v31  ;;  %v1237_v31 = vrot.slane %v1235_v22, 1  ;;  %v3529_v22 = vld [vmem:[%s4649_s1 + $0x6b4] ss:$8 sps:$4 sm:$0xff]  }
  0x96   : > { %1657 = vmatpush1.bf16.msra.mxu1 %v3366_v33  ;;  %v3455_v33 = vld [vmem:[%s4649_s1 + $0x674] ss:$8 sps:$4 sm:$0xff]  }
  0x97   : > { %1658 = vmatprep.subr.bf16.mxu1 %v3374_v34  ;;  %v2881_v34 = vcombine.low %v4136_v30, %v4136_v30 }
  0x98   : > { %1413 = vmatpush1.bf16.msra.mxu0 %v3369_v36  ;;  %v1990_v36 = vrot.slane %v1988_v27, 1  ;;  %v3535_v27 = vld [vmem:[%s4649_s1 + $0x6a4] ss:$8 sps:$4 sm:$0xff]  }
  0x99   : > { %1414 = vmatprep.subr.bf16.mxu0 %v3377_v37  ;;  %v1238_v37 = vor.u32 %v1237_v31, %v1233_v29  ;;  %v1490_v30 = vrot.slane %v2881_v34, 1  ;;  %v3538_v29 = vld [vmem:[%s4649_s1 + $0x7a4] ss:$8 sps:$4 sm:$0xff]   ;;  %v3533_v31 = vld [vmem:[%s4649_s1 + $0x6a0] ss:$8 sps:$4 sm:$0xff]   ;;  %v2949_v34 = vcombine.low %v4283_v16, %v4283_v16 }
  0x9a   : > { %1659 = vmatpush1.bf16.msra.mxu1 %v3372_v38  ;;  %v3460_v38 = vld [vmem:[%s4649_s1 + $0x774] ss:$8 sps:$4 sm:$0xff]   ;;  %v3547_v16 = vld [vmem:[%s4649_s1 + $0x684] ss:$8 sps:$4 sm:$0xff]  }
  0x9b   : > { %1660 = vmatprep.subr.bf16.mxu1 %v3380_v39  ;;  %v3453_v39 = vld [vmem:[%s4649_s1 + $0x670] ss:$8 sps:$4 sm:$0xff]  }
  0x9c   : > { %1415 = vmatpush1.bf16.msra.mxu0 %v3375_v40  ;;  %v3463_v40 = vld [vmem:[%s4649_s1 + $0x664] ss:$8 sps:$4 sm:$0xff]  }
  0x9d   : > { %1416 = vmatprep.subr.bf16.mxu0 %v3383_v41  ;;  %v3458_v41 = vld [vmem:[%s4649_s1 + $0x770] ss:$8 sps:$4 sm:$0xff]  }
  0x9e   : > { %1661 = vmatpush1.bf16.msra.mxu1 %v3378_v42  ;;  %v1991_v42 = vor.u32 %v1990_v36, %v1986_v25  ;;  %v3544_v25 = vld [vmem:[%s4649_s1 + $0x794] ss:$8 sps:$4 sm:$0xff]   ;;  %v3539_v36 = vld [vmem:[%s4649_s1 + $0x690] ss:$8 sps:$4 sm:$0xff]  }
  0x9f   : > { %1662 = vmatprep.subr.bf16.mxu1 %v3386_v43  ;;  %v3466_v43 = vld [vmem:[%s4649_s1 + $0x764] ss:$8 sps:$4 sm:$0xff]  }
  0xa0   : > { %1417 = vmatpush1.bf16.msra.mxu0 %v3381_v44  ;;  %v3461_v44 = vld [vmem:[%s4649_s1 + $0x660] ss:$8 sps:$4 sm:$0xff]  }
  0xa1   : > { %1418 = vmatprep.subr.bf16.mxu0 %v3389_v45  ;;  %v3469_v45 = vld [vmem:[%s4649_s1 + $0x654] ss:$8 sps:$4 sm:$0xff]  }
  0xa2   : > { %1663 = vmatpush1.bf16.msra.mxu1 %v3384_v46  ;;  %v3464_v46 = vld [vmem:[%s4649_s1 + $0x760] ss:$8 sps:$4 sm:$0xff]  }
  0xa3   : > { %1664 = vmatprep.subr.bf16.mxu1 %v3392_v47  ;;  %v3472_v47 = vld [vmem:[%s4649_s1 + $0x754] ss:$8 sps:$4 sm:$0xff]  }
  0xa4   : > { %1419 = vmatpush1.bf16.msra.mxu0 %v3387_v48  ;;  %v3467_v48 = vld [vmem:[%s4649_s1 + $0x650] ss:$8 sps:$4 sm:$0xff]  }
  0xa5   : > { %1420 = vmatprep.subr.bf16.mxu0 %v3395_v49  ;;  %v3475_v49 = vld [vmem:[%s4649_s1 + $0x644] ss:$8 sps:$4 sm:$0xff]  }
  0xa6   : > { %1665 = vmatpush1.bf16.msra.mxu1 %v3390_v50  ;;  %v3470_v50 = vld [vmem:[%s4649_s1 + $0x750] ss:$8 sps:$4 sm:$0xff]  }
  0xa7   : > { %1666 = vmatprep.subr.bf16.mxu1 %v3398_v51  ;;  %v3478_v51 = vld [vmem:[%s4649_s1 + $0x744] ss:$8 sps:$4 sm:$0xff]  }
  0xa8   : > { %1421 = vmatpush1.bf16.msra.mxu0 %v3393_v52  ;;  %v3473_v52 = vld [vmem:[%s4649_s1 + $0x640] ss:$8 sps:$4 sm:$0xff]  }
  0xa9   : > { %1422 = vmatprep.subr.bf16.mxu0 %v3401_v53  ;;  %v3481_v53 = vld [vmem:[%s4649_s1 + $0x634] ss:$8 sps:$4 sm:$0xff]  }
  0xaa   : > { %1667 = vmatpush1.bf16.msra.mxu1 %v3396_v54  ;;  %v3476_v54 = vld [vmem:[%s4649_s1 + $0x740] ss:$8 sps:$4 sm:$0xff]  }
  0xab   : > { %1668 = vmatprep.subr.bf16.mxu1 %v3404_v55  ;;  %v3484_v55 = vld [vmem:[%s4649_s1 + $0x734] ss:$8 sps:$4 sm:$0xff]  }
  0xac   : > { %1423 = vmatpush1.bf16.msra.mxu0 %v3399_v56  ;;  %v3479_v56 = vld [vmem:[%s4649_s1 + $0x630] ss:$8 sps:$4 sm:$0xff]  }
  0xad   : > { %1424 = vmatprep.subr.bf16.mxu0 %v3407_v57  ;;  %v3487_v57 = vld [vmem:[%s4649_s1 + $0x624] ss:$8 sps:$4 sm:$0xff]  }
  0xae   : > { %1669 = vmatpush1.bf16.msra.mxu1 %v3402_v58  ;;  %v3482_v58 = vld [vmem:[%s4649_s1 + $0x730] ss:$8 sps:$4 sm:$0xff]  }
  0xaf   : > { %1670 = vmatprep.subr.bf16.mxu1 %v3410_v59  ;;  %v3490_v59 = vld [vmem:[%s4649_s1 + $0x724] ss:$8 sps:$4 sm:$0xff]  }
  0xb0   : > { %1425 = vmatpush2.bf16.msra.mxu0 %v3405_v60  ;;  %v3485_v60 = vld [vmem:[%s4649_s1 + $0x620] ss:$8 sps:$4 sm:$0xff]  }
  0xb1   : > { %1426 = vmatprep.subr.bf16.mxu0 %v3413_v61  ;;  %v3493_v61 = vld [vmem:[%s4649_s1 + $0x614] ss:$8 sps:$4 sm:$0xff]  }
  0xb2   : > { %1671 = vmatpush2.bf16.msra.mxu1 %v3408_v62  ;;  %v3488_v62 = vld [vmem:[%s4649_s1 + $0x720] ss:$8 sps:$4 sm:$0xff]  }
  0xb3   : > { %1672 = vmatprep.subr.bf16.mxu1 %v3416_v63  ;;  %v3496_v63 = vld [vmem:[%s4649_s1 + $0x714] ss:$8 sps:$4 sm:$0xff]  }
  0xb4   : > { %1427 = vmatpush2.bf16.msra.mxu0 %v3411_v0  ;;  %v3491_v0 = vld [vmem:[%s4649_s1 + $0x610] ss:$8 sps:$4 sm:$0xff]  }
  0xb5   : > { %1428 = vmatprep.subr.bf16.mxu0 %v3419_v1  ;;  %v3499_v1 = vld [vmem:[%s4649_s1 + $0x604] ss:$8 sps:$4 sm:$0xff]  }
  0xb6   : > { %1673 = vmatpush2.bf16.msra.mxu1 %v3414_v2  ;;  %v3494_v2 = vld [vmem:[%s4649_s1 + $0x710] ss:$8 sps:$4 sm:$0xff]  }
  0xb7   : > { %1674 = vmatprep.subr.bf16.mxu1 %v3422_v3  ;;  %v3502_v3 = vld [vmem:[%s4649_s1 + $0x704] ss:$8 sps:$4 sm:$0xff]  }
  0xb8   : > { %1429 = vmatpush2.bf16.msra.mxu0 %v3417_v4  ;;  %v3497_v4 = vld [vmem:[%s4649_s1 + $0x600] ss:$8 sps:$4 sm:$0xff]  }
  0xb9   : > { %1430 = vmatprep.subr.bf16.mxu0 %v3425_v5  ;;  %v3505_v5 = vld [vmem:[%s4649_s1 + $0x6f4] ss:$8 sps:$4 sm:$0xff]  }
  0xba   : > { %1675 = vmatpush2.bf16.msra.mxu1 %v3420_v6  ;;  %v3500_v6 = vld [vmem:[%s4649_s1 + $0x700] ss:$8 sps:$4 sm:$0xff]  }
  0xbb   : > { %1676 = vmatprep.subr.bf16.mxu1 %v3428_v7  ;;  %v3508_v7 = vld [vmem:[%s4649_s1 + $0x7f4] ss:$8 sps:$4 sm:$0xff]  }
  0xbc   : > { %1431 = vmatpush2.bf16.msra.mxu0 %v3423_v8  ;;  %v3503_v8 = vld [vmem:[%s4649_s1 + $0x6f0] ss:$8 sps:$4 sm:$0xff]  }
  0xbd   : > { %1432 = vmatprep.subr.bf16.mxu0 %v3431_v9  ;;  %v3511_v9 = vld [vmem:[%s4649_s1 + $0x6e4] ss:$8 sps:$4 sm:$0xff]  }
  0xbe   : > { %1677 = vmatpush2.bf16.msra.mxu1 %v3426_v10  ;;  %v3506_v10 = vld [vmem:[%s4649_s1 + $0x7f0] ss:$8 sps:$4 sm:$0xff]  }
  0xbf   : > { %1678 = vmatprep.subr.bf16.mxu1 %v3434_v11  ;;  %v3514_v11 = vld [vmem:[%s4649_s1 + $0x7e4] ss:$8 sps:$4 sm:$0xff]  }
  0xc0   : > { %1433 = vmatpush2.bf16.msra.mxu0 %v3429_v12  ;;  %v3509_v12 = vld [vmem:[%s4649_s1 + $0x6e0] ss:$8 sps:$4 sm:$0xff]  }
  0xc1   : > { %1434 = vmatprep.subr.bf16.mxu0 %v3437_v14  ;;  %v3512_v14 = vld [vmem:[%s4649_s1 + $0x7e0] ss:$8 sps:$4 sm:$0xff]  }
  0xc2   : > { %1679 = vmatpush2.bf16.msra.mxu1 %v3432_v13  ;;  %v3517_v13 = vld [vmem:[%s4649_s1 + $0x6d4] ss:$8 sps:$4 sm:$0xff]  }
  0xc3   : > { %1680 = vmatprep.subr.bf16.mxu1 %v3440_v15  ;;  %v3520_v15 = vld [vmem:[%s4649_s1 + $0x7d4] ss:$8 sps:$4 sm:$0xff]  }
  0xc4   : > { %1435 = vmatpush2.bf16.msra.mxu0 %v3435_v17  ;;  %v3515_v17 = vld [vmem:[%s4649_s1 + $0x6d0] ss:$8 sps:$4 sm:$0xff]  }
  0xc5   : > { %1436 = vmatprep.subr.bf16.mxu0 %v3443_v18  ;;  %v3523_v18 = vld [vmem:[%s4649_s1 + $0x6c4] ss:$8 sps:$4 sm:$0xff]  }
  0xc6   : > { %1681 = vmatpush2.bf16.msra.mxu1 %v3438_v19  ;;  %v3518_v19 = vld [vmem:[%s4649_s1 + $0x7d0] ss:$8 sps:$4 sm:$0xff]  }
  0xc7   : > { %1682 = vmatprep.subr.bf16.mxu1 %v3446_v21  ;;  %v3521_v21 = vld [vmem:[%s4649_s1 + $0x6c0] ss:$8 sps:$4 sm:$0xff]  }
  0xc8   : > { %1437 = vmatpush2.bf16.msra.mxu0 %v3441_v23  ;;  %v3524_v23 = vld [vmem:[%s4649_s1 + $0x7c0] ss:$8 sps:$4 sm:$0xff]  }
  0xc9   : > { %1438 = vmatprep.subr.bf16.mxu0 %v3449_v24  ;;  %v3532_v24 = vld [vmem:[%s4649_s1 + $0x7b4] ss:$8 sps:$4 sm:$0xff]  }
  0xca   : > { %1683 = vmatpush2.bf16.msra.mxu1 %v3444_v26  ;;  %v3527_v26 = vld [vmem:[%s4649_s1 + $0x6b0] ss:$8 sps:$4 sm:$0xff]  }
  0xcb   : > { %1684 = vmatprep.subr.bf16.mxu1 %v3452_v28  ;;  %v3530_v28 = vld [vmem:[%s4649_s1 + $0x7b0] ss:$8 sps:$4 sm:$0xff]  }
  0xcc   : > { %1439 = vmatpush2.bf16.msra.mxu0 %v3447_v32  ;;  %v195_v32 = vlaneseq }
  0xcd   : > { %1902 = vmatprep.subr.bf16.mxu0 %v3455_v33  ;;  %v3541_v33 = vld [vmem:[%s4649_s1 + $0x694] ss:$8 sps:$4 sm:$0xff]  }
  0xce   : > { %1685 = vmatpush2.bf16.msra.mxu1 %v3450_v35  ;;  %v3536_v35 = vld [vmem:[%s4649_s1 + $0x7a0] ss:$8 sps:$4 sm:$0xff]  }
  0xcf   : > { %1441 = vmatmul.mubr.bf16.vlgmr.msra.gmra.mxu0 %v1238_v37  ;;  %2154 = vmatprep.subr.bf16.mxu1 %v3460_v38  ;;  %v196_v37 = vshrl.u32 %v195_v32, 7  ;;  %v1981_v38 = vshll.u32 %v2949_v34, 16  ;;  %v3597_v32 = vld [vmem:[%s4649_s1 + $0x894] ss:$8 sps:$4 sm:$0xff]  }
  0xd0   : > { %1903 = vmatpush1.bf16.msra.mxu0 %v3453_v39  ;;  %1934 = vmatprep.mubr.bf16.mxu0 %v2950_v20  ;;  %v3526_v20 = vld [vmem:[%s4649_s1 + $0x7c4] ss:$8 sps:$4 sm:$0xff]   ;;  %v4504_v39 = vld [vmem:[%s3835_s30 + $0x10] sm:$0x66] }
  0xd1   : > { %1687 = vmatmul.mubr.bf16.vlgmr.msra.gmra.mxu1 %v1490_v30  ;;  %1904 = vmatprep.subr.bf16.mxu0 %v3463_v40  ;;  %v3542_v30 = vld [vmem:[%s4649_s1 + $0x790] ss:$8 sps:$4 sm:$0xff]   ;;  %v3550_v40 = vld [vmem:[%s4649_s1 + $0x784] ss:$8 sps:$4 sm:$0xff]  }
  0xd2   : > { %2155 = vmatpush1.bf16.msra.mxu1 %v3458_v41  ;;  %2186 = vmatprep.mubr.bf16.mxu1 %v1991_v42  ;;  %v3545_v41 = vld [vmem:[%s4649_s1 + $0x680] ss:$8 sps:$4 sm:$0xff]   ;;  %v197_v42 = vsub.s32 0, %v196_v37 }
  0xd3   : > { %2156 = vmatprep.subr.bf16.mxu1 %v3466_v43  ;;  %v3081_v43 = vcombine.high %v4504_v39, %v4504_v39 }
  0xd4   : > { %1905 = vmatpush1.bf16.msra.mxu0 %v3461_v44  ;;  %v193_v44 = vld [vmem:[%s4650_s2] sm:$0x3] }
  0xd5   : > { %1906 = vmatprep.subr.bf16.mxu0 %v3469_v45  ;;  %v3555_v45 = vld [vmem:[%s4649_s1 + $0x874] ss:$8 sps:$4 sm:$0xff]  }
  0xd6   : > { %2157 = vmatpush1.bf16.msra.mxu1 %v3464_v46  ;;  %v1979_v46 = vshrl.u32 %v2949_v34, 16 }
  0xd7   : > { %2158 = vmatprep.subr.bf16.mxu1 %v3472_v47  ;;  %v1983_v47 = vrot.slane %v1981_v38, 1 }
  0xd8   : > { %1907 = vmatpush1.bf16.msra.mxu0 %v3467_v48  ;;  %v3548_v48 = vld [vmem:[%s4649_s1 + $0x780] ss:$8 sps:$4 sm:$0xff]  }
  0xd9   : > { %1908 = vmatprep.subr.bf16.mxu0 %v3475_v49  ;;  %v201_v49 = vsub.s32 1, %v196_v37 }
  0xda   : > { %2159 = vmatpush1.bf16.msra.mxu1 %v3470_v50  ;;  %v198_v50 = vrot.slane %v193_v44, %v197_v42 }
  0xdb   : > { %2160 = vmatprep.subr.bf16.mxu1 %v3478_v51  ;;  %v3553_v51 = vld [vmem:[%s4649_s1 + $0x870] ss:$8 sps:$4 sm:$0xff]  }
  0xdc   : > { %1909 = vmatpush1.bf16.msra.mxu0 %v3473_v52  ;;  %v2237_v52 = vrot.slane %v3081_v43, 1 }
  0xdd   : > { %1910 = vmatprep.subr.bf16.mxu0 %v3481_v53  ;;  %v1984_v53 = vor.u32 %v1983_v47, %v1979_v46 }
  0xde   : > { %2161 = vmatpush1.bf16.msra.mxu1 %v3476_v54  ;;  %v3558_v54 = vld [vmem:[%s4649_s1 + $0x864] ss:$8 sps:$4 sm:$0xff]  }
  0xdf   : > { %2162 = vmatprep.subr.bf16.mxu1 %v3484_v55  ;;  %v202_v55 = vrot.slane %v193_v44, %v201_v49 }
  0xe0   : > { %1911 = vmatpush1.bf16.msra.mxu0 %v3479_v56 }
  0xe1   : > { %1912 = vmatprep.subr.bf16.mxu0 %v3487_v57 }
  0xe2   : > { %2163 = vmatpush1.bf16.msra.mxu1 %v3482_v58  ;;  %v3556_v58 = vld [vmem:[%s4649_s1 + $0x860] ss:$8 sps:$4 sm:$0xff]  }
  0xe3   : > { %2164 = vmatprep.subr.bf16.mxu1 %v3490_v59 }
  0xe4   : > { %1913 = vmatpush1.bf16.msra.mxu0 %v3485_v60 }
  0xe5   : > { %1914 = vmatprep.subr.bf16.mxu0 %v3493_v61  ;;  %v3561_v61 = vld [vmem:[%s4649_s1 + $0x854] ss:$8 sps:$4 sm:$0xff]  }
  0xe6   : > { %2165 = vmatpush1.bf16.msra.mxu1 %v3488_v62 }
  0xe7   : > { %2166 = vmatprep.subr.bf16.mxu1 %v3496_v63 }
  0xe8   : > { %1915 = vmatpush1.bf16.msra.mxu0 %v3491_v0 }
  0xe9   : > { %1916 = vmatprep.subr.bf16.mxu0 %v3499_v1 }
  0xea   : > { %2167 = vmatpush1.bf16.msra.mxu1 %v3494_v2 }
  0xeb   : > { %2168 = vmatprep.subr.bf16.mxu1 %v3502_v3  ;;  %v3559_v3 = vld [vmem:[%s4649_s1 + $0x850] ss:$8 sps:$4 sm:$0xff]  }
  0xec   : > { %1917 = vmatpush1.bf16.msra.mxu0 %v3497_v4 }
  0xed   : > { %1918 = vmatprep.subr.bf16.mxu0 %v3505_v5  ;;  %v3564_v5 = vld [vmem:[%s4649_s1 + $0x844] ss:$8 sps:$4 sm:$0xff]  }
  0xee   : > { %2169 = vmatpush1.bf16.msra.mxu1 %v3500_v6 }
  0xef   : > { %2170 = vmatprep.subr.bf16.mxu1 %v3508_v7 }
  0xf0   : > { %1919 = vmatpush2.bf16.msra.mxu0 %v3503_v8  ;;  %v3562_v8 = vld [vmem:[%s4649_s1 + $0x840] ss:$8 sps:$4 sm:$0xff]  }
  0xf1   : > { %1920 = vmatprep.subr.bf16.mxu0 %v3511_v9  ;;  %v3567_v9 = vld [vmem:[%s4649_s1 + $0x834] ss:$8 sps:$4 sm:$0xff]  }
  0xf2   : > { %2171 = vmatpush2.bf16.msra.mxu1 %v3506_v10  ;;  %v3565_v10 = vld [vmem:[%s4649_s1 + $0x830] ss:$8 sps:$4 sm:$0xff]  }
  0xf3   : > { %2172 = vmatprep.subr.bf16.mxu1 %v3514_v11  ;;  %v3570_v11 = vld [vmem:[%s4649_s1 + $0x824] ss:$8 sps:$4 sm:$0xff]  }
  0xf4   : > { %1921 = vmatpush2.bf16.msra.mxu0 %v3509_v12  ;;  %v3568_v12 = vld [vmem:[%s4649_s1 + $0x820] ss:$8 sps:$4 sm:$0xff]  }
  0xf5   : > { %1922 = vmatprep.subr.bf16.mxu0 %v3517_v13  ;;  %v3573_v13 = vld [vmem:[%s4649_s1 + $0x814] ss:$8 sps:$4 sm:$0xff]  }
  0xf6   : > { %2173 = vmatpush2.bf16.msra.mxu1 %v3512_v14  ;;  %v3571_v14 = vld [vmem:[%s4649_s1 + $0x810] ss:$8 sps:$4 sm:$0xff]  }
  0xf7   : > { %2174 = vmatprep.subr.bf16.mxu1 %v3520_v15  ;;  %v3576_v15 = vld [vmem:[%s4649_s1 + $0x804] ss:$8 sps:$4 sm:$0xff]  }
  0xf8   : > { %1923 = vmatpush2.bf16.msra.mxu0 %v3515_v17  ;;  %v3574_v17 = vld [vmem:[%s4649_s1 + $0x800] ss:$8 sps:$4 sm:$0xff]  }
  0xf9   : > { %1924 = vmatprep.subr.bf16.mxu0 %v3523_v18  ;;  %v3579_v18 = vld [vmem:[%s4649_s1 + $0x8f4] ss:$8 sps:$4 sm:$0xff]  }
  0xfa   : > { %2175 = vmatpush2.bf16.msra.mxu1 %v3518_v19  ;;  %v3577_v19 = vld [vmem:[%s4649_s1 + $0x8f0] ss:$8 sps:$4 sm:$0xff]  }
  0xfb   : > { %2176 = vmatprep.subr.bf16.mxu1 %v3526_v20  ;;  %v3582_v20 = vld [vmem:[%s4649_s1 + $0x8e4] ss:$8 sps:$4 sm:$0xff]  }
  0xfc   : > { %1925 = vmatpush2.bf16.msra.mxu0 %v3521_v21  ;;  %v3580_v21 = vld [vmem:[%s4649_s1 + $0x8e0] ss:$8 sps:$4 sm:$0xff]  }
  0xfd   : > { %1926 = vmatprep.subr.bf16.mxu0 %v3529_v22  ;;  %v3585_v22 = vld [vmem:[%s4649_s1 + $0x8d4] ss:$8 sps:$4 sm:$0xff]  }
  0xfe   : > { %2177 = vmatpush2.bf16.msra.mxu1 %v3524_v23  ;;  %v3583_v23 = vld [vmem:[%s4649_s1 + $0x8d0] ss:$8 sps:$4 sm:$0xff]  }
  0xff   : > { %2178 = vmatprep.subr.bf16.mxu1 %v3532_v24  ;;  %v3588_v24 = vld [vmem:[%s4649_s1 + $0x8c4] ss:$8 sps:$4 sm:$0xff]  }
 0x100   : > { %1927 = vmatpush2.bf16.msra.mxu0 %v3527_v26  ;;  %v3586_v26 = vld [vmem:[%s4649_s1 + $0x8c0] ss:$8 sps:$4 sm:$0xff]  }
 0x101   : > { %1928 = vmatprep.subr.bf16.mxu0 %v3535_v27  ;;  %v3591_v27 = vld [vmem:[%s4649_s1 + $0x8b4] ss:$8 sps:$4 sm:$0xff]  }
 0x102   : > { %2179 = vmatpush2.bf16.msra.mxu1 %v3530_v28  ;;  %v3589_v28 = vld [vmem:[%s4649_s1 + $0x8b0] ss:$8 sps:$4 sm:$0xff]  }
 0x103   : > { %2180 = vmatprep.subr.bf16.mxu1 %v3538_v29  ;;  %v3594_v29 = vld [vmem:[%s4649_s1 + $0x8a4] ss:$8 sps:$4 sm:$0xff]  }
 0x104   : > { %1929 = vmatpush2.bf16.msra.mxu0 %v3533_v31  ;;  %v3592_v31 = vld [vmem:[%s4649_s1 + $0x8a0] ss:$8 sps:$4 sm:$0xff]  }
 0x105   : > { %1930 = vmatprep.subr.bf16.mxu0 %v3541_v33  ;;  %v3595_v33 = vld [vmem:[%s4649_s1 + $0x890] ss:$8 sps:$4 sm:$0xff]  }
 0x106   : > { %2181 = vmatpush2.bf16.msra.mxu1 %v3536_v35  ;;  %v3080_v35 = vcombine.low %v4504_v39, %v4504_v39 }
 0x107   : > { %2182 = vmatprep.subr.bf16.mxu1 %v3544_v25  ;;  %v3598_v25 = vld [vmem:[%s4649_s1 + $0x880] ss:$8 sps:$4 sm:$0xff]  }
 0x108   : > { %1931 = vmatpush2.bf16.msra.mxu0 %v3539_v36  ;;  %v2236_v36 = vrot.slane %v3080_v35, 1 }
 0x109   : > { %1932 = vmatprep.subr.bf16.mxu0 %v3547_v16 }
 0x10a   : > { %2183 = vmatpush2.bf16.msra.mxu1 %v3542_v30 }
 0x10b   : > { %2184 = vmatprep.subr.bf16.mxu1 %v3550_v40 }
 0x10c   : > { %1933 = vmatpush2.bf16.msra.mxu0 %v3545_v41 }
 0x10d   : > { %2400 = vmatprep.subr.bf16.mxu0 %v3555_v45 }
 0x10e   : > { %2185 = vmatpush2.bf16.msra.mxu1 %v3548_v48 }
 0x10f   : > { %v444_v56 = vpop.f32.mrf.mxu0  ;;  %1935 = vmatmul.mubr.bf16.vlgmr.msra.gmra.mxu0 %v2949_v34  ;;  %v3600_v34 = vld [vmem:[%s4649_s1 + $0x884] ss:$8 sps:$4 sm:$0xff]  }
 0x110   : > { %v451_v57 = vadd.f32 %v444_v56, %v198_v50  ;;  %2401 = vmatpush1.bf16.msra.mxu0 %v3553_v51  ;;  %2432 = vmatprep.mubr.bf16.mxu0 %v2237_v52  ;;  %v696_v60 = vpop.f32.mrf.mxu1 }
 0x111   : > { %v446_v59 = vpop.f32.mrf.mxu0  ;;  %2187 = vmatmul.mubr.bf16.vlgmr.msra.gmra.mxu1 %v1984_v53  ;;  %2402 = vmatprep.subr.bf16.mxu0 %v3558_v54 }
 0x112   : > { %v452_v62 = vadd.f32 %v446_v59, %v202_v55  ;;  %v4538_v63 = vadd.f32 %v696_v60, %v451_v57  ;;  %v698_v1 = vpop.f32.mrf.mxu1 }
 0x113   : > { %v448_v0 = vpop.f32.mrf.mxu0 }
 0x114   : > { %v4540_v2 = vadd.f32 %v698_v1, %v452_v62  ;;  %2403 = vmatpush1.bf16.msra.mxu0 %v3556_v58  ;;  %v700_v6 = vpop.f32.mrf.mxu1 }
 0x115   : > { %v449_v4 = vpop.f32.mrf.mxu0  ;;  %2404 = vmatprep.subr.bf16.mxu0 %v3561_v61 }
 0x116   : > { %v701_v7 = vpop.f32.mrf.mxu1 }
 0x118   : > { %2405 = vmatpush1.bf16.msra.mxu0 %v3559_v3 }
 0x119   : > { %2406 = vmatprep.subr.bf16.mxu0 %v3564_v5 }
 0x11c   : > { %2407 = vmatpush1.bf16.msra.mxu0 %v3562_v8 }
 0x11d   : > { %2408 = vmatprep.subr.bf16.mxu0 %v3567_v9 }
 0x120   : > { %2409 = vmatpush1.bf16.msra.mxu0 %v3565_v10 }
 0x121   : > { %2410 = vmatprep.subr.bf16.mxu0 %v3570_v11 }
 0x124   : > { %2411 = vmatpush1.bf16.msra.mxu0 %v3568_v12 }
 0x125   : > { %2412 = vmatprep.subr.bf16.mxu0 %v3573_v13 }
 0x128   : > { %2413 = vmatpush1.bf16.msra.mxu0 %v3571_v14 }
 0x129   : > { %2414 = vmatprep.subr.bf16.mxu0 %v3576_v15 }
 0x12c   : > { %2415 = vmatpush1.bf16.msra.mxu0 %v3574_v17 }
 0x12d   : > { %2416 = vmatprep.subr.bf16.mxu0 %v3579_v18 }
 0x130   : > { %2417 = vmatpush2.bf16.msra.mxu0 %v3577_v19 }
 0x131   : > { %2418 = vmatprep.subr.bf16.mxu0 %v3582_v20 }
 0x134   : > { %2419 = vmatpush2.bf16.msra.mxu0 %v3580_v21 }
 0x135   : > { %2420 = vmatprep.subr.bf16.mxu0 %v3585_v22 }
 0x138   : > { %2421 = vmatpush2.bf16.msra.mxu0 %v3583_v23 }
 0x139   : > { %2422 = vmatprep.subr.bf16.mxu0 %v3588_v24 }
 0x13c   : > { %2423 = vmatpush2.bf16.msra.mxu0 %v3586_v26 }
 0x13d   : > { %2424 = vmatprep.subr.bf16.mxu0 %v3591_v27 }
 0x140   : > { %2425 = vmatpush2.bf16.msra.mxu0 %v3589_v28 }
 0x141   : > { %2426 = vmatprep.subr.bf16.mxu0 %v3594_v29 }
 0x144   : > { %2427 = vmatpush2.bf16.msra.mxu0 %v3592_v31 }
 0x145   : > { %2428 = vmatprep.subr.bf16.mxu0 %v3597_v32 }
 0x148   : > { %2429 = vmatpush2.bf16.msra.mxu0 %v3595_v33 }
 0x149   : > { %2430 = vmatprep.subr.bf16.mxu0 %v3600_v34 }
 0x14c   : > { %2431 = vmatpush2.bf16.msra.mxu0 %v3598_v25 }
 0x14f   : > { %v942_v37 = vpop.f32.mrf.mxu0  ;;  %2433 = vmatmul.mubr.bf16.vlgmr.msra.gmra.mxu0 %v2236_v36 }
 0x150   : > { %v949_v16 = vadd.f32 %v942_v37, %v4538_v63 }
 0x151   : > { %v944_v38 = vpop.f32.mrf.mxu0  ;;  %v1190_v30 = vpop.f32.mrf.mxu1 }
 0x152   : > { %v950_v40 = vadd.f32 %v944_v38, %v4540_v2  ;;  %v1197_v41 = vadd.f32 %v1190_v30, %v949_v16 }
 0x153   : > { %v946_v42 = vpop.f32.mrf.mxu0  ;;  %v1192_v43 = vpop.f32.mrf.mxu1 }
 0x154   : > { %v1198_v39 = vadd.f32 %v1192_v43, %v950_v40 }
 0x155   : > { %v947_v44 = vpop.f32.mrf.mxu0  ;;  %v1194_v45 = vpop.f32.mrf.mxu1 }
 0x157   : > { %v1195_v46 = vpop.f32.mrf.mxu1 }
 0x18f   : > { %v1442_v47 = vpop.f32.mrf.mxu0 }
 0x190   : > { %v1449_v48 = vadd.f32 %v1442_v47, %v1197_v41 }
 0x191   : > { %v1444_v49 = vpop.f32.mrf.mxu0  ;;  %v1688_v50 = vpop.f32.mrf.mxu1 }
 0x192   : > { %v1450_v51 = vadd.f32 %v1444_v49, %v1198_v39  ;;  %v1695_v52 = vadd.f32 %v1688_v50, %v1449_v48 }
 0x193   : > { %v1446_v53 = vpop.f32.mrf.mxu0  ;;  %v1690_v54 = vpop.f32.mrf.mxu1 }
 0x194   : > { %v1696_v55 = vadd.f32 %v1690_v54, %v1450_v51 }
 0x195   : > { %v1447_v56 = vpop.f32.mrf.mxu0  ;;  %v1692_v57 = vpop.f32.mrf.mxu1 }
 0x197   : > { %v1693_v58 = vpop.f32.mrf.mxu1 }
 0x1cf   : > { %v1936_v59 = vpop.f32.mrf.mxu0 }
 0x1d0   : > { %v1943_v3 = vadd.f32 %v1936_v59, %v1695_v52 }
 0x1d1   : > { %v1938_v60 = vpop.f32.mrf.mxu0  ;;  %v2188_v61 = vpop.f32.mrf.mxu1 }
 0x1d2   : > { %v1944_v4 = vadd.f32 %v1938_v60, %v1696_v55  ;;  %v2195_v6 = vadd.f32 %v2188_v61, %v1943_v3 }
 0x1d3   : > { %v1940_v62 = vpop.f32.mrf.mxu0  ;;  %v2190_v63 = vpop.f32.mrf.mxu1 }
 0x1d4   : > { %v2196_v7 = vadd.f32 %v2190_v63, %v1944_v4 }
 0x1d5   : > { %v1941_v0 = vpop.f32.mrf.mxu0  ;;  %v2192_v1 = vpop.f32.mrf.mxu1 }
 0x1d7   : > { %v2193_v2 = vpop.f32.mrf.mxu1 }
 0x20f   : > { %v2434_v5 = vpop.f32.mrf.mxu0 }
 0x210   : > { %v2441_v9 = vadd.f32 %v2434_v5, %v2195_v6 }
 0x211   : > { %v2436_v8 = vpop.f32.mrf.mxu0 }
 0x212   : > { %v2442_v10 = vadd.f32 %v2436_v8, %v2196_v7 }
 0x213   : > { %v2438_v11 = vpop.f32.mrf.mxu0 }
 0x214   : > { %v2445_v12 = vcombine.low %v2441_v9, %v2442_v10 }
 0x215   : > { %v2439_v13 = vpop.f32.mrf.mxu0 }
 0x216   : > { %2447 = vst [vmem:[%s192_s4] sm:$0x77] %v2445_v12 }
 0x217 PF: > { %s13_s16 = sadd.s32 1, %s3641_s16   ;;  %s4652_s12 = smov %s3633_s14 }
 0x218   : > { %p10_p7 = scmp.ge.s32.totalorder %s13_s16, 8   ;;  %s4653_s13 = smov %s3637_s15 }
 0x219   : > { %s4654_s14 = smov %s4657_s17  ;;  %s4655_s15 = smov %s4661_s18 }
 0x21a   :  { %12 = sbr.rel (!%p10_p7) target bundleno = 3 (0x3), region = 73 }

</bundles_post_ra>
